<compile_context>
chip_gen: v7x
topology: tpu7x:2x2x1
jax: 0.10.0
libtpu: 0.0.40
codegen_flags: <defaults>
</compile_context>

<pallas_src>
import numpy as np
import jax
import jax.numpy as jnp
from jax.experimental import pallas as pl
from jax.experimental.pallas import tpu as pltpu

KERNEL_SIZE = 5
C1 = 16                        # conv_parameters['out_channels_1']
C2 = 32                        # conv_parameters['out_channels_2'] (forced by view)
HD = 64                        # fcn_parameters['hd_features']
OUT_F = 10                     # fcn_parameters['out_features_a']
IN_FEATURES = C2 * 2 * 5       # 320 = fcn_parameters['in_features_c']

H_MERGED, W_MERGED = 14, 28    # two 14x14 images merged side by side
PAD_H = 4                      # conv1 H zero-padding (W padding folded into weights)
H_CONV1, W_CONV1 = 18, 28      # conv1 output spatial
H_POOL1, W_POOL1 = 9, 14       # ... after 2x2 max pool
H_CONV2, W_CONV2 = 5, 10       # conv2 output spatial
H_POOL2, W_POOL2 = 2, 5        # ... after 2x2 max pool

# Parity-grouped lane layouts (pool pairs live in two aligned 256-lane halves):
#   conv1 lane for (co, w) = (w % 2) * 256 + co * 16 + w // 2   (lanes 14,15 dead)
#   conv2 lane for (co, w) = (w % 2) * 256 + co * 8  + w // 2   (lanes 5..7 dead)
CH1, CH2 = 16, 8
HALF1 = C1 * CH1               # 256
HALF2 = C2 * CH2               # 256
N1 = 2 * HALF1                 # 512: conv1 matmul output width
N2 = 2 * HALF2                 # 512: conv2 matmul output width
K1 = KERNEL_SIZE * W_MERGED    # 140: conv1 contraction depth
K2 = KERNEL_SIZE * HALF1       # 1280: conv2 contraction depth
OUT_PAD = 128                  # lane-dense output width (logits live in [:, :10])

B_TILE_MAX = 128               # images per grid step at large batch


# ------------------------------ fused kernel --------------------------------

def one_image_kernel(x_ref, a1_ref, b1_ref, a2_ref, b2_ref,
                     fc1_ref, fb1_ref, fc2_ref, fb2_ref,
                     fc3_ref, fb3_ref, fc4_ref, fb4_ref, o_ref):
    bt = x_ref.shape[0]
    f32, bf16 = jnp.float32, jnp.bfloat16

    # ---- merge the two 14x14 images side by side, zero-pad 4 rows in H -----
    xv = x_ref[...]                                           # (bt, 28, 14) f32
    merged = jnp.concatenate([xv[:, :H_MERGED, :],            # channel 0
                              xv[:, H_MERGED:, :]],           # channel 1
                             axis=-1)                         # (bt, 14, 28)
    zrows = jnp.zeros((bt, PAD_H, W_MERGED), f32)
    xh = jnp.concatenate([zrows, merged, zrows], axis=1)      # (bt, 22, 28)

    # ---- conv1 (1->16, 5x5, pad (4,2)) as ONE MXU matmul, K = 5*28 ----------
    rows1 = jnp.concatenate(
        [xh[:, kh:kh + H_CONV1, :] for kh in range(KERNEL_SIZE)],
        axis=-1).reshape(bt * H_CONV1, K1).astype(bf16)       # (bt*18, 140)
    acc1 = jnp.dot(rows1, a1_ref[...], preferred_element_type=f32)
    act1 = jnp.maximum(acc1 + b1_ref[...], 0.0).reshape(bt, H_CONV1, N1)

    # ---- 2x2 max pool #1: H = pair-rows max, W = max of the parity halves ---
    hmax1 = jnp.max(act1.reshape(bt, H_POOL1, 2, N1), axis=2)       # (bt, 9, 512)
    p1 = jnp.maximum(hmax1[..., :HALF1], hmax1[..., HALF1:])        # (bt, 9, 256)

    # ---- conv2 (16->32, 5x5, valid) as ONE MXU matmul, K = 5*256 ------------
    rows2 = jnp.concatenate(
        [p1[:, kh:kh + H_CONV2, :] for kh in range(KERNEL_SIZE)],
        axis=-1).reshape(bt * H_CONV2, K2).astype(bf16)       # (bt*5, 1280)
    acc2 = jnp.dot(rows2, a2_ref[...], preferred_element_type=f32)
    act2 = jnp.maximum(acc2 + b2_ref[...], 0.0).reshape(bt, H_CONV2, N2)

    # ---- 2x2 max pool #2 (conv2 row 4 is dropped by the floor pool) ---------
    hmax2 = jnp.max(act2[:, :2 * H_POOL2, :].reshape(bt, H_POOL2, 2, N2),
                    axis=2)                                          # (bt, 2, 512)
    p2 = jnp.maximum(hmax2[..., :HALF2], hmax2[..., HALF2:])         # (bt, 2, 256)

    # ---- flatten (PyTorch (C,H,W) order folded into fc1) + 4-layer FC head --
    feat = jnp.concatenate([p2[:, 0, :], p2[:, 1, :]], axis=-1).astype(bf16)
    h = jnp.dot(feat, fc1_ref[...], preferred_element_type=f32)
    h = jnp.maximum(h + fb1_ref[...], 0.0).astype(bf16)
    h = jnp.dot(h, fc2_ref[...], preferred_element_type=f32)
    h = jnp.maximum(h + fb2_ref[...], 0.0).astype(bf16)
    h = jnp.dot(h, fc3_ref[...], preferred_element_type=f32)
    h = jnp.maximum(h + fb3_ref[...], 0.0).astype(bf16)
    o_ref[...] = (jnp.dot(h, fc4_ref[...], preferred_element_type=f32)
                  + fb4_ref[...])


def _pick_b_tile(b):
    """Images per grid step: multiple of 8, capped, >= 2 grid steps when possible."""
    if b <= 8:
        return 8
    t = 8 * ((b + 15) // 16)          # ~ceil(b/2), rounded up to a multiple of 8
    return min(B_TILE_MAX, t)


@jax.jit
def one_image_forward(x, params):
    """x: (B, 2, 14, 14) float32 -> (B, 10) float32 (== PyTorch One_Image(x))."""
    b = x.shape[0]
    b_tile = _pick_b_tile(b)
    n_steps = -(-b // b_tile)
    b_full = n_steps * b_tile

    # free (bitcast) reshape: rows 0..13 are channel 0, rows 14..27 channel 1
    x2 = x.reshape(b, 2 * H_MERGED, H_MERGED)
    if b_full != b:
        x2 = jnp.pad(x2, ((0, b_full - b), (0, 0), (0, 0)))

    def fixed(arr):                    # grid-invariant (weight) inputs
        nd = arr.ndim
        return pl.BlockSpec(arr.shape, lambda i: (0,) * nd)

    out = pl.pallas_call(
        one_image_kernel,
        out_shape=jax.ShapeDtypeStruct((b_full, OUT_PAD), jnp.float32),
        grid=(n_steps,),
        in_specs=[pl.BlockSpec((b_tile, 2 * H_MERGED, H_MERGED),
                               lambda i: (i, 0, 0))]
                 + [fixed(a) for a in params],
        out_specs=pl.BlockSpec((b_tile, OUT_PAD), lambda i: (i, 0)),
        compiler_params=pltpu.CompilerParams(
            dimension_semantics=("parallel",),
            vmem_limit_bytes=48 << 20),
    )(x2, *params)
    return out[:b, :OUT_F]


# ------------------------ host-side parameter re-layout ----------------------

def prepare_params(conv_w1, conv_b1, conv_w2, conv_b2, fc_params):
    """Re-lay-out PyTorch-style parameters for the fused kernel (pure glue)."""
    w1 = np.asarray(conv_w1, np.float32)          # (16, 1, 5, 5)
    w2 = np.asarray(conv_w2, np.float32)          # (32, 16, 5, 5)
    b1 = np.asarray(conv_b1, np.float32)
    b2 = np.asarray(conv_b2, np.float32)

    def l1col(co, w):   # conv1 output lane for (channel, width)
        return (w % 2) * HALF1 + co * CH1 + w // 2

    def l2col(co, w):   # conv2 output lane for (channel, width)
        return (w % 2) * HALF2 + co * CH2 + w // 2

    # conv1 -> one banded (140, 512) matrix; W padding (2) folded in.
    a1f = np.zeros((K1, N1), np.float32)
    b1e = np.zeros((1, N1), np.float32)
    for co in range(C1):
        for w in range(W_CONV1):
            col = l1col(co, w)
            b1e[0, col] = b1[co]
            for kh in range(KERNEL_SIZE):
                for kw in range(KERNEL_SIZE):
                    c = w + kw - 2
                    if 0 <= c < W_MERGED:
                        a1f[kh * W_MERGED + c, col] = w1[co, 0, kh, kw]

    # conv2 -> one banded (1280, 512) matrix over the pooled conv1 lanes.
    a2f = np.zeros((K2, N2), np.float32)
    b2e = np.zeros((1, N2), np.float32)
    ci_rows = CH1 * np.arange(C1)[:, None]                    # (16, 1)
    for w in range(W_CONV2):
        cols = np.array([l2col(co, w) for co in range(C2)])[None, :]   # (1, 32)
        b2e[0, cols[0]] = b2
        for kh in range(KERNEL_SIZE):
            for kw in range(KERNEL_SIZE):
                rows = kh * HALF1 + ci_rows + (w + kw)        # (16, 1)
                a2f[rows, cols] = w2[:, :, kh, kw].T          # (16, 32) [ci, co]

    (fw1, fb1), (fw2, fb2), (fw3, fb3), (fw4, fb4) = [
        (np.asarray(w, np.float32), np.asarray(v, np.float32))
        for w, v in fc_params]

    # fc1: fold the pooled lane layout and the PyTorch (C, H, W) flatten order.
    fc1w = np.zeros((2 * HALF2, HD), np.float32)
    for h in range(H_POOL2):
        for co in range(C2):
            for w in range(W_POOL2):
                fc1w[h * HALF2 + co * CH2 + w, :] = \
                    fw1[:, co * (H_POOL2 * W_POOL2) + h * W_POOL2 + w]

    # fc4: lane-dense (zero-padded) 128-wide output; logits live in [:, :10].
    fc4w = np.zeros((HD // 4, OUT_PAD), np.float32)
    fc4w[:, :OUT_F] = fw4.T
    fb4e = np.zeros((1, OUT_PAD), np.float32)
    fb4e[0, :OUT_F] = fb4

    bf = lambda v: jnp.asarray(v, jnp.bfloat16)   # MXU operands in bf16
    f32 = lambda v: jnp.asarray(v, jnp.float32)   # biases stay f32
    return (bf(a1f), f32(b1e), bf(a2f), f32(b2e),
            bf(fc1w), f32(fb1[None, :]),
            bf(fw2.T), f32(fb2[None, :]),
            bf(fw3.T), f32(fb3[None, :]),
            bf(fc4w), f32(fb4e))


# ------------------------- plain-XLA reference (check) -----------------------

def reference_forward(x, conv_w1, conv_b1, conv_w2, conv_b2, fc_params):
    """Plain-JAX replica of the PyTorch One_Image.forward."""
    b = x.shape[0]
    merged = jnp.concatenate([x[:, 0], x[:, 1]], axis=-1)[:, None]  # (B,1,14,28)
    y = jax.lax.conv_general_dilated(
        merged, conv_w1, window_strides=(1, 1), padding=((4, 4), (2, 2)),
        dimension_numbers=("NCHW", "OIHW", "NCHW"))
    y = jax.nn.relu(y + conv_b1[None, :, None, None])
    y = jax.lax.reduce_window(y, -jnp.inf, jax.lax.max,
                              (1, 1, 2, 2), (1, 1, 2, 2), "VALID")
    y = jax.lax.conv_general_dilated(
        y, conv_w2, window_strides=(1, 1), padding=((0, 0), (0, 0)),
        dimension_numbers=("NCHW", "OIHW", "NCHW"))
    y = jax.nn.relu(y + conv_b2[None, :, None, None])
    y = jax.lax.reduce_window(y, -jnp.inf, jax.lax.max,
                              (1, 1, 2, 2), (1, 1, 2, 2), "VALID")
    h = y.reshape(b, IN_FEATURES)
    (w1, b1), (w2, b2), (w3, b3), (w4, b4) = fc_params
    h = jax.nn.relu(h @ w1.T + b1)
    h = jax.nn.relu(h @ w2.T + b2)
    h = jax.nn.relu(h @ w3.T + b3)
    return h @ w4.T + b4


# ----------------------------------- main ------------------------------------

if __name__ == "__main__":
    key = jax.random.PRNGKey(0)
    ks = jax.random.split(key, 13)

    # PyTorch-layout parameters (deterministic synthetic values).
    conv_w1 = jax.random.normal(ks[0], (C1, 1, KERNEL_SIZE, KERNEL_SIZE),
                                jnp.float32) * 0.10
    conv_b1 = jax.random.normal(ks[1], (C1,), jnp.float32) * 0.10
    conv_w2 = jax.random.normal(ks[2], (C2, C1, KERNEL_SIZE, KERNEL_SIZE),
                                jnp.float32) * 0.05
    conv_b2 = jax.random.normal(ks[3], (C2,), jnp.float32) * 0.10
    fc_params = [
        (jax.random.normal(ks[4], (HD, IN_FEATURES), jnp.float32) * 0.05,
         jax.random.normal(ks[5], (HD,), jnp.float32) * 0.10),
        (jax.random.normal(ks[6], (HD // 2, HD), jnp.float32) * 0.10,
         jax.random.normal(ks[7], (HD // 2,), jnp.float32) * 0.10),
        (jax.random.normal(ks[8], (HD // 4, HD // 2), jnp.float32) * 0.10,
         jax.random.normal(ks[9], (HD // 4,), jnp.float32) * 0.10),
        (jax.random.normal(ks[10], (OUT_F, HD // 4), jnp.float32) * 0.10,
         jax.random.normal(ks[11], (OUT_F,), jnp.float32) * 0.10),
    ]

    params = prepare_params(conv_w1, conv_b1, conv_w2, conv_b2, fc_params)

    # example input: batch of 2 image pairs, each channel 14x14
    x = jax.random.normal(ks[12], (2, 2, 14, 14), jnp.float32)

    out = jax.block_until_ready(one_image_forward(x, params))
    assert out.shape == (2, OUT_F) and out.dtype == jnp.float32

    # numerical sanity check against a plain-XLA replica of the PyTorch module
    # (tolerance accounts for the intentional bf16 matmul operands)
    ref = jax.block_until_ready(
        reference_forward(x, conv_w1, conv_b1, conv_w2, conv_b2, fc_params))
    np.testing.assert_allclose(np.asarray(out), np.asarray(ref),
                               rtol=5e-2, atol=5e-2)

    print("KERNEL_OK")
</pallas_src>

<mosaic_0001>
module attributes {stable_mosaic.version = 11 : i64} {
  func.func @one_image_kernel(%arg0: i32, %arg1: memref<8x28x14xf32, #tpu.memory_space<vmem>>, %arg2: memref<140x512xbf16, #tpu.memory_space<vmem>>, %arg3: memref<1x512xf32, #tpu.memory_space<vmem>>, %arg4: memref<1280x512xbf16, #tpu.memory_space<vmem>>, %arg5: memref<1x512xf32, #tpu.memory_space<vmem>>, %arg6: memref<512x64xbf16, #tpu.memory_space<vmem>>, %arg7: memref<1x64xf32, #tpu.memory_space<vmem>>, %arg8: memref<64x32xbf16, #tpu.memory_space<vmem>>, %arg9: memref<1x32xf32, #tpu.memory_space<vmem>>, %arg10: memref<32x16xbf16, #tpu.memory_space<vmem>>, %arg11: memref<1x16xf32, #tpu.memory_space<vmem>>, %arg12: memref<16x128xbf16, #tpu.memory_space<vmem>>, %arg13: memref<1x128xf32, #tpu.memory_space<vmem>>, %arg14: memref<8x128xf32, #tpu.memory_space<vmem>>) attributes {dimension_semantics = [#tpu.dimension_semantics<parallel>], iteration_bounds = array<i64: 1>, scalar_prefetch = 0 : i64, scratch_operands = 0 : i64, tpu.core_type = #tpu.core_type<tc>, window_params = [{transform_indices = @transform_0, window_bounds = array<i64: 8, 28, 14>}, {pipeline_mode = #tpu.pipeline_mode<synchronous>, transform_indices = @transform_1, window_bounds = array<i64: 140, 512>}, {pipeline_mode = #tpu.pipeline_mode<synchronous>, transform_indices = @transform_2, window_bounds = array<i64: 1, 512>}, {pipeline_mode = #tpu.pipeline_mode<synchronous>, transform_indices = @transform_3, window_bounds = array<i64: 1280, 512>}, {pipeline_mode = #tpu.pipeline_mode<synchronous>, transform_indices = @transform_4, window_bounds = array<i64: 1, 512>}, {pipeline_mode = #tpu.pipeline_mode<synchronous>, transform_indices = @transform_5, window_bounds = array<i64: 512, 64>}, {pipeline_mode = #tpu.pipeline_mode<synchronous>, transform_indices = @transform_6, window_bounds = array<i64: 1, 64>}, {pipeline_mode = #tpu.pipeline_mode<synchronous>, transform_indices = @transform_7, window_bounds = array<i64: 64, 32>}, {pipeline_mode = #tpu.pipeline_mode<synchronous>, transform_indices = @transform_8, window_bounds = array<i64: 1, 32>}, {pipeline_mode = #tpu.pipeline_mode<synchronous>, transform_indices = @transform_9, window_bounds = array<i64: 32, 16>}, {pipeline_mode = #tpu.pipeline_mode<synchronous>, transform_indices = @transform_10, window_bounds = array<i64: 1, 16>}, {pipeline_mode = #tpu.pipeline_mode<synchronous>, transform_indices = @transform_11, window_bounds = array<i64: 16, 128>}, {pipeline_mode = #tpu.pipeline_mode<synchronous>, transform_indices = @transform_12, window_bounds = array<i64: 1, 128>}, {transform_indices = @transform_13, window_bounds = array<i64: 8, 128>}]} {
    %c0 = arith.constant 0 : index
    %c0_0 = arith.constant 0 : index
    %c0_1 = arith.constant 0 : index
    %0 = vector.load %arg1[%c0, %c0_0, %c0_1] : memref<8x28x14xf32, #tpu.memory_space<vmem>>, vector<8x28x14xf32>
    %1 = vector.extract_strided_slice %0 {offsets = [0, 0, 0], sizes = [8, 14, 14], strides = [1, 1, 1]} : vector<8x28x14xf32> to vector<8x14x14xf32>
    %2 = vector.extract_strided_slice %0 {offsets = [0, 14, 0], sizes = [8, 14, 14], strides = [1, 1, 1]} : vector<8x28x14xf32> to vector<8x14x14xf32>
    %3 = tpu.concatenate %1, %2 in 2 : vector<8x14x14xf32>, vector<8x14x14xf32> -> vector<8x14x28xf32>
    %cst = arith.constant 0.000000e+00 : f32
    %4 = vector.broadcast %cst : f32 to vector<8x4x28xf32>
    %5 = tpu.concatenate %4, %3, %4 in 1 : vector<8x4x28xf32>, vector<8x14x28xf32>, vector<8x4x28xf32> -> vector<8x22x28xf32>
    %6 = vector.extract_strided_slice %5 {offsets = [0, 0, 0], sizes = [8, 18, 28], strides = [1, 1, 1]} : vector<8x22x28xf32> to vector<8x18x28xf32>
    %7 = vector.extract_strided_slice %5 {offsets = [0, 1, 0], sizes = [8, 18, 28], strides = [1, 1, 1]} : vector<8x22x28xf32> to vector<8x18x28xf32>
    %8 = vector.extract_strided_slice %5 {offsets = [0, 2, 0], sizes = [8, 18, 28], strides = [1, 1, 1]} : vector<8x22x28xf32> to vector<8x18x28xf32>
    %9 = vector.extract_strided_slice %5 {offsets = [0, 3, 0], sizes = [8, 18, 28], strides = [1, 1, 1]} : vector<8x22x28xf32> to vector<8x18x28xf32>
    %10 = vector.extract_strided_slice %5 {offsets = [0, 4, 0], sizes = [8, 18, 28], strides = [1, 1, 1]} : vector<8x22x28xf32> to vector<8x18x28xf32>
    %11 = tpu.concatenate %6, %7, %8, %9, %10 in 2 : vector<8x18x28xf32>, vector<8x18x28xf32>, vector<8x18x28xf32>, vector<8x18x28xf32>, vector<8x18x28xf32> -> vector<8x18x140xf32>
    %12 = vector.shape_cast %11 : vector<8x18x140xf32> to vector<144x140xf32>
    %13 = arith.truncf %12 : vector<144x140xf32> to vector<144x140xbf16>
    %c0_2 = arith.constant 0 : index
    %c0_3 = arith.constant 0 : index
    %14 = vector.load %arg2[%c0_2, %c0_3] : memref<140x512xbf16, #tpu.memory_space<vmem>>, vector<140x512xbf16>
    %cst_4 = arith.constant dense<0.000000e+00> : vector<144x512xf32>
    %15 = tpu.matmul %13, %14, %cst_4 {dimension_numbers = #tpu.dot_dimension_numbers<[1], [0], [0], [1], [0, 0, 1, 1], [], []>} : vector<144x140xbf16>, vector<140x512xbf16>, vector<144x512xf32> -> vector<144x512xf32>
    %c0_5 = arith.constant 0 : index
    %c0_6 = arith.constant 0 : index
    %16 = vector.load %arg3[%c0_5, %c0_6] : memref<1x512xf32, #tpu.memory_space<vmem>>, vector<1x512xf32>
    %17 = vector.broadcast %16 : vector<1x512xf32> to vector<144x512xf32>
    %18 = arith.addf %15, %17 : vector<144x512xf32>
    %cst_7 = arith.constant 0.000000e+00 : f32
    %19 = vector.broadcast %cst_7 : f32 to vector<144x512xf32>
    %20 = arith.maximumf %18, %19 : vector<144x512xf32>
    %21 = vector.shape_cast %20 : vector<144x512xf32> to vector<8x18x512xf32>
    %22 = vector.shape_cast %21 : vector<8x18x512xf32> to vector<8x9x2x512xf32>
    %cst_8 = arith.constant dense<0xFF800000> : vector<8x9x512xf32>
    %23 = vector.multi_reduction <maximumf>, %22, %cst_8 [2] : vector<8x9x2x512xf32> to vector<8x9x512xf32>
    %24 = vector.extract_strided_slice %23 {offsets = [0, 0, 0], sizes = [8, 9, 256], strides = [1, 1, 1]} : vector<8x9x512xf32> to vector<8x9x256xf32>
    %25 = vector.extract_strided_slice %23 {offsets = [0, 0, 256], sizes = [8, 9, 256], strides = [1, 1, 1]} : vector<8x9x512xf32> to vector<8x9x256xf32>
    %26 = arith.maximumf %24, %25 : vector<8x9x256xf32>
    %27 = vector.extract_strided_slice %26 {offsets = [0, 0, 0], sizes = [8, 5, 256], strides = [1, 1, 1]} : vector<8x9x256xf32> to vector<8x5x256xf32>
    %28 = vector.extract_strided_slice %26 {offsets = [0, 1, 0], sizes = [8, 5, 256], strides = [1, 1, 1]} : vector<8x9x256xf32> to vector<8x5x256xf32>
    %29 = vector.extract_strided_slice %26 {offsets = [0, 2, 0], sizes = [8, 5, 256], strides = [1, 1, 1]} : vector<8x9x256xf32> to vector<8x5x256xf32>
    %30 = vector.extract_strided_slice %26 {offsets = [0, 3, 0], sizes = [8, 5, 256], strides = [1, 1, 1]} : vector<8x9x256xf32> to vector<8x5x256xf32>
    %31 = vector.extract_strided_slice %26 {offsets = [0, 4, 0], sizes = [8, 5, 256], strides = [1, 1, 1]} : vector<8x9x256xf32> to vector<8x5x256xf32>
    %32 = tpu.concatenate %27, %28, %29, %30, %31 in 2 : vector<8x5x256xf32>, vector<8x5x256xf32>, vector<8x5x256xf32>, vector<8x5x256xf32>, vector<8x5x256xf32> -> vector<8x5x1280xf32>
    %33 = vector.shape_cast %32 : vector<8x5x1280xf32> to vector<40x1280xf32>
    %34 = arith.truncf %33 : vector<40x1280xf32> to vector<40x1280xbf16>
    %c0_9 = arith.constant 0 : index
    %c0_10 = arith.constant 0 : index
    %35 = vector.load %arg4[%c0_9, %c0_10] : memref<1280x512xbf16, #tpu.memory_space<vmem>>, vector<1280x512xbf16>
    %cst_11 = arith.constant dense<0.000000e+00> : vector<40x512xf32>
    %36 = tpu.matmul %34, %35, %cst_11 {dimension_numbers = #tpu.dot_dimension_numbers<[1], [0], [0], [1], [0, 0, 1, 1], [], []>} : vector<40x1280xbf16>, vector<1280x512xbf16>, vector<40x512xf32> -> vector<40x512xf32>
    %c0_12 = arith.constant 0 : index
    %c0_13 = arith.constant 0 : index
    %37 = vector.load %arg5[%c0_12, %c0_13] : memref<1x512xf32, #tpu.memory_space<vmem>>, vector<1x512xf32>
    %38 = vector.broadcast %37 : vector<1x512xf32> to vector<40x512xf32>
    %39 = arith.addf %36, %38 : vector<40x512xf32>
    %cst_14 = arith.constant 0.000000e+00 : f32
    %40 = vector.broadcast %cst_14 : f32 to vector<40x512xf32>
    %41 = arith.maximumf %39, %40 : vector<40x512xf32>
    %42 = vector.shape_cast %41 : vector<40x512xf32> to vector<8x5x512xf32>
    %43 = vector.extract_strided_slice %42 {offsets = [0, 0, 0], sizes = [8, 4, 512], strides = [1, 1, 1]} : vector<8x5x512xf32> to vector<8x4x512xf32>
    %44 = vector.shape_cast %43 : vector<8x4x512xf32> to vector<8x2x2x512xf32>
    %cst_15 = arith.constant dense<0xFF800000> : vector<8x2x512xf32>
    %45 = vector.multi_reduction <maximumf>, %44, %cst_15 [2] : vector<8x2x2x512xf32> to vector<8x2x512xf32>
    %46 = vector.extract_strided_slice %45 {offsets = [0, 0, 0], sizes = [8, 2, 256], strides = [1, 1, 1]} : vector<8x2x512xf32> to vector<8x2x256xf32>
    %47 = vector.extract_strided_slice %45 {offsets = [0, 0, 256], sizes = [8, 2, 256], strides = [1, 1, 1]} : vector<8x2x512xf32> to vector<8x2x256xf32>
    %48 = arith.maximumf %46, %47 : vector<8x2x256xf32>
    %49 = vector.extract_strided_slice %48 {offsets = [0, 0, 0], sizes = [8, 1, 256], strides = [1, 1, 1]} : vector<8x2x256xf32> to vector<8x1x256xf32>
    %50 = vector.shape_cast %49 : vector<8x1x256xf32> to vector<8x256xf32>
    %51 = vector.extract_strided_slice %48 {offsets = [0, 1, 0], sizes = [8, 1, 256], strides = [1, 1, 1]} : vector<8x2x256xf32> to vector<8x1x256xf32>
    %52 = vector.shape_cast %51 : vector<8x1x256xf32> to vector<8x256xf32>
    %53 = tpu.concatenate %50, %52 in 1 : vector<8x256xf32>, vector<8x256xf32> -> vector<8x512xf32>
    %54 = arith.truncf %53 : vector<8x512xf32> to vector<8x512xbf16>
    %c0_16 = arith.constant 0 : index
    %c0_17 = arith.constant 0 : index
    %55 = vector.load %arg6[%c0_16, %c0_17] : memref<512x64xbf16, #tpu.memory_space<vmem>>, vector<512x64xbf16>
    %cst_18 = arith.constant dense<0.000000e+00> : vector<8x64xf32>
    %56 = tpu.matmul %54, %55, %cst_18 {dimension_numbers = #tpu.dot_dimension_numbers<[1], [0], [0], [1], [0, 0, 1, 1], [], []>} : vector<8x512xbf16>, vector<512x64xbf16>, vector<8x64xf32> -> vector<8x64xf32>
    %c0_19 = arith.constant 0 : index
    %c0_20 = arith.constant 0 : index
    %57 = vector.load %arg7[%c0_19, %c0_20] : memref<1x64xf32, #tpu.memory_space<vmem>>, vector<1x64xf32>
    %58 = vector.broadcast %57 : vector<1x64xf32> to vector<8x64xf32>
    %59 = arith.addf %56, %58 : vector<8x64xf32>
    %cst_21 = arith.constant 0.000000e+00 : f32
    %60 = vector.broadcast %cst_21 : f32 to vector<8x64xf32>
    %61 = arith.maximumf %59, %60 : vector<8x64xf32>
    %62 = arith.truncf %61 : vector<8x64xf32> to vector<8x64xbf16>
    %c0_22 = arith.constant 0 : index
    %c0_23 = arith.constant 0 : index
    %63 = vector.load %arg8[%c0_22, %c0_23] : memref<64x32xbf16, #tpu.memory_space<vmem>>, vector<64x32xbf16>
    %cst_24 = arith.constant dense<0.000000e+00> : vector<8x32xf32>
    %64 = tpu.matmul %62, %63, %cst_24 {dimension_numbers = #tpu.dot_dimension_numbers<[1], [0], [0], [1], [0, 0, 1, 1], [], []>} : vector<8x64xbf16>, vector<64x32xbf16>, vector<8x32xf32> -> vector<8x32xf32>
    %c0_25 = arith.constant 0 : index
    %c0_26 = arith.constant 0 : index
    %65 = vector.load %arg9[%c0_25, %c0_26] : memref<1x32xf32, #tpu.memory_space<vmem>>, vector<1x32xf32>
    %66 = vector.broadcast %65 : vector<1x32xf32> to vector<8x32xf32>
    %67 = arith.addf %64, %66 : vector<8x32xf32>
    %cst_27 = arith.constant 0.000000e+00 : f32
    %68 = vector.broadcast %cst_27 : f32 to vector<8x32xf32>
    %69 = arith.maximumf %67, %68 : vector<8x32xf32>
    %70 = arith.truncf %69 : vector<8x32xf32> to vector<8x32xbf16>
    %c0_28 = arith.constant 0 : index
    %c0_29 = arith.constant 0 : index
    %71 = vector.load %arg10[%c0_28, %c0_29] : memref<32x16xbf16, #tpu.memory_space<vmem>>, vector<32x16xbf16>
    %cst_30 = arith.constant dense<0.000000e+00> : vector<8x16xf32>
    %72 = tpu.matmul %70, %71, %cst_30 {dimension_numbers = #tpu.dot_dimension_numbers<[1], [0], [0], [1], [0, 0, 1, 1], [], []>} : vector<8x32xbf16>, vector<32x16xbf16>, vector<8x16xf32> -> vector<8x16xf32>
    %c0_31 = arith.constant 0 : index
    %c0_32 = arith.constant 0 : index
    %73 = vector.load %arg11[%c0_31, %c0_32] : memref<1x16xf32, #tpu.memory_space<vmem>>, vector<1x16xf32>
    %74 = vector.broadcast %73 : vector<1x16xf32> to vector<8x16xf32>
    %75 = arith.addf %72, %74 : vector<8x16xf32>
    %cst_33 = arith.constant 0.000000e+00 : f32
    %76 = vector.broadcast %cst_33 : f32 to vector<8x16xf32>
    %77 = arith.maximumf %75, %76 : vector<8x16xf32>
    %78 = arith.truncf %77 : vector<8x16xf32> to vector<8x16xbf16>
    %c0_34 = arith.constant 0 : index
    %c0_35 = arith.constant 0 : index
    %79 = vector.load %arg12[%c0_34, %c0_35] : memref<16x128xbf16, #tpu.memory_space<vmem>>, vector<16x128xbf16>
    %cst_36 = arith.constant dense<0.000000e+00> : vector<8x128xf32>
    %80 = tpu.matmul %78, %79, %cst_36 {dimension_numbers = #tpu.dot_dimension_numbers<[1], [0], [0], [1], [0, 0, 1, 1], [], []>} : vector<8x16xbf16>, vector<16x128xbf16>, vector<8x128xf32> -> vector<8x128xf32>
    %c0_37 = arith.constant 0 : index
    %c0_38 = arith.constant 0 : index
    %81 = vector.load %arg13[%c0_37, %c0_38] : memref<1x128xf32, #tpu.memory_space<vmem>>, vector<1x128xf32>
    %82 = vector.broadcast %81 : vector<1x128xf32> to vector<8x128xf32>
    %83 = arith.addf %80, %82 : vector<8x128xf32>
    %c0_39 = arith.constant 0 : index
    %c0_40 = arith.constant 0 : index
    %84 = vector.load %arg14[%c0_39, %c0_40] : memref<8x128xf32, #tpu.memory_space<vmem>>, vector<8x128xf32>
    tpu.vector_store %arg14[%c0_39, %c0_40], %83 {strides = array<i32>} : memref<8x128xf32, #tpu.memory_space<vmem>>, vector<8x128xf32>,
    return
  }
  func.func @transform_0(%arg0: i32) -> (i32, i32, i32) {
    %c0_i32 = arith.constant 0 : i32
    %c0_i32_0 = arith.constant 0 : i32
    %c0_i32_1 = arith.constant 0 : i32
    return %arg0, %c0_i32, %c0_i32_0 : i32, i32, i32
  }
  func.func @transform_1(%arg0: i32) -> (i32, i32) {
    %c0_i32 = arith.constant 0 : i32
    %c0_i32_0 = arith.constant 0 : i32
    %c0_i32_1 = arith.constant 0 : i32
    return %c0_i32, %c0_i32_0 : i32, i32
  }
  func.func @transform_2(%arg0: i32) -> (i32, i32) {
    %c0_i32 = arith.constant 0 : i32
    %c0_i32_0 = arith.constant 0 : i32
    %c0_i32_1 = arith.constant 0 : i32
    return %c0_i32, %c0_i32_0 : i32, i32
  }
  func.func @transform_3(%arg0: i32) -> (i32, i32) {
    %c0_i32 = arith.constant 0 : i32
    %c0_i32_0 = arith.constant 0 : i32
    %c0_i32_1 = arith.constant 0 : i32
    return %c0_i32, %c0_i32_0 : i32, i32
  }
  func.func @transform_4(%arg0: i32) -> (i32, i32) {
    %c0_i32 = arith.constant 0 : i32
    %c0_i32_0 = arith.constant 0 : i32
    %c0_i32_1 = arith.constant 0 : i32
    return %c0_i32, %c0_i32_0 : i32, i32
  }
  func.func @transform_5(%arg0: i32) -> (i32, i32) {
    %c0_i32 = arith.constant 0 : i32
    %c0_i32_0 = arith.constant 0 : i32
    %c0_i32_1 = arith.constant 0 : i32
    return %c0_i32, %c0_i32_0 : i32, i32
  }
  func.func @transform_6(%arg0: i32) -> (i32, i32) {
    %c0_i32 = arith.constant 0 : i32
    %c0_i32_0 = arith.constant 0 : i32
    %c0_i32_1 = arith.constant 0 : i32
    return %c0_i32, %c0_i32_0 : i32, i32
  }
  func.func @transform_7(%arg0: i32) -> (i32, i32) {
    %c0_i32 = arith.constant 0 : i32
    %c0_i32_0 = arith.constant 0 : i32
    %c0_i32_1 = arith.constant 0 : i32
    return %c0_i32, %c0_i32_0 : i32, i32
  }
  func.func @transform_8(%arg0: i32) -> (i32, i32) {
    %c0_i32 = arith.constant 0 : i32
    %c0_i32_0 = arith.constant 0 : i32
    %c0_i32_1 = arith.constant 0 : i32
    return %c0_i32, %c0_i32_0 : i32, i32
  }
  func.func @transform_9(%arg0: i32) -> (i32, i32) {
    %c0_i32 = arith.constant 0 : i32
    %c0_i32_0 = arith.constant 0 : i32
    %c0_i32_1 = arith.constant 0 : i32
    return %c0_i32, %c0_i32_0 : i32, i32
  }
  func.func @transform_10(%arg0: i32) -> (i32, i32) {
    %c0_i32 = arith.constant 0 : i32
    %c0_i32_0 = arith.constant 0 : i32
    %c0_i32_1 = arith.constant 0 : i32
    return %c0_i32, %c0_i32_0 : i32, i32
  }
  func.func @transform_11(%arg0: i32) -> (i32, i32) {
    %c0_i32 = arith.constant 0 : i32
    %c0_i32_0 = arith.constant 0 : i32
    %c0_i32_1 = arith.constant 0 : i32
    return %c0_i32, %c0_i32_0 : i32, i32
  }
  func.func @transform_12(%arg0: i32) -> (i32, i32) {
    %c0_i32 = arith.constant 0 : i32
    %c0_i32_0 = arith.constant 0 : i32
    %c0_i32_1 = arith.constant 0 : i32
    return %c0_i32, %c0_i32_0 : i32, i32
  }
  func.func @transform_13(%arg0: i32) -> (i32, i32) {
    %c0_i32 = arith.constant 0 : i32
    %c0_i32_0 = arith.constant 0 : i32
    return %arg0, %c0_i32 : i32, i32
  }
}

</mosaic_0001>

<bundles_post_ra>
// kernel: one_image_forward.1
= control target key start
LH: loop header
LB: loop body
LE: loop exit
PB: predicated region body
PF: predicated region fallthrough
CT: control target
= control target key end

     0   :  { %18 = vsyncpa [#allocation3], 0  ;;  %s21472_s0 = inlined_call_operand.vmem [shape: f32[8,28,14], index: 0, kind: input, shape index: {}]   ;;  %s21473_s1 = inlined_call_operand.hbm [shape: bf16[140,512], index: 1, kind: input, shape index: {}]   ;;  %s21474_s2 = inlined_call_operand.hbm [shape: f32[1,512], index: 2, kind: input, shape index: {}]   ;;  %s21475_s3 = inlined_call_operand.hbm [shape: bf16[1280,512], index: 3, kind: input, shape index: {}]   ;;  %s21476_s4 = inlined_call_operand.hbm [shape: f32[1,512], index: 4, kind: input, shape index: {}]   ;;  %s21477_s5 = inlined_call_operand.vmem [shape: bf16[512,64], index: 5, kind: input, shape index: {}]   ;;  %s21478_s6 = inlined_call_operand.hbm [shape: f32[1,64], index: 6, kind: input, shape index: {}]   ;;  %s21479_s7 = inlined_call_operand.vmem [shape: bf16[64,32], index: 7, kind: input, shape index: {}]   ;;  %s21480_s8 = inlined_call_operand.hbm [shape: f32[1,32], index: 8, kind: input, shape index: {}]   ;;  %s21481_s9 = inlined_call_operand.vmem [shape: bf16[32,16], index: 9, kind: input, shape index: {}]   ;;  %s21482_s10 = inlined_call_operand.hbm [shape: f32[1,16], index: 10, kind: input, shape index: {}]   ;;  %s21483_s11 = inlined_call_operand.hbm [shape: bf16[16,128], index: 11, kind: input, shape index: {}]   ;;  %s21484_s12 = inlined_call_operand.hbm [shape: f32[1,128], index: 12, kind: input, shape index: {}]   ;;  %s21485_s13 = inlined_call_operand.vmem [shape: f32[8,128], index: 13, kind: output, shape index: {}]  }
   0x1   :  { %19 = vsyncpa [#allocation5], 0 }
   0x2   :  { %20 = vsyncpa [#allocation8], 0 }
   0x3   :  { %21 = vsyncpa [#allocation11], 0 }
   0x4   :  { %22 = vsyncpa [#allocation14], 0  ;;  %s15569_s25 = smov [#allocation4]   ;;  %s15570_s27 = smov [#allocation7]  }
   0x5   :  { %s43_s26 = sshll.u32 %s15569_s25, 4  ;;  %s65_s28 = sshll.u32 %s15570_s27, 4  ;;  %s44_s26 = int_to_ptr.vmem [resolvable:$true] %s43_s26  ;;  %s66_s28 = int_to_ptr.vmem [resolvable:$true] %s65_s28 }
   0x6   :  { %s15361_s14 = scalar_lea.hbm %s21474_s2, 64 }
   0x7   :  { %p15362_p0 = scmp.ne.s32.totalorder %s21474_s2, %s15361_s14  ;;  %p15365_p1 = scmp.lt.u32.totalorder %s15361_s14, %s21474_s2 }
   0x9   :  { %p15367_p2 = pnand %p15365_p1, %p15362_p0 }
   0xb   :  { %15370 = shalt.err (!%p15367_p2)
}
   0xc   :  { %s15371_s19 = scalar_lea.vmem %s44_s26, 64  ;;  %p15376_p4 = scmp.lt.s32.totalorder %s44_s26, %s44_s26 }
   0xd   :  { %p15372_p3 = scmp.ne.s32.totalorder %s44_s26, %s15371_s19  ;;  %p15377_p5 = scmp.lt.s32.totalorder %s15371_s19, %s15371_s19 }
   0xf   :  { %p15378_p6 = por %p15377_p5, %p15376_p4 }
  0x11   :  { %p15379_p7 = pnand %p15378_p6, %p15372_p3 }
  0x13   :  { %15382 = shalt.err (!%p15379_p7)
}
  0x14   :  { %46 = dma.hbm_to_vmem [thread:$0]  %s21474_s2, 64, %s44_s26, [#allocation5]  }
  0x15   :  { %s15383_s24 = scalar_lea.hbm %s21476_s4, 64 }
  0x16   :  { %p15384_p8 = scmp.ne.s32.totalorder %s21476_s4, %s15383_s24  ;;  %p15387_p9 = scmp.lt.u32.totalorder %s15383_s24, %s21476_s4 }
  0x18   :  { %p15389_p10 = pnand %p15387_p9, %p15384_p8 }
  0x1a   :  { %15392 = shalt.err (!%p15389_p10)
}
  0x1b   :  { %s15393_s14 = scalar_lea.vmem %s66_s28, 64  ;;  %p15398_p12 = scmp.lt.s32.totalorder %s66_s28, %s66_s28 }
  0x1c   :  { %p15394_p11 = scmp.ne.s32.totalorder %s66_s28, %s15393_s14  ;;  %p15399_p13 = scmp.lt.s32.totalorder %s15393_s14, %s15393_s14 }
  0x1e   :  { %p15400_p0 = por %p15399_p13, %p15398_p12 }
  0x20   :  { %p15401_p1 = pnand %p15400_p0, %p15394_p11 }
  0x22   :  { %15404 = shalt.err (!%p15401_p1)
}
  0x23   :  { %68 = dma.hbm_to_vmem [thread:$0]  %s21476_s4, 64, %s66_s28, [#allocation8]  }
  0x24   :  { %s15571_s15 = smov [#allocation10]   ;;  %s15572_s17 = smov [#allocation13]  }
  0x25   :  { %s89_s16 = sshll.u32 %s15571_s15, 4  ;;  %s110_s18 = sshll.u32 %s15572_s17, 4  ;;  %s90_s16 = int_to_ptr.vmem [resolvable:$true] %s89_s16  ;;  %s15685_s18 = int_to_ptr.vmem [resolvable:$true] %s110_s18 }
  0x26   :  { %s15405_s21 = scalar_lea.hbm %s21480_s8, 16 }
  0x27   :  { %p15406_p2 = scmp.ne.s32.totalorder %s21480_s8, %s15405_s21  ;;  %p15409_p3 = scmp.lt.u32.totalorder %s15405_s21, %s21480_s8 }
  0x29   :  { %p15411_p4 = pnand %p15409_p3, %p15406_p2 }
  0x2b   :  { %15414 = shalt.err (!%p15411_p4)
}
  0x2c   :  { %s15415_s4 = scalar_lea.vmem %s90_s16, 16  ;;  %s15419_s28 = scalar_lea.vmem %s90_s16, 32 }
  0x2d   :  { %p15416_p5 = scmp.ne.s32.totalorder %s90_s16, %s15415_s4  ;;  %p15420_p6 = scmp.lt.s32.totalorder %s90_s16, %s90_s16 }
  0x2e   :  { %p15421_p7 = scmp.lt.s32.totalorder %s15419_s28, %s15415_s4 }
  0x30   :  { %p15422_p8 = por %p15421_p7, %p15420_p6 }
  0x32   :  { %p15423_p9 = pnand %p15422_p8, %p15416_p5 }
  0x34   :  { %15426 = shalt.err (!%p15423_p9)
}
  0x35   :  { %92 = dma.hbm_to_vmem [thread:$0]  %s21480_s8, 16, %s90_s16, [#allocation11]  }
  0x36   :  { %s15427_s2 = scalar_lea.hbm %s21483_s11, 128 }
  0x37   :  { %p15428_p10 = scmp.ne.s32.totalorder %s21483_s11, %s15427_s2  ;;  %p15431_p11 = scmp.lt.u32.totalorder %s15427_s2, %s21483_s11 }
  0x39   :  { %p15433_p12 = pnand %p15431_p11, %p15428_p10 }
  0x3b   :  { %15436 = shalt.err (!%p15433_p12)
}
  0x3c   :  { %s15437_s20 = scalar_lea.vmem %s15685_s18, 128  ;;  %p15442_p0 = scmp.lt.s32.totalorder %s15685_s18, %s15685_s18 }
  0x3d   :  { %p15438_p13 = scmp.ne.s32.totalorder %s15685_s18, %s15437_s20  ;;  %p15443_p1 = scmp.lt.s32.totalorder %s15437_s20, %s15437_s20 }
  0x3f   :  { %p15444_p2 = por %p15443_p1, %p15442_p0 }
  0x41   :  { %p15445_p3 = pnand %p15444_p2, %p15438_p13 }
  0x43   :  { %15448 = shalt.err (!%p15445_p3)
}
  0x44   :  { %s15573_s8 = smov 64   ;;  %s15574_s16 = smov 4  }
  0x45   :  { %116 = dma.hbm_to_vmem [thread:$0]  %s21483_s11, 128, %s15685_s18, [#allocation14], %s15573_s8, %s15573_s8, %s15574_s16  }
  0x46   :  { %s15575_s23 = smov [#allocation2]   ;;  %s15449_s28 = scalar_lea.hbm %s21473_s1, 4608 }
  0x47   :  { %s30_s24 = sshll.u32 %s15575_s23, 4  ;;  %p15450_p4 = scmp.ne.s32.totalorder %s21473_s1, %s15449_s28  ;;  %s31_s24 = int_to_ptr.vmem [resolvable:$true] %s30_s24 }
  0x48   :  { %p15453_p5 = scmp.lt.u32.totalorder %s15449_s28, %s21473_s1 }
  0x4a   :  { %p15455_p6 = pnand %p15453_p5, %p15450_p4 }
  0x4c   :  { %15458 = shalt.err (!%p15455_p6)
}
  0x4d   :  { %s15459_s2 = scalar_lea.vmem %s31_s24, 4608  ;;  %p15464_p8 = scmp.lt.s32.totalorder %s31_s24, %s31_s24 }
  0x4e   :  { %p15460_p7 = scmp.ne.s32.totalorder %s31_s24, %s15459_s2  ;;  %p15465_p9 = scmp.lt.s32.totalorder %s15459_s2, %s15459_s2 }
  0x50   :  { %p15466_p10 = por %p15465_p9, %p15464_p8 }
  0x52   :  { %p15467_p11 = pnand %p15466_p10, %p15460_p7 }
  0x54   :  { %15470 = shalt.err (!%p15467_p11)
}
  0x55   :  { %s15576_s11 = smov 256   ;;  %s15577_s18 = smov 16  }
  0x56   :  { %36 = dma.hbm_to_vmem [thread:$0]  %s21473_s1, 4608, %s31_s24, [#allocation3], %s15576_s11, %s15576_s11, %s15577_s18  }
  0x57   :  { %s15578_s17 = smov [#allocation6]   ;;  %s15579_s20 = smov [#allocation9]  }
  0x58   :  { %s52_s19 = sshll.u32 %s15578_s17, 4  ;;  %s77_s8 = sshll.u32 %s15579_s20, 4  ;;  %s53_s19 = int_to_ptr.vmem [resolvable:$true] %s52_s19  ;;  %s78_s8 = int_to_ptr.vmem [resolvable:$true] %s77_s8 }
  0x59   :  { %s15471_s22 = scalar_lea.hbm %s21475_s3, 40960 }
  0x5a   :  { %p15472_p12 = scmp.ne.s32.totalorder %s21475_s3, %s15471_s22  ;;  %p15475_p13 = scmp.lt.u32.totalorder %s15471_s22, %s21475_s3 }
  0x5c   :  { %p15477_p0 = pnand %p15475_p13, %p15472_p12 }
  0x5e   :  { %15480 = shalt.err (!%p15477_p0)
}
  0x5f   :  { %s15481_s1 = scalar_lea.vmem %s53_s19, 40960  ;;  %p15486_p2 = scmp.lt.s32.totalorder %s53_s19, %s53_s19 }
  0x60   :  { %p15482_p1 = scmp.ne.s32.totalorder %s53_s19, %s15481_s1  ;;  %p15487_p3 = scmp.lt.s32.totalorder %s15481_s1, %s15481_s1 }
  0x62   :  { %p15488_p4 = por %p15487_p3, %p15486_p2 }
  0x64   :  { %p15489_p5 = pnand %p15488_p4, %p15482_p1 }
  0x66   :  { %15492 = shalt.err (!%p15489_p5)
}
  0x67   :  { %58 = dma.hbm_to_vmem [thread:$0]  %s21475_s3, 40960, %s53_s19, [#allocation5], %s15576_s11, %s15576_s11, %s15577_s18  }
  0x68   :  { %s15493_s14 = scalar_lea.hbm %s21478_s6, 16 }
  0x69   :  { %p15494_p6 = scmp.ne.s32.totalorder %s21478_s6, %s15493_s14  ;;  %p15497_p7 = scmp.lt.u32.totalorder %s15493_s14, %s21478_s6 }
  0x6b   :  { %p15499_p8 = pnand %p15497_p7, %p15494_p6 }
  0x6d   :  { %15502 = shalt.err (!%p15499_p8)
}
  0x6e   :  { %s15503_s20 = scalar_lea.vmem %s78_s8, 16  ;;  %s15507_s16 = scalar_lea.vmem %s78_s8, 32 }
  0x6f   :  { %p15504_p9 = scmp.ne.s32.totalorder %s78_s8, %s15503_s20  ;;  %p15508_p10 = scmp.lt.s32.totalorder %s78_s8, %s78_s8 }
  0x70   :  { %p15509_p11 = scmp.lt.s32.totalorder %s15507_s16, %s15503_s20 }
  0x72   :  { %p15510_p12 = por %p15509_p11, %p15508_p10 }
  0x74   :  { %p15511_p13 = pnand %p15510_p12, %p15504_p9 }
  0x76   :  { %15514 = shalt.err (!%p15511_p13)
}
  0x77   :  { %80 = dma.hbm_to_vmem [thread:$0]  %s21478_s6, 16, %s78_s8, [#allocation8]  }
  0x78   :  { %s15580_s18 = smov [#allocation12]   ;;  %s15581_s21 = smov [#allocation15]  }
  0x79   :  { %s101_s19 = sshll.u32 %s15580_s18, 4  ;;  %s123_s22 = sshll.u32 %s15581_s21, 4  ;;  %s102_s19 = int_to_ptr.vmem [resolvable:$true] %s101_s19  ;;  %s124_s22 = int_to_ptr.vmem [resolvable:$true] %s123_s22 }
  0x7a   :  { %s15515_s4 = scalar_lea.hbm %s21482_s10, 16 }
  0x7b   :  { %p15516_p0 = scmp.ne.s32.totalorder %s21482_s10, %s15515_s4  ;;  %p15519_p1 = scmp.lt.u32.totalorder %s15515_s4, %s21482_s10 }
  0x7d   :  { %p15521_p2 = pnand %p15519_p1, %p15516_p0 }
  0x7f   :  { %15524 = shalt.err (!%p15521_p2)
}
  0x80   :  { %s15525_s6 = scalar_lea.vmem %s102_s19, 16  ;;  %s15529_s8 = scalar_lea.vmem %s102_s19, 32 }
  0x81   :  { %p15526_p3 = scmp.ne.s32.totalorder %s102_s19, %s15525_s6  ;;  %p15530_p4 = scmp.lt.s32.totalorder %s102_s19, %s102_s19 }
  0x82   :  { %p15531_p5 = scmp.lt.s32.totalorder %s15529_s8, %s15525_s6 }
  0x84   :  { %p15532_p6 = por %p15531_p5, %p15530_p4 }
  0x86   :  { %p15533_p7 = pnand %p15532_p6, %p15526_p3 }
  0x88   :  { %15536 = shalt.err (!%p15533_p7)
}
  0x89   :  { %104 = dma.hbm_to_vmem [thread:$0]  %s21482_s10, 16, %s102_s19, [#allocation11]  }
  0x8a   :  { %s15537_s26 = scalar_lea.hbm %s21484_s12, 16 }
  0x8b   :  { %p15538_p8 = scmp.ne.s32.totalorder %s21484_s12, %s15537_s26  ;;  %p15541_p9 = scmp.lt.u32.totalorder %s15537_s26, %s21484_s12 }
  0x8d   :  { %p15543_p10 = pnand %p15541_p9, %p15538_p8 }
  0x8f   :  { %15546 = shalt.err (!%p15543_p10)
}
  0x90   :  { %s15547_s3 = scalar_lea.vmem %s124_s22, 16  ;;  %s15551_s11 = scalar_lea.vmem %s124_s22, 32 }
  0x91   :  { %p15548_p11 = scmp.ne.s32.totalorder %s124_s22, %s15547_s3  ;;  %p15552_p12 = scmp.lt.s32.totalorder %s124_s22, %s124_s22 }
  0x92   :  { %p15553_p13 = scmp.lt.s32.totalorder %s15551_s11, %s15547_s3 }
  0x94   :  { %p15554_p0 = por %p15553_p13, %p15552_p12 }
  0x96   :  { %p15555_p1 = pnand %p15554_p0, %p15548_p11 }
  0x98   :  { %15558 = shalt.err (!%p15555_p1)
}
  0x99   :  { %126 = dma.hbm_to_vmem [thread:$0]  %s21484_s12, 16, %s124_s22, [#allocation14]  }
  0x9a   :  { %15559 = dma.done.wait [#allocation3], 4608  }
  0x9b   :  { %15560 = vsyncadd [#allocation3], 4294962688 }
  0x9c   :  { %15561 = dma.done.wait [#allocation5], 41024  }
  0x9d   :  { %15562 = vsyncadd [#allocation5], 4294926272 }
  0x9e   :  { %15563 = dma.done.wait [#allocation8], 80  }
  0x9f   :  { %15564 = vsyncadd [#allocation8], 4294967216 }
  0xa0   :  { %15565 = dma.done.wait [#allocation11], 32  }
  0xa1   :  { %15566 = vsyncadd [#allocation11], 4294967264 }
  0xa2   :  { %15567 = dma.done.wait [#allocation14], 144  }
  0xa3   :  { %15568 = vsyncadd [#allocation14], 4294967152  ;;  %v15779_v0 = vld [vmem:[%s21472_s0 + $0x8] sm:$0xff]  ;;  %v157_v1 = vld [vmem:[%s21472_s0 + $0x10] sm:$0xff]  ;;  %vm211_vm0 = vcmask 1041408   ;;  %s15582_s15 = smov 14  }
  0xa4   :  { %v15787_v2 = vld [vmem:[%s21472_s0 + $0x28] sm:$0xff]  ;;  %v212_v3 = vrot.slane %v15779_v0, 6  ;;  %v213_v4 = vrot.slane %v157_v1, 6  ;;  %v161_v5 = vld [vmem:[%s21472_s0 + $0x30] sm:$0xff]  ;;  %v158_v7 = vld [vmem:[%s21472_s0 + $0x18] sm:$0xf] }
  0xa5   :  { %v217_v6 = vrot.slane %v15787_v2, 6  ;;  %v218_v8 = vrot.slane %v161_v5, 6  ;;  %v215_v9 = vrot.slane %v158_v7, 6  ;;  %v162_v10 = vld [vmem:[%s21472_s0 + $0x38] sm:$0xf]  ;;  %v165_v11 = vld [vmem:[%s21472_s0 + $0x50] sm:$0xff] }
  0xa6   :  { %v15806_v12 = vld [vmem:[%s21472_s0 + $0x48] sm:$0xff]  ;;  %v214_v13 = vsel %vm211_vm0, %v212_v3, %v213_v4  ;;  %v220_v14 = vrot.slane %v162_v10, 6  ;;  %v166_v15 = vld [vmem:[%s21472_s0 + $0x58] sm:$0xf]  ;;  %v223_v18 = vrot.slane %v165_v11, 6  ;;  %v169_v22 = vld [vmem:[%s21472_s0 + $0x70] sm:$0xff] }
  0xa7   :  { %252 = vrot.lane.b32.xlu0 %v214_v13, %s15582_s15  ;;  %v219_v16 = vsel %vm211_vm0, %v217_v6, %v218_v8  ;;  %v216_v17 = vsel %vm211_vm0, %v213_v4, %v215_v9  ;;  %v222_v19 = vrot.slane %v15806_v12, 6  ;;  %v225_v21 = vrot.slane %v166_v15, 6  ;;  %v15824_v23 = vld [vmem:[%s21472_s0 + $0x68] sm:$0xff]  ;;  %v170_v24 = vld [vmem:[%s21472_s0 + $0x78] sm:$0xf]  ;;  %v173_v28 = vld [vmem:[%s21472_s0 + $0x90] sm:$0xff] }
  0xa8   :  { %256 = vrot.lane.b32.xlu1 %v219_v16, %s15582_s15  ;;  %v221_v20 = vsel %vm211_vm0, %v218_v8, %v220_v14  ;;  %v228_v26 = vrot.slane %v169_v22, 6  ;;  %v227_v27 = vrot.slane %v15824_v23, 6  ;;  %v230_v30 = vrot.slane %v170_v24, 6  ;;  %v174_v31 = vld [vmem:[%s21472_s0 + $0x98] sm:$0xf]  ;;  %v15843_v32 = vld [vmem:[%s21472_s0 + $0x88] sm:$0xff] }
  0xa9   :  { %v224_v25 = vsel %vm211_vm0, %v222_v19, %v223_v18  ;;  %v226_v29 = vsel %vm211_vm0, %v223_v18, %v225_v21  ;;  %v177_v33 = vld [vmem:[%s21472_s0 + $0xb0] sm:$0xff]  ;;  %v233_v35 = vrot.slane %v173_v28, 6  ;;  %v232_v36 = vrot.slane %v15843_v32, 6  ;;  %v178_v37 = vld [vmem:[%s21472_s0 + $0xb8] sm:$0xf]  ;;  %v15858_v38 = vld [vmem:[%s21472_s0 + $0xa8] sm:$0xff] }
  0xaa   :  { %v229_v34 = vsel %vm211_vm0, %v227_v27, %v228_v26  ;;  %v231_v39 = vsel %vm211_vm0, %v228_v26, %v230_v30  ;;  %v235_v40 = vrot.slane %v174_v31, 6  ;;  %v181_v41 = vld [vmem:[%s21472_s0 + $0xd0] sm:$0xff]  ;;  %v15868_v42 = vld [vmem:[%s21472_s0 + $0xc8] sm:$0xff]  ;;  %v238_v44 = vrot.slane %v177_v33, 6  ;;  %v182_v46 = vld [vmem:[%s21472_s0 + $0xd8] sm:$0xf] }
  0xab   :  { %254 = vrot.lane.b32.xlu0 %v216_v17, %s15582_s15  ;;  %v234_v43 = vsel %vm211_vm0, %v232_v36, %v233_v35  ;;  %v237_v45 = vrot.slane %v15858_v38, 6  ;;  %v240_v48 = vrot.slane %v178_v37, 6  ;;  %v185_v49 = vld [vmem:[%s21472_s0 + $0xf0] sm:$0xff]  ;;  %v186_v50 = vld [vmem:[%s21472_s0 + $0xf8] sm:$0xf]  ;;  %v243_v52 = vrot.slane %v181_v41, 6 }
  0xac   :  { %258 = vrot.lane.b32.xlu1 %v221_v20, %s15582_s15  ;;  %v236_v47 = vsel %vm211_vm0, %v233_v35, %v235_v40  ;;  %v242_v53 = vrot.slane %v15868_v42, 6  ;;  %v15890_v54 = vld [vmem:[%s21472_s0 + $0xe8] sm:$0xff]  ;;  %v245_v56 = vrot.slane %v182_v46, 6  ;;  %v248_v58 = vrot.slane %v185_v49, 6  ;;  %s15584_s10 = smov 28   ;;  %s15585_s21 = smov 112  }
  0xad   :  { %v239_v51 = vsel %vm211_vm0, %v237_v45, %v238_v44  ;;  %v241_v55 = vsel %vm211_vm0, %v238_v44, %v240_v48  ;;  %v250_v59 = vrot.slane %v186_v50, 6  ;;  %v247_v61 = vrot.slane %v15890_v54, 6  ;;  %s15586_s23 = smov 84   ;;  %v171_v45 = vld [vmem:[%s21472_s0 + $0x80] sm:$0xff] }
  0xae   :  { %v244_v57 = vsel %vm211_vm0, %v242_v53, %v243_v52  ;;  %v246_v60 = vsel %vm211_vm0, %v243_v52, %v245_v56  ;;  %vm300_vm1 = vcmask 113664   ;;  %vm333_vm2 = vcmask 1043456   ;;  %v175_v46 = vld [vmem:[%s21472_s0 + $0xa0] sm:$0xff] }
  0xaf   :  { %260 = vrot.lane.b32.xlu0 %v224_v25, %s15582_s15  ;;  %v251_v62 = vsel %vm211_vm0, %v248_v58, %v250_v59  ;;  %v249_v63 = vsel %vm211_vm0, %v247_v61, %v248_v58  ;;  %v14788_v59 = vld [vmem:[#allocation2 + $0x4] ss:$16 sps:$4 sm:$0xff]   ;;  %vm414_vm3 = vcmask 1046528   ;;  %vm527_vm4 = vcmask 1045504  }
  0xb0   :  { %262 = vrot.lane.b32.xlu1 %v226_v29, %s15582_s15  ;;  %1993 = vmatprep.subr.bf16.mxu0 %v14788_v59  ;;  %vm640_vm5 = vcmask 1044480   ;;  %vm865_vm6 = vcmask 228352   ;;  %vm890_vm7 = vcmask 457728   ;;  %vm915_vm8 = vcmask 687104  }
  0xb1   :  { %vm940_vm9 = vcmask 916480   ;;  %vm1953_vm10 = vcmask 97280   ;;  %vm6783_vm11 = vcmask 1041409   ;;  %vm6785_vm12 = vcmask 1042434  }
  0xb2   :  { %vm6787_vm13 = vcmask 1043459   ;;  %vm6789_vm14 = vcmask 1044484   ;;  %vm13409_vm15 = vcmask 1045509  }
  0xb3   :  { %264 = vrot.lane.b32.xlu0 %v229_v34, %s15582_s15 }
  0xb4   :  { %266 = vrot.lane.b32.xlu1 %v231_v39, %s15582_s15 }
  0xb7   :  { %268 = vrot.lane.b32.xlu0 %v234_v43, %s15582_s15 }
  0xb8   :  { %270 = vrot.lane.b32.xlu1 %v236_v47, %s15582_s15 }
  0xbb   :  { %272 = vrot.lane.b32.xlu0 %v239_v51, %s15582_s15 }
  0xbc   :  { %274 = vrot.lane.b32.xlu1 %v241_v55, %s15582_s15 }
  0xbf   :  { %276 = vrot.lane.b32.xlu0 %v244_v57, %s15582_s15 }
  0xc0   :  { %278 = vrot.lane.b32.xlu1 %v246_v60, %s15582_s15 }
  0xc3   :  { %282 = vrot.lane.b32.xlu0 %v251_v62, %s15582_s15  ;;  %v14790_v62 = vld [vmem:[#allocation2 + $0xc] ss:$16 sps:$4 sm:$0xff]  }
  0xc4   :  { %280 = vrot.lane.b32.xlu1 %v249_v63, %s15582_s15  ;;  %s15583_s15 = smov 56   ;;  %v14792_v63 = vld [vmem:[#allocation2] ss:$16 sps:$4 sm:$0xff]   ;;  %2116 = vmatprep.subr.bf16.mxu1 %v14790_v62 }
  0xc5   :  { %1994 = vmatpush1.bf16.msra.mxu0 %v14792_v63  ;;  %v14798_v63 = vld [vmem:[#allocation2 + $0x20] ss:$16 sps:$4 sm:$0xff]  }
 0x119   :  { %v253_v1 = vpop.permute.xlu0 %252 }
 0x11a   :  { %v15904_v3 = vpop.permute.xlu1 %256 }
 0x11d   :  { %v255_v4 = vpop.permute.xlu0 %254 }
 0x11e   :  { %v302_v5 = vsel %vm300_vm1, %v15779_v0, %v255_v4  ;;  %v259_v6 = vpop.permute.xlu1 %258 }
 0x11f   :  { %v335_v7 = vrot.slane %v302_v5, 4  ;;  %v15910_v8 = vsel %vm300_vm1, %v15787_v2, %v259_v6  ;;  %v167_v2 = vld [vmem:[%s21472_s0 + $0x60] sm:$0xff] }
 0x120   :  { %v338_v15 = vrot.slane %v15910_v8, 4  ;;  %v14805_v8 = vld [vmem:[#allocation2 + $0x48] ss:$16 sps:$4 sm:$0xff]  }
 0x121   :  { %v15913_v9 = vsel %vm211_vm0, %v335_v7, 0.0  ;;  %v15915_v10 = vpop.permute.xlu0 %260 }
 0x122   :  { %v531_v11 = vrot.slane %v15913_v9, 2  ;;  %v418_v13 = vrot.slane %v15913_v9, 1  ;;  %v263_v14 = vpop.permute.xlu1 %262  ;;  %v756_v16 = vrot.slane %v15913_v9, 4  ;;  %v644_v17 = vrot.slane %v15913_v9, 3 }
 0x123   :  { %v15928_v0 = vsel %vm300_vm1, %v15806_v12, %v263_v14  ;;  %v15938_v20 = vsel %vm211_vm0, %v338_v15, 0.0  ;;  %v155_v12 = vld [vmem:[%s21472_s0] sm:$0xff] }
 0x124   :  { %572 = vrot.lane.b32.xlu1 %v531_v11, %s15583_s15  ;;  %459 = vrot.lane.b32.xlu0 %v418_v13, %s15584_s10  ;;  %v341_v21 = vrot.slane %v15928_v0, 4  ;;  %v536_v25 = vrot.slane %v15938_v20, 2  ;;  %v423_v26 = vrot.slane %v15938_v20, 1  ;;  %v15963_v28 = vsel %vm300_vm1, %v155_v12, %v253_v1  ;;  %v159_v1 = vld [vmem:[%s21472_s0 + $0x20] sm:$0xff] }
 0x125   :  { %v265_v19 = vpop.permute.xlu0 %264  ;;  %v761_v30 = vrot.slane %v15938_v20, 4  ;;  %v649_v31 = vrot.slane %v15938_v20, 3  ;;  %v334_v33 = vrot.slane %v15963_v28, 4  ;;  %v14810_v28 = vld [vmem:[#allocation2 + $0x60] ss:$16 sps:$4 sm:$0xff]  }
 0x126   :  { %v267_v18 = vpop.permute.xlu1 %266  ;;  %v15953_v24 = vsel %vm300_vm1, %v167_v2, %v265_v19  ;;  %v15960_v27 = vsel %vm211_vm0, %v341_v21, 0.0 }
 0x127   :  { %v308_v22 = vsel %vm300_vm1, %v15824_v23, %v267_v18  ;;  %v343_v29 = vrot.slane %v15953_v24, 4  ;;  %v541_v34 = vrot.slane %v15960_v27, 2  ;;  %v428_v37 = vrot.slane %v15960_v27, 1 }
 0x128   :  { %797 = vrot.lane.b32.xlu1 %v756_v16, %s15585_s21  ;;  %685 = vrot.lane.b32.xlu0 %v644_v17, %s15586_s23  ;;  %v344_v23 = vrot.slane %v308_v22, 4  ;;  %v15994_v40 = vsel %vm333_vm2, %v334_v33, %v335_v7  ;;  %v654_v51 = vrot.slane %v15960_v27, 3  ;;  %v766_v7 = vrot.slane %v15960_v27, 4  ;;  %v179_v22 = vld [vmem:[%s21472_s0 + $0xc0] sm:$0xff] }
 0x129   :  { %v269_v41 = vpop.permute.xlu0 %268  ;;  %v416_v47 = vrot.slane %v15994_v40, 1  ;;  %v529_v19 = vrot.slane %v15994_v40, 2 }
 0x12a   :  { %v15983_v35 = vsel %vm211_vm0, %v344_v23, 0.0  ;;  %v15988_v36 = vsel %vm333_vm2, %v343_v29, %v344_v23  ;;  %v271_v39 = vpop.permute.xlu1 %270  ;;  %v309_v53 = vsel %vm300_vm1, %v171_v45, %v269_v41  ;;  %v183_v45 = vld [vmem:[%s21472_s0 + $0xe0] sm:$0xff] }
 0x12b   :  { %v771_v43 = vrot.slane %v15983_v35, 4  ;;  %v769_v44 = vrot.slane %v15988_v36, 4  ;;  %v16013_v49 = vsel %vm300_vm1, %v15843_v32, %v271_v39  ;;  %v546_v55 = vrot.slane %v15983_v35, 2 }
 0x12c   :  { %578 = vrot.lane.b32.xlu1 %v536_v25, %s15583_s15  ;;  %465 = vrot.lane.b32.xlu0 %v423_v26, %s15584_s10  ;;  %v347_v52 = vrot.slane %v16013_v49, 4  ;;  %v544_v56 = vrot.slane %v15988_v36, 2  ;;  %v346_v57 = vrot.slane %v309_v53, 4  ;;  %v419_v18 = vsel %vm414_vm3, %v416_v47, %v418_v13 }
 0x12d   :  { %v273_v50 = vpop.permute.xlu0 %272  ;;  %v16023_v58 = vsel %vm333_vm2, %v769_v44, %v771_v43  ;;  %v16077_v39 = vsel %vm300_vm1, %v159_v1, %v15904_v3  ;;  %v433_v41 = vrot.slane %v15983_v35, 1  ;;  %v642_v3 = vrot.slane %v15994_v40, 3 }
 0x12e   :  { %v275_v48 = vpop.permute.xlu1 %274  ;;  %v311_v60 = vsel %vm300_vm1, %v175_v46, %v273_v50  ;;  %v16040_v4 = vsel %vm333_vm2, %v346_v57, %v347_v52  ;;  %v16043_v5 = vsel %vm333_vm2, 0.0, %v346_v57  ;;  %v16058_v12 = vsel %vm527_vm4, %v544_v56, %v546_v55 }
 0x12f   :  { %v16031_v32 = vsel %vm300_vm1, %v15858_v38, %v275_v48  ;;  %v14793_v38 = vld [vmem:[#allocation2 + $0x8] ss:$16 sps:$4 sm:$0xff]   ;;  %v349_v2 = vrot.slane %v311_v60, 4  ;;  %v532_v48 = vsel %vm527_vm4, %v529_v19, %v531_v11  ;;  %v14794_v60 = vld [vmem:[#allocation2 + $0x24] ss:$16 sps:$4 sm:$0xff]  }
 0x130   :  { %803 = vrot.lane.b32.xlu1 %v761_v30, %s15585_s21  ;;  %691 = vrot.lane.b32.xlu0 %v649_v31, %s15586_s23  ;;  %v350_v14 = vrot.slane %v16031_v32, 4  ;;  %v163_v11 = vld [vmem:[%s21472_s0 + $0x40] sm:$0xff] }
 0x131   :  { %v277_v6 = vpop.permute.xlu0 %276  ;;  %2117 = vmatpush1.bf16.msra.mxu1 %v14793_v38  ;;  %v16073_v23 = vsel %vm333_vm2, 0.0, %v349_v2  ;;  %1995 = vmatprep.subr.bf16.mxu0 %v14794_v60  ;;  %v659_v60 = vrot.slane %v15983_v35, 3 }
 0x132   :  { %v279_v61 = vpop.permute.xlu1 %278  ;;  %v16070_v13 = vsel %vm333_vm2, %v349_v2, %v350_v14  ;;  %v313_v53 = vsel %vm300_vm1, %v179_v22, %v277_v6  ;;  %v14800_v22 = vld [vmem:[#allocation2 + $0x44] ss:$16 sps:$4 sm:$0xff]   ;;  %1996 = vmatpush1.bf16.msra.mxu0 %v14798_v63 }
 0x133   :  { %v352_v59 = vrot.slane %v313_v53, 4  ;;  %v14804_v53 = vld [vmem:[#allocation2 + $0x40] ss:$16 sps:$4 sm:$0xff]   ;;  %1997 = vmatprep.subr.bf16.mxu0 %v14800_v22 }
 0x134   :  { %584 = vrot.lane.b32.xlu1 %v541_v34, %s15583_s15  ;;  %471 = vrot.lane.b32.xlu0 %v428_v37, %s15584_s10 }
 0x135   :  { %v283_v57 = vpop.permute.xlu0 %282  ;;  %v16110_v6 = vsel %vm333_vm2, 0.0, %v352_v59 }
 0x136   :  { %v281_v46 = vpop.permute.xlu1 %280  ;;  %v16114_v2 = vsel %vm300_vm1, %v15890_v54, %v283_v57  ;;  %1998 = vmatpush1.bf16.msra.mxu0 %v14804_v53  ;;  %v14816_v53 = vld [vmem:[#allocation2 + $0x80] ss:$16 sps:$4 sm:$0xff]   ;;  %v445_v32 = vrot.slane %v16110_v6, 1 }
 0x137   :  { %v315_v62 = vsel %vm300_vm1, %v183_v45, %v281_v46  ;;  %v754_v45 = vrot.slane %v15994_v40, 4  ;;  %v21486_v46 = vrot.slane %v16114_v2, 4 }
 0x138   :  { %815 = vrot.lane.b32.xlu1 %v771_v43, %s15585_s21  ;;  %697 = vrot.lane.b32.xlu0 %v654_v51, %s15586_s23  ;;  %v16082_v43 = vsel %vm300_vm1, %v15868_v42, %v279_v61  ;;  %v337_v42 = vrot.slane %v16077_v39, 4  ;;  %v14796_v61 = vld [vmem:[#allocation2 + $0x2c] ss:$16 sps:$4 sm:$0xff]   ;;  %v355_v38 = vrot.slane %v315_v62, 4  ;;  %v645_v39 = vsel %vm640_vm5, %v642_v3, %v644_v17 }
 0x139   :  { %v21487_v50 = vrot.slane %v16082_v43, 4  ;;  %2118 = vmatprep.subr.bf16.mxu1 %v14796_v61  ;;  %v14808_v61 = vld [vmem:[#allocation2 + $0x6c] ss:$16 sps:$4 sm:$0xff]   ;;  %v757_v62 = vsel %vm333_vm2, %v754_v45, %v756_v16 }
 0x13a   :  { %v16126_v54 = vsel %vm333_vm2, %v337_v42, %v338_v15  ;;  %v16133_v17 = vsel %vm333_vm2, 0.0, %v355_v38  ;;  %v16138_v57 = vsel %vm333_vm2, %v355_v38, %v21486_v46  ;;  %v16143_v15 = vsel %vm333_vm2, 0.0, %v334_v33  ;;  %v14812_v38 = vld [vmem:[#allocation2 + $0x84] ss:$16 sps:$4 sm:$0xff]   ;;  %v14828_v46 = vld [vmem:[#allocation2 + $0xc0] ss:$16 sps:$4 sm:$0xff]  }
 0x13b   :  { %v16107_v1 = vsel %vm333_vm2, %v352_v59, %v21487_v50  ;;  %v14806_v59 = vld [vmem:[#allocation2 + $0x64] ss:$16 sps:$4 sm:$0xff]   ;;  %v421_v63 = vrot.slane %v16126_v54, 1  ;;  %v415_v33 = vrot.slane %v16143_v15, 1  ;;  %v16160_v16 = vsel %vm333_vm2, 0.0, %v337_v42 }
 0x13c   :  { %809 = vrot.lane.b32.xlu0 %v766_v7, %s15585_s21  ;;  %457 = vrot.lane.b32.xlu1 %v419_v18, %s15584_s10  ;;  %v14799_v18 = vld [vmem:[#allocation2 + $0x28] ss:$16 sps:$4 sm:$0xff]   ;;  %v528_v42 = vrot.slane %v16143_v15, 2  ;;  %v14832_v50 = vld [vmem:[#allocation2 + $0xec] ss:$16 sps:$4 sm:$0xff]  }
 0x13d   :  { %2119 = vmatpush1.bf16.msra.mxu1 %v14799_v18  ;;  %1999 = vmatprep.subr.bf16.mxu0 %v14806_v59  ;;  %v14814_v18 = vld [vmem:[#allocation2 + $0x8c] ss:$16 sps:$4 sm:$0xff]   ;;  %v424_v22 = vsel %vm414_vm3, %v421_v63, %v423_v26  ;;  %v646_v59 = vrot.slane %v16160_v16, 3 }
 0x13e   :  { %2000 = vmatpush1.bf16.msra.mxu0 %v14810_v28  ;;  %v530_v0 = vsel %vm527_vm4, %v528_v42, %v529_v19  ;;  %v14820_v28 = vld [vmem:[#allocation2 + $0xac] ss:$16 sps:$4 sm:$0xff]  }
 0x13f   :  { %2001 = vmatprep.subr.bf16.mxu0 %v14812_v38  ;;  %v14824_v38 = vld [vmem:[#allocation2 + $0xc4] ss:$16 sps:$4 sm:$0xff]  }
 0x140   :  { %477 = vrot.lane.b32.xlu0 %v433_v41, %s15584_s10  ;;  %570 = vrot.lane.b32.xlu1 %v532_v48, %s15583_s15  ;;  %v14802_v48 = vld [vmem:[#allocation2 + $0x4c] ss:$16 sps:$4 sm:$0xff]  }
 0x141   :  { %2120 = vmatprep.subr.bf16.mxu1 %v14802_v48  ;;  %v534_v48 = vrot.slane %v16126_v54, 2 }
 0x142   :  { %2121 = vmatpush1.bf16.msra.mxu1 %v14805_v8  ;;  %v14817_v8 = vld [vmem:[#allocation2 + $0x88] ss:$16 sps:$4 sm:$0xff]   ;;  %2002 = vmatpush1.bf16.msra.mxu0 %v14816_v53  ;;  %v14826_v53 = vld [vmem:[#allocation2 + $0xcc] ss:$16 sps:$4 sm:$0xff]  }
 0x143   :  { %2122 = vmatprep.subr.bf16.mxu1 %v14808_v61  ;;  %v537_v61 = vsel %vm527_vm4, %v534_v48, %v536_v25  ;;  %v14823_v25 = vld [vmem:[#allocation2 + $0xa8] ss:$16 sps:$4 sm:$0xff]  }
 0x144   :  { %590 = vrot.lane.b32.xlu0 %v546_v55, %s15583_s15  ;;  %683 = vrot.lane.b32.xlu1 %v645_v39, %s15586_s23  ;;  %v305_v55 = vsel %vm300_vm1, %v163_v11, %v15915_v10  ;;  %v14811_v11 = vld [vmem:[#allocation2 + $0x68] ss:$16 sps:$4 sm:$0xff]   ;;  %v417_v39 = vsel %vm414_vm3, %v415_v33, %v416_v47  ;;  %v641_v47 = vrot.slane %v16143_v15, 3  ;;  %v753_v33 = vrot.slane %v16143_v15, 4 }
 0x145   :  { %v340_v10 = vrot.slane %v305_v55, 4  ;;  %vm13411_vm1 = vcmask 1046534  }
 0x146   :  { %2123 = vmatpush1.bf16.msra.mxu1 %v14811_v11  ;;  %v420_v11 = vrot.slane %v16160_v16, 1 }
 0x147   :  { %v16177_v26 = vsel %vm333_vm2, %v340_v10, %v341_v21  ;;  %2124 = vmatprep.subr.bf16.mxu1 %v14814_v18  ;;  %v16182_v55 = vsel %vm333_vm2, 0.0, %v340_v10  ;;  %v647_v21 = vrot.slane %v16126_v54, 3  ;;  %v14822_v10 = vld [vmem:[#allocation2 + $0xa0] ss:$16 sps:$4 sm:$0xff]   ;;  %v759_v18 = vrot.slane %v16126_v54, 4 }
 0x148   :  { %703 = vrot.lane.b32.xlu0 %v659_v60, %s15586_s23  ;;  %795 = vrot.lane.b32.xlu1 %v757_v62, %s15585_s21  ;;  %v14818_v62 = vld [vmem:[#allocation2 + $0xa4] ss:$16 sps:$4 sm:$0xff]   ;;  %v426_v19 = vrot.slane %v16177_v26, 1 }
 0x149   :  { %2003 = vmatprep.subr.bf16.mxu0 %v14818_v62  ;;  %v648_v42 = vsel %vm640_vm5, %v646_v59, %v647_v21  ;;  %v14829_v62 = vld [vmem:[#allocation2 + $0xc8] ss:$16 sps:$4 sm:$0xff]   ;;  %v14834_v59 = vld [vmem:[#allocation2 + $0xe0] ss:$16 sps:$4 sm:$0xff]  }
 0x14a   :  { %2125 = vmatpush1.bf16.msra.mxu1 %v14817_v8  ;;  %v643_v8 = vsel %vm640_vm5, %v641_v47, %v642_v3  ;;  %2004 = vmatpush1.bf16.msra.mxu0 %v14822_v10  ;;  %v762_v3 = vsel %vm333_vm2, %v759_v18, %v761_v30  ;;  %v755_v47 = vsel %vm333_vm2, %v753_v33, %v754_v45  ;;  %v14835_v10 = vld [vmem:[#allocation2 + $0xe8] ss:$16 sps:$4 sm:$0xff]   ;;  %v14836_v45 = vld [vmem:[#allocation2 + $0x104] ss:$16 sps:$4 sm:$0x3f]  }
 0x14b   :  { %2126 = vmatprep.subr.bf16.mxu1 %v14820_v28  ;;  %v14830_v28 = vld [vmem:[#allocation2 + $0xe4] ss:$16 sps:$4 sm:$0xff]   ;;  %2005 = vmatprep.subr.bf16.mxu0 %v14824_v38  ;;  %v422_v30 = vsel %vm414_vm3, %v420_v11, %v421_v63  ;;  %v14840_v63 = vld [vmem:[#allocation2 + $0x100] ss:$16 sps:$4 sm:$0x3f]   ;;  %v650_v38 = vsel %vm640_vm5, %v647_v21, %v649_v31 }
 0x14c   :  { %463 = vrot.lane.b32.xlu1 %v424_v22, %s15584_s10  ;;  %455 = vrot.lane.b32.xlu0 %v417_v39, %s15584_s10  ;;  %v539_v22 = vrot.slane %v16177_v26, 2  ;;  %v533_v39 = vrot.slane %v16160_v16, 2  ;;  %v14841_v33 = vld [vmem:[#allocation2 + $0x108] ss:$16 sps:$4 sm:$0x3f]   ;;  %v1982_v11 = vsel %vm527_vm4, %v14840_v63, 0 }
 0x14d   :  { %v435_v63 = vrot.slane %v16043_v5, 1 }
 0x14e   :  { %2127 = vmatpush1.bf16.msra.mxu1 %v14823_v25  ;;  %2006 = vmatpush1.bf16.msra.mxu0 %v14828_v46  ;;  %v429_v25 = vsel %vm414_vm3, %v426_v19, %v428_v37  ;;  %v535_v37 = vsel %vm527_vm4, %v533_v39, %v534_v48  ;;  %v14838_v46 = vld [vmem:[#allocation2 + $0x10c] ss:$16 sps:$4 sm:$0x3f]   ;;  %v764_v39 = vrot.slane %v16177_v26, 4 }
 0x14f   :  { %2128 = vmatprep.subr.bf16.mxu1 %v14826_v53  ;;  %2007 = vmatprep.subr.bf16.mxu0 %v14830_v28  ;;  %v758_v53 = vrot.slane %v16160_v16, 4 }
 0x150   :  { %576 = vrot.lane.b32.xlu1 %v537_v61, %s15583_s15  ;;  %568 = vrot.lane.b32.xlu0 %v530_v0, %s15583_s15  ;;  %v651_v61 = vrot.slane %v16182_v55, 3  ;;  %v652_v0 = vrot.slane %v16177_v26, 3 }
 0x151   :  { %v760_v31 = vsel %vm333_vm2, %v758_v53, %v759_v18  ;;  %v538_v18 = vrot.slane %v16182_v55, 2 }
 0x152   :  { %2129 = vmatpush1.bf16.msra.mxu1 %v14829_v62  ;;  %2008 = vmatpush1.bf16.msra.mxu0 %v14834_v59  ;;  %v653_v48 = vsel %vm640_vm5, %v651_v61, %v652_v0  ;;  %v425_v61 = vrot.slane %v16182_v55, 1  ;;  %v657_v59 = vrot.slane %v15988_v36, 3 }
 0x153   :  { %2130 = vmatprep.subr.bf16.mxu1 %v14832_v50  ;;  %v542_v50 = vsel %vm527_vm4, %v539_v22, %v541_v34  ;;  %14064 = vmatprep.subr.msk.bf16.mxu0 %vm527_vm4, %v14836_v45  ;;  %v1988_v34 = vsel %vm527_vm4, %v14841_v33, 0  ;;  %v773_v45 = vrot.slane %v16043_v5, 4  ;;  %v436_v33 = vrot.slane %v16040_v4, 1 }
 0x154   :  { %687 = vrot.lane.b32.xlu1 %v648_v42, %s15586_s23  ;;  %681 = vrot.lane.b32.xlu0 %v643_v8, %s15586_s23  ;;  %v16256_v42 = vsel %vm333_vm2, 0.0, %v343_v29  ;;  %v767_v8 = vsel %vm333_vm2, %v764_v39, %v766_v7  ;;  %v427_v29 = vsel %vm414_vm3, %v425_v61, %v426_v19  ;;  %v431_v7 = vrot.slane %v15988_v36, 1 }
 0x155   :  { %v543_v21 = vrot.slane %v16256_v42, 2  ;;  %v768_v28 = vrot.slane %v16256_v42, 4 }
 0x156   :  { %2131 = vmatpush1.bf16.msra.mxu1 %v14835_v10  ;;  %2010 = vmatpush1.bf16.msra.mxu0 %v1982_v11  ;;  %v434_v62 = vsel %vm414_vm3, %v431_v7, %v433_v41  ;;  %v655_v41 = vsel %vm640_vm5, %v652_v0, %v654_v51  ;;  %v548_v51 = vrot.slane %v16043_v5, 2  ;;  %v549_v0 = vrot.slane %v16040_v4, 2 }
 0x157   :  { %14074 = vmatprep.subr.msk.bf16.mxu1 %vm527_vm4, %v14838_v46  ;;  %v545_v24 = vsel %vm527_vm4, %v543_v21, %v544_v56  ;;  %v540_v56 = vsel %vm527_vm4, %v538_v18, %v539_v22  ;;  %v770_v19 = vsel %vm333_vm2, %v768_v28, %v769_v44  ;;  %v763_v22 = vrot.slane %v16182_v55, 4 }
 0x158   :  { %801 = vrot.lane.b32.xlu1 %v762_v3, %s15585_s21  ;;  %793 = vrot.lane.b32.xlu0 %v755_v47, %s15585_s21  ;;  %v660_v3 = vsel %vm640_vm5, %v657_v59, %v659_v60  ;;  %v430_v47 = vrot.slane %v16256_v42, 1  ;;  %v550_v60 = vsel %vm527_vm4, %v548_v51, %v549_v0  ;;  %v16327_v11 = vsel %vm211_vm0, %v347_v52, 0.0 }
 0x159   :  { %v765_v44 = vsel %vm333_vm2, %v763_v22, %v764_v39  ;;  %v437_v39 = vsel %vm414_vm3, %v435_v63, %v436_v33  ;;  %v438_v53 = vrot.slane %v16327_v11, 1  ;;  %v667_v18 = vrot.slane %v16070_v13, 3 }
 0x15a   :  { %2133 = vmatpush1.bf16.msra.mxu1 %v1988_v34  ;;  %v432_v10 = vsel %vm414_vm3, %v430_v47, %v431_v7  ;;  %v440_v34 = vrot.slane %v16073_v23, 1  ;;  %v666_v7 = vrot.slane %v16073_v23, 3  ;;  %v778_v28 = vrot.slane %v16073_v23, 4 }
 0x15b   :  { %v439_v52 = vsel %vm414_vm3, %v436_v33, %v438_v53  ;;  %v776_v22 = vrot.slane %v16327_v11, 4  ;;  %v558_v33 = vrot.slane %v16110_v6, 2 }
 0x15c   :  { %469 = vrot.lane.b32.xlu1 %v429_v25, %s15584_s10  ;;  %461 = vrot.lane.b32.xlu0 %v422_v30, %s15584_s10  ;;  %v656_v25 = vrot.slane %v16256_v42, 3 }
 0x15e   :  { %v658_v30 = vsel %vm640_vm5, %v656_v25, %v657_v59  ;;  %v779_v59 = vrot.slane %v16070_v13, 4 }
 0x160   :  { %582 = vrot.lane.b32.xlu1 %v542_v50, %s15583_s15  ;;  %574 = vrot.lane.b32.xlu0 %v535_v37, %s15583_s15  ;;  %v661_v50 = vrot.slane %v16043_v5, 3  ;;  %v662_v37 = vrot.slane %v16040_v4, 3 }
 0x162   :  { %v663_v46 = vsel %vm640_vm5, %v661_v50, %v662_v37 }
 0x164   :  { %693 = vrot.lane.b32.xlu1 %v653_v48, %s15586_s23  ;;  %689 = vrot.lane.b32.xlu0 %v650_v38, %s15586_s23  ;;  %v441_v48 = vrot.slane %v16070_v13, 1 }
 0x166   :  { %v442_v49 = vsel %vm414_vm3, %v440_v34, %v441_v48  ;;  %v559_v34 = vrot.slane %v16107_v1, 2 }
 0x168   :  { %807 = vrot.lane.b32.xlu1 %v767_v8, %s15585_s21  ;;  %799 = vrot.lane.b32.xlu0 %v760_v31, %s15585_s21  ;;  %v554_v8 = vrot.slane %v16070_v13, 2  ;;  %v551_v31 = vrot.slane %v16327_v11, 2 }
 0x16a   :  { %v552_v61 = vsel %vm527_vm4, %v549_v0, %v551_v31 }
 0x16c   :  { %586 = vrot.lane.b32.xlu1 %v545_v24, %s15583_s15  ;;  %467 = vrot.lane.b32.xlu0 %v427_v29, %s15584_s10  ;;  %v664_v24 = vrot.slane %v16327_v11, 3 }
 0x16e   :  { %v665_v29 = vsel %vm640_vm5, %v662_v37, %v664_v24 }
 0x170   :  { %475 = vrot.lane.b32.xlu1 %v434_v62, %s15584_s10  ;;  %580 = vrot.lane.b32.xlu0 %v540_v56, %s15583_s15 }
 0x174   :  { %811 = vrot.lane.b32.xlu1 %v770_v19, %s15585_s21  ;;  %695 = vrot.lane.b32.xlu0 %v655_v41, %s15586_s23  ;;  %v668_v41 = vsel %vm640_vm5, %v666_v7, %v667_v18 }
 0x178   :  { %701 = vrot.lane.b32.xlu1 %v660_v3, %s15586_s23  ;;  %805 = vrot.lane.b32.xlu0 %v765_v44, %s15585_s21 }
 0x17c   :  { %813 = vrot.lane.b32.xlu1 %v16023_v58, %s15585_s21  ;;  %473 = vrot.lane.b32.xlu0 %v432_v10, %s15584_s10  ;;  %v774_v58 = vrot.slane %v16040_v4, 4  ;;  %v16379_v10 = vsel %vm211_vm0, %v350_v14, 0.0  ;;  %v446_v14 = vrot.slane %v16107_v1, 1 }
 0x17e   :  { %v775_v38 = vsel %vm333_vm2, %v773_v45, %v774_v58  ;;  %v777_v0 = vsel %vm333_vm2, %v774_v58, %v776_v22  ;;  %v443_v45 = vrot.slane %v16379_v10, 1 }
 0x180   :  { %592 = vrot.lane.b32.xlu1 %v550_v60, %s15583_s15  ;;  %699 = vrot.lane.b32.xlu0 %v658_v30, %s15586_s23 }
 0x184   :  { %705 = vrot.lane.b32.xlu1 %v663_v46, %s15586_s23  ;;  %588 = vrot.lane.b32.xlu0 %v16058_v12, %s15583_s15  ;;  %v553_v12 = vrot.slane %v16073_v23, 2 }
 0x186   :  { %v555_v21 = vsel %vm527_vm4, %v553_v12, %v554_v8 }
 0x188   :  { %817 = vrot.lane.b32.xlu1 %v775_v38, %s15585_s21  ;;  %479 = vrot.lane.b32.xlu0 %v437_v39, %s15584_s10  ;;  %v447_v38 = vsel %vm414_vm3, %v445_v32, %v446_v14  ;;  %v444_v39 = vsel %vm414_vm3, %v441_v48, %v443_v45  ;;  %v560_v48 = vsel %vm527_vm4, %v558_v33, %v559_v34  ;;  %v21754_v32 = vrot.slane %v16082_v43, 4 }
 0x189   :  { %v15587_v43 = vmov 1983009808  }
 0x18c   :  { %485 = vrot.lane.b32.xlu1 %v442_v49, %s15584_s10  ;;  %481 = vrot.lane.b32.xlu0 %v439_v52, %s15584_s10 }
 0x190   :  { %598 = vrot.lane.b32.xlu1 %v555_v21, %s15583_s15  ;;  %594 = vrot.lane.b32.xlu0 %v552_v61, %s15583_s15 }
 0x194   :  { %707 = vrot.lane.b32.xlu1 %v665_v29, %s15586_s23  ;;  %483 = vrot.lane.b32.xlu0 %v438_v53, %s15584_s10  ;;  %v556_v53 = vrot.slane %v16379_v10, 2 }
 0x196   :  { %v573_v62 = vpop.permute.xlu1 %572  ;;  %v460_v56 = vpop.permute.xlu0 %459  ;;  %v557_v61 = vsel %vm527_vm4, %v554_v8, %v556_v53 }
 0x197   :  { %v868_v19 = vsel %vm865_vm6, %v15913_v9, %v460_v56  ;;  %v780_v9 = vsel %vm333_vm2, %v778_v28, %v779_v59  ;;  %v671_v28 = vrot.slane %v16110_v6, 3 }
 0x198   :  { %596 = vrot.lane.b32.xlu1 %v551_v31, %s15583_s15  ;;  %711 = vrot.lane.b32.xlu0 %v668_v41, %s15586_s23  ;;  %v893_v3 = vsel %vm890_vm7, %v868_v19, %v573_v62  ;;  %v672_v19 = vrot.slane %v16107_v1, 3 }
 0x19a   :  { %v16369_v44 = vpop.permute.xlu1 %797  ;;  %v686_v47 = vpop.permute.xlu0 %685 }
 0x19b   :  { %v918_v51 = vsel %vm915_vm8, %v893_v3, %v686_v47  ;;  %v673_v47 = vsel %vm640_vm5, %v671_v28, %v672_v19 }
 0x19c   :  { %v16383_v25 = vsel %vm940_vm9, %v918_v51, %v16369_v44  ;;  %823 = vrot.lane.b32.xlu1 %v780_v9, %s15585_s21  ;;  %819 = vrot.lane.b32.xlu0 %v777_v0, %s15585_s21  ;;  %v781_v51 = vrot.slane %v16379_v10, 4 }
 0x19d   :  { %v1025_v60 = vcombine.low %v16383_v25, %v16369_v44 }
 0x19e   :  { %v579_v30 = vpop.permute.xlu1 %578  ;;  %v466_v50 = vpop.permute.xlu0 %465 }
 0x19f   :  { %v871_v37 = vsel %vm865_vm6, %v15938_v20, %v466_v50 }
 0x1a0   :  { %821 = vrot.lane.b32.xlu1 %v776_v22, %s15585_s21  ;;  %709 = vrot.lane.b32.xlu0 %v664_v24, %s15586_s23  ;;  %v896_v46 = vsel %vm890_vm7, %v871_v37, %v579_v30  ;;  %v669_v24 = vrot.slane %v16379_v10, 3  ;;  %v783_v22 = vrot.slane %v16110_v6, 4  ;;  %v782_v37 = vsel %vm333_vm2, %v779_v59, %v781_v51 }
 0x1a2   :  { %v16397_v58 = vpop.permute.xlu1 %803  ;;  %v692_v63 = vpop.permute.xlu0 %691 }
 0x1a3   :  { %v921_v20 = vsel %vm915_vm8, %v896_v46, %v692_v63 }
 0x1a4   :  { %v16411_v49 = vsel %vm940_vm9, %v921_v20, %v16397_v58  ;;  %491 = vrot.lane.b32.xlu1 %v447_v38, %s15584_s10  ;;  %487 = vrot.lane.b32.xlu0 %v444_v39, %s15584_s10  ;;  %v992_v39 = vunpack.c.l.s4 %v15587_v43 }
 0x1a5   :  { %v1069_v52 = vcombine.low %v16411_v49, %v16397_v58 }
 0x1a6   :  { %v585_v12 = vpop.permute.xlu1 %584  ;;  %v472_v31 = vpop.permute.xlu0 %471 }
 0x1a7   :  { %v874_v21 = vsel %vm865_vm6, %v15960_v27, %v472_v31  ;;  %v670_v27 = vsel %vm640_vm5, %v667_v18, %v669_v24  ;;  %v784_v18 = vrot.slane %v16107_v1, 4 }
 0x1a8   :  { %604 = vrot.lane.b32.xlu1 %v560_v48, %s15583_s15  ;;  %600 = vrot.lane.b32.xlu0 %v557_v61, %s15583_s15  ;;  %v899_v29 = vsel %vm890_vm7, %v874_v21, %v585_v12  ;;  %v450_v21 = vrot.slane %v16133_v17, 1 }
 0x1a9   :  { %v785_v50 = vsel %vm333_vm2, %v783_v22, %v784_v18 }
 0x1aa   :  { %v16427_v7 = vpop.permute.xlu1 %815  ;;  %v698_v62 = vpop.permute.xlu0 %697 }
 0x1ab   :  { %v924_v56 = vsel %vm915_vm8, %v899_v29, %v698_v62 }
 0x1ac   :  { %713 = vrot.lane.b32.xlu1 %v670_v27, %s15586_s23  ;;  %489 = vrot.lane.b32.xlu0 %v443_v45, %s15584_s10  ;;  %v16456_v45 = vsel %vm211_vm0, %v21754_v32, 0.0 }
 0x1ad   :  { %v561_v38 = vrot.slane %v16456_v45, 2  ;;  %v448_v59 = vrot.slane %v16456_v45, 1 }
 0x1ae   :  { %v16435_v8 = vpop.permute.xlu0 %809  ;;  %v458_v41 = vpop.permute.xlu1 %457 }
 0x1af   :  { %v16440_v3 = vsel %vm940_vm9, %v924_v56, %v16435_v8  ;;  %v867_v48 = vsel %vm865_vm6, %v15994_v40, %v458_v41  ;;  %v562_v29 = vsel %vm527_vm4, %v559_v34, %v561_v38  ;;  %v993_v34 = vunpack.c.0.s8 %v992_v39 }
 0x1b0   :  { %v1113_v9 = vcombine.low %v16440_v3, %v16435_v8  ;;  %602 = vrot.lane.b32.xlu1 %v556_v53, %s15583_s15  ;;  %717 = vrot.lane.b32.xlu0 %v673_v47, %s15586_s23  ;;  %v994_v53 = vlaneseq }
 0x1b2   :  { %v478_v0 = vpop.permute.xlu0 %477  ;;  %v571_v30 = vpop.permute.xlu1 %570  ;;  %v16486_v28 = vshrl.u32 %v994_v53, 7 }
 0x1b3   :  { %v877_v46 = vsel %vm865_vm6, %v15983_v35, %v478_v0  ;;  %v451_v35 = vrot.slane %v16138_v57, 1  ;;  %v892_v62 = vsel %vm890_vm7, %v867_v48, %v571_v30 }
 0x1b4   :  { %829 = vrot.lane.b32.xlu1 %v785_v50, %s15585_s21  ;;  %825 = vrot.lane.b32.xlu0 %v782_v37, %s15585_s21  ;;  %21755 = vst [vmem:[#allocation21_spill] sm:$0xff] %v16486_v28  ;;  %v16498_v50 = vsub.s32 %v993_v34, %v16486_v28 }
 0x1b5   :  { %v452_v47 = vsel %vm414_vm3, %v450_v21, %v451_v35  ;;  %v677_v21 = vrot.slane %v16138_v57, 3 }
 0x1b6   :  { %v591_v63 = vpop.permute.xlu0 %590  ;;  %v684_v33 = vpop.permute.xlu1 %683  ;;  %21756 = vst [vmem:[#allocation22_spill] sm:$0xff] %v16498_v50 }
 0x1b7   :  { %v902_v20 = vsel %vm890_vm7, %v877_v46, %v591_v63  ;;  %v917_v40 = vsel %vm915_vm8, %v892_v62, %v684_v33  ;;  %v786_v63 = vrot.slane %v16456_v45, 4  ;;  %v563_v33 = vrot.slane %v16133_v17, 2 }
 0x1b8   :  { %827 = vrot.lane.b32.xlu1 %v781_v51, %s15585_s21  ;;  %715 = vrot.lane.b32.xlu0 %v669_v24, %s15586_s23  ;;  %v449_v24 = vsel %vm414_vm3, %v446_v14, %v448_v59  ;;  %v674_v51 = vrot.slane %v16456_v45, 3 }
 0x1ba   :  { %v704_v12 = vpop.permute.xlu0 %703  ;;  %v796_v31 = vpop.permute.xlu1 %795  ;;  %v675_v46 = vsel %vm640_vm5, %v672_v19, %v674_v51 }
 0x1bb   :  { %v927_v61 = vsel %vm915_vm8, %v902_v20, %v704_v12  ;;  %v942_v14 = vsel %vm940_vm9, %v917_v40, %v796_v31  ;;  %v564_v20 = vrot.slane %v16138_v57, 2  ;;  %v787_v12 = vsel %vm333_vm2, %v784_v18, %v786_v63 }
 0x1bc   :  { %v16479_v56 = vsel %vm940_vm9, %v927_v61, %v16427_v7  ;;  %606 = vrot.lane.b32.xlu1 %v562_v29, %s15583_s15  ;;  %493 = vrot.lane.b32.xlu0 %v449_v24, %s15584_s10  ;;  %v1007_v0 = vcombine.low %v942_v14, %v796_v31  ;;  %v1008_v30 = vcombine.high %v942_v14, %v796_v31  ;;  %v676_v31 = vrot.slane %v16133_v17, 3 }
 0x1bd   :  { %v1157_v27 = vcombine.low %v16479_v56, %v16427_v7  ;;  %v565_v19 = vsel %vm527_vm4, %v563_v33, %v564_v20  ;;  %v788_v14 = vrot.slane %v16133_v17, 4 }
 0x1be   :  { %v16489_v41 = vpop.permute.xlu1 %463  ;;  %v456_v22 = vpop.permute.xlu0 %455  ;;  %v1022_v43 = vrot.slane %v1008_v30, %v16498_v50  ;;  %v678_v34 = vsel %vm640_vm5, %v676_v31, %v677_v21 }
 0x1c0   :  { %497 = vrot.lane.b32.xlu1 %v452_v47, %s15584_s10  ;;  %495 = vrot.lane.b32.xlu0 %v448_v59, %s15584_s10  ;;  %v1015_v59 = vrot.slane %v1007_v0, %v16498_v50  ;;  %v1024_v61 = vcombine.high %v1022_v43, %v1022_v43 }
 0x1c2   :  { %v577_v37 = vpop.permute.xlu1 %576  ;;  %v569_v32 = vpop.permute.xlu0 %568  ;;  %v1023_v48 = vcombine.high %v1015_v59, %v1015_v59 }
 0x1c4   :  { %608 = vrot.lane.b32.xlu1 %v561_v38, %s15583_s15  ;;  %719 = vrot.lane.b32.xlu0 %v675_v46, %s15586_s23  ;;  %v866_v38 = vsel %vm865_vm6, %v16143_v15, %v456_v22  ;;  %v789_v15 = vrot.slane %v16138_v57, 4  ;;  %v21757_v22 = vrot.slane %v16114_v2, 4  ;;  %v1360_v46 = vcombine.low %v1022_v43, %v1024_v61 }
 0x1c5   :  { %v891_v29 = vsel %vm890_vm7, %v866_v38, %v569_v32  ;;  %v1359_v32 = vcombine.low %v1015_v59, %v1023_v48 }
 0x1c6   :  { %v16508_v39 = vpop.permute.xlu1 %687  ;;  %v682_v53 = vpop.permute.xlu0 %681  ;;  %v16529_v47 = vsel %vm211_vm0, %v21757_v22, 0.0  ;;  %v790_v2 = vsel %vm333_vm2, %v788_v14, %v789_v15  ;;  %v1374_v59 = vrot.slane %v1360_v46, %v16498_v50 }
 0x1c7   :  { %v916_v24 = vsel %vm915_vm8, %v891_v29, %v682_v53  ;;  %v566_v31 = vrot.slane %v16529_v47, 2  ;;  %v453_v38 = vrot.slane %v16529_v47, 1  ;;  %v679_v14 = vrot.slane %v16529_v47, 3 }
 0x1c8   :  { %831 = vrot.lane.b32.xlu1 %v787_v12, %s15585_s21  ;;  %610 = vrot.lane.b32.xlu0 %v565_v19, %s15583_s15 }
 0x1ca   :  { %v16520_v18 = vpop.permute.xlu1 %801  ;;  %v794_v62 = vpop.permute.xlu0 %793 }
 0x1cb   :  { %v941_v40 = vsel %vm940_vm9, %v916_v24, %v794_v62 }
 0x1cc   :  { %v989_v0 = vcombine.low %v941_v40, %v794_v62  ;;  %v990_v30 = vcombine.high %v941_v40, %v794_v62  ;;  %723 = vrot.lane.b32.xlu1 %v678_v34, %s15586_s23  ;;  %721 = vrot.lane.b32.xlu0 %v674_v51, %s15586_s23  ;;  %v1367_v51 = vrot.slane %v1359_v32, %v16498_v50  ;;  %v791_v32 = vrot.slane %v16529_v47, 4 }
 0x1cd   :  { %v567_v40 = vsel %vm527_vm4, %v564_v20, %v566_v31  ;;  %v454_v34 = vsel %vm414_vm3, %v451_v35, %v453_v38  ;;  %vm13844_vm3 = vcmask 523264   ;;  %vm13913_vm4 = vcmask 261120  }
 0x1ce   :  { %v997_v33 = vrot.slane %v989_v0, %v16498_v50  ;;  %v1004_v53 = vrot.slane %v990_v30, %v16498_v50  ;;  %v16535_v12 = vpop.permute.xlu1 %469  ;;  %v462_v19 = vpop.permute.xlu0 %461  ;;  %v1376_v30 = vcombine.high %v1367_v51, %v1374_v59 }
 0x1cf   :  { %v869_v35 = vsel %vm865_vm6, %v16160_v16, %v462_v19  ;;  %v873_v44 = vsel %vm865_vm6, %v16177_v26, %v16535_v12 }
 0x1d0   :  { %v1005_v29 = vcombine.high %v997_v33, %v997_v33  ;;  %v1006_v24 = vcombine.high %v1004_v53, %v1004_v53  ;;  %835 = vrot.lane.b32.xlu1 %v790_v2, %s15585_s21  ;;  %833 = vrot.lane.b32.xlu0 %v786_v63, %s15585_s21  ;;  %v870_v63 = vsel %vm865_vm6, %v16126_v54, %v16489_v41 }
 0x1d1   :  { %v895_v20 = vsel %vm890_vm7, %v870_v63, %v577_v37 }
 0x1d2   :  { %v16546_v43 = vpop.permute.xlu1 %582  ;;  %v575_v48 = vpop.permute.xlu0 %574  ;;  %v1341_v61 = vcombine.low %v997_v33, %v1005_v29  ;;  %v1342_v62 = vcombine.low %v1004_v53, %v1006_v24  ;;  %v1375_v53 = vcombine.low %v1367_v51, %v1374_v59  ;;  %v680_v24 = vsel %vm640_vm5, %v677_v21, %v679_v14 }
 0x1d3   :  { %v894_v2 = vsel %vm890_vm7, %v869_v35, %v575_v48  ;;  %vm13974_vm5 = vcmask 130048  }
 0x1d4   :  { %612 = vrot.lane.b32.xlu1 %v567_v40, %s15583_s15  ;;  %499 = vrot.lane.b32.xlu0 %v454_v34, %s15584_s10  ;;  %v1349_v22 = vrot.slane %v1341_v61, %v16498_v50  ;;  %v1356_v0 = vrot.slane %v1342_v62, %v16498_v50  ;;  %v919_v59 = vsel %vm915_vm8, %v894_v2, %v16508_v39 }
 0x1d6   :  { %v16564_v46 = vpop.permute.xlu1 %693  ;;  %v690_v33 = vpop.permute.xlu0 %689  ;;  %v1358_v54 = vcombine.high %v1349_v22, %v1356_v0  ;;  %v1357_v41 = vcombine.low %v1349_v22, %v1356_v0  ;;  %v1032_v22 = vrot.slane %v1025_v60, %v16498_v50 }
 0x1d7   :  { %v920_v29 = vsel %vm915_vm8, %v895_v20, %v690_v33 }
 0x1d8   :  { %v945_v37 = vsel %vm940_vm9, %v920_v29, %v16520_v18  ;;  %725 = vrot.lane.b32.xlu1 %v680_v24, %s15586_s23  ;;  %501 = vrot.lane.b32.xlu0 %v453_v38, %s15584_s10  ;;  %v1702_v16 = vpack.c.bf16 %v1376_v30, %v1358_v54  ;;  %v1701_v19 = vpack.c.bf16 %v1375_v53, %v1357_v41 }
 0x1d9   :  { %v1051_v61 = vcombine.low %v945_v37, %v16520_v18  ;;  %v1052_v51 = vcombine.high %v945_v37, %v16520_v18  ;;  %v792_v18 = vsel %vm333_vm2, %v789_v15, %v791_v32  ;;  %vm13413_vm2 = vcmask 1047559  }
 0x1da   :  { %v16577_v48 = vpop.permute.xlu1 %807  ;;  %14065 = vmatprep.mubr.msk.bf16.mxu0 %vm1953_vm10, %v1702_v16  ;;  %14075 = vmatprep.mubr.msk.bf16.mxu1 %vm1953_vm10, %v1702_v16  ;;  %v800_v21 = vpop.permute.xlu0 %799 }
 0x1db   :  { %v1059_v62 = vrot.slane %v1051_v61, %v16498_v50  ;;  %v944_v38 = vsel %vm940_vm9, %v919_v59, %v800_v21  ;;  %2026 = vmatmul.mubr.bf16.vlgmr.msra.gmra.mrb[0].mxu0 %v1701_v19  ;;  %2149 = vmatmul.mubr.bf16.vlgmr.msra.gmra.mrb[0].mxu1 %v1701_v19  ;;  %v1066_v39 = vrot.slane %v1052_v51, %v16498_v50 }
 0x1dc   :  { %v1033_v40 = vcombine.low %v944_v38, %v800_v21  ;;  %v1034_v34 = vcombine.high %v944_v38, %v800_v21  ;;  %837 = vrot.lane.b32.xlu1 %v792_v18, %s15585_s21  ;;  %614 = vrot.lane.b32.xlu0 %v566_v31, %s15583_s15 }
 0x1dd   :  { %v1067_v63 = vcombine.high %v1059_v62, %v1059_v62 }
 0x1de   :  { %v1041_v0 = vrot.slane %v1033_v40, %v16498_v50  ;;  %v1048_v20 = vrot.slane %v1034_v34, %v16498_v50  ;;  %v587_v30 = vpop.permute.xlu1 %586  ;;  %v468_v15 = vpop.permute.xlu0 %467 }
 0x1df   :  { %v1396_v35 = vcombine.low %v1067_v63, %v1066_v39  ;;  %v1068_v63 = vcombine.high %v1066_v39, %v1066_v39 }
 0x1e0   :  { %v1049_v33 = vcombine.high %v1041_v0, %v1041_v0  ;;  %v1050_v54 = vcombine.high %v1048_v20, %v1048_v20  ;;  %v1377_v41 = vcombine.low %v1032_v22, %v1041_v0  ;;  %839 = vrot.lane.b32.xlu1 %v791_v32, %s15585_s21  ;;  %727 = vrot.lane.b32.xlu0 %v679_v14, %s15586_s23 }
 0x1e1   :  { %v1410_v25 = vrot.slane %v1396_v35, %v16498_v50  ;;  %v898_v32 = vsel %vm890_vm7, %v873_v44, %v16546_v43  ;;  %v872_v14 = vsel %vm865_vm6, %v16182_v55, %v468_v15 }
 0x1e2   :  { %v1378_v31 = vcombine.low %v1049_v33, %v1048_v20  ;;  %v1395_v53 = vcombine.low %v1050_v54, %v1059_v62  ;;  %v476_v2 = vpop.permute.xlu1 %475  ;;  %v581_v29 = vpop.permute.xlu0 %580  ;;  %v1385_v60 = vrot.slane %v1377_v41, %v16498_v50 }
 0x1e3   :  { %v897_v12 = vsel %vm890_vm7, %v872_v14, %v581_v29 }
 0x1e4   :  { %v1392_v24 = vrot.slane %v1378_v31, %v16498_v50  ;;  %v1403_v37 = vrot.slane %v1395_v53, %v16498_v50  ;;  %v922_v55 = vsel %vm915_vm8, %v897_v12, %v16564_v46  ;;  %v1076_v46 = vrot.slane %v1069_v52, %v16498_v50 }
 0x1e6   :  { %v812_v16 = vpop.permute.xlu1 %811  ;;  %v696_v19 = vpop.permute.xlu0 %695  ;;  %v1394_v61 = vcombine.high %v1385_v60, %v1392_v24  ;;  %v1412_v51 = vcombine.high %v1403_v37, %v1410_v25  ;;  %v1393_v59 = vcombine.low %v1385_v60, %v1392_v24  ;;  %v1411_v26 = vcombine.low %v1403_v37, %v1410_v25 }
 0x1e7   :  { %v923_v21 = vsel %vm915_vm8, %v898_v32, %v696_v19  ;;  %v1413_v31 = vcombine.low %v1068_v63, %v1076_v46 }
 0x1e8   :  { %v948_v62 = vsel %vm940_vm9, %v923_v21, %v16577_v48  ;;  %v1704_v38 = vpack.c.bf16 %v1412_v51, %v1394_v61  ;;  %v1703_v18 = vpack.c.bf16 %v1411_v26, %v1393_v59  ;;  %v876_v59 = vsel %vm865_vm6, %v15988_v36, %v476_v2 }
 0x1e9   :  { %v1095_v43 = vcombine.low %v948_v62, %v16577_v48  ;;  %v1096_v53 = vcombine.high %v948_v62, %v16577_v48  ;;  %v1421_v19 = vrot.slane %v1413_v31, %v16498_v50 }
 0x1ea   :  { %v702_v40 = vpop.permute.xlu1 %701  ;;  %14066 = vmatprep.mubr.msk.bf16.mxu0 %vm1953_vm10, %v1704_v38  ;;  %14076 = vmatprep.mubr.msk.bf16.mxu1 %vm1953_vm10, %v1704_v38  ;;  %v806_v34 = vpop.permute.xlu0 %805 }
 0x1eb   :  { %v1103_v22 = vrot.slane %v1095_v43, %v16498_v50  ;;  %v947_v0 = vsel %vm940_vm9, %v922_v55, %v806_v34  ;;  %2036 = vmatmul.mubr.bf16.gmra.mrb[4].mxu0 %v1703_v18  ;;  %2159 = vmatmul.mubr.bf16.gmra.mrb[4].mxu1 %v1703_v18  ;;  %v1110_v32 = vrot.slane %v1096_v53, %v16498_v50 }
 0x1ec   :  { %v1077_v20 = vcombine.low %v947_v0, %v806_v34  ;;  %v1078_v15 = vcombine.high %v947_v0, %v806_v34 }
 0x1ed   :  { %v1111_v35 = vcombine.high %v1103_v22, %v1103_v22  ;;  %v1112_v34 = vcombine.high %v1110_v32, %v1110_v32 }
 0x1ee   :  { %v1085_v33 = vrot.slane %v1077_v20, %v16498_v50  ;;  %v1092_v54 = vrot.slane %v1078_v15, %v16498_v50  ;;  %v814_v41 = vpop.permute.xlu1 %813  ;;  %v474_v39 = vpop.permute.xlu0 %473 }
 0x1ef   :  { %v875_v29 = vsel %vm865_vm6, %v16256_v42, %v474_v39  ;;  %v1432_v44 = vcombine.low %v1103_v22, %v1111_v35 }
 0x1f0   :  { %v1093_v25 = vcombine.high %v1085_v33, %v1085_v33  ;;  %v1094_v60 = vcombine.high %v1092_v54, %v1092_v54  ;;  %v900_v49 = vsel %vm890_vm7, %v875_v29, %v587_v30  ;;  %v1120_v30 = vrot.slane %v1113_v9, %v16498_v50 }
 0x1f1   :  { %v1446_v48 = vrot.slane %v1432_v44, %v16498_v50 }
 0x1f2   :  { %v1414_v24 = vcombine.low %v1085_v33, %v1093_v25  ;;  %v1431_v37 = vcombine.low %v1092_v54, %v1094_v60  ;;  %v593_v58 = vpop.permute.xlu1 %592  ;;  %v700_v52 = vpop.permute.xlu0 %699  ;;  %v1449_v33 = vcombine.low %v1110_v32, %v1112_v34 }
 0x1f3   :  { %v925_v14 = vsel %vm915_vm8, %v900_v49, %v700_v52 }
 0x1f4   :  { %v1428_v61 = vrot.slane %v1414_v24, %v16498_v50  ;;  %v1439_v42 = vrot.slane %v1431_v37, %v16498_v50  ;;  %v950_v51 = vsel %vm940_vm9, %v925_v14, %v812_v16  ;;  %v1457_v52 = vrot.slane %v1449_v33, %v16498_v50 }
 0x1f5   :  { %v1121_v26 = vcombine.low %v950_v51, %v812_v16  ;;  %v1122_v12 = vcombine.high %v950_v51, %v812_v16 }
 0x1f6   :  { %v706_v21 = vpop.permute.xlu1 %705  ;;  %v589_v62 = vpop.permute.xlu0 %588  ;;  %v1430_v38 = vcombine.high %v1421_v19, %v1428_v61  ;;  %v1448_v18 = vcombine.high %v1439_v42, %v1446_v48  ;;  %v1429_v43 = vcombine.low %v1421_v19, %v1428_v61  ;;  %v1447_v55 = vcombine.low %v1439_v42, %v1446_v48 }
 0x1f7   :  { %v1129_v63 = vrot.slane %v1121_v26, %v16498_v50  ;;  %v1136_v22 = vrot.slane %v1122_v12, %v16498_v50  ;;  %v901_v0 = vsel %vm890_vm7, %v876_v59, %v589_v62 }
 0x1f8   :  { %v926_v8 = vsel %vm915_vm8, %v901_v0, %v702_v40  ;;  %v1706_v3 = vpack.c.bf16 %v1448_v18, %v1430_v38  ;;  %v1705_v9 = vpack.c.bf16 %v1447_v55, %v1429_v43 }
 0x1f9   :  { %v1137_v36 = vcombine.high %v1129_v63, %v1129_v63  ;;  %v1450_v2 = vcombine.low %v1120_v30, %v1129_v63  ;;  %v951_v16 = vsel %vm940_vm9, %v926_v8, %v814_v41  ;;  %v1138_v54 = vcombine.high %v1136_v22, %v1136_v22 }
 0x1fa   :  { %v1139_v20 = vcombine.low %v951_v16, %v814_v41  ;;  %v1140_v15 = vcombine.high %v951_v16, %v814_v41  ;;  %v818_v46 = vpop.permute.xlu1 %817  ;;  %14067 = vmatprep.mubr.msk.bf16.mxu0 %vm1953_vm10, %v1706_v3  ;;  %14077 = vmatprep.mubr.msk.bf16.mxu1 %vm1953_vm10, %v1706_v3  ;;  %v480_v35 = vpop.permute.xlu0 %479 }
 0x1fb   :  { %v878_v39 = vsel %vm865_vm6, %v16043_v5, %v480_v35  ;;  %2046 = vmatmul.mubr.bf16.gmra.mrb[8].mxu0 %v1705_v9  ;;  %2169 = vmatmul.mubr.bf16.gmra.mrb[8].mxu1 %v1705_v9  ;;  %v1467_v40 = vcombine.low %v1137_v36, %v1136_v22  ;;  %v1464_v29 = vrot.slane %v1450_v2, %v16498_v50 }
 0x1fc   :  { %v1147_v31 = vrot.slane %v1139_v20, %v16498_v50  ;;  %v1154_v53 = vrot.slane %v1140_v15, %v16498_v50  ;;  %v903_v41 = vsel %vm890_vm7, %v878_v39, %v593_v58  ;;  %v1164_v58 = vrot.slane %v1157_v27, %v16498_v50 }
 0x1fd   :  { %v928_v44 = vsel %vm915_vm8, %v903_v41, %v706_v21  ;;  %v1475_v19 = vrot.slane %v1467_v40, %v16498_v50  ;;  %v1466_v51 = vcombine.high %v1457_v52, %v1464_v29  ;;  %v1465_v30 = vcombine.low %v1457_v52, %v1464_v29 }
 0x1fe   :  { %v1155_v25 = vcombine.high %v1147_v31, %v1147_v31  ;;  %v1156_v60 = vcombine.high %v1154_v53, %v1154_v53  ;;  %v1468_v24 = vcombine.low %v1138_v54, %v1147_v31  ;;  %v953_v37 = vsel %vm940_vm9, %v928_v44, %v818_v46  ;;  %v486_v49 = vpop.permute.xlu1 %485  ;;  %v482_v5 = vpop.permute.xlu0 %481 }
 0x1ff   :  { %v1165_v32 = vcombine.low %v953_v37, %v818_v46  ;;  %v1166_v14 = vcombine.high %v953_v37, %v818_v46  ;;  %v881_v46 = vsel %vm865_vm6, %v16073_v23, %v486_v49  ;;  %v879_v35 = vsel %vm865_vm6, %v16040_v4, %v482_v5 }
 0x200   :  { %v1482_v48 = vrot.slane %v1468_v24, %v16498_v50  ;;  %v1485_v59 = vcombine.low %v1155_v25, %v1154_v53  ;;  %v1486_v26 = vcombine.low %v1156_v60, %v1164_v58 }
 0x201   :  { %v1173_v61 = vrot.slane %v1165_v32, %v16498_v50  ;;  %v1180_v42 = vrot.slane %v1166_v14, %v16498_v50 }
 0x202   :  { %v599_v12 = vpop.permute.xlu1 %598  ;;  %v595_v21 = vpop.permute.xlu0 %594  ;;  %v1484_v62 = vcombine.high %v1475_v19, %v1482_v48  ;;  %v1483_v38 = vcombine.low %v1475_v19, %v1482_v48  ;;  %v1493_v22 = vrot.slane %v1485_v59, %v16498_v50  ;;  %v1500_v0 = vrot.slane %v1486_v26, %v16498_v50 }
 0x203   :  { %v1181_v18 = vcombine.high %v1173_v61, %v1173_v61  ;;  %v1182_v43 = vcombine.high %v1180_v42, %v1180_v42  ;;  %v906_v54 = vsel %vm890_vm7, %v881_v46, %v599_v12  ;;  %v904_v39 = vsel %vm890_vm7, %v879_v35, %v595_v21 }
 0x204   :  { %v1708_v7 = vpack.c.bf16 %v1484_v62, %v1466_v51  ;;  %v1707_v56 = vpack.c.bf16 %v1483_v38, %v1465_v30  ;;  %v1502_v2 = vcombine.high %v1493_v22, %v1500_v0  ;;  %v1501_v15 = vcombine.low %v1493_v22, %v1500_v0 }
 0x205   :  { %v1503_v27 = vcombine.low %v1173_v61, %v1181_v18  ;;  %v1504_v55 = vcombine.low %v1180_v42, %v1182_v43 }
 0x206   :  { %v708_v34 = vpop.permute.xlu1 %707  ;;  %14068 = vmatprep.mubr.msk.bf16.mxu0 %vm1953_vm10, %v1708_v7  ;;  %14078 = vmatprep.mubr.msk.bf16.mxu1 %vm1953_vm10, %v1708_v7  ;;  %v484_v63 = vpop.permute.xlu0 %483 }
 0x207   :  { %2056 = vmatmul.mubr.bf16.gmra.mrb[12].mxu0 %v1707_v56  ;;  %2179 = vmatmul.mubr.bf16.gmra.mrb[12].mxu1 %v1707_v56  ;;  %v1511_v8 = vrot.slane %v1503_v27, %v16498_v50  ;;  %v1518_v3 = vrot.slane %v1504_v55, %v16498_v50  ;;  %v929_v31 = vsel %vm915_vm8, %v904_v39, %v708_v34 }
 0x208   :  { %v880_v44 = vsel %vm865_vm6, %v16327_v11, %v484_v63 }
 0x209   :  { %v1520_v16 = vcombine.high %v1511_v8, %v1518_v3  ;;  %v1519_v20 = vcombine.low %v1511_v8, %v1518_v3 }
 0x20a   :  { %v597_v9 = vpop.permute.xlu1 %596  ;;  %v712_v36 = vpop.permute.xlu0 %711 }
 0x20b   :  { %v1710_v33 = vpack.c.bf16 %v1520_v16, %v1502_v2  ;;  %v1709_v40 = vpack.c.bf16 %v1519_v20, %v1501_v15  ;;  %v931_v53 = vsel %vm915_vm8, %v906_v54, %v712_v36  ;;  %v905_v37 = vsel %vm890_vm7, %v880_v44, %v597_v9 }
 0x20d   :  { %14069 = vmatprep.mubr.msk.bf16.mxu0 %vm1953_vm10, %v1710_v33  ;;  %14079 = vmatprep.mubr.msk.bf16.mxu1 %vm1953_vm10, %v1710_v33 }
 0x20e   :  { %v824_v41 = vpop.permute.xlu1 %823  ;;  %v820_v29 = vpop.permute.xlu0 %819 }
 0x20f   :  { %v956_v23 = vsel %vm940_vm9, %v931_v53, %v824_v41  ;;  %v954_v4 = vsel %vm940_vm9, %v929_v31, %v820_v29  ;;  %2066 = vmatmul.mubr.bf16.gmra.mrb[16].mxu0 %v1709_v40  ;;  %2189 = vmatmul.mubr.bf16.gmra.mrb[16].mxu1 %v1709_v40 }
 0x210   :  { %v1209_v25 = vcombine.low %v956_v23, %v824_v41  ;;  %v1183_v60 = vcombine.low %v954_v4, %v820_v29  ;;  %v1184_v24 = vcombine.high %v954_v4, %v820_v29  ;;  %v1210_v49 = vcombine.high %v956_v23, %v824_v41 }
 0x212   :  { %v1217_v5 = vrot.slane %v1209_v25, %v16498_v50  ;;  %v1191_v52 = vrot.slane %v1183_v60, %v16498_v50  ;;  %v1198_v32 = vrot.slane %v1184_v24, %v16498_v50  ;;  %v822_v14 = vpop.permute.xlu1 %821  ;;  %v710_v58 = vpop.permute.xlu0 %709  ;;  %v1224_v51 = vrot.slane %v1210_v49, %v16498_v50 }
 0x213   :  { %v930_v19 = vsel %vm915_vm8, %v905_v37, %v710_v58 }
 0x214   :  { %v1225_v48 = vcombine.high %v1217_v5, %v1217_v5  ;;  %v1199_v61 = vcombine.high %v1191_v52, %v1191_v52  ;;  %v1200_v42 = vcombine.high %v1198_v32, %v1198_v32  ;;  %v955_v11 = vsel %vm940_vm9, %v930_v19, %v822_v14 }
 0x215   :  { %v1201_v26 = vcombine.low %v955_v11, %v822_v14  ;;  %v1226_v14 = vcombine.high %v1224_v51, %v1224_v51 }
 0x216   :  { %v1521_v30 = vcombine.low %v1191_v52, %v1199_v61  ;;  %v1522_v59 = vcombine.low %v1198_v32, %v1200_v42  ;;  %v492_v12 = vpop.permute.xlu1 %491  ;;  %v488_v21 = vpop.permute.xlu0 %487  ;;  %v1540_v62 = vcombine.low %v1225_v48, %v1224_v51 }
 0x217   :  { %v1208_v38 = vrot.slane %v1201_v26, %v16498_v50  ;;  %v884_v15 = vsel %vm865_vm6, %v16110_v6, %v492_v12  ;;  %v882_v46 = vsel %vm865_vm6, %v16070_v13, %v488_v21 }
 0x218   :  { %v1529_v18 = vrot.slane %v1521_v30, %v16498_v50  ;;  %v1536_v43 = vrot.slane %v1522_v59, %v16498_v50  ;;  %v1554_v55 = vrot.slane %v1540_v62, %v16498_v50 }
 0x219   :  { %v1539_v7 = vcombine.low %v1208_v38, %v1217_v5 }
 0x21a   :  { %v605_v56 = vpop.permute.xlu1 %604  ;;  %v601_v27 = vpop.permute.xlu0 %600  ;;  %v1538_v0 = vcombine.high %v1529_v18, %v1536_v43  ;;  %v1537_v3 = vcombine.low %v1529_v18, %v1536_v43 }
 0x21b   :  { %v1547_v34 = vrot.slane %v1539_v7, %v16498_v50  ;;  %v909_v35 = vsel %vm890_vm7, %v884_v15, %v605_v56  ;;  %v907_v33 = vsel %vm890_vm7, %v882_v46, %v601_v27 }
 0x21d   :  { %v1556_v8 = vcombine.high %v1547_v34, %v1554_v55  ;;  %v1555_v9 = vcombine.low %v1547_v34, %v1554_v55 }
 0x21e   :  { %v714_v63 = vpop.permute.xlu1 %713  ;;  %v490_v22 = vpop.permute.xlu0 %489 }
 0x21f   :  { %v1712_v36 = vpack.c.bf16 %v1556_v8, %v1538_v0  ;;  %v1711_v2 = vpack.c.bf16 %v1555_v9, %v1537_v3  ;;  %v932_v54 = vsel %vm915_vm8, %v907_v33, %v714_v63  ;;  %v883_v13 = vsel %vm865_vm6, %v16379_v10, %v490_v22 }
 0x221   :  { %14070 = vmatprep.mubr.msk.bf16.mxu0 %vm1953_vm10, %v1712_v36  ;;  %14080 = vmatprep.mubr.msk.bf16.mxu1 %vm1953_vm10, %v1712_v36 }
 0x222   :  { %v603_v16 = vpop.permute.xlu1 %602  ;;  %v718_v20 = vpop.permute.xlu0 %717  ;;  %2076 = vmatmul.mubr.bf16.gmra.mrb[20].mxu0 %v1711_v2  ;;  %2199 = vmatmul.mubr.bf16.gmra.mrb[20].mxu1 %v1711_v2 }
 0x223   :  { %v934_v39 = vsel %vm915_vm8, %v909_v35, %v718_v20  ;;  %v908_v4 = vsel %vm890_vm7, %v883_v13, %v603_v16 }
 0x226   :  { %v830_v40 = vpop.permute.xlu1 %829  ;;  %v826_v31 = vpop.permute.xlu0 %825 }
 0x227   :  { %v959_v53 = vsel %vm940_vm9, %v934_v39, %v830_v40  ;;  %v957_v41 = vsel %vm940_vm9, %v932_v54, %v826_v31 }
 0x228   :  { %v1253_v29 = vcombine.low %v959_v53, %v830_v40  ;;  %v1227_v23 = vcombine.low %v957_v41, %v826_v31  ;;  %v1228_v6 = vcombine.high %v957_v41, %v826_v31  ;;  %v1254_v8 = vcombine.high %v959_v53, %v830_v40 }
 0x22a   :  { %v1261_v44 = vrot.slane %v1253_v29, %v16498_v50  ;;  %v1235_v25 = vrot.slane %v1227_v23, %v16498_v50  ;;  %v828_v60 = vpop.permute.xlu1 %827  ;;  %v716_v24 = vpop.permute.xlu0 %715  ;;  %v1242_v5 = vrot.slane %v1228_v6, %v16498_v50  ;;  %v1268_v20 = vrot.slane %v1254_v8, %v16498_v50 }
 0x22b   :  { %v933_v37 = vsel %vm915_vm8, %v908_v4, %v716_v24 }
 0x22c   :  { %v1269_v49 = vcombine.high %v1261_v44, %v1261_v44  ;;  %v1243_v52 = vcombine.high %v1235_v25, %v1235_v25  ;;  %v958_v32 = vsel %vm940_vm9, %v933_v37, %v828_v60  ;;  %v1244_v42 = vcombine.high %v1242_v5, %v1242_v5 }
 0x22d   :  { %v1245_v19 = vcombine.low %v958_v32, %v828_v60  ;;  %v1557_v11 = vcombine.low %v1226_v14, %v1235_v25  ;;  %v1270_v41 = vcombine.high %v1268_v20, %v1268_v20 }
 0x22e   :  { %v1558_v58 = vcombine.low %v1243_v52, %v1242_v5  ;;  %v607_v10 = vpop.permute.xlu1 %606  ;;  %v494_v48 = vpop.permute.xlu0 %493  ;;  %v1576_v61 = vcombine.low %v1261_v44, %v1269_v49 }
 0x22f   :  { %v1252_v30 = vrot.slane %v1245_v19, %v16498_v50  ;;  %v1565_v38 = vrot.slane %v1557_v11, %v16498_v50  ;;  %v885_v18 = vsel %vm865_vm6, %v16107_v1, %v494_v48  ;;  %v1593_v24 = vcombine.low %v1268_v20, %v1270_v41 }
 0x230   :  { %v1572_v59 = vrot.slane %v1558_v58, %v16498_v50  ;;  %v1590_v62 = vrot.slane %v1576_v61, %v16498_v50  ;;  %v910_v0 = vsel %vm890_vm7, %v885_v18, %v607_v10 }
 0x231   :  { %v1575_v26 = vcombine.low %v1244_v42, %v1252_v30  ;;  %v1601_v19 = vrot.slane %v1593_v24, %v16498_v50 }
 0x232   :  { %v498_v12 = vpop.permute.xlu1 %497  ;;  %v496_v21 = vpop.permute.xlu0 %495  ;;  %v1574_v56 = vcombine.high %v1565_v38, %v1572_v59  ;;  %v1573_v55 = vcombine.low %v1565_v38, %v1572_v59 }
 0x233   :  { %v1583_v51 = vrot.slane %v1575_v26, %v16498_v50  ;;  %v887_v54 = vsel %vm865_vm6, %v16133_v17, %v498_v12  ;;  %v886_v39 = vsel %vm865_vm6, %v16456_v45, %v496_v21 }
 0x235   :  { %v1592_v27 = vcombine.high %v1583_v51, %v1590_v62  ;;  %v1591_v34 = vcombine.low %v1583_v51, %v1590_v62 }
 0x236   :  { %v609_v43 = vpop.permute.xlu1 %608  ;;  %v720_v7 = vpop.permute.xlu0 %719 }
 0x237   :  { %v1714_v63 = vpack.c.bf16 %v1592_v27, %v1574_v56  ;;  %v1713_v22 = vpack.c.bf16 %v1591_v34, %v1573_v55  ;;  %v935_v3 = vsel %vm915_vm8, %v910_v0, %v720_v7  ;;  %v911_v31 = vsel %vm890_vm7, %v886_v39, %v609_v43 }
 0x239   :  { %14071 = vmatprep.mubr.msk.bf16.mxu0 %vm1953_vm10, %v1714_v63  ;;  %14081 = vmatprep.mubr.msk.bf16.mxu1 %vm1953_vm10, %v1714_v63 }
 0x23a   :  { %v832_v9 = vpop.permute.xlu1 %831  ;;  %v611_v36 = vpop.permute.xlu0 %610  ;;  %2086 = vmatmul.mubr.bf16.gmra.mrb[24].mxu0 %v1713_v22  ;;  %2209 = vmatmul.mubr.bf16.gmra.mrb[24].mxu1 %v1713_v22 }
 0x23b   :  { %v960_v1 = vsel %vm940_vm9, %v935_v3, %v832_v9  ;;  %v912_v53 = vsel %vm890_vm7, %v887_v54, %v611_v36 }
 0x23c   :  { %v1271_v2 = vcombine.low %v960_v1, %v832_v9  ;;  %v1272_v16 = vcombine.high %v960_v1, %v832_v9 }
 0x23e   :  { %v1279_v15 = vrot.slane %v1271_v2, %v16498_v50  ;;  %v724_v46 = vpop.permute.xlu1 %723  ;;  %v722_v35 = vpop.permute.xlu0 %721  ;;  %v1286_v33 = vrot.slane %v1272_v16, %v16498_v50 }
 0x23f   :  { %v937_v29 = vsel %vm915_vm8, %v912_v53, %v724_v46  ;;  %v936_v23 = vsel %vm915_vm8, %v911_v31, %v722_v35 }
 0x240   :  { %v1287_v40 = vcombine.high %v1279_v15, %v1279_v15  ;;  %v1288_v4 = vcombine.high %v1286_v33, %v1286_v33 }
 0x242   :  { %v836_v6 = vpop.permute.xlu1 %835  ;;  %v834_v13 = vpop.permute.xlu0 %833  ;;  %v1594_v25 = vcombine.low %v1279_v15, %v1287_v40  ;;  %v1611_v52 = vcombine.low %v1286_v33, %v1288_v4 }
 0x243   :  { %v962_v44 = vsel %vm940_vm9, %v937_v29, %v836_v6  ;;  %v961_v17 = vsel %vm940_vm9, %v936_v23, %v834_v13 }
 0x244   :  { %v1297_v60 = vcombine.low %v962_v44, %v836_v6  ;;  %v1289_v45 = vcombine.low %v961_v17, %v834_v13  ;;  %v1608_v14 = vrot.slane %v1594_v25, %v16498_v50  ;;  %v1619_v42 = vrot.slane %v1611_v52, %v16498_v50  ;;  %v1755_v25 = vld [vmem:[#allocation4] sm:$0xf] }
 0x245   :  { %v1298_v11 = vcombine.high %v962_v44, %v836_v6  ;;  %v21491_v44 = vsub.s32 0, %v16486_v28  ;;  %v21490_v17 = vsub.s32 2, %v16486_v28 }
 0x246   :  { %v1305_v37 = vrot.slane %v1297_v60, %v16498_v50  ;;  %v613_v49 = vpop.permute.xlu1 %612  ;;  %v500_v5 = vpop.permute.xlu0 %499  ;;  %v1296_v32 = vrot.slane %v1289_v45, %v16498_v50  ;;  %v1610_v59 = vcombine.high %v1601_v19, %v1608_v14  ;;  %v1609_v21 = vcombine.low %v1601_v19, %v1608_v14 }
 0x247   :  { %v888_v10 = vsel %vm865_vm6, %v16138_v57, %v500_v5  ;;  %v1312_v43 = vrot.slane %v1298_v11, %v16498_v50  ;;  %v21489_v60 = vsub.s32 1, %v16486_v28  ;;  %v21488_v45 = vsub.s32 3, %v16486_v28 }
 0x248   :  { %v1612_v58 = vcombine.low %v1296_v32, %v1305_v37  ;;  %v913_v26 = vsel %vm890_vm7, %v888_v10, %v613_v49  ;;  %v1313_v3 = vcombine.high %v1305_v37, %v1305_v37  ;;  %v16777_v24 = vrot.slane %v1755_v25, %v21491_v44 }
 0x249   :  { %v1314_v9 = vcombine.high %v1312_v43, %v1312_v43  ;;  %v16781_v37 = vrot.slane %v1755_v25, %v21490_v17  ;;  %v16785_v49 = vrot.slane %v1755_v25, %v21489_v60  ;;  %v16789_v5 = vrot.slane %v1755_v25, %v21488_v45 }
 0x24a   :  { %v726_v48 = vpop.permute.xlu1 %725  ;;  %v502_v61 = vpop.permute.xlu0 %501  ;;  %v1626_v30 = vrot.slane %v1612_v58, %v16498_v50  ;;  %v1629_v15 = vcombine.low %v1313_v3, %v1312_v43 }
 0x24b   :  { %v938_v38 = vsel %vm915_vm8, %v913_v26, %v726_v48  ;;  %v889_v34 = vsel %vm865_vm6, %v16529_v47, %v502_v61 }
 0x24c   :  { %v1628_v12 = vcombine.high %v1619_v42, %v1626_v30  ;;  %v1627_v62 = vcombine.low %v1619_v42, %v1626_v30  ;;  %v1637_v40 = vrot.slane %v1629_v15, %v16498_v50 }
 0x24e   :  { %v838_v51 = vpop.permute.xlu1 %837  ;;  %v615_v18 = vpop.permute.xlu0 %614  ;;  %v1716_v7 = vpack.c.bf16 %v1628_v12, %v1610_v59  ;;  %v1715_v56 = vpack.c.bf16 %v1627_v62, %v1609_v21 }
 0x24f   :  { %v963_v57 = vsel %vm940_vm9, %v938_v38, %v838_v51  ;;  %v914_v22 = vsel %vm890_vm7, %v889_v34, %v615_v18 }
 0x250   :  { %v1315_v27 = vcombine.low %v963_v57, %v838_v51  ;;  %v1316_v55 = vcombine.high %v963_v57, %v838_v51  ;;  %14072 = vmatprep.mubr.msk.bf16.mxu0 %vm1953_vm10, %v1716_v7  ;;  %14082 = vmatprep.mubr.msk.bf16.mxu1 %vm1953_vm10, %v1716_v7 }
 0x251   :  { %2096 = vmatmul.mubr.bf16.gmra.mrb[28].mxu0 %v1715_v56  ;;  %2219 = vmatmul.mubr.bf16.gmra.mrb[28].mxu1 %v1715_v56 }
 0x252   :  { %v1323_v63 = vrot.slane %v1315_v27, %v16498_v50  ;;  %v840_v0 = vpop.permute.xlu1 %839  ;;  %v728_v8 = vpop.permute.xlu0 %727  ;;  %v1330_v36 = vrot.slane %v1316_v55, %v16498_v50 }
 0x253   :  { %v939_v1 = vsel %vm915_vm8, %v914_v22, %v728_v8 }
 0x254   :  { %v1331_v2 = vcombine.high %v1323_v63, %v1323_v63  ;;  %v964_v47 = vsel %vm940_vm9, %v939_v1, %v840_v0  ;;  %v1630_v16 = vcombine.low %v1314_v9, %v1323_v63  ;;  %v1332_v46 = vcombine.high %v1330_v36, %v1330_v36 }
 0x255   :  { %v1333_v20 = vcombine.low %v964_v47, %v840_v0 }
 0x256   :  { %v1647_v35 = vcombine.low %v1331_v2, %v1330_v36  ;;  %v1644_v54 = vrot.slane %v1630_v16, %v16498_v50 }
 0x257   :  { %v1340_v33 = vrot.slane %v1333_v20, %v16498_v50 }
 0x258   :  { %v1655_v31 = vrot.slane %v1647_v35, %v16498_v50  ;;  %v1646_v41 = vcombine.high %v1637_v40, %v1644_v54  ;;  %v1645_v23 = vcombine.low %v1637_v40, %v1644_v54 }
 0x259   :  { %v1648_v39 = vcombine.low %v1332_v46, %v1340_v33 }
 0x25b   :  { %v1662_v53 = vrot.slane %v1648_v39, %v16498_v50 }
 0x25d   :  { %v1664_v29 = vcombine.high %v1655_v31, %v1662_v53  ;;  %v1663_v6 = vcombine.low %v1655_v31, %v1662_v53 }
 0x25f   :  { %v1718_v13 = vpack.c.bf16 %v1664_v29, %v1646_v41  ;;  %v1717_v4 = vpack.c.bf16 %v1663_v6, %v1645_v23 }
 0x261   :  { %14073 = vmatprep.mubr.msk.bf16.mxu0 %vm1953_vm10, %v1718_v13  ;;  %14083 = vmatprep.mubr.msk.bf16.mxu1 %vm1953_vm10, %v1718_v13 }
 0x262   :  { %2106 = vmatmul.mubr.bf16.gmra.mrb[32].mxu0 %v1717_v4  ;;  %2229 = vmatmul.mubr.bf16.gmra.mrb[32].mxu1 %v1717_v4 }
 0x2ae   :  { %v2027_v52 = vpop.f32.mrb[0].mxu0  ;;  %v2150_v32 = vpop.f32.mrb[0].mxu1 }
 0x2af   :  { %v2028_v14 = vadd.f32 %v2027_v52, %v16777_v24  ;;  %v2151_v58 = vadd.f32 %v2150_v32, %v16781_v37  ;;  %v2029_v19 = vpop.f32.mrb[1].mxu0  ;;  %v2152_v10 = vpop.f32.mrb[1].mxu1 }
 0x2b0   :  { %v2030_v48 = vadd.f32 %v2029_v19, %v16785_v49  ;;  %v2153_v61 = vadd.f32 %v2152_v10, %v16789_v5  ;;  %v2031_v42 = vpop.f32.mrb[2].mxu0  ;;  %v2154_v11 = vpop.f32.mrb[2].mxu1 }
 0x2b1   :  { %v2239_v30 = vmax.f32 %v2028_v14, 0.0  ;;  %v2241_v59 = vmax.f32 %v2151_v58, 0.0  ;;  %v2032_v26 = vadd.f32 %v2031_v42, %v16777_v24  ;;  %v2155_v12 = vadd.f32 %v2154_v11, %v16781_v37  ;;  %v2033_v21 = vpop.f32.mrb[3].mxu0  ;;  %v2156_v62 = vpop.f32.mrb[3].mxu1 }
 0x2b2   :  { %v2240_v38 = vmax.f32 %v2030_v48, 0.0  ;;  %v2242_v51 = vmax.f32 %v2153_v61, 0.0  ;;  %v2034_v18 = vadd.f32 %v2033_v21, %v16785_v49  ;;  %v2157_v43 = vadd.f32 %v2156_v62, %v16789_v5 }
 0x2b3   :  { %v2243_v57 = vmax.f32 %v2032_v26, 0.0  ;;  %v2245_v7 = vmax.f32 %v2155_v12, 0.0 }
 0x2b4   :  { %v2383_v56 = vcombine.low %v2239_v30, %v2240_v38  ;;  %v2384_v27 = vcombine.high %v2239_v30, %v2240_v38  ;;  %v2385_v55 = vcombine.low %v2241_v59, %v2242_v51  ;;  %v2386_v34 = vcombine.high %v2241_v59, %v2242_v51 }
 0x2b5   :  { %v2244_v63 = vmax.f32 %v2034_v18, 0.0  ;;  %v2246_v22 = vmax.f32 %v2157_v43, 0.0 }
 0x2b6   :  { %v2393_v0 = vrot.slane %v2383_v56, %v16498_v50  ;;  %v2400_v8 = vrot.slane %v2384_v27, %v16498_v50  ;;  %v2407_v3 = vrot.slane %v2385_v55, %v16498_v50  ;;  %v2414_v9 = vrot.slane %v2386_v34, %v16498_v50 }
 0x2b7   :  { %v16803_v36 = vcombine.low %v2243_v57, %v2244_v63  ;;  %v16805_v1 = vcombine.high %v2243_v57, %v2244_v63  ;;  %v16807_v2 = vcombine.low %v2245_v7, %v2246_v22  ;;  %v16809_v47 = vcombine.high %v2245_v7, %v2246_v22 }
 0x2b8   :  { %v2415_v16 = vcombine.low %v2393_v0, %v2407_v3  ;;  %v2416_v20 = vcombine.high %v2393_v0, %v2407_v3  ;;  %v2417_v15 = vcombine.low %v2400_v8, %v2414_v9  ;;  %v2418_v46 = vcombine.high %v2400_v8, %v2414_v9 }
 0x2b9   :  { %v14084_v35 = vcombine.low %v2407_v3, %v2407_v3  ;;  %v14085_v33 = vcombine.high %v2407_v3, %v2407_v3  ;;  %v14086_v54 = vcombine.low %v2414_v9, %v2414_v9  ;;  %v14087_v39 = vcombine.high %v2414_v9, %v2414_v9 }
 0x2ba   :  { %v3038_v40 = vrot.slane %v2415_v16, %v16498_v50  ;;  %v3055_v31 = vrot.slane %v2416_v20, %v16498_v50  ;;  %v16814_v53 = vrot.slane %v2417_v15, %v16498_v50  ;;  %v16817_v41 = vrot.slane %v2418_v46, %v16498_v50 }
 0x2bb   :  { %v3045_v29 = vrot.slane %v14084_v35, %v16498_v50  ;;  %v3062_v23 = vrot.slane %v14085_v33, %v16498_v50  ;;  %v16822_v6 = vrot.slane %v14086_v54, %v16498_v50  ;;  %v16825_v13 = vrot.slane %v14087_v39, %v16498_v50 }
 0x2bc   :  { %v3046_v4 = vcombine.high %v3038_v40, %v3038_v40  ;;  %v3063_v25 = vcombine.high %v3055_v31, %v3055_v31  ;;  %v3080_v52 = vcombine.high %v16814_v53, %v16814_v53  ;;  %v3097_v32 = vcombine.high %v16817_v41, %v16817_v41 }
 0x2bd   :  { %v3047_v14 = vcombine.high %v3045_v29, %v3045_v29  ;;  %v3064_v58 = vcombine.high %v3062_v23, %v3062_v23  ;;  %v3081_v19 = vcombine.high %v16822_v6, %v16822_v6  ;;  %v3098_v10 = vcombine.high %v16825_v13, %v16825_v13 }
 0x2be   :  { %v4543_v48 = vsel %vm211_vm0, %v3038_v40, -inf  ;;  %v4550_v61 = vsel %vm211_vm0, %v3046_v4, -inf  ;;  %v4557_v42 = vsel %vm211_vm0, %v3045_v29, -inf  ;;  %v4571_v11 = vsel %vm211_vm0, %v3055_v31, -inf  ;;  %v16839_v30 = vpop.f32.mrb[4].mxu0  ;;  %v16841_v59 = vpop.f32.mrb[4].mxu1 }
 0x2bf   :  { %v4544_v26 = vrot.slane %v4543_v48, 4  ;;  %v4551_v12 = vrot.slane %v4550_v61, 4  ;;  %v4558_v21 = vrot.slane %v4557_v42, 4  ;;  %v4564_v62 = vsel %vm211_vm0, %v3047_v14, -inf  ;;  %v16844_v38 = vpop.f32.mrb[5].mxu0  ;;  %v16846_v51 = vpop.f32.mrb[5].mxu1 }
 0x2c0   :  { %v4565_v18 = vrot.slane %v4564_v62, 4  ;;  %v4572_v43 = vrot.slane %v4571_v11, 4  ;;  %v4578_v57 = vsel %vm211_vm0, %v3063_v25, -inf  ;;  %v4585_v7 = vsel %vm211_vm0, %v3062_v23, -inf  ;;  %v16850_v56 = vpop.f32.mrb[6].mxu0  ;;  %v16852_v27 = vpop.f32.mrb[6].mxu1 }
 0x2c1   :  { %v4545_v55 = vmax.f32 %v4543_v48, %v4544_v26  ;;  %v4552_v34 = vmax.f32 %v4550_v61, %v4551_v12  ;;  %v4559_v63 = vmax.f32 %v4557_v42, %v4558_v21  ;;  %v4579_v22 = vrot.slane %v4578_v57, 4  ;;  %v16854_v0 = vpop.f32.mrb[7].mxu0  ;;  %v16856_v8 = vpop.f32.mrb[7].mxu1 }
 0x2c2   :  { %v4566_v3 = vmax.f32 %v4564_v62, %v4565_v18  ;;  %v4573_v9 = vmax.f32 %v4571_v11, %v4572_v43  ;;  %v4586_v16 = vrot.slane %v4585_v7, 4  ;;  %v4592_v20 = vsel %vm211_vm0, %v3064_v58, -inf }
 0x2c3   :  { %v4546_v15 = vrot.slane %v4545_v55, 2  ;;  %v4553_v46 = vrot.slane %v4552_v34, 2  ;;  %v4560_v35 = vrot.slane %v4559_v63, 2  ;;  %v4580_v33 = vmax.f32 %v4578_v57, %v4579_v22 }
 0x2c4   :  { %v4567_v54 = vrot.slane %v4566_v3, 2  ;;  %v4574_v39 = vrot.slane %v4573_v9, 2  ;;  %v4587_v40 = vmax.f32 %v4585_v7, %v4586_v16  ;;  %v4593_v31 = vrot.slane %v4592_v20, 4 }
 0x2c5   :  { %v4547_v29 = vmax.f32 %v4545_v55, %v4546_v15  ;;  %v4554_v23 = vmax.f32 %v4552_v34, %v4553_v46  ;;  %v4561_v4 = vmax.f32 %v4559_v63, %v4560_v35  ;;  %v4581_v25 = vrot.slane %v4580_v33, 2 }
 0x2c6   :  { %v4568_v14 = vmax.f32 %v4566_v3, %v4567_v54  ;;  %v4575_v48 = vmax.f32 %v4573_v9, %v4574_v39  ;;  %v4588_v61 = vrot.slane %v4587_v40, 2  ;;  %v4594_v42 = vmax.f32 %v4592_v20, %v4593_v31 }
 0x2c7   :  { %v4548_v11 = vrot.slane %v4547_v29, 1  ;;  %v4555_v26 = vrot.slane %v4554_v23, 1  ;;  %v4562_v12 = vrot.slane %v4561_v4, 1  ;;  %v4582_v58 = vmax.f32 %v4580_v33, %v4581_v25 }
 0x2c8   :  { %v4569_v21 = vrot.slane %v4568_v14, 1  ;;  %v4576_v62 = vrot.slane %v4575_v48, 1  ;;  %v4589_v18 = vmax.f32 %v4587_v40, %v4588_v61  ;;  %v4595_v43 = vrot.slane %v4594_v42, 2 }
 0x2c9   :  { %v16859_v57 = vmax.f32 %v4547_v29, %v4548_v11  ;;  %v16861_v7 = vmax.f32 %v4554_v23, %v4555_v26  ;;  %v16863_v55 = vmax.f32 %v4561_v4, %v4562_v12  ;;  %v4583_v34 = vrot.slane %v4582_v58, 1 }
 0x2ca   :  { %v16865_v63 = vmax.f32 %v4568_v14, %v4569_v21  ;;  %v16867_v22 = vmax.f32 %v4575_v48, %v4576_v62  ;;  %v4590_v3 = vrot.slane %v4589_v18, 1  ;;  %v4596_v9 = vmax.f32 %v4594_v42, %v4595_v43 }
 0x2cb   :  { %21758 = vst [vmem:[#allocation23_spill] sm:$0xff] %v16861_v7  ;;  %v16869_v16 = vmax.f32 %v4582_v58, %v4583_v34  ;;  %v4599_v20 = vsel %vm211_vm0, %v16814_v53, -inf  ;;  %v4606_v15 = vsel %vm211_vm0, %v3080_v52, -inf  ;;  %v4613_v46 = vsel %vm211_vm0, %v16822_v6, -inf }
 0x2cc   :  { %21759 = vst [vmem:[#allocation24_spill] sm:$0xff] %v16865_v63  ;;  %v4591_v35 = vmax.f32 %v4589_v18, %v4590_v3  ;;  %v4597_v33 = vrot.slane %v4596_v9, 1  ;;  %v4600_v54 = vrot.slane %v4599_v20, 4  ;;  %v4607_v39 = vrot.slane %v4606_v15, 4 }
 0x2cd   :  { %v4614_v40 = vrot.slane %v4613_v46, 4  ;;  %v4620_v31 = vsel %vm211_vm0, %v3081_v19, -inf  ;;  %v4627_v29 = vsel %vm211_vm0, %v16817_v41, -inf  ;;  %v4634_v53 = vsel %vm211_vm0, %v3097_v32, -inf }
 0x2ce   :  { %v4598_v52 = vmax.f32 %v4596_v9, %v4597_v33  ;;  %v4601_v23 = vmax.f32 %v4599_v20, %v4600_v54  ;;  %v4608_v4 = vmax.f32 %v4606_v15, %v4607_v39  ;;  %v4621_v25 = vrot.slane %v4620_v31, 4  ;;  %v16889_v14 = vpop.f32.mrb[8].mxu0  ;;  %v16891_v48 = vpop.f32.mrb[8].mxu1 }
 0x2cf   :  { %v4615_v61 = vmax.f32 %v4613_v46, %v4614_v40  ;;  %v4628_v6 = vrot.slane %v4627_v29, 4  ;;  %v4635_v42 = vrot.slane %v4634_v53, 4  ;;  %v4641_v19 = vsel %vm211_vm0, %v16825_v13, -inf  ;;  %v16899_v18 = vpop.f32.mrb[9].mxu0  ;;  %v16901_v20 = vpop.f32.mrb[9].mxu1 }
 0x2d0   :  { %v4602_v11 = vrot.slane %v4601_v23, 2  ;;  %v4609_v26 = vrot.slane %v4608_v4, 2  ;;  %v4622_v12 = vmax.f32 %v4620_v31, %v4621_v25  ;;  %v4642_v41 = vrot.slane %v4641_v19, 4 }
 0x2d1   :  { %v4616_v32 = vrot.slane %v4615_v61, 2  ;;  %v4629_v58 = vmax.f32 %v4627_v29, %v4628_v6  ;;  %v4636_v21 = vmax.f32 %v4634_v53, %v4635_v42  ;;  %v4648_v62 = vsel %vm211_vm0, %v3098_v10, -inf }
 0x2d2   :  { %v4603_v43 = vmax.f32 %v4601_v23, %v4602_v11  ;;  %v4610_v34 = vmax.f32 %v4608_v4, %v4609_v26  ;;  %v4623_v3 = vrot.slane %v4622_v12, 2  ;;  %v4643_v9 = vmax.f32 %v4641_v19, %v4642_v41 }
 0x2d3   :  { %v4617_v15 = vmax.f32 %v4615_v61, %v4616_v32  ;;  %v4630_v46 = vrot.slane %v4629_v58, 2  ;;  %v4637_v33 = vrot.slane %v4636_v21, 2  ;;  %v4649_v54 = vrot.slane %v4648_v62, 4 }
 0x2d4   :  { %v4604_v39 = vrot.slane %v4603_v43, 1  ;;  %v4611_v40 = vrot.slane %v4610_v34, 1  ;;  %v4624_v31 = vmax.f32 %v4622_v12, %v4623_v3  ;;  %v4644_v29 = vrot.slane %v4643_v9, 2 }
 0x2d5   :  { %v4618_v53 = vrot.slane %v4617_v15, 1  ;;  %v4631_v13 = vmax.f32 %v4629_v58, %v4630_v46  ;;  %v4638_v25 = vmax.f32 %v4636_v21, %v4637_v33  ;;  %v4650_v10 = vmax.f32 %v4648_v62, %v4649_v54 }
 0x2d6   :  { %v4605_v6 = vmax.f32 %v4603_v43, %v4604_v39  ;;  %v4612_v42 = vmax.f32 %v4610_v34, %v4611_v40  ;;  %v4625_v23 = vrot.slane %v4624_v31, 1  ;;  %v4645_v4 = vmax.f32 %v4643_v9, %v4644_v29 }
 0x2d7   :  { %v4619_v11 = vmax.f32 %v4617_v15, %v4618_v53  ;;  %v4632_v19 = vrot.slane %v4631_v13, 1  ;;  %v4639_v26 = vrot.slane %v4638_v25, 1  ;;  %v4651_v41 = vrot.slane %v4650_v10, 2 }
 0x2d8   :  { %v4626_v61 = vmax.f32 %v4624_v31, %v4625_v23  ;;  %v4646_v32 = vrot.slane %v4645_v4, 1  ;;  %v6559_v45 = vmax.f32 %v16859_v57, %v16863_v55  ;;  %v16908_v62 = vmax.f32 %v16867_v22, %v4591_v35 }
 0x2d9   :  { %v4633_v3 = vmax.f32 %v4631_v13, %v4632_v19  ;;  %v4640_v58 = vmax.f32 %v4638_v25, %v4639_v26  ;;  %v4652_v21 = vmax.f32 %v4650_v10, %v4651_v41  ;;  %v16911_v34 = vmax.f32 %v16869_v16, %v4598_v52 }
 0x2da   :  { %v4647_v43 = vmax.f32 %v4645_v4, %v4646_v32  ;;  %v16913_v9 = vmax.f32 %v4605_v6, %v4619_v11  ;;  %v16915_v15 = vmax.f32 %v4612_v42, %v4626_v61  ;;  %v16919_v57 = vsel %vm6783_vm11, %v16908_v62, %v6559_v45 }
 0x2db   :  { %21760 = vst [vmem:[#allocation25_spill] sm:$0xff] %v16911_v34  ;;  %v4653_v46 = vrot.slane %v4652_v21, 1  ;;  %21763 = vst [vmem:[#allocation28_spill] sm:$0xff] %v16919_v57  ;;  %v2429_v55 = vrot.slane %v16803_v36, %v16498_v50  ;;  %v2436_v22 = vrot.slane %v16805_v1, %v16498_v50  ;;  %v2443_v16 = vrot.slane %v16807_v2, %v16498_v50 }
 0x2dc   :  { %21761 = vst [vmem:[#allocation26_spill] sm:$0xff] %v16913_v9  ;;  %21762 = vst [vmem:[#allocation27_spill] sm:$0xff] %v16915_v15  ;;  %v16925_v35 = vmax.f32 %v4633_v3, %v4647_v43  ;;  %v2450_v52 = vrot.slane %v16809_v47, %v16498_v50  ;;  %v16933_v54 = vadd.f32 %v16839_v30, %v16777_v24 }
 0x2dd   :  { %v4654_v33 = vmax.f32 %v4652_v21, %v4653_v46  ;;  %v16937_v45 = vadd.f32 %v16841_v59, %v16781_v37  ;;  %v2451_v36 = vcombine.low %v2429_v55, %v2443_v16  ;;  %v2452_v39 = vcombine.high %v2429_v55, %v2443_v16 }
 0x2de   :  { %21764 = vst [vmem:[#allocation29_spill] sm:$0xff] %v16925_v35  ;;  %v2453_v1 = vcombine.low %v2436_v22, %v2450_v52  ;;  %v16941_v40 = vadd.f32 %v16844_v38, %v16785_v49  ;;  %v2454_v31 = vcombine.high %v2436_v22, %v2450_v52  ;;  %v14088_v47 = vcombine.low %v2443_v16, %v2443_v16 }
 0x2df   :  { %v16943_v2 = vmax.f32 %v4640_v58, %v4654_v33  ;;  %v14089_v29 = vcombine.high %v2443_v16, %v2443_v16  ;;  %v3106_v53 = vrot.slane %v2451_v36, %v16498_v50  ;;  %v3123_v30 = vrot.slane %v2452_v39, %v16498_v50 }
 0x2e0   :  { %v14090_v13 = vcombine.low %v2450_v52, %v2450_v52  ;;  %v16948_v59 = vrot.slane %v2453_v1, %v16498_v50  ;;  %v3113_v25 = vrot.slane %v14088_v47, %v16498_v50  ;;  %v14091_v6 = vcombine.high %v2450_v52, %v2450_v52 }
 0x2e1   :  { %21765 = vst [vmem:[#allocation30_spill] sm:$0xff] %v16943_v2  ;;  %v3130_v10 = vrot.slane %v14089_v29, %v16498_v50  ;;  %v16953_v38 = vrot.slane %v2454_v31, %v16498_v50  ;;  %v3114_v42 = vcombine.high %v3106_v53, %v3106_v53  ;;  %v3131_v23 = vcombine.high %v3123_v30, %v3123_v30 }
 0x2e2   :  { %v16956_v4 = vrot.slane %v14090_v13, %v16498_v50  ;;  %v3148_v11 = vcombine.high %v16948_v59, %v16948_v59  ;;  %v3115_v19 = vcombine.high %v3113_v25, %v3113_v25  ;;  %v16961_v41 = vrot.slane %v14091_v6, %v16498_v50  ;;  %v16977_v6 = vpop.f32.mrb[10].mxu0 }
 0x2e3   :  { %v3132_v26 = vcombine.high %v3130_v10, %v3130_v10  ;;  %v4655_v3 = vsel %vm211_vm0, %v3106_v53, -inf  ;;  %v4662_v58 = vsel %vm211_vm0, %v3114_v42, -inf  ;;  %v4669_v21 = vsel %vm211_vm0, %v3113_v25, -inf  ;;  %v16979_v42 = vpop.f32.mrb[10].mxu1 }
 0x2e4   :  { %v4656_v46 = vrot.slane %v4655_v3, 4  ;;  %v4663_v55 = vrot.slane %v4662_v58, 4  ;;  %v4670_v22 = vrot.slane %v4669_v21, 4  ;;  %v4676_v16 = vsel %vm211_vm0, %v3115_v19, -inf }
 0x2e5   :  { %v4683_v52 = vsel %vm211_vm0, %v3123_v30, -inf  ;;  %v4690_v33 = vsel %vm211_vm0, %v3131_v23, -inf  ;;  %v4697_v36 = vsel %vm211_vm0, %v3130_v10, -inf  ;;  %v4677_v47 = vrot.slane %v4676_v16, 4  ;;  %v16981_v23 = vpop.f32.mrb[11].mxu0 }
 0x2e6   :  { %v4657_v39 = vmax.f32 %v4655_v3, %v4656_v46  ;;  %v4664_v1 = vmax.f32 %v4662_v58, %v4663_v55  ;;  %v4671_v31 = vmax.f32 %v4669_v21, %v4670_v22  ;;  %v4684_v29 = vrot.slane %v4683_v52, 4  ;;  %21766 = vst [vmem:[#allocation31_spill] sm:$0xff] %v16981_v23 }
 0x2e7   :  { %v4691_v53 = vrot.slane %v4690_v33, 4  ;;  %v4698_v13 = vrot.slane %v4697_v36, 4  ;;  %v4704_v25 = vsel %vm211_vm0, %v3132_v26, -inf  ;;  %v4678_v17 = vmax.f32 %v4676_v16, %v4677_v47 }
 0x2e8   :  { %v4658_v19 = vrot.slane %v4657_v39, 2  ;;  %v4665_v60 = vrot.slane %v4664_v1, 2  ;;  %v4672_v30 = vrot.slane %v4671_v31, 2  ;;  %v4685_v10 = vmax.f32 %v4683_v52, %v4684_v29 }
 0x2e9   :  { %v4692_v3 = vmax.f32 %v4690_v33, %v4691_v53  ;;  %v4699_v58 = vmax.f32 %v4697_v36, %v4698_v13  ;;  %v4705_v21 = vrot.slane %v4704_v25, 4  ;;  %v4679_v44 = vrot.slane %v4678_v17, 2 }
 0x2ea   :  { %v4659_v46 = vmax.f32 %v4657_v39, %v4658_v19  ;;  %v4666_v55 = vmax.f32 %v4664_v1, %v4665_v60  ;;  %v4673_v22 = vmax.f32 %v4671_v31, %v4672_v30  ;;  %v4686_v12 = vrot.slane %v4685_v10, 2 }
 0x2eb   :  { %v4693_v26 = vrot.slane %v4692_v3, 2  ;;  %v4700_v43 = vrot.slane %v4699_v58, 2  ;;  %v4706_v61 = vmax.f32 %v4704_v25, %v4705_v21  ;;  %v4680_v15 = vmax.f32 %v4678_v17, %v4679_v44 }
 0x2ec   :  { %v4660_v32 = vrot.slane %v4659_v46, 1  ;;  %v4667_v28 = vrot.slane %v4666_v55, 1  ;;  %v4674_v2 = vrot.slane %v4673_v22, 1  ;;  %v4687_v34 = vmax.f32 %v4685_v10, %v4686_v12 }
 0x2ed   :  { %v4694_v16 = vmax.f32 %v4692_v3, %v4693_v26  ;;  %v4701_v47 = vmax.f32 %v4699_v58, %v4700_v43  ;;  %v4707_v63 = vrot.slane %v4706_v61, 2  ;;  %v4681_v60 = vrot.slane %v4680_v15, 1 }
 0x2ee   :  { %v16983_v52 = vmax.f32 %v4659_v46, %v4660_v32  ;;  %v16985_v33 = vmax.f32 %v4666_v55, %v4667_v28  ;;  %v16987_v36 = vmax.f32 %v4673_v22, %v4674_v2  ;;  %v4688_v39 = vrot.slane %v4687_v34, 1 }
 0x2ef   :  { %v4695_v1 = vrot.slane %v4694_v16, 1  ;;  %v4702_v31 = vrot.slane %v4701_v47, 1  ;;  %v4708_v29 = vmax.f32 %v4706_v61, %v4707_v63  ;;  %v4682_v53 = vmax.f32 %v4680_v15, %v4681_v60 }
 0x2f0   :  { %v4711_v13 = vsel %vm211_vm0, %v16948_v59, -inf  ;;  %v4718_v44 = vsel %vm211_vm0, %v3148_v11, -inf  ;;  %v4725_v17 = vsel %vm211_vm0, %v16956_v4, -inf  ;;  %v4689_v12 = vmax.f32 %v4687_v34, %v4688_v39 }
 0x2f1   :  { %v4696_v32 = vmax.f32 %v4694_v16, %v4695_v1  ;;  %v4703_v28 = vmax.f32 %v4701_v47, %v4702_v31  ;;  %v4709_v43 = vrot.slane %v4708_v29, 1  ;;  %v4712_v2 = vrot.slane %v4711_v13, 4 }
 0x2f2   :  { %v4719_v25 = vrot.slane %v4718_v44, 4  ;;  %v4726_v19 = vrot.slane %v4725_v17, 4  ;;  %v21767_v30 = vcombine.high %v16956_v4, %v16956_v4  ;;  %v4739_v59 = vsel %vm211_vm0, %v16953_v38, -inf }
 0x2f3   :  { %v4710_v15 = vmax.f32 %v4708_v29, %v4709_v43  ;;  %v21768_v11 = vcombine.high %v16953_v38, %v16953_v38  ;;  %v4713_v10 = vmax.f32 %v4711_v13, %v4712_v2  ;;  %v4740_v21 = vrot.slane %v4739_v59, 4  ;;  %v17010_v13 = vpop.f32.mrb[11].mxu1 }
 0x2f4   :  { %v4732_v63 = vsel %vm211_vm0, %v21767_v30, -inf  ;;  %v4720_v3 = vmax.f32 %v4718_v44, %v4719_v25  ;;  %v4727_v58 = vmax.f32 %v4725_v17, %v4726_v19  ;;  %v4753_v4 = vsel %vm211_vm0, %v16961_v41, -inf  ;;  %21770 = vst [vmem:[#allocation32_spill] sm:$0xff] %v17010_v13 }
 0x2f5   :  { %v4733_v61 = vrot.slane %v4732_v63, 4  ;;  %v4746_v34 = vsel %vm211_vm0, %v21768_v11, -inf  ;;  %v21769_v22 = vcombine.high %v16961_v41, %v16961_v41  ;;  %v4714_v16 = vrot.slane %v4713_v10, 2 }
 0x2f6   :  { %v4747_v55 = vrot.slane %v4746_v34, 4  ;;  %v4721_v47 = vrot.slane %v4720_v3, 2  ;;  %v4728_v60 = vrot.slane %v4727_v58, 2  ;;  %v4741_v38 = vmax.f32 %v4739_v59, %v4740_v21 }
 0x2f7   :  { %v4734_v46 = vmax.f32 %v4732_v63, %v4733_v61  ;;  %v4760_v26 = vsel %vm211_vm0, %v21769_v22, -inf  ;;  %v4754_v31 = vrot.slane %v4753_v4, 4  ;;  %v4715_v44 = vmax.f32 %v4713_v10, %v4714_v16 }
 0x2f8   :  { %v4748_v1 = vmax.f32 %v4746_v34, %v4747_v55  ;;  %v4761_v29 = vrot.slane %v4760_v26, 4  ;;  %v4722_v17 = vmax.f32 %v4720_v3, %v4721_v47  ;;  %v4729_v43 = vmax.f32 %v4727_v58, %v4728_v60 }
 0x2f9   :  { %v4735_v39 = vrot.slane %v4734_v46, 2  ;;  %v4742_v2 = vrot.slane %v4741_v38, 2  ;;  %v4755_v30 = vmax.f32 %v4753_v4, %v4754_v31  ;;  %v4716_v63 = vrot.slane %v4715_v44, 1 }
 0x2fa   :  { %v4749_v19 = vrot.slane %v4748_v1, 2  ;;  %v4762_v41 = vmax.f32 %v4760_v26, %v4761_v29  ;;  %v4723_v61 = vrot.slane %v4722_v17, 1  ;;  %v4730_v11 = vrot.slane %v4729_v43, 1 }
 0x2fb   :  { %v4736_v25 = vmax.f32 %v4734_v46, %v4735_v39  ;;  %v4743_v22 = vmax.f32 %v4741_v38, %v4742_v2  ;;  %v4756_v21 = vrot.slane %v4755_v30, 2  ;;  %v4717_v55 = vmax.f32 %v4715_v44, %v4716_v63 }
 0x2fc   :  { %v4750_v59 = vmax.f32 %v4748_v1, %v4749_v19  ;;  %v4763_v34 = vrot.slane %v4762_v41, 2  ;;  %v4724_v57 = vmax.f32 %v4722_v17, %v4723_v61  ;;  %v4731_v23 = vmax.f32 %v4729_v43, %v4730_v11 }
 0x2fd   :  { %v4737_v7 = vrot.slane %v4736_v25, 1  ;;  %v4744_v13 = vrot.slane %v4743_v22, 1  ;;  %v4757_v58 = vmax.f32 %v4755_v30, %v4756_v21  ;;  %v17014_v4 = vmax.f32 %v16983_v52, %v16987_v36 }
 0x2fe   :  { %v4751_v3 = vrot.slane %v4750_v59, 1  ;;  %v4764_v16 = vmax.f32 %v4762_v41, %v4763_v34  ;;  %v17017_v26 = vmax.f32 %v16985_v33, %v4682_v53  ;;  %v17019_v47 = vmax.f32 %v4689_v12, %v4703_v28 }
 0x2ff   :  { %v4738_v10 = vmax.f32 %v4736_v25, %v4737_v7  ;;  %v4745_v46 = vmax.f32 %v4743_v22, %v4744_v13  ;;  %21771 = vst [vmem:[#allocation33_spill] sm:$0xff] %v17014_v4  ;;  %v4758_v38 = vrot.slane %v4757_v58, 1  ;;  %v17021_v1 = vmax.f32 %v4696_v32, %v4710_v15 }
 0x300   :  { %21772 = vst [vmem:[#allocation34_spill] sm:$0xff] %v17017_v26  ;;  %21773 = vst [vmem:[#allocation35_spill] sm:$0xff] %v17019_v47  ;;  %v4752_v60 = vmax.f32 %v4750_v59, %v4751_v3  ;;  %v4765_v39 = vrot.slane %v4764_v16, 1  ;;  %v17023_v31 = vmax.f32 %v4717_v55, %v4731_v23  ;;  %v2247_v29 = vmax.f32 %v16933_v54, 0.0 }
 0x301   :  { %21774 = vst [vmem:[#allocation36_spill] sm:$0xff] %v17021_v1  ;;  %v17025_v7 = vmax.f32 %v4724_v57, %v4738_v10  ;;  %v2249_v13 = vmax.f32 %v16937_v45, 0.0  ;;  %v4759_v52 = vmax.f32 %v4757_v58, %v4758_v38  ;;  %v2248_v33 = vmax.f32 %v16941_v40, 0.0 }
 0x302   :  { %21775 = vst [vmem:[#allocation37_spill] sm:$0xff] %v17023_v31  ;;  %v4766_v36 = vmax.f32 %v4764_v16, %v4765_v39  ;;  %v2163_v53 = vadd.f32 %v16846_v51, %v16789_v5  ;;  %v2042_v12 = vadd.f32 %v16850_v56, %v16777_v24  ;;  %v2165_v23 = vadd.f32 %v16852_v27, %v16781_v37 }
 0x303   :  { %21776 = vst [vmem:[#allocation38_spill] sm:$0xff] %v17025_v7  ;;  %v2044_v57 = vadd.f32 %v16854_v0, %v16785_v49  ;;  %v2167_v54 = vadd.f32 %v16856_v8, %v16789_v5  ;;  %v17040_v45 = vmax.f32 %v4745_v46, %v4759_v52  ;;  %v2455_v40 = vcombine.low %v2247_v29, %v2248_v33 }
 0x304   :  { %v17042_v32 = vmax.f32 %v4752_v60, %v4766_v36  ;;  %v2456_v28 = vcombine.high %v2247_v29, %v2248_v33  ;;  %v2250_v15 = vmax.f32 %v2163_v53, 0.0  ;;  %v2251_v51 = vmax.f32 %v2042_v12, 0.0 }
 0x305   :  { %21777 = vst [vmem:[#allocation39_spill] sm:$0xff] %v17040_v45  ;;  %v2253_v44 = vmax.f32 %v2165_v23, 0.0  ;;  %v2252_v17 = vmax.f32 %v2044_v57, 0.0  ;;  %v2465_v56 = vrot.slane %v2455_v40, %v16498_v50  ;;  %v2254_v43 = vmax.f32 %v2167_v54, 0.0 }
 0x306   :  { %21778 = vst [vmem:[#allocation40_spill] sm:$0xff] %v17042_v32  ;;  %v2472_v27 = vrot.slane %v2456_v28, %v16498_v50  ;;  %v2457_v2 = vcombine.low %v2249_v13, %v2250_v15  ;;  %v2458_v0 = vcombine.high %v2249_v13, %v2250_v15  ;;  %v17051_v61 = vsel %vm6783_vm11, %v16913_v9, %v16908_v62 }
 0x307   :  { %v2491_v25 = vcombine.low %v2251_v51, %v2252_v17  ;;  %v2492_v19 = vcombine.high %v2251_v51, %v2252_v17  ;;  %v2493_v8 = vcombine.low %v2253_v44, %v2254_v43  ;;  %v2494_v30 = vcombine.high %v2253_v44, %v2254_v43  ;;  %21779 = vst [vmem:[#allocation41_spill] sm:$0xff] %v17051_v61  ;;  %v14844_v44 = vld [vmem:[#allocation6 + $0x4] ss:$16 sps:$4 sm:$0xff]  }
 0x308   :  { %v2479_v41 = vrot.slane %v2457_v2, %v16498_v50  ;;  %v2486_v63 = vrot.slane %v2458_v0, %v16498_v50  ;;  %v17061_v59 = vadd.f32 %v16889_v14, %v16777_v24  ;;  %v17078_v52 = vadd.f32 %v16891_v48, %v16781_v37  ;;  %v14842_v2 = vld [vmem:[#allocation6] ss:$16 sps:$4 sm:$0xff]   ;;  %11459 = vmatprep.subr.bf16.mxu0 %v14844_v44 }
 0x309   :  { %v17054_v11 = vrot.slane %v2491_v25, %v16498_v50  ;;  %v17057_v22 = vrot.slane %v2492_v19, %v16498_v50  ;;  %v17069_v39 = vrot.slane %v2493_v8, %v16498_v50  ;;  %v17074_v13 = vrot.slane %v2494_v30, %v16498_v50  ;;  %v14845_v30 = vld [vmem:[#allocation6 + $0x8] ss:$16 sps:$4 sm:$0xff]   ;;  %11460 = vmatpush1.bf16.msra.mxu0 %v14842_v2 }
 0x30a   :  { %v2487_v21 = vcombine.low %v2465_v56, %v2479_v41  ;;  %v2488_v34 = vcombine.high %v2465_v56, %v2479_v41  ;;  %v2489_v55 = vcombine.low %v2472_v27, %v2486_v63  ;;  %v2490_v10 = vcombine.high %v2472_v27, %v2486_v63 }
 0x30b   :  { %v14092_v3 = vcombine.low %v2479_v41, %v2479_v41  ;;  %v14093_v58 = vcombine.high %v2479_v41, %v2479_v41  ;;  %v14094_v16 = vcombine.low %v2486_v63, %v2486_v63  ;;  %v14095_v46 = vcombine.high %v2486_v63, %v2486_v63 }
 0x30c   :  { %v3174_v62 = vrot.slane %v2487_v21, %v16498_v50  ;;  %v3191_v60 = vrot.slane %v2488_v34, %v16498_v50  ;;  %v17066_v38 = vrot.slane %v2489_v55, %v16498_v50  ;;  %v17084_v12 = vrot.slane %v2490_v10, %v16498_v50  ;;  %v14847_v55 = vld [vmem:[#allocation6 + $0xc] ss:$16 sps:$4 sm:$0xff]  }
 0x30d   :  { %v3181_v14 = vrot.slane %v14092_v3, %v16498_v50  ;;  %v3198_v29 = vrot.slane %v14093_v58, %v16498_v50  ;;  %v17081_v53 = vrot.slane %v14094_v16, %v16498_v50  ;;  %v17089_v40 = vrot.slane %v14095_v46, %v16498_v50  ;;  %11764 = vmatprep.subr.bf16.mxu1 %v14847_v55 }
 0x30e   :  { %v3182_v36 = vcombine.high %v3174_v62, %v3174_v62  ;;  %v3199_v33 = vcombine.high %v3191_v60, %v3191_v60  ;;  %v3216_v54 = vcombine.high %v17066_v38, %v17066_v38  ;;  %v4767_v28 = vsel %vm211_vm0, %v3174_v62, -inf  ;;  %11765 = vmatpush1.bf16.msra.mxu1 %v14845_v30 }
 0x30f   :  { %v3183_v23 = vcombine.high %v3181_v14, %v3181_v14  ;;  %v3200_v57 = vcombine.high %v3198_v29, %v3198_v29  ;;  %v4781_v15 = vsel %vm211_vm0, %v3181_v14, -inf  ;;  %v4795_v51 = vsel %vm211_vm0, %v3191_v60, -inf }
 0x310   :  { %v4774_v48 = vsel %vm211_vm0, %v3182_v36, -inf  ;;  %v4768_v17 = vrot.slane %v4767_v28, 4  ;;  %v4782_v27 = vrot.slane %v4781_v15, 4  ;;  %v4796_v25 = vrot.slane %v4795_v51, 4  ;;  %v17099_v36 = vpop.f32.mrb[12].mxu0 }
 0x311   :  { %v4775_v56 = vrot.slane %v4774_v48, 4  ;;  %v4788_v43 = vsel %vm211_vm0, %v3183_v23, -inf  ;;  %v4802_v19 = vsel %vm211_vm0, %v3199_v33, -inf  ;;  %v4809_v8 = vsel %vm211_vm0, %v3198_v29, -inf  ;;  %v17101_v29 = vpop.f32.mrb[12].mxu1 }
 0x312   :  { %v4789_v0 = vrot.slane %v4788_v43, 4  ;;  %v4769_v41 = vmax.f32 %v4767_v28, %v4768_v17  ;;  %v4783_v21 = vmax.f32 %v4781_v15, %v4782_v27  ;;  %v4803_v34 = vrot.slane %v4802_v19, 4  ;;  %v17103_v15 = vpop.f32.mrb[13].mxu0 }
 0x313   :  { %v4776_v63 = vmax.f32 %v4774_v48, %v4775_v56  ;;  %v4797_v3 = vmax.f32 %v4795_v51, %v4796_v25  ;;  %v4810_v58 = vrot.slane %v4809_v8, 4  ;;  %v4816_v16 = vsel %vm211_vm0, %v3200_v57, -inf }
 0x314   :  { %v4790_v10 = vmax.f32 %v4788_v43, %v4789_v0  ;;  %v4770_v46 = vrot.slane %v4769_v41, 2  ;;  %v4784_v60 = vrot.slane %v4783_v21, 2  ;;  %v4804_v14 = vmax.f32 %v4802_v19, %v4803_v34 }
 0x315   :  { %v4777_v62 = vrot.slane %v4776_v63, 2  ;;  %v4798_v23 = vrot.slane %v4797_v3, 2  ;;  %v4811_v28 = vmax.f32 %v4809_v8, %v4810_v58  ;;  %v4817_v48 = vrot.slane %v4816_v16, 4 }
 0x316   :  { %v4791_v33 = vrot.slane %v4790_v10, 2  ;;  %v4771_v51 = vmax.f32 %v4769_v41, %v4770_v46  ;;  %v4785_v57 = vmax.f32 %v4783_v21, %v4784_v60  ;;  %v4805_v17 = vrot.slane %v4804_v14, 2 }
 0x317   :  { %v17105_v44 = vmax.f32 %v4776_v63, %v4777_v62  ;;  %v3233_v56 = vcombine.high %v17084_v12, %v17084_v12  ;;  %v4799_v27 = vmax.f32 %v4797_v3, %v4798_v23  ;;  %v4812_v43 = vrot.slane %v4811_v28, 2 }
 0x318   :  { %v4818_v2 = vmax.f32 %v4816_v16, %v4817_v48  ;;  %v3217_v0 = vcombine.high %v17081_v53, %v17081_v53  ;;  %v4772_v25 = vrot.slane %v4771_v51, 1  ;;  %v4786_v19 = vrot.slane %v4785_v57, 1 }
 0x319   :  { %v4806_v8 = vmax.f32 %v4804_v14, %v4805_v17  ;;  %v3234_v30 = vcombine.high %v17089_v40, %v17089_v40  ;;  %v4800_v41 = vrot.slane %v4799_v27, 1  ;;  %v4813_v63 = vmax.f32 %v4811_v28, %v4812_v43 }
 0x31a   :  { %v4819_v34 = vrot.slane %v4818_v2, 2  ;;  %v17113_v21 = vmax.f32 %v4771_v51, %v4772_v25  ;;  %v17116_v58 = vmax.f32 %v4790_v10, %v4791_v33  ;;  %v17118_v16 = vmax.f32 %v4785_v57, %v4786_v19 }
 0x31b   :  { %v4807_v3 = vrot.slane %v4806_v8, 1  ;;  %v17120_v46 = vmax.f32 %v4799_v27, %v4800_v41  ;;  %v4814_v62 = vrot.slane %v4813_v63, 1  ;;  %v4823_v23 = vsel %vm211_vm0, %v17066_v38, -inf }
 0x31c   :  { %21780 = vst [vmem:[#allocation42_spill] sm:$0xff] %v17113_v21  ;;  %21781 = vst [vmem:[#allocation43_spill] sm:$0xff] %v17118_v16  ;;  %v4820_v60 = vmax.f32 %v4818_v2, %v4819_v34  ;;  %v4830_v28 = vsel %vm211_vm0, %v3216_v54, -inf  ;;  %v4837_v10 = vsel %vm211_vm0, %v17081_v53, -inf  ;;  %v4824_v51 = vrot.slane %v4823_v23, 4  ;;  %v17142_v34 = vpop.f32.mrb[13].mxu1 }
 0x31d   :  { %v17122_v14 = vmax.f32 %v4806_v8, %v4807_v3  ;;  %v17132_v33 = vmax.f32 %v4813_v63, %v4814_v62  ;;  %v4831_v57 = vrot.slane %v4830_v28, 4  ;;  %v4838_v17 = vrot.slane %v4837_v10, 4 }
 0x31e   :  { %v4821_v48 = vrot.slane %v4820_v60, 1  ;;  %v4844_v27 = vsel %vm211_vm0, %v3217_v0, -inf  ;;  %v4851_v43 = vsel %vm211_vm0, %v17084_v12, -inf  ;;  %v4858_v2 = vsel %vm211_vm0, %v3233_v56, -inf }
 0x31f   :  { %21782 = vst [vmem:[#allocation44_spill] sm:$0xff] %v17122_v14  ;;  %v4825_v38 = vmax.f32 %v4823_v23, %v4824_v51  ;;  %v4832_v54 = vmax.f32 %v4830_v28, %v4831_v57  ;;  %v4845_v19 = vrot.slane %v4844_v27, 4  ;;  %v4839_v8 = vmax.f32 %v4837_v10, %v4838_v17 }
 0x320   :  { %v17138_v25 = vmax.f32 %v4820_v60, %v4821_v48  ;;  %v4852_v53 = vrot.slane %v4851_v43, 4  ;;  %v4859_v41 = vrot.slane %v4858_v2, 4  ;;  %v4865_v63 = vsel %vm211_vm0, %v17089_v40, -inf }
 0x321   :  { %v4826_v3 = vrot.slane %v4825_v38, 2  ;;  %v4833_v0 = vrot.slane %v4832_v54, 2  ;;  %v4846_v62 = vmax.f32 %v4844_v27, %v4845_v19  ;;  %v4866_v55 = vrot.slane %v4865_v63, 4 }
 0x322   :  { %21783 = vst [vmem:[#allocation45_spill] sm:$0xff] %v17138_v25  ;;  %v4840_v12 = vrot.slane %v4839_v8, 2  ;;  %v4853_v32 = vmax.f32 %v4851_v43, %v4852_v53  ;;  %v4860_v56 = vmax.f32 %v4858_v2, %v4859_v41  ;;  %v4872_v60 = vsel %vm211_vm0, %v3234_v30, -inf }
 0x323   :  { %v4827_v23 = vmax.f32 %v4825_v38, %v4826_v3  ;;  %v4834_v28 = vmax.f32 %v4832_v54, %v4833_v0  ;;  %v4847_v48 = vrot.slane %v4846_v62, 2  ;;  %v4867_v10 = vmax.f32 %v4865_v63, %v4866_v55 }
 0x324   :  { %v4841_v51 = vmax.f32 %v4839_v8, %v4840_v12  ;;  %v4854_v57 = vrot.slane %v4853_v32, 2  ;;  %v4861_v17 = vrot.slane %v4860_v56, 2  ;;  %v4873_v45 = vrot.slane %v4872_v60, 4 }
 0x325   :  { %v4828_v40 = vrot.slane %v4827_v23, 1  ;;  %v4835_v7 = vrot.slane %v4834_v28, 1  ;;  %v4848_v31 = vmax.f32 %v4846_v62, %v4847_v48  ;;  %v4868_v1 = vrot.slane %v4867_v10, 2 }
 0x326   :  { %v4842_v47 = vrot.slane %v4841_v51, 1  ;;  %v4855_v27 = vmax.f32 %v4853_v32, %v4854_v57  ;;  %v4862_v19 = vmax.f32 %v4860_v56, %v4861_v17  ;;  %v4874_v61 = vmax.f32 %v4872_v60, %v4873_v45 }
 0x327   :  { %v4829_v43 = vmax.f32 %v4827_v23, %v4828_v40  ;;  %v4836_v2 = vmax.f32 %v4834_v28, %v4835_v7  ;;  %v4849_v53 = vrot.slane %v4848_v31, 1  ;;  %v4869_v30 = vmax.f32 %v4867_v10, %v4868_v1 }
 0x328   :  { %v4843_v38 = vmax.f32 %v4841_v51, %v4842_v47  ;;  %v4856_v54 = vrot.slane %v4855_v27, 1  ;;  %v4863_v41 = vrot.slane %v4862_v19, 1  ;;  %v4875_v55 = vrot.slane %v4874_v61, 2 }
 0x329   :  { %v4850_v8 = vmax.f32 %v4848_v31, %v4849_v53  ;;  %v4870_v63 = vrot.slane %v4869_v30, 1  ;;  %v6577_v0 = vmax.f32 %v17120_v46, %v17132_v33  ;;  %v2523_v31 = vcombine.low %v17054_v11, %v17069_v39 }
 0x32a   :  { %v4857_v62 = vmax.f32 %v4855_v27, %v4856_v54  ;;  %v4864_v32 = vmax.f32 %v4862_v19, %v4863_v41  ;;  %v4876_v12 = vmax.f32 %v4874_v61, %v4875_v55  ;;  %v6579_v1 = vmax.f32 %v4829_v43, %v4843_v38  ;;  %v14850_v41 = vld [vmem:[#allocation6 + $0x24] ss:$16 sps:$4 sm:$0xff]   ;;  %v14853_v55 = vld [vmem:[#allocation6 + $0x2c] ss:$16 sps:$4 sm:$0xff]  }
 0x32b   :  { %v4871_v45 = vmax.f32 %v4869_v30, %v4870_v63  ;;  %v17151_v47 = vmax.f32 %v4836_v2, %v4850_v8  ;;  %v2524_v60 = vcombine.high %v17054_v11, %v17069_v39  ;;  %v2525_v46 = vcombine.low %v17057_v22, %v17074_v13  ;;  %11461 = vmatprep.subr.bf16.mxu0 %v14850_v41 }
 0x32c   :  { %v4877_v56 = vrot.slane %v4876_v12, 1  ;;  %v2526_v61 = vcombine.high %v17057_v22, %v17074_v13  ;;  %v17164_v23 = vsel %vm6783_vm11, %v6579_v1, %v6577_v0  ;;  %v14096_v28 = vcombine.low %v17069_v39, %v17069_v39  ;;  %11766 = vmatprep.subr.bf16.mxu1 %v14853_v55 }
 0x32d   :  { %21784 = vst [vmem:[#allocation46_spill] sm:$0xff] %v17151_v47  ;;  %v17161_v33 = vmax.f32 %v4857_v62, %v4871_v45  ;;  %21786 = vst [vmem:[#allocation48_spill] sm:$0xff] %v17164_v23  ;;  %v3242_v48 = vrot.slane %v2523_v31, %v16498_v50  ;;  %v14097_v11 = vcombine.high %v17069_v39, %v17069_v39 }
 0x32e   :  { %v4878_v10 = vmax.f32 %v4876_v12, %v4877_v56  ;;  %v3259_v51 = vrot.slane %v2524_v60, %v16498_v50  ;;  %v14098_v57 = vcombine.low %v17074_v13, %v17074_v13  ;;  %v3249_v17 = vrot.slane %v14096_v28, %v16498_v50  ;;  %v14851_v12 = vld [vmem:[#allocation6 + $0x28] ss:$16 sps:$4 sm:$0xff]   ;;  %v17208_v28 = vpop.f32.mrb[14].mxu0 }
 0x32f   :  { %21785 = vst [vmem:[#allocation47_spill] sm:$0xff] %v17161_v33  ;;  %v17176_v22 = vsel %vm6783_vm11, %v17161_v33, %v6579_v1  ;;  %v3250_v40 = vcombine.high %v3242_v48, %v3242_v48  ;;  %v17180_v27 = vrot.slane %v2525_v46, %v16498_v50  ;;  %v3266_v43 = vrot.slane %v14097_v11, %v16498_v50 }
 0x330   :  { %21787 = vst [vmem:[#allocation49_spill] sm:$0xff] %v17176_v22  ;;  %v17182_v19 = vmax.f32 %v4864_v32, %v4878_v10  ;;  %v3267_v39 = vcombine.high %v3259_v51, %v3259_v51  ;;  %v17186_v2 = vrot.slane %v14098_v57, %v16498_v50  ;;  %v3251_v53 = vcombine.high %v3249_v17, %v3249_v17  ;;  %v14848_v32 = vld [vmem:[#allocation6 + $0x20] ss:$16 sps:$4 sm:$0xff]  }
 0x331   :  { %v14099_v38 = vcombine.high %v17074_v13, %v17074_v13  ;;  %v17193_v54 = vrot.slane %v2526_v61, %v16498_v50  ;;  %v3268_v8 = vcombine.high %v3266_v43, %v3266_v43  ;;  %v4879_v0 = vsel %vm211_vm0, %v3242_v48, -inf  ;;  %v17210_v48 = vpop.f32.mrb[14].mxu1  ;;  %11462 = vmatpush1.bf16.msra.mxu0 %v14848_v32  ;;  %11767 = vmatpush1.bf16.msra.mxu1 %v14851_v12 }
 0x332   :  { %21788 = vst [vmem:[#allocation50_spill] sm:$0xff] %v17182_v19  ;;  %v4886_v62 = vsel %vm211_vm0, %v3250_v40, -inf  ;;  %v4880_v1 = vrot.slane %v4879_v0, 4  ;;  %v4893_v56 = vsel %vm211_vm0, %v3249_v17, -inf  ;;  %v4900_v60 = vsel %vm211_vm0, %v3251_v53, -inf  ;;  %21789 = vst [vmem:[#allocation51_spill] sm:$0xff] %v17210_v48 }
 0x333   :  { %v17200_v45 = vrot.slane %v14099_v38, %v16498_v50  ;;  %v4887_v31 = vrot.slane %v4886_v62, 4  ;;  %v4907_v46 = vsel %vm211_vm0, %v3259_v51, -inf  ;;  %v4914_v61 = vsel %vm211_vm0, %v3267_v39, -inf  ;;  %v17214_v38 = vpop.f32.mrb[15].mxu0 }
 0x334   :  { %v4881_v11 = vmax.f32 %v4879_v0, %v4880_v1  ;;  %v4894_v40 = vrot.slane %v4893_v56, 4  ;;  %v4901_v17 = vrot.slane %v4900_v60, 4  ;;  %v4908_v53 = vrot.slane %v4907_v46, 4 }
 0x335   :  { %v4888_v57 = vmax.f32 %v4886_v62, %v4887_v31  ;;  %v4915_v41 = vrot.slane %v4914_v61, 4  ;;  %v4921_v51 = vsel %vm211_vm0, %v3266_v43, -inf  ;;  %v4928_v63 = vsel %vm211_vm0, %v3268_v8, -inf }
 0x336   :  { %v4882_v39 = vrot.slane %v4881_v11, 2  ;;  %v4895_v3 = vmax.f32 %v4893_v56, %v4894_v40  ;;  %v4922_v7 = vrot.slane %v4921_v51, 4  ;;  %v4902_v13 = vmax.f32 %v4900_v60, %v4901_v17 }
 0x337   :  { %v4889_v55 = vrot.slane %v4888_v57, 2  ;;  %v4909_v32 = vmax.f32 %v4907_v46, %v4908_v53  ;;  %v4916_v12 = vmax.f32 %v4914_v61, %v4915_v41  ;;  %v4929_v21 = vrot.slane %v4928_v63, 4 }
 0x338   :  { %v4883_v10 = vmax.f32 %v4881_v11, %v4882_v39  ;;  %v4896_v62 = vrot.slane %v4895_v3, 2  ;;  %v4923_v1 = vmax.f32 %v4921_v51, %v4922_v7  ;;  %v4903_v31 = vrot.slane %v4902_v13, 2 }
 0x339   :  { %v4890_v0 = vmax.f32 %v4888_v57, %v4889_v55  ;;  %v4910_v30 = vrot.slane %v4909_v32, 2  ;;  %v4917_v16 = vrot.slane %v4916_v12, 2  ;;  %v4930_v60 = vmax.f32 %v4928_v63, %v4929_v21 }
 0x33a   :  { %v4884_v22 = vrot.slane %v4883_v10, 1  ;;  %v4897_v43 = vmax.f32 %v4895_v3, %v4896_v62  ;;  %v4924_v4 = vrot.slane %v4923_v1, 2  ;;  %v4904_v47 = vmax.f32 %v4902_v13, %v4903_v31 }
 0x33b   :  { %v4891_v26 = vrot.slane %v4890_v0, 1  ;;  %v4911_v56 = vmax.f32 %v4909_v32, %v4910_v30  ;;  %v4918_v40 = vmax.f32 %v4916_v12, %v4917_v16  ;;  %v4931_v53 = vrot.slane %v4930_v60, 2 }
 0x33c   :  { %v17218_v46 = vmax.f32 %v4883_v10, %v4884_v22  ;;  %v4898_v8 = vrot.slane %v4897_v43, 1  ;;  %v4925_v11 = vmax.f32 %v4923_v1, %v4924_v4  ;;  %v4905_v57 = vrot.slane %v4904_v47, 1 }
 0x33d   :  { %v17220_v61 = vmax.f32 %v4890_v0, %v4891_v26  ;;  %v4912_v7 = vrot.slane %v4911_v56, 1  ;;  %v4919_v17 = vrot.slane %v4918_v40, 1  ;;  %v4935_v3 = vsel %vm211_vm0, %v17180_v27, -inf }
 0x33e   :  { %v4899_v41 = vmax.f32 %v4897_v43, %v4898_v8  ;;  %v4926_v51 = vrot.slane %v4925_v11, 1  ;;  %v21790_v30 = vcombine.high %v17180_v27, %v17180_v27  ;;  %v4906_v16 = vmax.f32 %v4904_v47, %v4905_v57 }
 0x33f   :  { %v4913_v22 = vmax.f32 %v4911_v56, %v4912_v7  ;;  %v4920_v26 = vmax.f32 %v4918_v40, %v4919_v17  ;;  %v4932_v63 = vmax.f32 %v4930_v60, %v4931_v53  ;;  %v4936_v4 = vrot.slane %v4935_v3, 4  ;;  %v17242_v17 = vpop.f32.mrb[15].mxu1 }
 0x340   :  { %v4942_v21 = vsel %vm211_vm0, %v21790_v30, -inf  ;;  %v4927_v13 = vmax.f32 %v4925_v11, %v4926_v51  ;;  %v4949_v39 = vsel %vm211_vm0, %v17186_v2, -inf  ;;  %v21791_v12 = vcombine.high %v17186_v2, %v17186_v2  ;;  %21793 = vst [vmem:[#allocation52_spill] sm:$0xff] %v17242_v17 }
 0x341   :  { %v4943_v10 = vrot.slane %v4942_v21, 4  ;;  %v4933_v55 = vrot.slane %v4932_v63, 1  ;;  %v4950_v32 = vrot.slane %v4949_v39, 4  ;;  %v4963_v27 = vsel %vm211_vm0, %v17193_v54, -inf }
 0x342   :  { %v4956_v0 = vsel %vm211_vm0, %v21791_v12, -inf  ;;  %v4937_v47 = vmax.f32 %v4935_v3, %v4936_v4  ;;  %v4964_v31 = vrot.slane %v4963_v27, 4  ;;  %v21792_v40 = vcombine.high %v17193_v54, %v17193_v54 }
 0x343   :  { %v4944_v62 = vmax.f32 %v4942_v21, %v4943_v10  ;;  %v4957_v1 = vrot.slane %v4956_v0, 4  ;;  %v4934_v43 = vmax.f32 %v4932_v63, %v4933_v55  ;;  %v4951_v56 = vmax.f32 %v4949_v39, %v4950_v32 }
 0x344   :  { %v4970_v60 = vsel %vm211_vm0, %v21792_v40, -inf  ;;  %v4977_v8 = vsel %vm211_vm0, %v17200_v45, -inf  ;;  %v4938_v2 = vrot.slane %v4937_v47, 2  ;;  %v4965_v7 = vmax.f32 %v4963_v27, %v4964_v31 }
 0x345   :  { %v4945_v11 = vrot.slane %v4944_v62, 2  ;;  %v4958_v57 = vmax.f32 %v4956_v0, %v4957_v1  ;;  %v4952_v53 = vrot.slane %v4951_v56, 2  ;;  %v4971_v51 = vrot.slane %v4970_v60, 4 }
 0x346   :  { %v4978_v3 = vrot.slane %v4977_v8, 4  ;;  %v21794_v30 = vcombine.high %v17200_v45, %v17200_v45  ;;  %v4939_v54 = vmax.f32 %v4937_v47, %v4938_v2  ;;  %v4966_v10 = vrot.slane %v4965_v7, 2 }
 0x347   :  { %v4946_v63 = vmax.f32 %v4944_v62, %v4945_v11  ;;  %v4959_v4 = vrot.slane %v4958_v57, 2  ;;  %v4953_v39 = vmax.f32 %v4951_v56, %v4952_v53  ;;  %v4972_v55 = vmax.f32 %v4970_v60, %v4971_v51 }
 0x348   :  { %v4984_v21 = vsel %vm211_vm0, %v21794_v30, -inf  ;;  %v4979_v32 = vmax.f32 %v4977_v8, %v4978_v3  ;;  %v4940_v0 = vrot.slane %v4939_v54, 1  ;;  %v4967_v31 = vmax.f32 %v4965_v7, %v4966_v10 }
 0x349   :  { %v4985_v12 = vrot.slane %v4984_v21, 4  ;;  %v4947_v27 = vrot.slane %v4946_v63, 1  ;;  %v4960_v1 = vmax.f32 %v4958_v57, %v4959_v4  ;;  %v4954_v40 = vrot.slane %v4953_v39, 1 }
 0x34a   :  { %v4973_v25 = vrot.slane %v4972_v55, 2  ;;  %v4980_v14 = vrot.slane %v4979_v32, 2  ;;  %v4941_v17 = vmax.f32 %v4939_v54, %v4940_v0  ;;  %v4968_v30 = vrot.slane %v4967_v31, 1 }
 0x34b   :  { %v4986_v23 = vmax.f32 %v4984_v21, %v4985_v12  ;;  %v4948_v45 = vmax.f32 %v4946_v63, %v4947_v27  ;;  %v4961_v48 = vrot.slane %v4960_v1, 1  ;;  %v4955_v47 = vmax.f32 %v4953_v39, %v4954_v40 }
 0x34c   :  { %v4974_v62 = vmax.f32 %v4972_v55, %v4973_v25  ;;  %v4981_v2 = vmax.f32 %v4979_v32, %v4980_v14  ;;  %v4969_v60 = vmax.f32 %v4967_v31, %v4968_v30  ;;  %v17249_v8 = vmax.f32 %v17218_v46, %v4899_v41 }
 0x34d   :  { %v4987_v11 = vrot.slane %v4986_v23, 2  ;;  %v4962_v56 = vmax.f32 %v4960_v1, %v4961_v48  ;;  %v17252_v57 = vmax.f32 %v17220_v61, %v4906_v16  ;;  %v17254_v3 = vmax.f32 %v4913_v22, %v4927_v13 }
 0x34e   :  { %21795 = vst [vmem:[#allocation53_spill] sm:$0xff] %v17249_v8  ;;  %v4975_v7 = vrot.slane %v4974_v62, 1  ;;  %v4982_v53 = vrot.slane %v4981_v2, 1  ;;  %v17256_v21 = vmax.f32 %v4920_v26, %v4934_v43  ;;  %v17258_v54 = vmax.f32 %v4941_v17, %v4955_v47 }
 0x34f   :  { %21796 = vst [vmem:[#allocation54_spill] sm:$0xff] %v17252_v57  ;;  %v4988_v51 = vmax.f32 %v4986_v23, %v4987_v11  ;;  %21797 = vst [vmem:[#allocation55_spill] sm:$0xff] %v17254_v3  ;;  %v17260_v25 = vmax.f32 %v4948_v45, %v4962_v56  ;;  %v17265_v14 = vsel %vm6783_vm11, %v17249_v8, %v17161_v33  ;;  %v4793_v16 = vrot.slane %v17116_v58, 1 }
 0x350   :  { %21798 = vst [vmem:[#allocation56_spill] sm:$0xff] %v17256_v21  ;;  %21799 = vst [vmem:[#allocation57_spill] sm:$0xff] %v17258_v54  ;;  %v4976_v48 = vmax.f32 %v4974_v62, %v4975_v7  ;;  %v4983_v46 = vmax.f32 %v4981_v2, %v4982_v53  ;;  %v17270_v23 = vsel %vm6783_vm11, %v17252_v57, %v17182_v19  ;;  %v2255_v22 = vmax.f32 %v17061_v59, 0.0  ;;  %v21805_v59 = vld [vmem:[#allocation31_spill] sm:$0xff] }
 0x351   :  { %21800 = vst [vmem:[#allocation58_spill] sm:$0xff] %v17260_v25  ;;  %21801 = vst [vmem:[#allocation59_spill] sm:$0xff] %v17265_v14  ;;  %v4989_v61 = vrot.slane %v4988_v51, 1  ;;  %v17275_v41 = vsel %vm6783_vm11, %v16925_v35, %v16913_v9  ;;  %v2050_v26 = vadd.f32 %v16899_v18, %v16785_v49  ;;  %v2257_v17 = vmax.f32 %v17078_v52, 0.0 }
 0x352   :  { %21802 = vst [vmem:[#allocation60_spill] sm:$0xff] %v17270_v23  ;;  %21803 = vst [vmem:[#allocation61_spill] sm:$0xff] %v17275_v41  ;;  %v17281_v43 = vmax.f32 %v4969_v60, %v4983_v46  ;;  %v2173_v63 = vadd.f32 %v16901_v20, %v16789_v5  ;;  %v2052_v10 = vadd.f32 %v16977_v6, %v16777_v24  ;;  %v21806_v18 = vrot.slane %v17105_v44, 1  ;;  %v21809_v20 = vld [vmem:[#allocation32_spill] sm:$0xff] }
 0x353   :  { %v4990_v13 = vmax.f32 %v4988_v51, %v4989_v61  ;;  %v2256_v4 = vmax.f32 %v2050_v26, 0.0  ;;  %v2175_v39 = vadd.f32 %v16979_v42, %v16781_v37  ;;  %v2054_v55 = vadd.f32 %v21805_v59, %v16785_v49  ;;  %v14856_v26 = vld [vmem:[#allocation6 + $0x44] ss:$16 sps:$4 sm:$0xff]   ;;  %v14857_v59 = vld [vmem:[#allocation6 + $0x48] ss:$16 sps:$4 sm:$0xff]  }
 0x354   :  { %21804 = vst [vmem:[#allocation62_spill] sm:$0xff] %v17281_v43  ;;  %v17295_v32 = vmax.f32 %v17105_v44, %v21806_v18  ;;  %v2258_v12 = vmax.f32 %v2173_v63, 0.0  ;;  %v2177_v0 = vadd.f32 %v21809_v20, %v16789_v5  ;;  %v2259_v6 = vmax.f32 %v2052_v10, 0.0  ;;  %11463 = vmatprep.subr.bf16.mxu0 %v14856_v26 }
 0x355   :  { %v17297_v52 = vmax.f32 %v4976_v48, %v4990_v13  ;;  %v2527_v27 = vcombine.low %v2255_v22, %v2256_v4  ;;  %v2528_v1 = vcombine.high %v2255_v22, %v2256_v4  ;;  %v2261_v31 = vmax.f32 %v2175_v39, 0.0  ;;  %v14859_v13 = vld [vmem:[#allocation6 + $0x4c] ss:$16 sps:$4 sm:$0xff]   ;;  %v14854_v39 = vld [vmem:[#allocation6 + $0x40] ss:$16 sps:$4 sm:$0xff]  }
 0x356   :  { %21807 = vst [vmem:[#allocation31_spill] sm:$0xff] %v17295_v32  ;;  %v2529_v40 = vcombine.low %v2257_v17, %v2258_v12  ;;  %v2530_v42 = vcombine.high %v2257_v17, %v2258_v12  ;;  %v2260_v45 = vmax.f32 %v2054_v55, 0.0  ;;  %v2262_v30 = vmax.f32 %v2177_v0, 0.0  ;;  %11768 = vmatprep.subr.bf16.mxu1 %v14859_v13  ;;  %11464 = vmatpush1.bf16.msra.mxu0 %v14854_v39 }
 0x357   :  { %21808 = vst [vmem:[#allocation63_spill] sm:$0xff] %v17297_v52  ;;  %v17302_v47 = vmax.f32 %v17116_v58, %v4793_v16  ;;  %v7035_v44 = vsel %vm6783_vm11, %v17254_v3, %v17249_v8  ;;  %v2537_v62 = vrot.slane %v2527_v27, %v16498_v50  ;;  %v2544_v2 = vrot.slane %v2528_v1, %v16498_v50 }
 0x358   :  { %v2551_v11 = vrot.slane %v2529_v40, %v16498_v50  ;;  %v2558_v56 = vrot.slane %v2530_v42, %v16498_v50  ;;  %v17311_v60 = vcombine.low %v2259_v6, %v2260_v45  ;;  %v17313_v7 = vcombine.high %v2259_v6, %v2260_v45  ;;  %11769 = vmatpush1.bf16.msra.mxu1 %v14857_v59 }
 0x359   :  { %21810 = vst [vmem:[#allocation32_spill] sm:$0xff] %v17302_v47  ;;  %v17315_v53 = vcombine.low %v2261_v31, %v2262_v30  ;;  %v17317_v58 = vcombine.high %v2261_v31, %v2262_v30  ;;  %v17321_v51 = vadd.f32 %v17099_v36, %v16777_v24  ;;  %v17325_v48 = vadd.f32 %v17101_v29, %v16781_v37 }
 0x35a   :  { %v2559_v46 = vcombine.low %v2537_v62, %v2551_v11  ;;  %v2560_v61 = vcombine.high %v2537_v62, %v2551_v11  ;;  %v2561_v16 = vcombine.low %v2544_v2, %v2558_v56  ;;  %v2562_v22 = vcombine.high %v2544_v2, %v2558_v56  ;;  %v17354_v62 = vpop.f32.mrb[16].mxu0  ;;  %v17356_v2 = vpop.f32.mrb[16].mxu1 }
 0x35b   :  { %v14100_v17 = vcombine.low %v2551_v11, %v2551_v11  ;;  %v14101_v63 = vcombine.high %v2551_v11, %v2551_v11  ;;  %v14102_v4 = vcombine.low %v2558_v56, %v2558_v56  ;;  %v14103_v10 = vcombine.high %v2558_v56, %v2558_v56 }
 0x35c   :  { %v17329_v36 = vsel %vm6785_vm12, %v17258_v54, %v7035_v44  ;;  %v17334_v29 = vsel %vm6783_vm11, %v17256_v21, %v17252_v57  ;;  %v3310_v55 = vrot.slane %v2559_v46, %v16498_v50  ;;  %v3327_v18 = vrot.slane %v2560_v61, %v16498_v50 }
 0x35d   :  { %21811 = vst [vmem:[#allocation64_spill] sm:$0xff] %v17334_v29  ;;  %v3317_v12 = vrot.slane %v14100_v17, %v16498_v50  ;;  %v3334_v20 = vrot.slane %v14101_v63, %v16498_v50  ;;  %v17343_v31 = vrot.slane %v2561_v16, %v16498_v50  ;;  %v17346_v40 = vrot.slane %v2562_v22, %v16498_v50 }
 0x35e   :  { %v3318_v1 = vcombine.high %v3310_v55, %v3310_v55  ;;  %v3335_v6 = vcombine.high %v3327_v18, %v3327_v18  ;;  %v17349_v30 = vrot.slane %v14102_v4, %v16498_v50  ;;  %v17352_v44 = vrot.slane %v14103_v10, %v16498_v50 }
 0x35f   :  { %v3319_v42 = vcombine.high %v3317_v12, %v3317_v12  ;;  %v3336_v45 = vcombine.high %v3334_v20, %v3334_v20  ;;  %v4991_v11 = vsel %vm211_vm0, %v3310_v55, -inf  ;;  %v5005_v46 = vsel %vm211_vm0, %v3317_v12, -inf }
 0x360   :  { %v4998_v56 = vsel %vm211_vm0, %v3318_v1, -inf  ;;  %v5019_v61 = vsel %vm211_vm0, %v3327_v18, -inf  ;;  %v4992_v16 = vrot.slane %v4991_v11, 4  ;;  %v5006_v26 = vrot.slane %v5005_v46, 4 }
 0x361   :  { %v4999_v22 = vrot.slane %v4998_v56, 4  ;;  %v5012_v13 = vsel %vm211_vm0, %v3319_v42, -inf  ;;  %v5020_v63 = vrot.slane %v5019_v61, 4  ;;  %v5026_v4 = vsel %vm211_vm0, %v3335_v6, -inf }
 0x362   :  { %v5013_v17 = vrot.slane %v5012_v13, 4  ;;  %v5033_v10 = vsel %vm211_vm0, %v3334_v20, -inf  ;;  %v4993_v39 = vmax.f32 %v4991_v11, %v4992_v16  ;;  %v5007_v55 = vmax.f32 %v5005_v46, %v5006_v26 }
 0x363   :  { %v5000_v59 = vmax.f32 %v4998_v56, %v4999_v22  ;;  %v5027_v27 = vrot.slane %v5026_v4, 4  ;;  %v5021_v0 = vmax.f32 %v5019_v61, %v5020_v63  ;;  %v5034_v12 = vrot.slane %v5033_v10, 4 }
 0x364   :  { %v5014_v1 = vmax.f32 %v5012_v13, %v5013_v17  ;;  %v5040_v18 = vsel %vm211_vm0, %v3336_v45, -inf  ;;  %v4994_v32 = vrot.slane %v4993_v39, 2  ;;  %v5008_v41 = vrot.slane %v5007_v55, 2 }
 0x365   :  { %v5001_v47 = vrot.slane %v5000_v59, 2  ;;  %v5028_v52 = vmax.f32 %v5026_v4, %v5027_v27  ;;  %v5022_v29 = vrot.slane %v5021_v0, 2  ;;  %v5035_v23 = vmax.f32 %v5033_v10, %v5034_v12 }
 0x366   :  { %v5015_v42 = vrot.slane %v5014_v1, 2  ;;  %v5041_v14 = vrot.slane %v5040_v18, 4  ;;  %v4995_v6 = vmax.f32 %v4993_v39, %v4994_v32  ;;  %v5009_v20 = vmax.f32 %v5007_v55, %v5008_v41 }
 0x367   :  { %v5002_v25 = vmax.f32 %v5000_v59, %v5001_v47  ;;  %v5029_v11 = vrot.slane %v5028_v52, 2  ;;  %v5023_v46 = vmax.f32 %v5021_v0, %v5022_v29  ;;  %v5036_v16 = vrot.slane %v5035_v23, 2 }
 0x368   :  { %v5016_v56 = vmax.f32 %v5014_v1, %v5015_v42  ;;  %v5042_v22 = vmax.f32 %v5040_v18, %v5041_v14  ;;  %v3352_v61 = vcombine.high %v17343_v31, %v17343_v31  ;;  %v4996_v45 = vrot.slane %v4995_v6, 1 }
 0x369   :  { %v5003_v26 = vrot.slane %v5002_v25, 1  ;;  %v5010_v13 = vrot.slane %v5009_v20, 1  ;;  %v5024_v27 = vrot.slane %v5023_v46, 1  ;;  %v5037_v63 = vmax.f32 %v5035_v23, %v5036_v16 }
 0x36a   :  { %v5017_v17 = vrot.slane %v5016_v56, 1  ;;  %v5043_v4 = vrot.slane %v5042_v22, 2  ;;  %v3353_v32 = vcombine.high %v17349_v30, %v17349_v30  ;;  %v3369_v41 = vcombine.high %v17346_v40, %v17346_v40 }
 0x36b   :  { %v3370_v47 = vcombine.high %v17352_v44, %v17352_v44  ;;  %v17374_v14 = vmax.f32 %v5028_v52, %v5029_v11  ;;  %v4997_v29 = vmax.f32 %v4995_v6, %v4996_v45  ;;  %v5004_v0 = vmax.f32 %v5002_v25, %v5003_v26 }
 0x36c   :  { %v5011_v10 = vmax.f32 %v5009_v20, %v5010_v13  ;;  %v5038_v39 = vrot.slane %v5037_v63, 1  ;;  %v5018_v59 = vmax.f32 %v5016_v56, %v5017_v17  ;;  %v5047_v23 = vsel %vm211_vm0, %v17343_v31, -inf }
 0x36d   :  { %v5054_v55 = vsel %vm211_vm0, %v3352_v61, -inf  ;;  %v5061_v1 = vsel %vm211_vm0, %v17349_v30, -inf  ;;  %v17381_v12 = vmax.f32 %v5023_v46, %v5024_v27  ;;  %v17383_v18 = vmax.f32 %v5042_v22, %v5043_v4  ;;  %v17393_v4 = vpop.f32.mrb[17].mxu0 }
 0x36e   :  { %v5048_v42 = vrot.slane %v5047_v23, 4  ;;  %v5055_v52 = vrot.slane %v5054_v55, 4  ;;  %v5062_v11 = vrot.slane %v5061_v1, 4  ;;  %v5068_v25 = vsel %vm211_vm0, %v3353_v32, -inf }
 0x36f   :  { %21812 = vst [vmem:[#allocation65_spill] sm:$0xff] %v17381_v12  ;;  %v5075_v6 = vsel %vm211_vm0, %v17346_v40, -inf  ;;  %v5082_v20 = vsel %vm211_vm0, %v3369_v41, -inf  ;;  %v17389_v31 = vmax.f32 %v5037_v63, %v5038_v39  ;;  %v5069_v61 = vrot.slane %v5068_v25, 4  ;;  %v17395_v40 = vpop.f32.mrb[17].mxu1 }
 0x370   :  { %v5049_v56 = vmax.f32 %v5047_v23, %v5048_v42  ;;  %v5056_v16 = vmax.f32 %v5054_v55, %v5055_v52  ;;  %v5063_v30 = vmax.f32 %v5061_v1, %v5062_v11  ;;  %v5076_v46 = vrot.slane %v5075_v6, 4 }
 0x371   :  { %21813 = vst [vmem:[#allocation66_spill] sm:$0xff] %v17389_v31  ;;  %v5083_v45 = vrot.slane %v5082_v20, 4  ;;  %v5089_v22 = vsel %vm211_vm0, %v17352_v44, -inf  ;;  %v5070_v17 = vmax.f32 %v5068_v25, %v5069_v61  ;;  %v5096_v39 = vsel %vm211_vm0, %v3370_v47, -inf }
 0x372   :  { %v5050_v26 = vrot.slane %v5049_v56, 2  ;;  %v5057_v13 = vrot.slane %v5056_v16, 2  ;;  %v5090_v27 = vrot.slane %v5089_v22, 4  ;;  %v5064_v32 = vrot.slane %v5063_v30, 2 }
 0x373   :  { %v5077_v63 = vmax.f32 %v5075_v6, %v5076_v46  ;;  %v5084_v41 = vmax.f32 %v5082_v20, %v5083_v45  ;;  %v5071_v1 = vrot.slane %v5070_v17, 2  ;;  %v5097_v54 = vrot.slane %v5096_v39, 4 }
 0x374   :  { %v5051_v23 = vmax.f32 %v5049_v56, %v5050_v26  ;;  %v5058_v55 = vmax.f32 %v5056_v16, %v5057_v13  ;;  %v5091_v42 = vmax.f32 %v5089_v22, %v5090_v27  ;;  %v5065_v52 = vmax.f32 %v5063_v30, %v5064_v32 }
 0x375   :  { %v5078_v11 = vrot.slane %v5077_v63, 2  ;;  %v5085_v44 = vrot.slane %v5084_v41, 2  ;;  %v5072_v61 = vmax.f32 %v5070_v17, %v5071_v1  ;;  %v5098_v8 = vmax.f32 %v5096_v39, %v5097_v54 }
 0x376   :  { %v5052_v21 = vrot.slane %v5051_v23, 1  ;;  %v5059_v25 = vrot.slane %v5058_v55, 1  ;;  %v5092_v57 = vrot.slane %v5091_v42, 2  ;;  %v5066_v19 = vrot.slane %v5065_v52, 1 }
 0x377   :  { %v5079_v3 = vmax.f32 %v5077_v63, %v5078_v11  ;;  %v5086_v35 = vmax.f32 %v5084_v41, %v5085_v44  ;;  %v5073_v47 = vrot.slane %v5072_v61, 1  ;;  %v5099_v30 = vrot.slane %v5098_v8, 2 }
 0x378   :  { %v5053_v6 = vmax.f32 %v5051_v23, %v5052_v21  ;;  %v17398_v20 = vmax.f32 %v5058_v55, %v5059_v25  ;;  %v5093_v56 = vmax.f32 %v5091_v42, %v5092_v57  ;;  %v5067_v16 = vmax.f32 %v5065_v52, %v5066_v19 }
 0x379   :  { %v5080_v46 = vrot.slane %v5079_v3, 1  ;;  %v5087_v45 = vrot.slane %v5086_v35, 1  ;;  %v17400_v22 = vmax.f32 %v5072_v61, %v5073_v47  ;;  %v17402_v13 = vmax.f32 %v4997_v29, %v5011_v10 }
 0x37a   :  { %21814 = vst [vmem:[#allocation67_spill] sm:$0xff] %v17398_v20  ;;  %v5094_v26 = vrot.slane %v5093_v56, 1  ;;  %v17404_v17 = vmax.f32 %v5004_v0, %v5018_v59  ;;  %v5100_v63 = vmax.f32 %v5098_v8, %v5099_v30  ;;  %v6595_v41 = vmax.f32 %v5053_v6, %v5067_v16 }
 0x37b   :  { %21815 = vst [vmem:[#allocation68_spill] sm:$0xff] %v17400_v22  ;;  %21816 = vst [vmem:[#allocation69_spill] sm:$0xff] %v17402_v13  ;;  %v5081_v27 = vmax.f32 %v5079_v3, %v5080_v46  ;;  %v5088_v32 = vmax.f32 %v5086_v35, %v5087_v45  ;;  %v2573_v57 = vrot.slane %v17311_v60, %v16498_v50 }
 0x37c   :  { %21817 = vst [vmem:[#allocation70_spill] sm:$0xff] %v17404_v17  ;;  %v5095_v54 = vmax.f32 %v5093_v56, %v5094_v26  ;;  %v5101_v39 = vrot.slane %v5100_v63, 1  ;;  %v2580_v29 = vrot.slane %v17313_v7, %v16498_v50  ;;  %v2587_v3 = vrot.slane %v17315_v53, %v16498_v50 }
 0x37d   :  { %v2594_v35 = vrot.slane %v17317_v58, %v16498_v50  ;;  %v17422_v0 = vadd.f32 %v17103_v15, %v16785_v49  ;;  %v17426_v10 = vadd.f32 %v17142_v34, %v16789_v5  ;;  %v17430_v60 = vadd.f32 %v17208_v28, %v16777_v24 }
 0x37e   :  { %v17418_v8 = vmax.f32 %v5081_v27, %v5095_v54  ;;  %v5102_v7 = vmax.f32 %v5100_v63, %v5101_v39  ;;  %v2595_v59 = vcombine.low %v2573_v57, %v2587_v3  ;;  %v2596_v53 = vcombine.high %v2573_v57, %v2587_v3  ;;  %v14862_v27 = vld [vmem:[#allocation6 + $0x64] ss:$16 sps:$4 sm:$0xff]   ;;  %v14860_v39 = vld [vmem:[#allocation6 + $0x60] ss:$16 sps:$4 sm:$0xff]  }
 0x37f   :  { %v2597_v23 = vcombine.low %v2580_v29, %v2594_v35  ;;  %v2598_v55 = vcombine.high %v2580_v29, %v2594_v35  ;;  %v14104_v1 = vcombine.low %v2587_v3, %v2587_v3  ;;  %v14105_v15 = vcombine.high %v2587_v3, %v2587_v3  ;;  %v14863_v29 = vld [vmem:[#allocation6 + $0x68] ss:$16 sps:$4 sm:$0xff]   ;;  %11465 = vmatprep.subr.bf16.mxu0 %v14862_v27 }
 0x380   :  { %v17434_v58 = vsel %vm6783_vm11, %v17418_v8, %v6595_v41  ;;  %v17436_v42 = vmax.f32 %v5088_v32, %v5102_v7  ;;  %v3378_v34 = vrot.slane %v2595_v59, %v16498_v50  ;;  %v3395_v52 = vrot.slane %v2596_v53, %v16498_v50  ;;  %v14865_v32 = vld [vmem:[#allocation6 + $0x6c] ss:$16 sps:$4 sm:$0xff]   ;;  %11466 = vmatpush1.bf16.msra.mxu0 %v14860_v39 }
 0x381   :  { %21818 = vst [vmem:[#allocation71_spill] sm:$0xff] %v17434_v58  ;;  %v14106_v11 = vcombine.low %v2594_v35, %v2594_v35  ;;  %v3385_v28 = vrot.slane %v14104_v1, %v16498_v50  ;;  %v3402_v44 = vrot.slane %v14105_v15, %v16498_v50  ;;  %v17443_v25 = vrot.slane %v2597_v23, %v16498_v50  ;;  %v17468_v15 = vpop.f32.mrb[18].mxu0 }
 0x382   :  { %21819 = vst [vmem:[#allocation72_spill] sm:$0xff] %v17436_v42  ;;  %v14107_v61 = vcombine.high %v2594_v35, %v2594_v35  ;;  %v3386_v6 = vcombine.high %v3378_v34, %v3378_v34  ;;  %v3403_v47 = vcombine.high %v3395_v52, %v3395_v52  ;;  %v17449_v16 = vrot.slane %v2598_v55, %v16498_v50 }
 0x383   :  { %v17446_v56 = vrot.slane %v14106_v11, %v16498_v50  ;;  %v3387_v46 = vcombine.high %v3385_v28, %v3385_v28  ;;  %v3404_v45 = vcombine.high %v3402_v44, %v3402_v44  ;;  %v5103_v41 = vsel %vm211_vm0, %v3378_v34, -inf  ;;  %11770 = vmatprep.subr.bf16.mxu1 %v14865_v32  ;;  %v17470_v34 = vpop.f32.mrb[18].mxu1 }
 0x384   :  { %v17454_v26 = vrot.slane %v14107_v61, %v16498_v50  ;;  %v5110_v57 = vsel %vm211_vm0, %v3386_v6, -inf  ;;  %v5104_v35 = vrot.slane %v5103_v41, 4  ;;  %v5117_v59 = vsel %vm211_vm0, %v3385_v28, -inf  ;;  %11771 = vmatpush1.bf16.msra.mxu1 %v14863_v29  ;;  %v17472_v28 = vpop.f32.mrb[19].mxu0 }
 0x385   :  { %v5111_v7 = vrot.slane %v5110_v57, 4  ;;  %v5118_v53 = vrot.slane %v5117_v59, 4  ;;  %v5124_v23 = vsel %vm211_vm0, %v3387_v46, -inf  ;;  %v5131_v55 = vsel %vm211_vm0, %v3395_v52, -inf }
 0x386   :  { %v5138_v1 = vsel %vm211_vm0, %v3403_v47, -inf  ;;  %v5105_v11 = vmax.f32 %v5103_v41, %v5104_v35  ;;  %v5125_v6 = vrot.slane %v5124_v23, 4  ;;  %v5132_v21 = vrot.slane %v5131_v55, 4 }
 0x387   :  { %v5112_v61 = vmax.f32 %v5110_v57, %v5111_v7  ;;  %v5119_v27 = vmax.f32 %v5117_v59, %v5118_v53  ;;  %v5139_v32 = vrot.slane %v5138_v1, 4  ;;  %v5145_v46 = vsel %vm211_vm0, %v3402_v44, -inf }
 0x388   :  { %v5152_v52 = vsel %vm211_vm0, %v3404_v45, -inf  ;;  %v5106_v19 = vrot.slane %v5105_v11, 2  ;;  %v5126_v3 = vmax.f32 %v5124_v23, %v5125_v6  ;;  %v5133_v54 = vmax.f32 %v5131_v55, %v5132_v21 }
 0x389   :  { %v5113_v47 = vrot.slane %v5112_v61, 2  ;;  %v5120_v63 = vrot.slane %v5119_v27, 2  ;;  %v5140_v30 = vmax.f32 %v5138_v1, %v5139_v32  ;;  %v5146_v39 = vrot.slane %v5145_v46, 4 }
 0x38a   :  { %v5153_v29 = vrot.slane %v5152_v52, 4  ;;  %v5107_v41 = vmax.f32 %v5105_v11, %v5106_v19  ;;  %v5127_v35 = vrot.slane %v5126_v3, 2  ;;  %v5134_v7 = vrot.slane %v5133_v54, 2 }
 0x38b   :  { %v5114_v57 = vmax.f32 %v5112_v61, %v5113_v47  ;;  %v5121_v31 = vmax.f32 %v5119_v27, %v5120_v63  ;;  %v5141_v12 = vrot.slane %v5140_v30, 2  ;;  %v5147_v59 = vmax.f32 %v5145_v46, %v5146_v39 }
 0x38c   :  { %v5154_v53 = vmax.f32 %v5152_v52, %v5153_v29  ;;  %v5108_v17 = vrot.slane %v5107_v41, 1  ;;  %v5128_v13 = vmax.f32 %v5126_v3, %v5127_v35  ;;  %v5135_v45 = vmax.f32 %v5133_v54, %v5134_v7 }
 0x38d   :  { %v5115_v44 = vrot.slane %v5114_v57, 1  ;;  %v5122_v42 = vrot.slane %v5121_v31, 1  ;;  %v5142_v22 = vmax.f32 %v5140_v30, %v5141_v12  ;;  %v5148_v23 = vrot.slane %v5147_v59, 2 }
 0x38e   :  { %v5155_v21 = vrot.slane %v5154_v53, 2  ;;  %v17476_v55 = vmax.f32 %v5107_v41, %v5108_v17  ;;  %v5129_v19 = vrot.slane %v5128_v13, 1  ;;  %v5136_v11 = vrot.slane %v5135_v45, 1 }
 0x38f   :  { %v17478_v1 = vmax.f32 %v5114_v57, %v5115_v44  ;;  %v5123_v61 = vmax.f32 %v5121_v31, %v5122_v42  ;;  %v5143_v6 = vrot.slane %v5142_v22, 1  ;;  %v5149_v63 = vmax.f32 %v5147_v59, %v5148_v23 }
 0x390   :  { %v5156_v27 = vmax.f32 %v5154_v53, %v5155_v21  ;;  %v5130_v32 = vmax.f32 %v5128_v13, %v5129_v19  ;;  %v17480_v46 = vmax.f32 %v5135_v45, %v5136_v11  ;;  %v5159_v54 = vsel %vm211_vm0, %v17443_v25, -inf }
 0x391   :  { %v21820_v12 = vcombine.high %v17443_v25, %v17443_v25  ;;  %v5144_v30 = vmax.f32 %v5142_v22, %v5143_v6  ;;  %v5150_v3 = vrot.slane %v5149_v63, 1  ;;  %v5160_v47 = vrot.slane %v5159_v54, 4 }
 0x392   :  { %v5157_v52 = vrot.slane %v5156_v27, 1  ;;  %v5173_v31 = vsel %vm211_vm0, %v17446_v56, -inf  ;;  %v21821_v13 = vcombine.high %v17446_v56, %v17446_v56  ;;  %v5187_v29 = vsel %vm211_vm0, %v17449_v16, -inf }
 0x393   :  { %v5166_v17 = vsel %vm211_vm0, %v21820_v12, -inf  ;;  %v5151_v41 = vmax.f32 %v5149_v63, %v5150_v3  ;;  %v5161_v57 = vmax.f32 %v5159_v54, %v5160_v47  ;;  %v5174_v35 = vrot.slane %v5173_v31, 4  ;;  %v17506_v3 = vpop.f32.mrb[19].mxu1 }
 0x394   :  { %v5167_v39 = vrot.slane %v5166_v17, 4  ;;  %v5180_v42 = vsel %vm211_vm0, %v21821_v13, -inf  ;;  %v5158_v25 = vmax.f32 %v5156_v27, %v5157_v52  ;;  %v5188_v59 = vrot.slane %v5187_v29, 4 }
 0x395   :  { %v5181_v7 = vrot.slane %v5180_v42, 4  ;;  %v21822_v53 = vcombine.high %v17449_v16, %v17449_v16  ;;  %v5162_v45 = vrot.slane %v5161_v57, 2  ;;  %v5175_v23 = vmax.f32 %v5173_v31, %v5174_v35 }
 0x396   :  { %v5168_v22 = vmax.f32 %v5166_v17, %v5167_v39  ;;  %v5201_v21 = vsel %vm211_vm0, %v17454_v26, -inf  ;;  %v5189_v6 = vmax.f32 %v5187_v29, %v5188_v59  ;;  %v21823_v17 = vcombine.high %v17454_v26, %v17454_v26 }
 0x397   :  { %v5194_v44 = vsel %vm211_vm0, %v21822_v53, -inf  ;;  %v5182_v11 = vmax.f32 %v5180_v42, %v5181_v7  ;;  %v5202_v63 = vrot.slane %v5201_v21, 4  ;;  %v5163_v27 = vmax.f32 %v5161_v57, %v5162_v45 }
 0x398   :  { %v5195_v56 = vrot.slane %v5194_v44, 4  ;;  %v5169_v19 = vrot.slane %v5168_v22, 2  ;;  %v5176_v54 = vrot.slane %v5175_v23, 2  ;;  %v5208_v16 = vsel %vm211_vm0, %v21823_v17, -inf }
 0x399   :  { %v5183_v47 = vrot.slane %v5182_v11, 2  ;;  %v5190_v39 = vrot.slane %v5189_v6, 2  ;;  %v5203_v31 = vmax.f32 %v5201_v21, %v5202_v63  ;;  %v5164_v13 = vrot.slane %v5163_v27, 1 }
 0x39a   :  { %v5196_v12 = vmax.f32 %v5194_v44, %v5195_v56  ;;  %v5170_v52 = vmax.f32 %v5168_v22, %v5169_v19  ;;  %v5177_v35 = vmax.f32 %v5175_v23, %v5176_v54  ;;  %v5209_v29 = vrot.slane %v5208_v16, 4 }
 0x39b   :  { %v5184_v57 = vmax.f32 %v5182_v11, %v5183_v47  ;;  %v5191_v59 = vmax.f32 %v5189_v6, %v5190_v39  ;;  %v5204_v53 = vrot.slane %v5203_v31, 2  ;;  %v5165_v44 = vmax.f32 %v5163_v27, %v5164_v13 }
 0x39c   :  { %v5197_v42 = vrot.slane %v5196_v12, 2  ;;  %v5171_v7 = vrot.slane %v5170_v52, 1  ;;  %v5178_v45 = vrot.slane %v5177_v35, 1  ;;  %v5210_v56 = vmax.f32 %v5208_v16, %v5209_v29 }
 0x39d   :  { %v5185_v20 = vrot.slane %v5184_v57, 1  ;;  %v5192_v58 = vrot.slane %v5191_v59, 1  ;;  %v5205_v22 = vmax.f32 %v5203_v31, %v5204_v53  ;;  %v17509_v63 = vmax.f32 %v17476_v55, %v5123_v61 }
 0x39e   :  { %v5198_v26 = vmax.f32 %v5196_v12, %v5197_v42  ;;  %v5172_v17 = vmax.f32 %v5170_v52, %v5171_v7  ;;  %v5179_v19 = vmax.f32 %v5177_v35, %v5178_v45  ;;  %v5211_v21 = vrot.slane %v5210_v56, 2 }
 0x39f   :  { %21824 = vst [vmem:[#allocation73_spill] sm:$0xff] %v17509_v63  ;;  %v5186_v23 = vmax.f32 %v5184_v57, %v5185_v20  ;;  %v5193_v54 = vmax.f32 %v5191_v59, %v5192_v58  ;;  %v5206_v9 = vrot.slane %v5205_v22, 1  ;;  %v17512_v11 = vmax.f32 %v17478_v1, %v5130_v32 }
 0x3a0   :  { %v5199_v33 = vrot.slane %v5198_v26, 1  ;;  %v5031_v6 = vrot.slane %v17374_v14, 1  ;;  %v5212_v27 = vmax.f32 %v5210_v56, %v5211_v21  ;;  %v17516_v12 = vmax.f32 %v17480_v46, %v5151_v41 }
 0x3a1   :  { %21825 = vst [vmem:[#allocation74_spill] sm:$0xff] %v17512_v11  ;;  %v17518_v16 = vmax.f32 %v5144_v30, %v5158_v25  ;;  %v5045_v52 = vrot.slane %v17383_v18, 1  ;;  %v5207_v47 = vmax.f32 %v5205_v22, %v5206_v9  ;;  %v17521_v39 = vmax.f32 %v5165_v44, %v5179_v19 }
 0x3a2   :  { %21826 = vst [vmem:[#allocation75_spill] sm:$0xff] %v17516_v12  ;;  %v17523_v55 = vmax.f32 %v5172_v17, %v5186_v23  ;;  %v5200_v20 = vmax.f32 %v5198_v26, %v5199_v33  ;;  %v5213_v58 = vrot.slane %v5212_v27, 1  ;;  %v2264_v1 = vmax.f32 %v17422_v0, 0.0 }
 0x3a3   :  { %21827 = vst [vmem:[#allocation76_spill] sm:$0xff] %v17518_v16  ;;  %21828 = vst [vmem:[#allocation77_spill] sm:$0xff] %v17521_v39  ;;  %v2266_v61 = vmax.f32 %v17426_v10, 0.0  ;;  %v17530_v32 = vsel %vm6787_vm13, %v17281_v43, %v17329_v36  ;;  %v17532_v46 = vmax.f32 %v5193_v54, %v5207_v47  ;;  %v2267_v30 = vmax.f32 %v17430_v60, 0.0 }
 0x3a4   :  { %21829 = vst [vmem:[#allocation78_spill] sm:$0xff] %v17523_v55  ;;  %21830 = vst [vmem:[#allocation79_spill] sm:$0xff] %v17530_v32  ;;  %v2064_v9 = vadd.f32 %v17214_v38, %v16785_v49  ;;  %v5214_v41 = vmax.f32 %v5212_v27, %v5213_v58  ;;  %v21832_v33 = vmax.f32 %v17321_v51, 0.0  ;;  %v21834_v10 = vmax.f32 %v17325_v48, 0.0 }
 0x3a5   :  { %21831 = vst [vmem:[#allocation80_spill] sm:$0xff] %v17532_v46  ;;  %v17544_v36 = vmax.f32 %v17374_v14, %v5031_v6  ;;  %v17547_v35 = vmax.f32 %v17383_v18, %v5045_v52  ;;  %v17559_v14 = vsel %vm6783_vm11, %v17509_v63, %v17418_v8  ;;  %v21840_v52 = vld [vmem:[#allocation51_spill] sm:$0xff] }
 0x3a6   :  { %v2599_v25 = vcombine.low %v21832_v33, %v2264_v1  ;;  %v21833_v0 = vmov %v21832_v33  ;;  %v2601_v13 = vcombine.low %v21834_v10, %v2266_v61  ;;  %v21837_v60 = vmov %v21834_v10  ;;  %21839 = vst [vmem:[#allocation84_spill] sm:$0xff] %v17559_v14  ;;  %v14871_v10 = vld [vmem:[#allocation6 + $0x8c] ss:$16 sps:$4 sm:$0xff]   ;;  %v14872_v33 = vld [vmem:[#allocation6 + $0xa0] ss:$16 sps:$4 sm:$0xff]  }
 0x3a7   :  { %v2600_v31 = vcombine.high %v21833_v0, %v2264_v1  ;;  %21835 = vst [vmem:[#allocation81_spill] sm:$0xff] %v17544_v36  ;;  %21836 = vst [vmem:[#allocation82_spill] sm:$0xff] %v17547_v35  ;;  %v2602_v42 = vcombine.high %v21837_v60, %v2266_v61  ;;  %v2268_v38 = vmax.f32 %v2064_v9, 0.0  ;;  %v17551_v29 = vmax.f32 %v5200_v20, %v5214_v41  ;;  %v21841_v20 = vld [vmem:[#allocation52_spill] sm:$0xff] }
 0x3a8   :  { %v2609_v7 = vrot.slane %v2599_v25, %v16498_v50  ;;  %v2623_v57 = vrot.slane %v2601_v13, %v16498_v50  ;;  %v17578_v47 = vadd.f32 %v21840_v52, %v16781_v37  ;;  %v17582_v58 = vadd.f32 %v21841_v20, %v16789_v5  ;;  %11772 = vmatprep.subr.bf16.mxu1 %v14871_v10  ;;  %v14874_v52 = vld [vmem:[#allocation6 + $0xa4] ss:$16 sps:$4 sm:$0xff]   ;;  %v14877_v20 = vld [vmem:[#allocation6 + $0xac] ss:$16 sps:$4 sm:$0xff]  }
 0x3a9   :  { %21838 = vst [vmem:[#allocation83_spill] sm:$0xff] %v17551_v29  ;;  %v2616_v51 = vrot.slane %v2600_v31, %v16498_v50  ;;  %v2630_v18 = vrot.slane %v2602_v42, %v16498_v50  ;;  %v17562_v59 = vcombine.low %v2267_v30, %v2268_v38  ;;  %v17564_v48 = vcombine.high %v2267_v30, %v2268_v38  ;;  %v14868_v31 = vld [vmem:[#allocation6 + $0x84] ss:$16 sps:$4 sm:$0xff]   ;;  %v14878_v29 = vld [vmem:[#allocation6 + $0xc0] ss:$16 sps:$4 sm:$0xff]  }
 0x3aa   :  { %v2631_v53 = vcombine.low %v2609_v7, %v2623_v57  ;;  %v2632_v44 = vcombine.high %v2609_v7, %v2623_v57  ;;  %v14108_v45 = vcombine.low %v2623_v57, %v2623_v57  ;;  %v14109_v26 = vcombine.high %v2623_v57, %v2623_v57  ;;  %v14866_v7 = vld [vmem:[#allocation6 + $0x80] ss:$16 sps:$4 sm:$0xff]   ;;  %11467 = vmatprep.subr.bf16.mxu0 %v14868_v31 }
 0x3ab   :  { %v2633_v56 = vcombine.low %v2616_v51, %v2630_v18  ;;  %v2634_v17 = vcombine.high %v2616_v51, %v2630_v18  ;;  %v14110_v22 = vcombine.low %v2630_v18, %v2630_v18  ;;  %v14111_v19 = vcombine.high %v2630_v18, %v2630_v18  ;;  %11468 = vmatpush1.bf16.msra.mxu0 %v14866_v7 }
 0x3ac   :  { %v3446_v21 = vrot.slane %v2631_v53, %v16498_v50  ;;  %v3453_v23 = vrot.slane %v14108_v45, %v16498_v50  ;;  %v3463_v8 = vrot.slane %v2632_v44, %v16498_v50  ;;  %v3470_v54 = vrot.slane %v14109_v26, %v16498_v50  ;;  %v14869_v44 = vld [vmem:[#allocation6 + $0x88] ss:$16 sps:$4 sm:$0xff]   ;;  %11469 = vmatprep.subr.bf16.mxu0 %v14874_v52 }
 0x3ad   :  { %v17571_v6 = vrot.slane %v2633_v56, %v16498_v50  ;;  %v17574_v27 = vrot.slane %v14110_v22, %v16498_v50  ;;  %v17589_v25 = vrot.slane %v2634_v17, %v16498_v50  ;;  %v17592_v0 = vrot.slane %v14111_v19, %v16498_v50  ;;  %11773 = vmatpush1.bf16.msra.mxu1 %v14869_v44 }
 0x3ae   :  { %v3454_v1 = vcombine.high %v3446_v21, %v3446_v21  ;;  %v3455_v61 = vcombine.high %v3453_v23, %v3453_v23  ;;  %v3471_v30 = vcombine.high %v3463_v8, %v3463_v8  ;;  %v3472_v9 = vcombine.high %v3470_v54, %v3470_v54  ;;  %11774 = vmatprep.subr.bf16.mxu1 %v14877_v20 }
 0x3af   :  { %v5215_v13 = vsel %vm211_vm0, %v3446_v21, -inf  ;;  %v5229_v42 = vsel %vm211_vm0, %v3453_v23, -inf  ;;  %v5243_v45 = vsel %vm211_vm0, %v3463_v8, -inf  ;;  %v5257_v56 = vsel %vm211_vm0, %v3470_v54, -inf  ;;  %v14875_v54 = vld [vmem:[#allocation6 + $0xa8] ss:$16 sps:$4 sm:$0xff]   ;;  %11470 = vmatpush1.bf16.msra.mxu0 %v14872_v33 }
 0x3b0   :  { %v5222_v60 = vsel %vm211_vm0, %v3454_v1, -inf  ;;  %v5236_v38 = vsel %vm211_vm0, %v3455_v61, -inf  ;;  %v5216_v51 = vrot.slane %v5215_v13, 4  ;;  %v5230_v18 = vrot.slane %v5229_v42, 4 }
 0x3b1   :  { %v5223_v57 = vrot.slane %v5222_v60, 4  ;;  %v5237_v53 = vrot.slane %v5236_v38, 4  ;;  %v5250_v26 = vsel %vm211_vm0, %v3471_v30, -inf  ;;  %v5264_v17 = vsel %vm211_vm0, %v3472_v9, -inf  ;;  %11775 = vmatpush1.bf16.msra.mxu1 %v14875_v54 }
 0x3b2   :  { %v5217_v22 = vmax.f32 %v5215_v13, %v5216_v51  ;;  %v5231_v21 = vmax.f32 %v5229_v42, %v5230_v18  ;;  %v5244_v1 = vrot.slane %v5243_v45, 4  ;;  %v5251_v61 = vrot.slane %v5250_v26, 4  ;;  %v14880_v18 = vld [vmem:[#allocation6 + $0xc4] ss:$16 sps:$4 sm:$0xff]  }
 0x3b3   :  { %v5224_v19 = vmax.f32 %v5222_v60, %v5223_v57  ;;  %v5238_v23 = vmax.f32 %v5236_v38, %v5237_v53  ;;  %v5258_v31 = vrot.slane %v5257_v56, 4  ;;  %v5265_v10 = vrot.slane %v5264_v17, 4  ;;  %v14883_v53 = vld [vmem:[#allocation6 + $0xcc] ss:$16 sps:$4 sm:$0xff]   ;;  %11471 = vmatprep.subr.bf16.mxu0 %v14880_v18  ;;  %v17634_v18 = vpop.f32.mrb[20].mxu0 }
 0x3b4   :  { %v5218_v8 = vrot.slane %v5217_v22, 2  ;;  %v5232_v30 = vrot.slane %v5231_v21, 2  ;;  %v5245_v9 = vmax.f32 %v5243_v45, %v5244_v1  ;;  %v5252_v13 = vmax.f32 %v5250_v26, %v5251_v61  ;;  %v14881_v26 = vld [vmem:[#allocation6 + $0xc8] ss:$16 sps:$4 sm:$0xff]   ;;  %11776 = vmatprep.subr.bf16.mxu1 %v14883_v53  ;;  %11472 = vmatpush1.bf16.msra.mxu0 %v14878_v29  ;;  %v14889_v1 = vld [vmem:[#allocation6 + $0xec] ss:$16 sps:$4 sm:$0xff]  }
 0x3b5   :  { %v5225_v41 = vrot.slane %v5224_v19, 2  ;;  %v5239_v36 = vrot.slane %v5238_v23, 2  ;;  %v5259_v60 = vmax.f32 %v5257_v56, %v5258_v31  ;;  %v5266_v42 = vmax.f32 %v5264_v17, %v5265_v10  ;;  %11777 = vmatpush1.bf16.msra.mxu1 %v14881_v26  ;;  %v14884_v29 = vld [vmem:[#allocation6 + $0xe0] ss:$16 sps:$4 sm:$0xff]  }
 0x3b6   :  { %v5219_v38 = vmax.f32 %v5217_v22, %v5218_v8  ;;  %v5233_v51 = vmax.f32 %v5231_v21, %v5232_v30  ;;  %v5246_v44 = vrot.slane %v5245_v9, 2  ;;  %v5253_v35 = vrot.slane %v5252_v13, 2  ;;  %11778 = vmatprep.subr.bf16.mxu1 %v14889_v1 }
 0x3b7   :  { %v5226_v7 = vmax.f32 %v5224_v19, %v5225_v41  ;;  %v5240_v57 = vmax.f32 %v5238_v23, %v5239_v36  ;;  %v5260_v32 = vrot.slane %v5259_v60, 2  ;;  %v5267_v43 = vrot.slane %v5266_v42, 2  ;;  %v14886_v23 = vld [vmem:[#allocation6 + $0xe4] ss:$16 sps:$4 sm:$0xff]  }
 0x3b8   :  { %v5220_v52 = vrot.slane %v5219_v38, 1  ;;  %v5234_v20 = vrot.slane %v5233_v51, 1  ;;  %v5247_v33 = vmax.f32 %v5245_v9, %v5246_v44  ;;  %v5254_v56 = vmax.f32 %v5252_v13, %v5253_v35  ;;  %11473 = vmatprep.subr.bf16.mxu0 %v14886_v23  ;;  %v14887_v9 = vld [vmem:[#allocation6 + $0xe8] ss:$16 sps:$4 sm:$0xff]  }
 0x3b9   :  { %v5227_v46 = vrot.slane %v5226_v7, 1  ;;  %v5241_v45 = vrot.slane %v5240_v57, 1  ;;  %v17602_v41 = vmax.f32 %v5259_v60, %v5260_v32  ;;  %v17604_v36 = vmax.f32 %v5266_v42, %v5267_v43  ;;  %11474 = vmatpush1.bf16.msra.mxu0 %v14884_v29  ;;  %11779 = vmatpush1.bf16.msra.mxu1 %v14887_v9 }
 0x3ba   :  { %v3505_v17 = vcombine.high %v17589_v25, %v17589_v25  ;;  %v3506_v22 = vcombine.high %v17592_v0, %v17592_v0  ;;  %v17612_v61 = vmax.f32 %v5219_v38, %v5220_v52  ;;  %v17616_v43 = vmax.f32 %v5233_v51, %v5234_v20 }
 0x3bb   :  { %v17614_v32 = vmax.f32 %v5226_v7, %v5227_v46  ;;  %v17618_v35 = vmax.f32 %v5240_v57, %v5241_v45  ;;  %v5271_v31 = vsel %vm211_vm0, %v17571_v6, -inf  ;;  %v21842_v10 = vcombine.high %v17571_v6, %v17571_v6  ;;  %v17644_v45 = vpop.f32.mrb[21].mxu0 }
 0x3bc   :  { %v5285_v30 = vsel %vm211_vm0, %v17574_v27, -inf  ;;  %v21843_v46 = vcombine.high %v17574_v27, %v17574_v27  ;;  %v5248_v13 = vrot.slane %v5247_v33, 1  ;;  %v5255_v60 = vrot.slane %v5254_v56, 1  ;;  %v17636_v27 = vpop.f32.mrb[20].mxu1  ;;  %21845 = vst [vmem:[#allocation52_spill] sm:$0xff] %v17644_v45 }
 0x3bd   :  { %v5278_v8 = vsel %vm211_vm0, %v21842_v10, -inf  ;;  %v5262_v42 = vrot.slane %v17602_v41, 1  ;;  %v5269_v38 = vrot.slane %v17604_v36, 1  ;;  %v5272_v6 = vrot.slane %v5271_v31, 4  ;;  %21844 = vst [vmem:[#allocation51_spill] sm:$0xff] %v17636_v27  ;;  %v17646_v21 = vpop.f32.mrb[21].mxu1 }
 0x3be   :  { %v5292_v54 = vsel %vm211_vm0, %v21843_v46, -inf  ;;  %v5279_v7 = vrot.slane %v5278_v8, 4  ;;  %v5286_v51 = vrot.slane %v5285_v30, 4  ;;  %v5299_v53 = vsel %vm211_vm0, %v17589_v25, -inf  ;;  %21846 = vst [vmem:[#allocation85_spill] sm:$0xff] %v17646_v21 }
 0x3bf   :  { %v5293_v57 = vrot.slane %v5292_v54, 4  ;;  %v5306_v44 = vsel %vm211_vm0, %v3505_v17, -inf  ;;  %v5313_v52 = vsel %vm211_vm0, %v17592_v0, -inf  ;;  %v5320_v20 = vsel %vm211_vm0, %v3506_v22, -inf }
 0x3c0   :  { %v5273_v26 = vmax.f32 %v5271_v31, %v5272_v6  ;;  %v5280_v23 = vmax.f32 %v5278_v8, %v5279_v7  ;;  %v5287_v1 = vmax.f32 %v5285_v30, %v5286_v51  ;;  %v5300_v10 = vrot.slane %v5299_v53, 4 }
 0x3c1   :  { %v5294_v29 = vmax.f32 %v5292_v54, %v5293_v57  ;;  %v5307_v46 = vrot.slane %v5306_v44, 4  ;;  %v5314_v9 = vrot.slane %v5313_v52, 4  ;;  %v5321_v19 = vrot.slane %v5320_v20, 4 }
 0x3c2   :  { %v5249_v25 = vmax.f32 %v5247_v33, %v5248_v13  ;;  %v5256_v14 = vmax.f32 %v5254_v56, %v5255_v60  ;;  %v5274_v17 = vrot.slane %v5273_v26, 2  ;;  %v5288_v55 = vrot.slane %v5287_v1, 2 }
 0x3c3   :  { %v5301_v39 = vmax.f32 %v5299_v53, %v5300_v10  ;;  %v5308_v0 = vmax.f32 %v5306_v44, %v5307_v46  ;;  %v5315_v16 = vmax.f32 %v5313_v52, %v5314_v9  ;;  %v5322_v22 = vmax.f32 %v5320_v20, %v5321_v19  ;;  %v14895_v46 = vld [vmem:[#allocation6 + $0x10c] ss:$16 sps:$4 sm:$0xff]  }
 0x3c4   :  { %v5275_v11 = vmax.f32 %v5273_v26, %v5274_v17  ;;  %v5281_v45 = vrot.slane %v5280_v23, 2  ;;  %v5289_v31 = vmax.f32 %v5287_v1, %v5288_v55  ;;  %v5295_v8 = vrot.slane %v5294_v29, 2  ;;  %11780 = vmatprep.subr.bf16.mxu1 %v14895_v46 }
 0x3c5   :  { %v5302_v30 = vrot.slane %v5301_v39, 2  ;;  %v5309_v54 = vrot.slane %v5308_v0, 2  ;;  %v5316_v6 = vrot.slane %v5315_v16, 2  ;;  %v5323_v7 = vrot.slane %v5322_v22, 2 }
 0x3c6   :  { %v5263_v51 = vmax.f32 %v17602_v41, %v5262_v42  ;;  %v5270_v57 = vmax.f32 %v17604_v36, %v5269_v38  ;;  %v5276_v33 = vrot.slane %v5275_v11, 1  ;;  %v5290_v56 = vrot.slane %v5289_v31, 1 }
 0x3c7   :  { %v5303_v13 = vmax.f32 %v5301_v39, %v5302_v30  ;;  %v5310_v60 = vmax.f32 %v5308_v0, %v5309_v54  ;;  %v5317_v53 = vmax.f32 %v5315_v16, %v5316_v6  ;;  %v5324_v44 = vmax.f32 %v5322_v22, %v5323_v7  ;;  %v17749_v22 = vpop.f32.mrb[22].mxu0 }
 0x3c8   :  { %v17650_v52 = vmax.f32 %v5275_v11, %v5276_v33  ;;  %v17652_v19 = vmax.f32 %v5280_v23, %v5281_v45  ;;  %v17654_v55 = vmax.f32 %v5289_v31, %v5290_v56  ;;  %v17656_v20 = vmax.f32 %v5294_v29, %v5295_v8  ;;  %21859 = vst [vmem:[#allocation94_spill] sm:$0xff] %v17749_v22 }
 0x3c9   :  { %v5304_v26 = vrot.slane %v5303_v13, 1  ;;  %v5311_v1 = vrot.slane %v5310_v60, 1  ;;  %v5318_v10 = vrot.slane %v5317_v53, 1  ;;  %v5325_v41 = vrot.slane %v5324_v44, 1 }
 0x3ca   :  { %21847 = vst [vmem:[#allocation86_spill] sm:$0xff] %v17650_v52  ;;  %21848 = vst [vmem:[#allocation87_spill] sm:$0xff] %v17654_v55  ;;  %v17660_v36 = vmax.f32 %v17612_v61, %v17616_v43  ;;  %v17664_v16 = vmax.f32 %v17614_v32, %v17618_v35  ;;  %v17666_v11 = vmax.f32 %v5249_v25, %v5263_v51  ;;  %v21856_v35 = vmax.f32 %v17578_v47, 0.0 }
 0x3cb   :  { %v17668_v39 = vmax.f32 %v5256_v14, %v5270_v57  ;;  %v17670_v42 = vmax.f32 %v5303_v13, %v5304_v26  ;;  %v17672_v38 = vmax.f32 %v5310_v60, %v5311_v1  ;;  %v17674_v45 = vmax.f32 %v5317_v53, %v5318_v10 }
 0x3cc   :  { %21849 = vst [vmem:[#allocation88_spill] sm:$0xff] %v17660_v36  ;;  %21850 = vst [vmem:[#allocation89_spill] sm:$0xff] %v17664_v16  ;;  %v17676_v23 = vmax.f32 %v5324_v44, %v5325_v41  ;;  %v2645_v43 = vrot.slane %v17562_v59, %v16498_v50  ;;  %v2652_v32 = vrot.slane %v17564_v48, %v16498_v50  ;;  %v21855_v14 = vmax.f32 %v17582_v58, 0.0  ;;  %v14893_v48 = vld [vmem:[#allocation6 + $0x108] ss:$16 sps:$4 sm:$0xff]  }
 0x3cd   :  { %21851 = vst [vmem:[#allocation90_spill] sm:$0xff] %v17666_v11  ;;  %21852 = vst [vmem:[#allocation91_spill] sm:$0xff] %v17668_v39  ;;  %v21858_v17 = vmov %v21856_v35  ;;  %v17698_v59 = vadd.f32 %v17354_v62, %v16777_v24  ;;  %v17705_v8 = vadd.f32 %v17356_v2, %v16781_v37  ;;  %v17711_v47 = vadd.f32 %v17393_v4, %v16785_v49 }
 0x3ce   :  { %21853 = vst [vmem:[#allocation92_spill] sm:$0xff] %v17672_v38  ;;  %21854 = vst [vmem:[#allocation93_spill] sm:$0xff] %v17676_v23  ;;  %v2637_v29 = vcombine.low %v21856_v35, %v21855_v14  ;;  %v21857_v25 = vmov %v21855_v14  ;;  %v17715_v62 = vadd.f32 %v17395_v40, %v16789_v5  ;;  %v17753_v35 = vpop.f32.mrb[23].mxu0  ;;  %11781 = vmatpush1.bf16.msra.mxu1 %v14893_v48 }
 0x3cf   :  { %v2638_v0 = vcombine.high %v21858_v17, %v21857_v25  ;;  %21861 = vst [vmem:[#allocation96_spill] sm:$0xff] %v17753_v35 }
 0x3d0   :  { %v2659_v31 = vrot.slane %v2637_v29, %v16498_v50 }
 0x3d1   :  { %v2666_v30 = vrot.slane %v2638_v0, %v16498_v50 }
 0x3d2   :  { %v2667_v54 = vcombine.low %v2645_v43, %v2659_v31  ;;  %v2668_v6 = vcombine.high %v2645_v43, %v2659_v31  ;;  %v14112_v7 = vcombine.low %v2659_v31, %v2659_v31  ;;  %v14113_v51 = vcombine.high %v2659_v31, %v2659_v31 }
 0x3d3   :  { %v2669_v57 = vcombine.low %v2652_v32, %v2666_v30  ;;  %v2670_v33 = vcombine.high %v2652_v32, %v2666_v30  ;;  %v14114_v2 = vcombine.low %v2666_v30, %v2666_v30  ;;  %v14115_v56 = vcombine.high %v2666_v30, %v2666_v30 }
 0x3d4   :  { %v3514_v13 = vrot.slane %v2667_v54, %v16498_v50  ;;  %v3521_v60 = vrot.slane %v14112_v7, %v16498_v50  ;;  %v3531_v53 = vrot.slane %v2668_v6, %v16498_v50  ;;  %v3538_v4 = vrot.slane %v14113_v51, %v16498_v50 }
 0x3d5   :  { %v17722_v44 = vrot.slane %v2669_v57, %v16498_v50  ;;  %v17725_v40 = vrot.slane %v14114_v2, %v16498_v50  ;;  %v17728_v26 = vrot.slane %v2670_v33, %v16498_v50  ;;  %v17731_v1 = vrot.slane %v14115_v56, %v16498_v50  ;;  %v14892_v57 = vld [vmem:[#allocation6 + $0x104] ss:$16 sps:$4 sm:$0xff]  }
 0x3d6   :  { %v3522_v10 = vcombine.high %v3514_v13, %v3514_v13  ;;  %v3523_v41 = vcombine.high %v3521_v60, %v3521_v60  ;;  %v3539_v43 = vcombine.high %v3531_v53, %v3531_v53  ;;  %v3540_v32 = vcombine.high %v3538_v4, %v3538_v4  ;;  %11475 = vmatprep.subr.bf16.mxu0 %v14892_v57 }
 0x3d7   :  { %v5327_v17 = vsel %vm211_vm0, %v3514_v13, -inf  ;;  %v5341_v31 = vsel %vm211_vm0, %v3521_v60, -inf  ;;  %v5355_v33 = vsel %vm211_vm0, %v3531_v53, -inf  ;;  %v5369_v56 = vsel %vm211_vm0, %v3538_v4, -inf  ;;  %v14890_v13 = vld [vmem:[#allocation6 + $0x100] ss:$16 sps:$4 sm:$0xff]  }
 0x3d8   :  { %v5334_v0 = vsel %vm211_vm0, %v3522_v10, -inf  ;;  %v5348_v30 = vsel %vm211_vm0, %v3523_v41, -inf  ;;  %v5328_v54 = vrot.slane %v5327_v17, 4  ;;  %v5342_v7 = vrot.slane %v5341_v31, 4  ;;  %v17751_v41 = vpop.f32.mrb[22].mxu1  ;;  %11476 = vmatpush1.bf16.msra.mxu0 %v14890_v13 }
 0x3d9   :  { %v5335_v6 = vrot.slane %v5334_v0, 4  ;;  %v5349_v51 = vrot.slane %v5348_v30, 4  ;;  %v5362_v2 = vsel %vm211_vm0, %v3539_v43, -inf  ;;  %v5376_v61 = vsel %vm211_vm0, %v3540_v32, -inf  ;;  %21860 = vst [vmem:[#allocation95_spill] sm:$0xff] %v17751_v41 }
 0x3da   :  { %v5329_v9 = vmax.f32 %v5327_v17, %v5328_v54  ;;  %v5343_v58 = vmax.f32 %v5341_v31, %v5342_v7  ;;  %v5356_v25 = vrot.slane %v5355_v33, 4  ;;  %v5363_v53 = vrot.slane %v5362_v2, 4 }
 0x3db   :  { %v5336_v10 = vmax.f32 %v5334_v0, %v5335_v6  ;;  %v5350_v60 = vmax.f32 %v5348_v30, %v5349_v51  ;;  %v5370_v29 = vrot.slane %v5369_v56, 4  ;;  %v5377_v43 = vrot.slane %v5376_v61, 4 }
 0x3dc   :  { %v5330_v4 = vrot.slane %v5329_v9, 2  ;;  %v5344_v17 = vrot.slane %v5343_v58, 2  ;;  %v5357_v31 = vmax.f32 %v5355_v33, %v5356_v25  ;;  %v5364_v30 = vmax.f32 %v5362_v2, %v5363_v53 }
 0x3dd   :  { %v5337_v32 = vrot.slane %v5336_v10, 2  ;;  %v5351_v0 = vrot.slane %v5350_v60, 2  ;;  %v5371_v54 = vmax.f32 %v5369_v56, %v5370_v29  ;;  %v5378_v6 = vmax.f32 %v5376_v61, %v5377_v43 }
 0x3de   :  { %v5331_v7 = vmax.f32 %v5329_v9, %v5330_v4  ;;  %v5345_v57 = vmax.f32 %v5343_v58, %v5344_v17  ;;  %v5358_v55 = vrot.slane %v5357_v31, 2  ;;  %v5365_v52 = vrot.slane %v5364_v30, 2 }
 0x3df   :  { %v5338_v51 = vmax.f32 %v5336_v10, %v5337_v32  ;;  %v5352_v14 = vmax.f32 %v5350_v60, %v5351_v0  ;;  %v5372_v39 = vrot.slane %v5371_v54, 2  ;;  %v5379_v11 = vrot.slane %v5378_v6, 2 }
 0x3e0   :  { %v5332_v16 = vrot.slane %v5331_v7, 1  ;;  %v5346_v36 = vrot.slane %v5345_v57, 1  ;;  %v5359_v38 = vmax.f32 %v5357_v31, %v5358_v55  ;;  %v5366_v35 = vmax.f32 %v5364_v30, %v5365_v52 }
 0x3e1   :  { %v5339_v13 = vrot.slane %v5338_v51, 1  ;;  %v5353_v23 = vrot.slane %v5352_v14, 1  ;;  %v5373_v46 = vmax.f32 %v5371_v54, %v5372_v39  ;;  %v5380_v25 = vmax.f32 %v5378_v6, %v5379_v11 }
 0x3e2   :  { %v17755_v33 = vmax.f32 %v5331_v7, %v5332_v16  ;;  %v17759_v9 = vmax.f32 %v5345_v57, %v5346_v36  ;;  %v5360_v58 = vrot.slane %v5359_v38, 1  ;;  %v5367_v29 = vrot.slane %v5366_v35, 1 }
 0x3e3   :  { %v17757_v61 = vmax.f32 %v5338_v51, %v5339_v13  ;;  %v17761_v48 = vmax.f32 %v5352_v14, %v5353_v23  ;;  %v5374_v2 = vrot.slane %v5373_v46, 1  ;;  %v5381_v56 = vrot.slane %v5380_v25, 1 }
 0x3e4   :  { %v5383_v10 = vsel %vm211_vm0, %v17722_v44, -inf  ;;  %v21862_v52 = vcombine.high %v17722_v44, %v17722_v44  ;;  %v5397_v16 = vsel %vm211_vm0, %v17725_v40, -inf  ;;  %v21863_v36 = vcombine.high %v17725_v40, %v17725_v40 }
 0x3e5   :  { %v5361_v39 = vmax.f32 %v5359_v38, %v5360_v58  ;;  %v5368_v23 = vmax.f32 %v5366_v35, %v5367_v29  ;;  %v5375_v14 = vmax.f32 %v5373_v46, %v5374_v2  ;;  %v5382_v60 = vmax.f32 %v5380_v25, %v5381_v56  ;;  %v17787_v29 = vpop.f32.mrb[23].mxu1 }
 0x3e6   :  { %v5390_v55 = vsel %vm211_vm0, %v21862_v52, -inf  ;;  %v5404_v11 = vsel %vm211_vm0, %v21863_v36, -inf  ;;  %v5384_v53 = vrot.slane %v5383_v10, 4  ;;  %v5398_v4 = vrot.slane %v5397_v16, 4  ;;  %21866 = vst [vmem:[#allocation97_spill] sm:$0xff] %v17787_v29 }
 0x3e7   :  { %v5391_v43 = vrot.slane %v5390_v55, 4  ;;  %v5405_v32 = vrot.slane %v5404_v11, 4  ;;  %v5411_v44 = vsel %vm211_vm0, %v17728_v26, -inf  ;;  %v21864_v17 = vcombine.high %v17728_v26, %v17728_v26 }
 0x3e8   :  { %v5425_v40 = vsel %vm211_vm0, %v17731_v1, -inf  ;;  %v21865_v38 = vcombine.high %v17731_v1, %v17731_v1  ;;  %v5385_v31 = vmax.f32 %v5383_v10, %v5384_v53  ;;  %v5399_v54 = vmax.f32 %v5397_v16, %v5398_v4 }
 0x3e9   :  { %v5418_v0 = vsel %vm211_vm0, %v21864_v17, -inf  ;;  %v5392_v30 = vmax.f32 %v5390_v55, %v5391_v43  ;;  %v5406_v6 = vmax.f32 %v5404_v11, %v5405_v32  ;;  %v5412_v7 = vrot.slane %v5411_v44, 4 }
 0x3ea   :  { %v5432_v35 = vsel %vm211_vm0, %v21865_v38, -inf  ;;  %v5419_v51 = vrot.slane %v5418_v0, 4  ;;  %v5426_v57 = vrot.slane %v5425_v40, 4  ;;  %v5386_v46 = vrot.slane %v5385_v31, 2 }
 0x3eb   :  { %v5433_v13 = vrot.slane %v5432_v35, 4  ;;  %v5393_v26 = vrot.slane %v5392_v30, 2  ;;  %v5400_v25 = vrot.slane %v5399_v54, 2  ;;  %v5407_v58 = vrot.slane %v5406_v6, 2 }
 0x3ec   :  { %v5413_v2 = vmax.f32 %v5411_v44, %v5412_v7  ;;  %v5420_v56 = vmax.f32 %v5418_v0, %v5419_v51  ;;  %v5427_v52 = vmax.f32 %v5425_v40, %v5426_v57  ;;  %v5387_v36 = vmax.f32 %v5385_v31, %v5386_v46 }
 0x3ed   :  { %v5434_v1 = vmax.f32 %v5432_v35, %v5433_v13  ;;  %v5394_v17 = vmax.f32 %v5392_v30, %v5393_v26  ;;  %v5401_v10 = vmax.f32 %v5399_v54, %v5400_v25  ;;  %v5408_v55 = vmax.f32 %v5406_v6, %v5407_v58 }
 0x3ee   :  { %v5414_v16 = vrot.slane %v5413_v2, 2  ;;  %v5421_v11 = vrot.slane %v5420_v56, 2  ;;  %v5428_v53 = vrot.slane %v5427_v52, 2  ;;  %v5388_v4 = vrot.slane %v5387_v36, 1 }
 0x3ef   :  { %v5435_v43 = vrot.slane %v5434_v1, 2  ;;  %v5395_v32 = vrot.slane %v5394_v17, 1  ;;  %v5402_v38 = vrot.slane %v5401_v10, 1  ;;  %v5409_v41 = vrot.slane %v5408_v55, 1 }
 0x3f0   :  { %v5415_v22 = vmax.f32 %v5413_v2, %v5414_v16  ;;  %v5422_v21 = vmax.f32 %v5420_v56, %v5421_v11  ;;  %v5429_v27 = vmax.f32 %v5427_v52, %v5428_v53  ;;  %v5389_v44 = vmax.f32 %v5387_v36, %v5388_v4 }
 0x3f1   :  { %v5436_v29 = vmax.f32 %v5434_v1, %v5435_v43  ;;  %v5396_v0 = vmax.f32 %v5394_v17, %v5395_v32  ;;  %v5403_v40 = vmax.f32 %v5401_v10, %v5402_v38  ;;  %v5410_v35 = vmax.f32 %v5408_v55, %v5409_v41  ;;  %v21886_v32 = vld [vmem:[#allocation51_spill] sm:$0xff] }
 0x3f2   :  { %v5416_v31 = vrot.slane %v5415_v22, 1  ;;  %v5423_v30 = vrot.slane %v5422_v21, 1  ;;  %v5430_v54 = vrot.slane %v5429_v27, 1  ;;  %v6615_v7 = vmax.f32 %v17755_v33, %v17759_v9 }
 0x3f3   :  { %v5437_v6 = vrot.slane %v5436_v29, 1  ;;  %v17793_v51 = vmax.f32 %v17757_v61, %v17761_v48  ;;  %v17795_v57 = vmax.f32 %v5361_v39, %v5375_v14  ;;  %v17797_v13 = vmax.f32 %v5368_v23, %v5382_v60 }
 0x3f4   :  { %v5417_v46 = vmax.f32 %v5415_v22, %v5416_v31  ;;  %v5424_v26 = vmax.f32 %v5422_v21, %v5423_v30  ;;  %v5431_v25 = vmax.f32 %v5429_v27, %v5430_v54  ;;  %v17799_v41 = vmax.f32 %v5389_v44, %v5403_v40 }
 0x3f5   :  { %21867 = vst [vmem:[#allocation98_spill] sm:$0xff] %v17793_v51  ;;  %21868 = vst [vmem:[#allocation99_spill] sm:$0xff] %v17795_v57  ;;  %v5438_v58 = vmax.f32 %v5436_v29, %v5437_v6  ;;  %v17801_v2 = vmax.f32 %v5396_v0, %v5410_v35  ;;  %v21872_v56 = vmax.f32 %v17670_v42, %v17674_v45  ;;  %v2273_v21 = vmax.f32 %v17705_v8, 0.0 }
 0x3f6   :  { %21869 = vst [vmem:[#allocation100_spill] sm:$0xff] %v17797_v13  ;;  %21870 = vst [vmem:[#allocation101_spill] sm:$0xff] %v17799_v41  ;;  %v17811_v61 = vadd.f32 %v17468_v15, %v16777_v24  ;;  %v17813_v9 = vmax.f32 %v5417_v46, %v5431_v25  ;;  %v2272_v27 = vmax.f32 %v17711_v47, 0.0  ;;  %v17822_v48 = vsel %vm6783_vm11, %v17516_v12, %v17509_v63 }
 0x3f7   :  { %21871 = vst [vmem:[#allocation102_spill] sm:$0xff] %v17801_v2  ;;  %v17807_v33 = vsel %vm6783_vm11, %v6615_v7, %v21872_v56  ;;  %v17815_v22 = vmax.f32 %v5424_v26, %v5438_v58  ;;  %21876 = vst [vmem:[#allocation106_spill] sm:$0xff] %v17822_v48  ;;  %v6971_v42 = vsel %vm6783_vm11, %v17799_v41, %v17795_v57  ;;  %v2274_v15 = vmax.f32 %v17715_v62, 0.0 }
 0x3f8   :  { %21873 = vst [vmem:[#allocation103_spill] sm:$0xff] %v17807_v33  ;;  %21874 = vst [vmem:[#allocation104_spill] sm:$0xff] %v17813_v9  ;;  %v17830_v45 = vadd.f32 %v17470_v34, %v16781_v37  ;;  %v21877_v39 = vrot.slane %v17652_v19, 1  ;;  %v21879_v47 = vrot.slane %v17656_v20, 1  ;;  %v17844_v14 = vsel %vm6783_vm11, %v17795_v57, %v6615_v7 }
 0x3f9   :  { %21875 = vst [vmem:[#allocation105_spill] sm:$0xff] %v17815_v22  ;;  %21881 = vst [vmem:[#allocation109_spill] sm:$0xff] %v17844_v14  ;;  %v21882_v62 = vmax.f32 %v17698_v59, 0.0  ;;  %v17851_v34 = vsel %vm6783_vm11, %v17801_v2, %v17797_v13  ;;  %v2673_v52 = vcombine.low %v2273_v21, %v2274_v15  ;;  %v2674_v1 = vcombine.high %v2273_v21, %v2274_v15  ;;  %v14898_v15 = vld [vmem:[#allocation6 + $0x124] ss:$16 sps:$4 sm:$0xff]  }
 0x3fa   :  { %v17835_v8 = vmax.f32 %v17652_v19, %v21877_v39  ;;  %v17840_v23 = vmax.f32 %v17656_v20, %v21879_v47  ;;  %21883 = vst [vmem:[#allocation110_spill] sm:$0xff] %v17851_v34  ;;  %v17857_v20 = vsel %vm6785_vm12, %v17813_v9, %v6971_v42  ;;  %v17862_v36 = vsel %vm6783_vm11, %v17813_v9, %v17799_v41  ;;  %v14901_v39 = vld [vmem:[#allocation6 + $0x12c] ss:$16 sps:$4 sm:$0xff]  }
 0x3fb   :  { %v2671_v60 = vcombine.low %v21882_v62, %v2272_v27  ;;  %v21884_v19 = vmov %v21882_v62  ;;  %21885 = vst [vmem:[#allocation111_spill] sm:$0xff] %v17857_v20  ;;  %v2695_v59 = vrot.slane %v2673_v52, %v16498_v50  ;;  %v2702_v16 = vrot.slane %v2674_v1, %v16498_v50  ;;  %v14899_v52 = vld [vmem:[#allocation6 + $0x128] ss:$16 sps:$4 sm:$0xff]   ;;  %11477 = vmatprep.subr.bf16.mxu0 %v14898_v15 }
 0x3fc   :  { %21878 = vst [vmem:[#allocation107_spill] sm:$0xff] %v17835_v8  ;;  %21880 = vst [vmem:[#allocation108_spill] sm:$0xff] %v17840_v23  ;;  %v2672_v29 = vcombine.high %v21884_v19, %v2272_v27  ;;  %v17872_v53 = vadd.f32 %v17472_v28, %v16785_v49  ;;  %v17876_v43 = vadd.f32 %v17506_v3, %v16789_v5  ;;  %11782 = vmatprep.subr.bf16.mxu1 %v14901_v39  ;;  %v14905_v15 = vld [vmem:[#allocation6 + $0x148] ss:$16 sps:$4 sm:$0xff]  }
 0x3fd   :  { %v2681_v17 = vrot.slane %v2671_v60, %v16498_v50  ;;  %v17880_v4 = vadd.f32 %v17634_v18, %v16777_v24  ;;  %v17884_v38 = vadd.f32 %v21886_v32, %v16781_v37  ;;  %v14116_v31 = vcombine.low %v2695_v59, %v2695_v59  ;;  %11783 = vmatpush1.bf16.msra.mxu1 %v14899_v52 }
 0x3fe   :  { %v2688_v55 = vrot.slane %v2672_v29, %v16498_v50  ;;  %v14117_v30 = vcombine.high %v2695_v59, %v2695_v59  ;;  %v14118_v28 = vcombine.low %v2702_v16, %v2702_v16  ;;  %v14119_v54 = vcombine.high %v2702_v16, %v2702_v16  ;;  %v14896_v29 = vld [vmem:[#allocation6 + $0x120] ss:$16 sps:$4 sm:$0xff]  }
 0x3ff   :  { %v2703_v44 = vcombine.low %v2681_v17, %v2695_v59  ;;  %v2704_v0 = vcombine.high %v2681_v17, %v2695_v59  ;;  %v3589_v46 = vrot.slane %v14116_v31, %v16498_v50  ;;  %11478 = vmatpush1.bf16.msra.mxu0 %v14896_v29  ;;  %v14907_v29 = vld [vmem:[#allocation6 + $0x14c] ss:$16 sps:$4 sm:$0xff]  }
 0x400   :  { %v2705_v40 = vcombine.low %v2688_v55, %v2702_v16  ;;  %v2706_v35 = vcombine.high %v2688_v55, %v2702_v16  ;;  %v3606_v26 = vrot.slane %v14117_v30, %v16498_v50  ;;  %v17897_v25 = vrot.slane %v14118_v28, %v16498_v50  ;;  %v14904_v28 = vld [vmem:[#allocation6 + $0x144] ss:$16 sps:$4 sm:$0xff]   ;;  %11784 = vmatprep.subr.bf16.mxu1 %v14907_v29 }
 0x401   :  { %v3582_v6 = vrot.slane %v2703_v44, %v16498_v50  ;;  %v3599_v3 = vrot.slane %v2704_v0, %v16498_v50  ;;  %v17903_v42 = vrot.slane %v14119_v54, %v16498_v50  ;;  %v3591_v47 = vcombine.high %v3589_v46, %v3589_v46  ;;  %11479 = vmatprep.subr.bf16.mxu0 %v14904_v28 }
 0x402   :  { %v17889_v7 = vrot.slane %v2705_v40, %v16498_v50  ;;  %v17892_v18 = vrot.slane %v2706_v35, %v16498_v50  ;;  %v3608_v62 = vcombine.high %v3606_v26, %v3606_v26  ;;  %v5453_v55 = vsel %vm211_vm0, %v3589_v46, -inf  ;;  %11785 = vmatpush1.bf16.msra.mxu1 %v14905_v15  ;;  %v14914_v15 = vld [vmem:[#allocation6 + $0x180] ss:$16 sps:$4 sm:$0xff]  }
 0x403   :  { %v3590_v56 = vcombine.high %v3582_v6, %v3582_v6  ;;  %v3607_v21 = vcombine.high %v3599_v3, %v3599_v3  ;;  %v5439_v1 = vsel %vm211_vm0, %v3582_v6, -inf  ;;  %v5467_v59 = vsel %vm211_vm0, %v3599_v3, -inf }
 0x404   :  { %v5440_v16 = vrot.slane %v5439_v1, 4  ;;  %v5454_v44 = vrot.slane %v5453_v55, 4  ;;  %v5460_v0 = vsel %vm211_vm0, %v3591_v47, -inf  ;;  %v5468_v35 = vrot.slane %v5467_v59, 4 }
 0x405   :  { %v5446_v17 = vsel %vm211_vm0, %v3590_v56, -inf  ;;  %v5461_v40 = vrot.slane %v5460_v0, 4  ;;  %v5474_v31 = vsel %vm211_vm0, %v3607_v21, -inf  ;;  %v5481_v30 = vsel %vm211_vm0, %v3606_v26, -inf  ;;  %v14902_v56 = vld [vmem:[#allocation6 + $0x140] ss:$16 sps:$4 sm:$0xff]  }
 0x406   :  { %v5447_v32 = vrot.slane %v5446_v17, 4  ;;  %v5441_v54 = vmax.f32 %v5439_v1, %v5440_v16  ;;  %v5455_v46 = vmax.f32 %v5453_v55, %v5454_v44  ;;  %v5475_v3 = vrot.slane %v5474_v31, 4  ;;  %11480 = vmatpush1.bf16.msra.mxu0 %v14902_v56  ;;  %v14910_v55 = vld [vmem:[#allocation6 + $0x164] ss:$16 sps:$4 sm:$0xff]  }
 0x407   :  { %v5462_v39 = vmax.f32 %v5460_v0, %v5461_v40  ;;  %v5469_v11 = vmax.f32 %v5467_v59, %v5468_v35  ;;  %v5482_v10 = vrot.slane %v5481_v30, 4  ;;  %v5488_v47 = vsel %vm211_vm0, %v3608_v62, -inf  ;;  %v14908_v0 = vld [vmem:[#allocation6 + $0x160] ss:$16 sps:$4 sm:$0xff]   ;;  %v14911_v62 = vld [vmem:[#allocation6 + $0x168] ss:$16 sps:$4 sm:$0xff]   ;;  %11481 = vmatprep.subr.bf16.mxu0 %v14910_v55 }
 0x408   :  { %v5448_v6 = vmax.f32 %v5446_v17, %v5447_v32  ;;  %v5442_v52 = vrot.slane %v5441_v54, 2  ;;  %v5456_v19 = vrot.slane %v5455_v46, 2  ;;  %v5476_v21 = vmax.f32 %v5474_v31, %v5475_v3  ;;  %v14913_v31 = vld [vmem:[#allocation6 + $0x16c] ss:$16 sps:$4 sm:$0xff]  }
 0x409   :  { %v5463_v26 = vrot.slane %v5462_v39, 2  ;;  %v5470_v60 = vrot.slane %v5469_v11, 2  ;;  %v5483_v1 = vmax.f32 %v5481_v30, %v5482_v10  ;;  %v5489_v17 = vrot.slane %v5488_v47, 4  ;;  %11786 = vmatprep.subr.bf16.mxu1 %v14913_v31 }
 0x40a   :  { %v5449_v58 = vrot.slane %v5448_v6, 2  ;;  %v5443_v16 = vmax.f32 %v5441_v54, %v5442_v52  ;;  %v5457_v44 = vmax.f32 %v5455_v46, %v5456_v19  ;;  %v5477_v59 = vrot.slane %v5476_v21, 2  ;;  %11482 = vmatpush1.bf16.msra.mxu0 %v14908_v0  ;;  %v14916_v19 = vld [vmem:[#allocation6 + $0x184] ss:$16 sps:$4 sm:$0xff]   ;;  %11787 = vmatpush1.bf16.msra.mxu1 %v14911_v62 }
 0x40b   :  { %v5464_v40 = vmax.f32 %v5462_v39, %v5463_v26  ;;  %v5471_v35 = vmax.f32 %v5469_v11, %v5470_v60  ;;  %v5484_v28 = vrot.slane %v5483_v1, 2  ;;  %v5490_v27 = vmax.f32 %v5488_v47, %v5489_v17  ;;  %v14917_v39 = vld [vmem:[#allocation6 + $0x188] ss:$16 sps:$4 sm:$0xff]   ;;  %11483 = vmatprep.subr.bf16.mxu0 %v14916_v19  ;;  %v14922_v62 = vld [vmem:[#allocation6 + $0x1a4] ss:$16 sps:$4 sm:$0xff]  }
 0x40c   :  { %v5450_v32 = vmax.f32 %v5448_v6, %v5449_v58  ;;  %v5444_v3 = vrot.slane %v5443_v16, 1  ;;  %v5458_v8 = vrot.slane %v5457_v44, 1  ;;  %v5478_v10 = vmax.f32 %v5476_v21, %v5477_v59  ;;  %v14925_v19 = vld [vmem:[#allocation6 + $0x1ac] ss:$16 sps:$4 sm:$0xff]  }
 0x40d   :  { %v5465_v30 = vrot.slane %v5464_v40, 1  ;;  %v5472_v29 = vrot.slane %v5471_v35, 1  ;;  %v5485_v54 = vmax.f32 %v5483_v1, %v5484_v28  ;;  %v5491_v58 = vrot.slane %v5490_v27, 2  ;;  %v14919_v1 = vld [vmem:[#allocation6 + $0x18c] ss:$16 sps:$4 sm:$0xff]  }
 0x40e   :  { %v5451_v56 = vrot.slane %v5450_v32, 1  ;;  %v3642_v6 = vcombine.high %v17903_v42, %v17903_v42  ;;  %v17919_v46 = vmax.f32 %v5443_v16, %v5444_v3  ;;  %v5479_v60 = vrot.slane %v5478_v10, 1  ;;  %11484 = vmatpush1.bf16.msra.mxu0 %v14914_v15  ;;  %11788 = vmatprep.subr.bf16.mxu1 %v14919_v1 }
 0x40f   :  { %v17923_v47 = vmax.f32 %v5457_v44, %v5458_v8  ;;  %v17925_v52 = vmax.f32 %v5464_v40, %v5465_v30  ;;  %v5486_v21 = vrot.slane %v5485_v54, 1  ;;  %v5492_v26 = vmax.f32 %v5490_v27, %v5491_v58  ;;  %11789 = vmatpush1.bf16.msra.mxu1 %v14917_v39  ;;  %11485 = vmatprep.subr.bf16.mxu0 %v14922_v62  ;;  %v14923_v58 = vld [vmem:[#allocation6 + $0x1a8] ss:$16 sps:$4 sm:$0xff]   ;;  %v17953_v39 = vpop.f32.mrb[24].mxu0 }
 0x410   :  { %v17921_v11 = vmax.f32 %v5450_v32, %v5451_v56  ;;  %v17927_v17 = vmax.f32 %v5471_v35, %v5472_v29  ;;  %v5495_v55 = vsel %vm211_vm0, %v17889_v7, -inf  ;;  %v21887_v16 = vcombine.high %v17889_v7, %v17889_v7  ;;  %v14920_v56 = vld [vmem:[#allocation6 + $0x1a0] ss:$16 sps:$4 sm:$0xff]   ;;  %11790 = vmatprep.subr.bf16.mxu1 %v14925_v19  ;;  %v17958_v62 = vpop.f32.mrb[25].mxu0 }
 0x411   :  { %v5509_v8 = vsel %vm211_vm0, %v17897_v25, -inf  ;;  %v17937_v44 = vmax.f32 %v5478_v10, %v5479_v60  ;;  %v17939_v59 = vmax.f32 %v5485_v54, %v5486_v21  ;;  %v5496_v27 = vrot.slane %v5495_v55, 4 }
 0x412   :  { %v5502_v32 = vsel %vm211_vm0, %v21887_v16, -inf  ;;  %v5510_v40 = vrot.slane %v5509_v8, 4  ;;  %v21888_v35 = vcombine.high %v17897_v25, %v17897_v25  ;;  %v5523_v28 = vsel %vm211_vm0, %v17892_v18, -inf  ;;  %11486 = vmatpush1.bf16.msra.mxu0 %v14920_v56 }
 0x413   :  { %v5503_v0 = vrot.slane %v5502_v32, 4  ;;  %v21889_v31 = vcombine.high %v17892_v18, %v17892_v18  ;;  %v5493_v10 = vrot.slane %v5492_v26, 1  ;;  %v5497_v30 = vmax.f32 %v5495_v55, %v5496_v27  ;;  %v17955_v55 = vpop.f32.mrb[24].mxu1  ;;  %11791 = vmatpush1.bf16.msra.mxu1 %v14923_v58 }
 0x414   :  { %v5516_v7 = vsel %vm211_vm0, %v21888_v35, -inf  ;;  %v5511_v25 = vmax.f32 %v5509_v8, %v5510_v40  ;;  %v5524_v60 = vrot.slane %v5523_v28, 4  ;;  %v5537_v21 = vsel %vm211_vm0, %v17903_v42, -inf  ;;  %v17960_v40 = vpop.f32.mrb[25].mxu1 }
 0x415   :  { %v5530_v3 = vsel %vm211_vm0, %v21889_v31, -inf  ;;  %v5504_v29 = vmax.f32 %v5502_v32, %v5503_v0  ;;  %v5517_v54 = vrot.slane %v5516_v7, 4  ;;  %v5498_v1 = vrot.slane %v5497_v30, 2 }
 0x416   :  { %v5531_v15 = vrot.slane %v5530_v3, 4  ;;  %v5538_v35 = vrot.slane %v5537_v21, 4  ;;  %v5512_v32 = vrot.slane %v5511_v25, 2  ;;  %v5525_v27 = vmax.f32 %v5523_v28, %v5524_v60 }
 0x417   :  { %v5505_v18 = vrot.slane %v5504_v29, 2  ;;  %v5518_v16 = vmax.f32 %v5516_v7, %v5517_v54  ;;  %v5544_v8 = vsel %vm211_vm0, %v3642_v6, -inf  ;;  %v5499_v42 = vmax.f32 %v5497_v30, %v5498_v1 }
 0x418   :  { %v5532_v0 = vmax.f32 %v5530_v3, %v5531_v15  ;;  %v5539_v7 = vmax.f32 %v5537_v21, %v5538_v35  ;;  %v5513_v54 = vmax.f32 %v5511_v25, %v5512_v32  ;;  %v5526_v19 = vrot.slane %v5525_v27, 2 }
 0x419   :  { %v5506_v31 = vmax.f32 %v5504_v29, %v5505_v18  ;;  %v5519_v56 = vrot.slane %v5518_v16, 2  ;;  %v5545_v48 = vrot.slane %v5544_v8, 4  ;;  %v5500_v34 = vrot.slane %v5499_v42, 1 }
 0x41a   :  { %v5533_v23 = vrot.slane %v5532_v0, 2  ;;  %v5540_v28 = vrot.slane %v5539_v7, 2  ;;  %v5494_v3 = vmax.f32 %v5492_v26, %v5493_v10  ;;  %v5514_v60 = vrot.slane %v5513_v54, 1 }
 0x41b   :  { %v5507_v20 = vrot.slane %v5506_v31, 1  ;;  %v5520_v14 = vmax.f32 %v5518_v16, %v5519_v56  ;;  %v5527_v6 = vmax.f32 %v5525_v27, %v5526_v19  ;;  %v5546_v58 = vmax.f32 %v5544_v8, %v5545_v48 }
 0x41c   :  { %v5501_v15 = vmax.f32 %v5499_v42, %v5500_v34  ;;  %v5541_v41 = vmax.f32 %v5539_v7, %v5540_v28  ;;  %v5515_v30 = vmax.f32 %v5513_v54, %v5514_v60  ;;  %v17962_v1 = vmax.f32 %v5532_v0, %v5533_v23  ;;  %v21894_v23 = vld [vmem:[#allocation52_spill] sm:$0xff]  ;;  %v21906_v28 = vld [vmem:[#allocation85_spill] sm:$0xff] }
 0x41d   :  { %v5508_v9 = vmax.f32 %v5506_v31, %v5507_v20  ;;  %v5521_v13 = vrot.slane %v5520_v14, 1  ;;  %v5528_v29 = vrot.slane %v5527_v6, 1  ;;  %v2278_v25 = vmax.f32 %v17876_v43, 0.0 }
 0x41e   :  { %v5542_v18 = vrot.slane %v5541_v41, 1  ;;  %v17967_v16 = vmax.f32 %v17919_v46, %v17923_v47  ;;  %v17971_v26 = vmax.f32 %v17921_v11, %v17925_v52  ;;  %v5547_v34 = vrot.slane %v5546_v58, 2 }
 0x41f   :  { %v5522_v21 = vmax.f32 %v5520_v14, %v5521_v13  ;;  %v17973_v48 = vmax.f32 %v5527_v6, %v5528_v29  ;;  %v17977_v20 = vmax.f32 %v17927_v17, %v17939_v59  ;;  %v17981_v43 = vadd.f32 %v21894_v23, %v16785_v49  ;;  %v21908_v6 = vld [vmem:[#allocation95_spill] sm:$0xff]  ;;  %v21910_v29 = vld [vmem:[#allocation97_spill] sm:$0xff] }
 0x420   :  { %21890 = vst [vmem:[#allocation51_spill] sm:$0xff] %v17967_v16  ;;  %21891 = vst [vmem:[#allocation112_spill] sm:$0xff] %v17971_v26  ;;  %v17983_v13 = vmax.f32 %v5541_v41, %v5542_v18  ;;  %v17986_v14 = vmax.f32 %v17937_v44, %v5494_v3  ;;  %v17988_v46 = vmax.f32 %v5501_v15, %v5515_v30  ;;  %v21900_v52 = vmax.f32 %v17872_v53, 0.0  ;;  %v21909_v15 = vld [vmem:[#allocation96_spill] sm:$0xff] }
 0x421   :  { %21892 = vst [vmem:[#allocation113_spill] sm:$0xff] %v17973_v48  ;;  %21893 = vst [vmem:[#allocation114_spill] sm:$0xff] %v17977_v20  ;;  %v17990_v11 = vmax.f32 %v5508_v9, %v5522_v21  ;;  %v17995_v47 = vsel %vm6783_vm11, %v17815_v22, %v17801_v2  ;;  %v21901_v17 = vmax.f32 %v17811_v61, 0.0  ;;  %v21904_v27 = vmax.f32 %v17830_v45, 0.0  ;;  %v21907_v45 = vld [vmem:[#allocation94_spill] sm:$0xff] }
 0x422   :  { %21895 = vst [vmem:[#allocation52_spill] sm:$0xff] %v17983_v13  ;;  %21896 = vst [vmem:[#allocation115_spill] sm:$0xff] %v17986_v14  ;;  %v21902_v41 = vmov %v21900_v52  ;;  %v18013_v31 = vmax.f32 %v5546_v58, %v5547_v34  ;;  %v18023_v3 = vadd.f32 %v21906_v28, %v16789_v5  ;;  %v18027_v60 = vadd.f32 %v21907_v45, %v16777_v24  ;;  %v14926_v28 = vld [vmem:[#allocation6 + $0x1c0] ss:$16 sps:$4 sm:$0xff]   ;;  %v14929_v45 = vld [vmem:[#allocation6 + $0x1c8] ss:$16 sps:$4 sm:$0xff]  }
 0x423   :  { %21897 = vst [vmem:[#allocation116_spill] sm:$0xff] %v17988_v46  ;;  %21898 = vst [vmem:[#allocation117_spill] sm:$0xff] %v17990_v11  ;;  %v2707_v59 = vcombine.low %v21901_v17, %v21900_v52  ;;  %v21903_v10 = vmov %v21901_v17  ;;  %v2709_v0 = vcombine.low %v21904_v27, %v2278_v25  ;;  %v21905_v8 = vmov %v21904_v27 }
 0x424   :  { %21899 = vst [vmem:[#allocation118_spill] sm:$0xff] %v17995_v47  ;;  %v2708_v44 = vcombine.high %v21903_v10, %v21902_v41  ;;  %v2710_v42 = vcombine.high %v21905_v8, %v2278_v25  ;;  %v18031_v58 = vadd.f32 %v21908_v6, %v16781_v37  ;;  %v18035_v30 = vadd.f32 %v21909_v15, %v16785_v49  ;;  %v14928_v8 = vld [vmem:[#allocation6 + $0x1c4] ss:$16 sps:$4 sm:$0xff]  }
 0x425   :  { %v2717_v53 = vrot.slane %v2707_v59, %v16498_v50  ;;  %v2731_v7 = vrot.slane %v2709_v0, %v16498_v50  ;;  %v18039_v25 = vadd.f32 %v21910_v29, %v16789_v5  ;;  %11487 = vmatprep.subr.bf16.mxu0 %v14928_v8 }
 0x426   :  { %v2724_v61 = vrot.slane %v2708_v44, %v16498_v50  ;;  %v2738_v54 = vrot.slane %v2710_v42, %v16498_v50  ;;  %v14931_v42 = vld [vmem:[#allocation6 + $0x1cc] ss:$16 sps:$4 sm:$0xff]   ;;  %11488 = vmatpush1.bf16.msra.mxu0 %v14926_v28 }
 0x427   :  { %v2739_v21 = vcombine.low %v2717_v53, %v2731_v7  ;;  %v2740_v18 = vcombine.high %v2717_v53, %v2731_v7  ;;  %v14120_v52 = vcombine.low %v2731_v7, %v2731_v7  ;;  %v14121_v17 = vcombine.high %v2731_v7, %v2731_v7  ;;  %11792 = vmatprep.subr.bf16.mxu1 %v14931_v42 }
 0x428   :  { %v2741_v34 = vcombine.low %v2724_v61, %v2738_v54  ;;  %v2742_v23 = vcombine.high %v2724_v61, %v2738_v54  ;;  %v14122_v59 = vcombine.low %v2738_v54, %v2738_v54  ;;  %v14123_v41 = vcombine.high %v2738_v54, %v2738_v54  ;;  %11793 = vmatpush1.bf16.msra.mxu1 %v14929_v45 }
 0x429   :  { %v3650_v10 = vrot.slane %v2739_v21, %v16498_v50  ;;  %v3667_v44 = vrot.slane %v2740_v18, %v16498_v50  ;;  %v3657_v53 = vrot.slane %v14120_v52, %v16498_v50  ;;  %v3674_v61 = vrot.slane %v14121_v17, %v16498_v50  ;;  %v18061_v18 = vpop.f32.mrb[26].mxu0 }
 0x42a   :  { %v18044_v27 = vrot.slane %v2741_v34, %v16498_v50  ;;  %v18047_v0 = vrot.slane %v2742_v23, %v16498_v50  ;;  %v18052_v7 = vrot.slane %v14122_v59, %v16498_v50  ;;  %v18055_v54 = vrot.slane %v14123_v41, %v16498_v50  ;;  %v18063_v34 = vpop.f32.mrb[26].mxu1  ;;  %v18069_v41 = vpop.f32.mrb[27].mxu0 }
 0x42b   :  { %v3658_v6 = vcombine.high %v3650_v10, %v3650_v10  ;;  %v3675_v15 = vcombine.high %v3667_v44, %v3667_v44  ;;  %v3659_v23 = vcombine.high %v3657_v53, %v3657_v53  ;;  %v3676_v52 = vcombine.high %v3674_v61, %v3674_v61  ;;  %21911 = vst [vmem:[#allocation85_spill] sm:$0xff] %v18069_v41 }
 0x42c   :  { %v5551_v32 = vsel %vm211_vm0, %v3650_v10, -inf  ;;  %v5565_v56 = vsel %vm211_vm0, %v3657_v53, -inf  ;;  %v5579_v35 = vsel %vm211_vm0, %v3667_v44, -inf  ;;  %v5593_v13 = vsel %vm211_vm0, %v3674_v61, -inf }
 0x42d   :  { %v5558_v9 = vsel %vm211_vm0, %v3658_v6, -inf  ;;  %v5552_v8 = vrot.slane %v5551_v32, 4  ;;  %v5566_v21 = vrot.slane %v5565_v56, 4  ;;  %v5572_v17 = vsel %vm211_vm0, %v3659_v23, -inf }
 0x42e   :  { %v5559_v19 = vrot.slane %v5558_v9, 4  ;;  %v5573_v29 = vrot.slane %v5572_v17, 4  ;;  %v5580_v59 = vrot.slane %v5579_v35, 4  ;;  %v5586_v42 = vsel %vm211_vm0, %v3675_v15, -inf }
 0x42f   :  { %v5553_v10 = vmax.f32 %v5551_v32, %v5552_v8  ;;  %v5567_v6 = vmax.f32 %v5565_v56, %v5566_v21  ;;  %v5587_v11 = vrot.slane %v5586_v42, 4  ;;  %v5594_v44 = vrot.slane %v5593_v13, 4 }
 0x430   :  { %v5560_v48 = vmax.f32 %v5558_v9, %v5559_v19  ;;  %v5574_v53 = vmax.f32 %v5572_v17, %v5573_v29  ;;  %v5581_v47 = vmax.f32 %v5579_v35, %v5580_v59  ;;  %v5600_v28 = vsel %vm211_vm0, %v3676_v52, -inf }
 0x431   :  { %v5554_v45 = vrot.slane %v5553_v10, 2  ;;  %v5568_v14 = vrot.slane %v5567_v6, 2  ;;  %v5588_v26 = vmax.f32 %v5586_v42, %v5587_v11  ;;  %v5595_v2 = vmax.f32 %v5593_v13, %v5594_v44 }
 0x432   :  { %v5561_v46 = vrot.slane %v5560_v48, 2  ;;  %v5575_v23 = vrot.slane %v5574_v53, 2  ;;  %v5582_v22 = vrot.slane %v5581_v47, 2  ;;  %v5601_v51 = vrot.slane %v5600_v28, 4 }
 0x433   :  { %v5555_v15 = vmax.f32 %v5553_v10, %v5554_v45  ;;  %v5569_v61 = vmax.f32 %v5567_v6, %v5568_v14  ;;  %v5589_v32 = vrot.slane %v5588_v26, 2  ;;  %v5596_v19 = vrot.slane %v5595_v2, 2 }
 0x434   :  { %v5562_v57 = vmax.f32 %v5560_v48, %v5561_v46  ;;  %v5576_v9 = vmax.f32 %v5574_v53, %v5575_v23  ;;  %v5583_v56 = vmax.f32 %v5581_v47, %v5582_v22  ;;  %v5602_v29 = vmax.f32 %v5600_v28, %v5601_v51 }
 0x435   :  { %v5556_v35 = vrot.slane %v5555_v15, 1  ;;  %v5570_v17 = vrot.slane %v5569_v61, 1  ;;  %v5590_v52 = vmax.f32 %v5588_v26, %v5589_v32  ;;  %v5597_v33 = vmax.f32 %v5595_v2, %v5596_v19 }
 0x436   :  { %v5563_v21 = vrot.slane %v5562_v57, 1  ;;  %v5577_v59 = vrot.slane %v5576_v9, 1  ;;  %v5584_v8 = vrot.slane %v5583_v56, 1  ;;  %v5603_v11 = vrot.slane %v5602_v29, 2 }
 0x437   :  { %v18079_v42 = vmax.f32 %v5555_v15, %v5556_v35  ;;  %v18083_v10 = vmax.f32 %v5569_v61, %v5570_v17  ;;  %v5591_v48 = vrot.slane %v5590_v52, 1  ;;  %v5598_v51 = vrot.slane %v5597_v33, 1 }
 0x438   :  { %v18081_v13 = vmax.f32 %v5562_v57, %v5563_v21  ;;  %v18085_v14 = vmax.f32 %v5576_v9, %v5577_v59  ;;  %v18087_v22 = vmax.f32 %v5583_v56, %v5584_v8  ;;  %v5604_v46 = vmax.f32 %v5602_v29, %v5603_v11 }
 0x439   :  { %v5592_v47 = vmax.f32 %v5590_v52, %v5591_v48  ;;  %v5607_v26 = vsel %vm211_vm0, %v18044_v27, -inf  ;;  %v21914_v2 = vcombine.high %v18044_v27, %v18044_v27  ;;  %v5621_v57 = vsel %vm211_vm0, %v18052_v7, -inf }
 0x43a   :  { %21912 = vst [vmem:[#allocation94_spill] sm:$0xff] %v18081_v13  ;;  %21913 = vst [vmem:[#allocation95_spill] sm:$0xff] %v18085_v14  ;;  %v5599_v53 = vmax.f32 %v5597_v33, %v5598_v51  ;;  %v5605_v44 = vrot.slane %v5604_v46, 1  ;;  %v5608_v28 = vrot.slane %v5607_v26, 4  ;;  %v5622_v23 = vrot.slane %v5621_v57, 4 }
 0x43b   :  { %v5614_v6 = vsel %vm211_vm0, %v21914_v2, -inf  ;;  %v21915_v15 = vcombine.high %v18052_v7, %v18052_v7  ;;  %v5635_v32 = vsel %vm211_vm0, %v18047_v0, -inf  ;;  %v21916_v27 = vcombine.high %v18047_v0, %v18047_v0 }
 0x43c   :  { %v5615_v45 = vrot.slane %v5614_v6, 4  ;;  %v5606_v56 = vmax.f32 %v5604_v46, %v5605_v44  ;;  %v5609_v19 = vmax.f32 %v5607_v26, %v5608_v28  ;;  %v5623_v35 = vmax.f32 %v5621_v57, %v5622_v23  ;;  %v18113_v26 = vpop.f32.mrb[27].mxu1 }
 0x43d   :  { %v5628_v61 = vsel %vm211_vm0, %v21915_v15, -inf  ;;  %v5642_v9 = vsel %vm211_vm0, %v21916_v27, -inf  ;;  %v5636_v21 = vrot.slane %v5635_v32, 4  ;;  %v5649_v7 = vsel %vm211_vm0, %v18055_v54, -inf  ;;  %21918 = vst [vmem:[#allocation96_spill] sm:$0xff] %v18113_v26 }
 0x43e   :  { %v5616_v33 = vmax.f32 %v5614_v6, %v5615_v45  ;;  %v5629_v29 = vrot.slane %v5628_v61, 4  ;;  %v5643_v17 = vrot.slane %v5642_v9, 4  ;;  %v5610_v52 = vrot.slane %v5609_v19, 2 }
 0x43f   :  { %v5650_v11 = vrot.slane %v5649_v7, 4  ;;  %v5624_v48 = vrot.slane %v5623_v35, 2  ;;  %v5637_v51 = vmax.f32 %v5635_v32, %v5636_v21  ;;  %v21917_v0 = vcombine.high %v18055_v54, %v18055_v54 }
 0x440   :  { %v5617_v59 = vrot.slane %v5616_v33, 2  ;;  %v5630_v8 = vmax.f32 %v5628_v61, %v5629_v29  ;;  %v5644_v2 = vmax.f32 %v5642_v9, %v5643_v17  ;;  %v5611_v6 = vmax.f32 %v5609_v19, %v5610_v52 }
 0x441   :  { %v5656_v46 = vsel %vm211_vm0, %v21917_v0, -inf  ;;  %v5651_v28 = vmax.f32 %v5649_v7, %v5650_v11  ;;  %v5625_v45 = vmax.f32 %v5623_v35, %v5624_v48  ;;  %v5638_v23 = vrot.slane %v5637_v51, 2 }
 0x442   :  { %v5618_v57 = vmax.f32 %v5616_v33, %v5617_v59  ;;  %v5631_v44 = vrot.slane %v5630_v8, 2  ;;  %v5645_v15 = vrot.slane %v5644_v2, 2  ;;  %v5657_v27 = vrot.slane %v5656_v46, 4 }
 0x443   :  { %v5612_v61 = vrot.slane %v5611_v6, 1  ;;  %v5652_v32 = vrot.slane %v5651_v28, 2  ;;  %v5626_v9 = vrot.slane %v5625_v45, 1  ;;  %v5639_v21 = vmax.f32 %v5637_v51, %v5638_v23 }
 0x444   :  { %v5619_v29 = vrot.slane %v5618_v57, 1  ;;  %v5632_v12 = vmax.f32 %v5630_v8, %v5631_v44  ;;  %v5646_v17 = vmax.f32 %v5644_v2, %v5645_v15  ;;  %v5658_v54 = vmax.f32 %v5656_v46, %v5657_v27 }
 0x445   :  { %v5613_v63 = vmax.f32 %v5611_v6, %v5612_v61  ;;  %v5653_v26 = vmax.f32 %v5651_v28, %v5652_v32  ;;  %v5627_v19 = vmax.f32 %v5625_v45, %v5626_v9  ;;  %v5640_v33 = vrot.slane %v5639_v21, 1 }
 0x446   :  { %v5620_v0 = vmax.f32 %v5618_v57, %v5619_v29  ;;  %v5633_v41 = vrot.slane %v5632_v12, 1  ;;  %v5647_v52 = vrot.slane %v5646_v17, 1  ;;  %v5659_v7 = vrot.slane %v5658_v54, 2 }
 0x447   :  { %v5654_v59 = vrot.slane %v5653_v26, 1  ;;  %v6631_v11 = vmax.f32 %v18079_v42, %v18083_v10  ;;  %v5641_v48 = vmax.f32 %v5639_v21, %v5640_v33  ;;  %v18120_v46 = vmax.f32 %v18087_v22, %v5599_v53 }
 0x448   :  { %v5634_v35 = vmax.f32 %v5632_v12, %v5633_v41  ;;  %v5648_v51 = vmax.f32 %v5646_v17, %v5647_v52  ;;  %v5660_v2 = vmax.f32 %v5658_v54, %v5659_v7  ;;  %v18122_v57 = vmax.f32 %v5592_v47, %v5606_v56 }
 0x449   :  { %v5655_v6 = vmax.f32 %v5653_v26, %v5654_v59  ;;  %v18124_v44 = vmax.f32 %v5613_v63, %v5627_v19  ;;  %v18130_v41 = vsel %vm6783_vm11, %v18120_v46, %v6631_v11  ;;  %v21923_v42 = vmax.f32 %v17981_v43, 0.0 }
 0x44a   :  { %21919 = vst [vmem:[#allocation97_spill] sm:$0xff] %v18122_v57  ;;  %v18126_v28 = vmax.f32 %v5620_v0, %v5634_v35  ;;  %v5661_v12 = vrot.slane %v5660_v2, 1  ;;  %21922 = vst [vmem:[#allocation121_spill] sm:$0xff] %v18130_v41  ;;  %v21924_v10 = vmax.f32 %v17880_v4, 0.0  ;;  %v7052_v63 = vsel %vm6785_vm12, %v17967_v16, %v17862_v36 }
 0x44b   :  { %21920 = vst [vmem:[#allocation119_spill] sm:$0xff] %v18124_v44  ;;  %v21925_v22 = vmov %v21923_v42  ;;  %v18143_v56 = vmax.f32 %v5641_v48, %v5655_v6  ;;  %v2282_v26 = vmax.f32 %v18023_v3, 0.0  ;;  %v2283_v23 = vmax.f32 %v18027_v60, 0.0 }
 0x44c   :  { %21921 = vst [vmem:[#allocation120_spill] sm:$0xff] %v18126_v28  ;;  %v2743_v45 = vcombine.low %v21924_v10, %v21923_v42  ;;  %v21926_v53 = vmov %v21924_v10  ;;  %v5549_v15 = vrot.slane %v18013_v31, 1  ;;  %v5662_v27 = vmax.f32 %v5660_v2, %v5661_v12 }
 0x44d   :  { %v2744_v47 = vcombine.high %v21926_v53, %v21925_v22  ;;  %21927 = vst [vmem:[#allocation122_spill] sm:$0xff] %v18143_v56  ;;  %v2285_v43 = vmax.f32 %v18031_v58, 0.0  ;;  %v21928_v29 = vmax.f32 %v17884_v38, 0.0  ;;  %v2284_v21 = vmax.f32 %v18035_v30, 0.0 }
 0x44e   :  { %v2753_v61 = vrot.slane %v2743_v45, %v16498_v50  ;;  %v21930_v3 = vrot.slane %v17962_v1, 1  ;;  %v18163_v17 = vsel %vm6787_vm13, %v17977_v20, %v7052_v63  ;;  %v18165_v58 = vmax.f32 %v5648_v51, %v5662_v27 }
 0x44f   :  { %v2760_v4 = vrot.slane %v2744_v47, %v16498_v50  ;;  %v2745_v32 = vcombine.low %v21928_v29, %v2282_v26  ;;  %v21929_v36 = vmov %v21928_v29  ;;  %21932 = vst [vmem:[#allocation124_spill] sm:$0xff] %v18163_v17  ;;  %v2286_v54 = vmax.f32 %v18039_v25, 0.0  ;;  %v14937_v29 = vld [vmem:[#allocation6 + $0x1ec] ss:$16 sps:$4 sm:$0xff]  }
 0x450   :  { %v2746_v9 = vcombine.high %v21929_v36, %v2282_v26  ;;  %v18159_v60 = vmax.f32 %v17962_v1, %v21930_v3  ;;  %21933 = vst [vmem:[#allocation125_spill] sm:$0xff] %v18165_v58  ;;  %v18170_v19 = vcombine.low %v2283_v23, %v2284_v21  ;;  %v18172_v30 = vcombine.high %v2283_v23, %v2284_v21  ;;  %v14932_v3 = vld [vmem:[#allocation6 + $0x1e0] ss:$16 sps:$4 sm:$0xff]  }
 0x451   :  { %v2767_v0 = vrot.slane %v2745_v32, %v16498_v50  ;;  %v18175_v33 = vmax.f32 %v18013_v31, %v5549_v15  ;;  %v18177_v1 = vcombine.low %v2285_v43, %v2286_v54  ;;  %v18179_v52 = vcombine.high %v2285_v43, %v2286_v54  ;;  %11794 = vmatprep.subr.bf16.mxu1 %v14937_v29 }
 0x452   :  { %21931 = vst [vmem:[#allocation123_spill] sm:$0xff] %v18159_v60  ;;  %v2774_v38 = vrot.slane %v2746_v9, %v16498_v50  ;;  %v18183_v7 = vadd.f32 %v17953_v39, %v16777_v24 }
 0x453   :  { %21934 = vst [vmem:[#allocation126_spill] sm:$0xff] %v18175_v33  ;;  %v2775_v25 = vcombine.low %v2753_v61, %v2767_v0  ;;  %v2776_v35 = vcombine.high %v2753_v61, %v2767_v0  ;;  %v14124_v48 = vcombine.low %v2767_v0, %v2767_v0  ;;  %v14125_v51 = vcombine.high %v2767_v0, %v2767_v0 }
 0x454   :  { %v2777_v59 = vcombine.low %v2760_v4, %v2774_v38  ;;  %v2778_v11 = vcombine.high %v2760_v4, %v2774_v38  ;;  %v14126_v2 = vcombine.low %v2774_v38, %v2774_v38  ;;  %v14127_v6 = vcombine.high %v2774_v38, %v2774_v38  ;;  %v14934_v4 = vld [vmem:[#allocation6 + $0x1e4] ss:$16 sps:$4 sm:$0xff]  }
 0x455   :  { %v3718_v12 = vrot.slane %v2775_v25, %v16498_v50  ;;  %v3735_v31 = vrot.slane %v2776_v35, %v16498_v50  ;;  %v3725_v39 = vrot.slane %v14124_v48, %v16498_v50  ;;  %v3742_v45 = vrot.slane %v14125_v51, %v16498_v50  ;;  %11489 = vmatprep.subr.bf16.mxu0 %v14934_v4  ;;  %v14935_v35 = vld [vmem:[#allocation6 + $0x1e8] ss:$16 sps:$4 sm:$0xff]  }
 0x456   :  { %v18188_v42 = vrot.slane %v2777_v59, %v16498_v50  ;;  %v18191_v10 = vrot.slane %v2778_v11, %v16498_v50  ;;  %v18196_v22 = vrot.slane %v14126_v2, %v16498_v50  ;;  %v18199_v53 = vrot.slane %v14127_v6, %v16498_v50  ;;  %11490 = vmatpush1.bf16.msra.mxu0 %v14932_v3 }
 0x457   :  { %v3726_v47 = vcombine.high %v3718_v12, %v3718_v12  ;;  %v3743_v63 = vcombine.high %v3735_v31, %v3735_v31  ;;  %v3727_v15 = vcombine.high %v3725_v39, %v3725_v39  ;;  %v3744_v27 = vcombine.high %v3742_v45, %v3742_v45  ;;  %11795 = vmatpush1.bf16.msra.mxu1 %v14935_v35 }
 0x458   :  { %v5663_v32 = vsel %vm211_vm0, %v3718_v12, -inf  ;;  %v5677_v9 = vsel %vm211_vm0, %v3725_v39, -inf  ;;  %v5691_v21 = vsel %vm211_vm0, %v3735_v31, -inf  ;;  %v5705_v51 = vsel %vm211_vm0, %v3742_v45, -inf }
 0x459   :  { %v5670_v36 = vsel %vm211_vm0, %v3726_v47, -inf  ;;  %v5664_v54 = vrot.slane %v5663_v32, 4  ;;  %v5678_v38 = vrot.slane %v5677_v9, 4  ;;  %v5684_v25 = vsel %vm211_vm0, %v3727_v15, -inf }
 0x45a   :  { %v5671_v0 = vrot.slane %v5670_v36, 4  ;;  %v5685_v59 = vrot.slane %v5684_v25, 4  ;;  %v5692_v11 = vrot.slane %v5691_v21, 4  ;;  %v5698_v48 = vsel %vm211_vm0, %v3743_v63, -inf }
 0x45b   :  { %v5665_v2 = vmax.f32 %v5663_v32, %v5664_v54  ;;  %v5679_v12 = vmax.f32 %v5677_v9, %v5678_v38  ;;  %v5699_v31 = vrot.slane %v5698_v48, 4  ;;  %v5706_v8 = vrot.slane %v5705_v51, 4 }
 0x45c   :  { %v5672_v6 = vmax.f32 %v5670_v36, %v5671_v0  ;;  %v5686_v39 = vmax.f32 %v5684_v25, %v5685_v59  ;;  %v5693_v47 = vmax.f32 %v5691_v21, %v5692_v11  ;;  %v5712_v15 = vsel %vm211_vm0, %v3744_v27, -inf }
 0x45d   :  { %v5666_v4 = vrot.slane %v5665_v2, 2  ;;  %v5680_v29 = vrot.slane %v5679_v12, 2  ;;  %v5700_v23 = vmax.f32 %v5698_v48, %v5699_v31  ;;  %v5707_v63 = vmax.f32 %v5705_v51, %v5706_v8 }
 0x45e   :  { %v5673_v43 = vrot.slane %v5672_v6, 2  ;;  %v5687_v61 = vrot.slane %v5686_v39, 2  ;;  %v5694_v26 = vrot.slane %v5693_v47, 2  ;;  %v5713_v60 = vrot.slane %v5712_v15, 4 }
 0x45f   :  { %v5667_v45 = vmax.f32 %v5665_v2, %v5666_v4  ;;  %v5681_v32 = vmax.f32 %v5679_v12, %v5680_v29  ;;  %v5701_v36 = vrot.slane %v5700_v23, 2  ;;  %v5708_v0 = vrot.slane %v5707_v63, 2 }
 0x460   :  { %v5674_v3 = vmax.f32 %v5672_v6, %v5673_v43  ;;  %v5688_v9 = vmax.f32 %v5686_v39, %v5687_v61  ;;  %v5695_v54 = vmax.f32 %v5693_v47, %v5694_v26  ;;  %v5714_v38 = vmax.f32 %v5712_v15, %v5713_v60 }
 0x461   :  { %v5668_v21 = vrot.slane %v5667_v45, 1  ;;  %v5682_v35 = vrot.slane %v5681_v32, 1  ;;  %v5702_v27 = vmax.f32 %v5700_v23, %v5701_v36  ;;  %v5709_v33 = vmax.f32 %v5707_v63, %v5708_v0 }
 0x462   :  { %v5675_v25 = vrot.slane %v5674_v3, 1  ;;  %v5689_v59 = vrot.slane %v5688_v9, 1  ;;  %v5696_v11 = vrot.slane %v5695_v54, 1  ;;  %v5715_v48 = vrot.slane %v5714_v38, 2 }
 0x463   :  { %v5669_v31 = vmax.f32 %v5667_v45, %v5668_v21  ;;  %v5683_v8 = vmax.f32 %v5681_v32, %v5682_v35  ;;  %v5703_v51 = vrot.slane %v5702_v27, 1  ;;  %v5710_v6 = vrot.slane %v5709_v33, 1 }
 0x464   :  { %v5676_v17 = vmax.f32 %v5674_v3, %v5675_v25  ;;  %v5690_v2 = vmax.f32 %v5688_v9, %v5689_v59  ;;  %v5697_v43 = vmax.f32 %v5695_v54, %v5696_v11  ;;  %v5716_v12 = vmax.f32 %v5714_v38, %v5715_v48 }
 0x465   :  { %v5704_v61 = vmax.f32 %v5702_v27, %v5703_v51  ;;  %v5719_v60 = vsel %vm211_vm0, %v18188_v42, -inf  ;;  %v21935_v26 = vcombine.high %v18188_v42, %v18188_v42  ;;  %v5733_v39 = vsel %vm211_vm0, %v18196_v22, -inf }
 0x466   :  { %v5711_v47 = vmax.f32 %v5709_v33, %v5710_v6  ;;  %v5717_v15 = vrot.slane %v5716_v12, 1  ;;  %v5720_v4 = vrot.slane %v5719_v60, 4  ;;  %v5734_v63 = vrot.slane %v5733_v39, 4 }
 0x467   :  { %v5726_v23 = vsel %vm211_vm0, %v21935_v26, -inf  ;;  %v21936_v45 = vcombine.high %v18196_v22, %v18196_v22  ;;  %v5747_v32 = vsel %vm211_vm0, %v18191_v10, -inf  ;;  %v21937_v42 = vcombine.high %v18191_v10, %v18191_v10 }
 0x468   :  { %v5727_v29 = vrot.slane %v5726_v23, 4  ;;  %v5718_v9 = vmax.f32 %v5716_v12, %v5717_v15  ;;  %v5721_v54 = vmax.f32 %v5719_v60, %v5720_v4  ;;  %v5735_v38 = vmax.f32 %v5733_v39, %v5734_v63 }
 0x469   :  { %v5740_v3 = vsel %vm211_vm0, %v21936_v45, -inf  ;;  %v5754_v36 = vsel %vm211_vm0, %v21937_v42, -inf  ;;  %v5748_v21 = vrot.slane %v5747_v32, 4  ;;  %v5761_v22 = vsel %vm211_vm0, %v18199_v53, -inf }
 0x46a   :  { %v5728_v33 = vmax.f32 %v5726_v23, %v5727_v29  ;;  %v5741_v0 = vrot.slane %v5740_v3, 4  ;;  %v5755_v25 = vrot.slane %v5754_v36, 4  ;;  %v5722_v35 = vrot.slane %v5721_v54, 2 }
 0x46b   :  { %v5762_v11 = vrot.slane %v5761_v22, 4  ;;  %v5736_v48 = vrot.slane %v5735_v38, 2  ;;  %v5749_v51 = vmax.f32 %v5747_v32, %v5748_v21  ;;  %v21938_v10 = vcombine.high %v18199_v53, %v18199_v53 }
 0x46c   :  { %v5729_v27 = vrot.slane %v5728_v33, 2  ;;  %v5742_v59 = vmax.f32 %v5740_v3, %v5741_v0  ;;  %v5756_v6 = vmax.f32 %v5754_v36, %v5755_v25  ;;  %v5723_v60 = vmax.f32 %v5721_v54, %v5722_v35 }
 0x46d   :  { %v5768_v12 = vsel %vm211_vm0, %v21938_v10, -inf  ;;  %v5763_v39 = vmax.f32 %v5761_v22, %v5762_v11  ;;  %v5737_v15 = vmax.f32 %v5735_v38, %v5736_v48  ;;  %v5750_v4 = vrot.slane %v5749_v51, 2 }
 0x46e   :  { %v5730_v26 = vmax.f32 %v5728_v33, %v5729_v27  ;;  %v5743_v23 = vrot.slane %v5742_v59, 2  ;;  %v5757_v29 = vrot.slane %v5756_v6, 2  ;;  %v5769_v63 = vrot.slane %v5768_v12, 4 }
 0x46f   :  { %v5724_v45 = vrot.slane %v5723_v60, 1  ;;  %v5764_v0 = vrot.slane %v5763_v39, 2  ;;  %v5738_v20 = vrot.slane %v5737_v15, 1  ;;  %v5751_v32 = vmax.f32 %v5749_v51, %v5750_v4 }
 0x470   :  { %v5731_v42 = vrot.slane %v5730_v26, 1  ;;  %v5744_v3 = vmax.f32 %v5742_v59, %v5743_v23  ;;  %v5758_v36 = vmax.f32 %v5756_v6, %v5757_v29  ;;  %v5770_v21 = vmax.f32 %v5768_v12, %v5769_v63 }
 0x471   :  { %v5725_v25 = vmax.f32 %v5723_v60, %v5724_v45  ;;  %v5765_v10 = vmax.f32 %v5763_v39, %v5764_v0  ;;  %v5739_v54 = vmax.f32 %v5737_v15, %v5738_v20  ;;  %v5752_v33 = vrot.slane %v5751_v32, 1 }
 0x472   :  { %v5732_v53 = vmax.f32 %v5730_v26, %v5731_v42  ;;  %v5745_v58 = vrot.slane %v5744_v3, 1  ;;  %v5759_v35 = vrot.slane %v5758_v36, 1  ;;  %v5771_v22 = vrot.slane %v5770_v21, 2 }
 0x473   :  { %v5766_v27 = vrot.slane %v5765_v10, 1  ;;  %v18241_v11 = vmax.f32 %v5669_v31, %v5683_v8  ;;  %v18243_v48 = vmax.f32 %v5676_v17, %v5690_v2  ;;  %v5753_v59 = vmax.f32 %v5751_v32, %v5752_v33 }
 0x474   :  { %v5746_v38 = vmax.f32 %v5744_v3, %v5745_v58  ;;  %v5760_v23 = vmax.f32 %v5758_v36, %v5759_v35  ;;  %v5772_v28 = vmax.f32 %v5770_v21, %v5771_v22  ;;  %v18245_v51 = vmax.f32 %v5697_v43, %v5711_v47 }
 0x475   :  { %21939 = vst [vmem:[#allocation127_spill] sm:$0xff] %v18241_v11  ;;  %21940 = vst [vmem:[#allocation128_spill] sm:$0xff] %v18243_v48  ;;  %v5767_v6 = vmax.f32 %v5765_v10, %v5766_v27  ;;  %v18247_v12 = vmax.f32 %v5704_v61, %v5718_v9  ;;  %v18249_v60 = vmax.f32 %v5725_v25, %v5739_v54 }
 0x476   :  { %21941 = vst [vmem:[#allocation129_spill] sm:$0xff] %v18245_v51  ;;  %v18251_v20 = vmax.f32 %v5732_v53, %v5746_v38  ;;  %v5773_v26 = vrot.slane %v5772_v28, 1  ;;  %v2789_v58 = vrot.slane %v18170_v19, %v16498_v50  ;;  %v2796_v17 = vrot.slane %v18172_v30, %v16498_v50 }
 0x477   :  { %21942 = vst [vmem:[#allocation130_spill] sm:$0xff] %v18247_v12  ;;  %21943 = vst [vmem:[#allocation131_spill] sm:$0xff] %v18249_v60  ;;  %v2803_v31 = vrot.slane %v18177_v1, %v16498_v50  ;;  %v18259_v8 = vmax.f32 %v5753_v59, %v5767_v6  ;;  %v2810_v2 = vrot.slane %v18179_v52, %v16498_v50 }
 0x478   :  { %21944 = vst [vmem:[#allocation132_spill] sm:$0xff] %v18251_v20  ;;  %v18266_v61 = vadd.f32 %v17955_v55, %v16781_v37  ;;  %v5774_v47 = vmax.f32 %v5772_v28, %v5773_v26  ;;  %v18280_v21 = vadd.f32 %v17958_v62, %v16785_v49  ;;  %v18290_v54 = vadd.f32 %v17960_v40, %v16789_v5 }
 0x479   :  { %21945 = vst [vmem:[#allocation133_spill] sm:$0xff] %v18259_v8  ;;  %v2811_v9 = vcombine.low %v2789_v58, %v2803_v31  ;;  %v2812_v19 = vcombine.high %v2789_v58, %v2803_v31  ;;  %v14128_v39 = vcombine.low %v2803_v31, %v2803_v31  ;;  %v2813_v15 = vcombine.low %v2796_v17, %v2810_v2 }
 0x47a   :  { %v2814_v30 = vcombine.high %v2796_v17, %v2810_v2  ;;  %v14129_v4 = vcombine.high %v2803_v31, %v2803_v31  ;;  %v14130_v29 = vcombine.low %v2810_v2, %v2810_v2  ;;  %v18268_v1 = vmax.f32 %v5760_v23, %v5774_v47 }
 0x47b   :  { %v3786_v63 = vrot.slane %v2811_v9, %v16498_v50  ;;  %v3793_v52 = vrot.slane %v14128_v39, %v16498_v50  ;;  %v3803_v45 = vrot.slane %v2812_v19, %v16498_v50  ;;  %v18275_v55 = vrot.slane %v2813_v15, %v16498_v50 }
 0x47c   :  { %21946 = vst [vmem:[#allocation134_spill] sm:$0xff] %v18268_v1  ;;  %v3810_v42 = vrot.slane %v14129_v4, %v16498_v50  ;;  %v14131_v28 = vcombine.high %v2810_v2, %v2810_v2  ;;  %v18283_v53 = vrot.slane %v14130_v29, %v16498_v50  ;;  %v18286_v10 = vrot.slane %v2814_v30, %v16498_v50 }
 0x47d   :  { %v3794_v0 = vcombine.high %v3786_v63, %v3786_v63  ;;  %v3795_v32 = vcombine.high %v3793_v52, %v3793_v52  ;;  %v3811_v36 = vcombine.high %v3803_v45, %v3803_v45  ;;  %v3828_v33 = vcombine.high %v18275_v55, %v18275_v55 }
 0x47e   :  { %v3812_v25 = vcombine.high %v3810_v42, %v3810_v42  ;;  %v5775_v35 = vsel %vm211_vm0, %v3786_v63, -inf  ;;  %v5789_v62 = vsel %vm211_vm0, %v3793_v52, -inf  ;;  %v18298_v38 = vrot.slane %v14131_v28, %v16498_v50 }
 0x47f   :  { %v5782_v22 = vsel %vm211_vm0, %v3794_v0, -inf  ;;  %v5776_v27 = vrot.slane %v5775_v35, 4  ;;  %v5790_v23 = vrot.slane %v5789_v62, 4  ;;  %v5796_v6 = vsel %vm211_vm0, %v3795_v32, -inf }
 0x480   :  { %v5783_v59 = vrot.slane %v5782_v22, 4  ;;  %v5803_v40 = vsel %vm211_vm0, %v3803_v45, -inf  ;;  %v5810_v26 = vsel %vm211_vm0, %v3811_v36, -inf  ;;  %v5817_v58 = vsel %vm211_vm0, %v3810_v42, -inf }
 0x481   :  { %v5777_v17 = vmax.f32 %v5775_v35, %v5776_v27  ;;  %v5791_v2 = vmax.f32 %v5789_v62, %v5790_v23  ;;  %v5797_v47 = vrot.slane %v5796_v6, 4  ;;  %v5804_v9 = vrot.slane %v5803_v40, 4 }
 0x482   :  { %v5784_v31 = vmax.f32 %v5782_v22, %v5783_v59  ;;  %v5811_v19 = vrot.slane %v5810_v26, 4  ;;  %v5818_v39 = vrot.slane %v5817_v58, 4  ;;  %v5824_v15 = vsel %vm211_vm0, %v3812_v25, -inf }
 0x483   :  { %v5778_v30 = vrot.slane %v5777_v17, 2  ;;  %v5792_v29 = vrot.slane %v5791_v2, 2  ;;  %v5798_v63 = vmax.f32 %v5796_v6, %v5797_v47  ;;  %v5805_v52 = vmax.f32 %v5803_v40, %v5804_v9 }
 0x484   :  { %v5785_v4 = vrot.slane %v5784_v31, 2  ;;  %v5812_v28 = vmax.f32 %v5810_v26, %v5811_v19  ;;  %v5819_v45 = vmax.f32 %v5817_v58, %v5818_v39  ;;  %v5825_v0 = vrot.slane %v5824_v15, 4 }
 0x485   :  { %v5779_v32 = vmax.f32 %v5777_v17, %v5778_v30  ;;  %v5793_v42 = vmax.f32 %v5791_v2, %v5792_v29  ;;  %v5799_v35 = vrot.slane %v5798_v63, 2  ;;  %v5806_v22 = vrot.slane %v5805_v52, 2 }
 0x486   :  { %v18305_v36 = vmax.f32 %v5784_v31, %v5785_v4  ;;  %v5813_v62 = vrot.slane %v5812_v28, 2  ;;  %v5820_v27 = vrot.slane %v5819_v45, 2  ;;  %v5826_v59 = vmax.f32 %v5824_v15, %v5825_v0 }
 0x487   :  { %v3829_v25 = vcombine.high %v18283_v53, %v18283_v53  ;;  %v3845_v23 = vcombine.high %v18286_v10, %v18286_v10  ;;  %v5780_v6 = vrot.slane %v5779_v32, 1  ;;  %v5794_v40 = vrot.slane %v5793_v42, 1 }
 0x488   :  { %v5807_v26 = vmax.f32 %v5805_v52, %v5806_v22  ;;  %v5814_v58 = vmax.f32 %v5812_v28, %v5813_v62  ;;  %v5821_v47 = vmax.f32 %v5819_v45, %v5820_v27  ;;  %v5827_v17 = vrot.slane %v5826_v59, 2 }
 0x489   :  { %v3846_v31 = vcombine.high %v18298_v38, %v18298_v38  ;;  %v18313_v2 = vmax.f32 %v5779_v32, %v5780_v6  ;;  %v18316_v19 = vmax.f32 %v5798_v63, %v5799_v35  ;;  %v18318_v29 = vmax.f32 %v5793_v42, %v5794_v40 }
 0x48a   :  { %v5808_v39 = vrot.slane %v5807_v26, 1  ;;  %v5815_v15 = vrot.slane %v5814_v58, 1  ;;  %v5822_v30 = vrot.slane %v5821_v47, 1  ;;  %v5828_v4 = vmax.f32 %v5826_v59, %v5827_v17 }
 0x48b   :  { %21947 = vst [vmem:[#allocation135_spill] sm:$0xff] %v18313_v2  ;;  %21948 = vst [vmem:[#allocation136_spill] sm:$0xff] %v18318_v29  ;;  %v5831_v52 = vsel %vm211_vm0, %v18275_v55, -inf  ;;  %v5838_v28 = vsel %vm211_vm0, %v3828_v33, -inf  ;;  %v5845_v45 = vsel %vm211_vm0, %v18283_v53, -inf  ;;  %v5852_v42 = vsel %vm211_vm0, %v3829_v25, -inf }
 0x48c   :  { %v18325_v0 = vmax.f32 %v5807_v26, %v5808_v39  ;;  %v18327_v32 = vmax.f32 %v5814_v58, %v5815_v15  ;;  %v18329_v63 = vmax.f32 %v5821_v47, %v5822_v30  ;;  %v5829_v35 = vrot.slane %v5828_v4, 1 }
 0x48d   :  { %v5832_v22 = vrot.slane %v5831_v52, 4  ;;  %v5839_v62 = vrot.slane %v5838_v28, 4  ;;  %v5846_v27 = vrot.slane %v5845_v45, 4  ;;  %v5853_v55 = vrot.slane %v5852_v42, 4 }
 0x48e   :  { %21949 = vst [vmem:[#allocation137_spill] sm:$0xff] %v18327_v32  ;;  %v18332_v59 = vmax.f32 %v5828_v4, %v5829_v35  ;;  %v5859_v33 = vsel %vm211_vm0, %v18286_v10, -inf  ;;  %v5866_v53 = vsel %vm211_vm0, %v3845_v23, -inf  ;;  %v5873_v39 = vsel %vm211_vm0, %v18298_v38, -inf }
 0x48f   :  { %v5833_v6 = vmax.f32 %v5831_v52, %v5832_v22  ;;  %v5840_v40 = vmax.f32 %v5838_v28, %v5839_v62  ;;  %v5847_v26 = vmax.f32 %v5845_v45, %v5846_v27  ;;  %v5860_v58 = vrot.slane %v5859_v33, 4 }
 0x490   :  { %21950 = vst [vmem:[#allocation138_spill] sm:$0xff] %v18332_v59  ;;  %v5854_v47 = vmax.f32 %v5852_v42, %v5853_v55  ;;  %v5867_v17 = vrot.slane %v5866_v53, 4  ;;  %v5880_v15 = vsel %vm211_vm0, %v3846_v31, -inf  ;;  %v5874_v10 = vrot.slane %v5873_v39, 4 }
 0x491   :  { %v5834_v25 = vrot.slane %v5833_v6, 2  ;;  %v5841_v30 = vrot.slane %v5840_v40, 2  ;;  %v5848_v4 = vrot.slane %v5847_v26, 2  ;;  %v5861_v35 = vmax.f32 %v5859_v33, %v5860_v58 }
 0x492   :  { %v5855_v9 = vrot.slane %v5854_v47, 2  ;;  %v5868_v3 = vmax.f32 %v5866_v53, %v5867_v17  ;;  %v5881_v43 = vrot.slane %v5880_v15, 4  ;;  %v5875_v27 = vmax.f32 %v5873_v39, %v5874_v10 }
 0x493   :  { %v5835_v23 = vmax.f32 %v5833_v6, %v5834_v25  ;;  %v5842_v52 = vmax.f32 %v5840_v40, %v5841_v30  ;;  %v5849_v28 = vmax.f32 %v5847_v26, %v5848_v4  ;;  %v5862_v45 = vrot.slane %v5861_v35, 2 }
 0x494   :  { %v5856_v22 = vmax.f32 %v5854_v47, %v5855_v9  ;;  %v5869_v62 = vrot.slane %v5868_v3, 2  ;;  %v5882_v42 = vmax.f32 %v5880_v15, %v5881_v43  ;;  %v5876_v60 = vrot.slane %v5875_v27, 2 }
 0x495   :  { %v5836_v55 = vrot.slane %v5835_v23, 1  ;;  %v5843_v38 = vrot.slane %v5842_v52, 1  ;;  %v5850_v1 = vrot.slane %v5849_v28, 1  ;;  %v5863_v31 = vmax.f32 %v5861_v35, %v5862_v45 }
 0x496   :  { %v5857_v8 = vrot.slane %v5856_v22, 1  ;;  %v5870_v20 = vmax.f32 %v5868_v3, %v5869_v62  ;;  %v5883_v33 = vrot.slane %v5882_v42, 2  ;;  %v5877_v26 = vmax.f32 %v5875_v27, %v5876_v60 }
 0x497   :  { %v5837_v58 = vmax.f32 %v5835_v23, %v5836_v55  ;;  %v5844_v53 = vmax.f32 %v5842_v52, %v5843_v38  ;;  %v5851_v17 = vmax.f32 %v5849_v28, %v5850_v1  ;;  %v5864_v12 = vrot.slane %v5863_v31, 1 }
 0x498   :  { %v5858_v6 = vmax.f32 %v5856_v22, %v5857_v8  ;;  %v5871_v40 = vrot.slane %v5870_v20, 1  ;;  %v5884_v25 = vmax.f32 %v5882_v42, %v5883_v33  ;;  %v6649_v47 = vmax.f32 %v18325_v0, %v18329_v63 }
 0x499   :  { %v5865_v9 = vmax.f32 %v5863_v31, %v5864_v12  ;;  %v5878_v15 = vrot.slane %v5877_v26, 1  ;;  %v6651_v4 = vmax.f32 %v5837_v58, %v5851_v17  ;;  %v2288_v8 = vmax.f32 %v18280_v21, 0.0  ;;  %v18379_v31 = vpop.f32.mrb[28].mxu0 }
 0x49a   :  { %v5872_v39 = vmax.f32 %v5870_v20, %v5871_v40  ;;  %v5885_v30 = vrot.slane %v5884_v25, 1  ;;  %v18346_v1 = vmax.f32 %v5844_v53, %v5858_v6  ;;  %v2290_v60 = vmax.f32 %v18290_v54, 0.0  ;;  %v21960_v53 = vld [vmem:[#allocation85_spill] sm:$0xff]  ;;  %v21961_v6 = vld [vmem:[#allocation96_spill] sm:$0xff] }
 0x49b   :  { %v18352_v12 = vadd.f32 %v18061_v18, %v16777_v24  ;;  %v5879_v35 = vmax.f32 %v5877_v26, %v5878_v15  ;;  %v18355_v0 = vsel %vm6783_vm11, %v6651_v4, %v6649_v47  ;;  %v18359_v20 = vadd.f32 %v18063_v34, %v16781_v37  ;;  %v18396_v26 = vpop.f32.mrb[29].mxu0 }
 0x49c   :  { %21951 = vst [vmem:[#allocation139_spill] sm:$0xff] %v18346_v1  ;;  %v5886_v10 = vmax.f32 %v5884_v25, %v5885_v30  ;;  %21952 = vst [vmem:[#allocation140_spill] sm:$0xff] %v18355_v0  ;;  %v21953_v63 = vmax.f32 %v18183_v7, 0.0  ;;  %v21955_v54 = vmax.f32 %v18266_v61, 0.0  ;;  %v18381_v61 = vpop.f32.mrb[28].mxu1  ;;  %v18390_v17 = vadd.f32 %v21960_v53, %v16785_v49 }
 0x49d   :  { %v18370_v62 = vmax.f32 %v5865_v9, %v5879_v35  ;;  %v18394_v40 = vadd.f32 %v21961_v6, %v16789_v5  ;;  %v18398_v25 = vpop.f32.mrb[29].mxu1 }
 0x49e   :  { %v2815_v23 = vcombine.low %v21953_v63, %v2288_v8  ;;  %v21954_v21 = vmov %v21953_v63  ;;  %v2817_v28 = vcombine.low %v21955_v54, %v2290_v60  ;;  %v21956_v18 = vmov %v21955_v54 }
 0x49f   :  { %v2816_v52 = vcombine.high %v21954_v21, %v2288_v8  ;;  %v2818_v45 = vcombine.high %v21956_v18, %v2290_v60  ;;  %21957 = vst [vmem:[#allocation141_spill] sm:$0xff] %v18370_v62  ;;  %v18372_v27 = vmax.f32 %v5872_v39, %v5886_v10  ;;  %v18385_v33 = vsel %vm6783_vm11, %v18370_v62, %v6651_v4 }
 0x4a0   :  { %v2825_v42 = vrot.slane %v2815_v23, %v16498_v50  ;;  %v2839_v7 = vrot.slane %v2817_v28, %v16498_v50  ;;  %21959 = vst [vmem:[#allocation143_spill] sm:$0xff] %v18385_v33 }
 0x4a1   :  { %21958 = vst [vmem:[#allocation142_spill] sm:$0xff] %v18372_v27  ;;  %v2832_v55 = vrot.slane %v2816_v52, %v16498_v50  ;;  %v2846_v38 = vrot.slane %v2818_v45, %v16498_v50 }
 0x4a2   :  { %v2847_v9 = vcombine.low %v2825_v42, %v2839_v7  ;;  %v2848_v47 = vcombine.high %v2825_v42, %v2839_v7  ;;  %v14132_v30 = vcombine.low %v2839_v7, %v2839_v7  ;;  %v14133_v4 = vcombine.high %v2839_v7, %v2839_v7 }
 0x4a3   :  { %v2849_v39 = vcombine.low %v2832_v55, %v2846_v38  ;;  %v2850_v15 = vcombine.high %v2832_v55, %v2846_v38  ;;  %v14134_v8 = vcombine.low %v2846_v38, %v2846_v38  ;;  %v14135_v60 = vcombine.high %v2846_v38, %v2846_v38 }
 0x4a4   :  { %v3854_v35 = vrot.slane %v2847_v9, %v16498_v50  ;;  %v3871_v10 = vrot.slane %v2848_v47, %v16498_v50  ;;  %v3861_v21 = vrot.slane %v14132_v30, %v16498_v50  ;;  %v3878_v52 = vrot.slane %v14133_v4, %v16498_v50 }
 0x4a5   :  { %v18403_v63 = vrot.slane %v2849_v39, %v16498_v50  ;;  %v18406_v23 = vrot.slane %v2850_v15, %v16498_v50  ;;  %v18411_v54 = vrot.slane %v14134_v8, %v16498_v50  ;;  %v18414_v28 = vrot.slane %v14135_v60, %v16498_v50 }
 0x4a6   :  { %v3862_v18 = vcombine.high %v3854_v35, %v3854_v35  ;;  %v3879_v45 = vcombine.high %v3871_v10, %v3871_v10  ;;  %v3863_v7 = vcombine.high %v3861_v21, %v3861_v21  ;;  %v3880_v38 = vcombine.high %v3878_v52, %v3878_v52 }
 0x4a7   :  { %v3896_v42 = vcombine.high %v18403_v63, %v18403_v63  ;;  %v5887_v9 = vsel %vm211_vm0, %v3854_v35, -inf  ;;  %v5901_v39 = vsel %vm211_vm0, %v3861_v21, -inf  ;;  %v5915_v15 = vsel %vm211_vm0, %v3871_v10, -inf }
 0x4a8   :  { %v5894_v47 = vsel %vm211_vm0, %v3862_v18, -inf  ;;  %v5888_v30 = vrot.slane %v5887_v9, 4  ;;  %v5902_v8 = vrot.slane %v5901_v39, 4  ;;  %v5908_v60 = vsel %vm211_vm0, %v3863_v7, -inf }
 0x4a9   :  { %v5895_v4 = vrot.slane %v5894_v47, 4  ;;  %v5909_v43 = vrot.slane %v5908_v60, 4  ;;  %v5916_v3 = vrot.slane %v5915_v15, 4  ;;  %v5922_v58 = vsel %vm211_vm0, %v3879_v45, -inf }
 0x4aa   :  { %v5929_v34 = vsel %vm211_vm0, %v3878_v52, -inf  ;;  %v5889_v22 = vmax.f32 %v5887_v9, %v5888_v30  ;;  %v5903_v35 = vmax.f32 %v5901_v39, %v5902_v8  ;;  %v5923_v55 = vrot.slane %v5922_v58, 4 }
 0x4ab   :  { %v5896_v6 = vmax.f32 %v5894_v47, %v5895_v4  ;;  %v5910_v18 = vmax.f32 %v5908_v60, %v5909_v43  ;;  %v5917_v53 = vmax.f32 %v5915_v15, %v5916_v3  ;;  %v5930_v21 = vrot.slane %v5929_v34, 4 }
 0x4ac   :  { %v5936_v10 = vsel %vm211_vm0, %v3880_v38, -inf  ;;  %v5890_v29 = vrot.slane %v5889_v22, 2  ;;  %v5904_v33 = vrot.slane %v5903_v35, 2  ;;  %v5924_v51 = vmax.f32 %v5922_v58, %v5923_v55 }
 0x4ad   :  { %v5897_v2 = vrot.slane %v5896_v6, 2  ;;  %v5911_v7 = vrot.slane %v5910_v18, 2  ;;  %v5918_v48 = vrot.slane %v5917_v53, 2  ;;  %v5931_v11 = vmax.f32 %v5929_v34, %v5930_v21 }
 0x4ae   :  { %v5937_v1 = vrot.slane %v5936_v10, 4  ;;  %v5891_v45 = vmax.f32 %v5889_v22, %v5890_v29  ;;  %v5905_v52 = vmax.f32 %v5903_v35, %v5904_v33  ;;  %v5925_v9 = vrot.slane %v5924_v51, 2 }
 0x4af   :  { %v5898_v59 = vmax.f32 %v5896_v6, %v5897_v2  ;;  %v5912_v47 = vmax.f32 %v5910_v18, %v5911_v7  ;;  %v5919_v39 = vmax.f32 %v5917_v53, %v5918_v48  ;;  %v5932_v30 = vrot.slane %v5931_v11, 2 }
 0x4b0   :  { %v5938_v43 = vmax.f32 %v5936_v10, %v5937_v1  ;;  %v5892_v3 = vrot.slane %v5891_v45, 1  ;;  %v5906_v4 = vrot.slane %v5905_v52, 1  ;;  %v5926_v38 = vmax.f32 %v5924_v51, %v5925_v9 }
 0x4b1   :  { %v5899_v15 = vrot.slane %v5898_v59, 1  ;;  %v5913_v8 = vrot.slane %v5912_v47, 1  ;;  %v5920_v60 = vrot.slane %v5919_v39, 1  ;;  %v5933_v32 = vmax.f32 %v5931_v11, %v5932_v30 }
 0x4b2   :  { %v5939_v58 = vrot.slane %v5938_v43, 2  ;;  %v5893_v55 = vmax.f32 %v5891_v45, %v5892_v3  ;;  %v5907_v34 = vmax.f32 %v5905_v52, %v5906_v4  ;;  %v5927_v21 = vrot.slane %v5926_v38, 1 }
 0x4b3   :  { %v5900_v0 = vmax.f32 %v5898_v59, %v5899_v15  ;;  %v5914_v29 = vmax.f32 %v5912_v47, %v5913_v8  ;;  %v5921_v2 = vmax.f32 %v5919_v39, %v5920_v60  ;;  %v5934_v22 = vrot.slane %v5933_v32, 1 }
 0x4b4   :  { %v5940_v33 = vmax.f32 %v5938_v43, %v5939_v58  ;;  %v5928_v6 = vmax.f32 %v5926_v38, %v5927_v21  ;;  %v5943_v48 = vsel %vm211_vm0, %v18403_v63, -inf  ;;  %v5950_v1 = vsel %vm211_vm0, %v3896_v42, -inf }
 0x4b5   :  { %v5957_v51 = vsel %vm211_vm0, %v18411_v54, -inf  ;;  %v5935_v53 = vmax.f32 %v5933_v32, %v5934_v22  ;;  %v5944_v35 = vrot.slane %v5943_v48, 4  ;;  %v5951_v18 = vrot.slane %v5950_v1, 4 }
 0x4b6   :  { %v5941_v11 = vrot.slane %v5940_v33, 1  ;;  %v5958_v59 = vrot.slane %v5957_v51, 4  ;;  %v21962_v10 = vcombine.high %v18411_v54, %v18411_v54  ;;  %v5971_v45 = vsel %vm211_vm0, %v18406_v23, -inf }
 0x4b7   :  { %v21963_v63 = vcombine.high %v18406_v23, %v18406_v23  ;;  %v5945_v9 = vmax.f32 %v5943_v48, %v5944_v35  ;;  %v5952_v32 = vmax.f32 %v5950_v1, %v5951_v18  ;;  %v5972_v30 = vrot.slane %v5971_v45, 4 }
 0x4b8   :  { %v5964_v7 = vsel %vm211_vm0, %v21962_v10, -inf  ;;  %v5942_v52 = vmax.f32 %v5940_v33, %v5941_v11  ;;  %v5959_v39 = vmax.f32 %v5957_v51, %v5958_v59  ;;  %v5985_v54 = vsel %vm211_vm0, %v18414_v28, -inf }
 0x4b9   :  { %v5978_v42 = vsel %vm211_vm0, %v21963_v63, -inf  ;;  %v5965_v47 = vrot.slane %v5964_v7, 4  ;;  %v5946_v3 = vrot.slane %v5945_v9, 2  ;;  %v5953_v15 = vrot.slane %v5952_v32, 2 }
 0x4ba   :  { %v5979_v43 = vrot.slane %v5978_v42, 4  ;;  %v5986_v38 = vrot.slane %v5985_v54, 4  ;;  %v5960_v8 = vrot.slane %v5959_v39, 2  ;;  %v5973_v60 = vmax.f32 %v5971_v45, %v5972_v30 }
 0x4bb   :  { %v5966_v4 = vmax.f32 %v5964_v7, %v5965_v47  ;;  %v21964_v23 = vcombine.high %v18414_v28, %v18414_v28  ;;  %v5947_v22 = vmax.f32 %v5945_v9, %v5946_v3  ;;  %v5954_v33 = vmax.f32 %v5952_v32, %v5953_v15 }
 0x4bc   :  { %v5980_v58 = vmax.f32 %v5978_v42, %v5979_v43  ;;  %v5987_v1 = vmax.f32 %v5985_v54, %v5986_v38  ;;  %v5961_v51 = vmax.f32 %v5959_v39, %v5960_v8  ;;  %v5974_v11 = vrot.slane %v5973_v60, 2 }
 0x4bd   :  { %v5992_v21 = vsel %vm211_vm0, %v21964_v23, -inf  ;;  %v5967_v48 = vrot.slane %v5966_v4, 2  ;;  %v5948_v59 = vrot.slane %v5947_v22, 1  ;;  %v5955_v10 = vrot.slane %v5954_v33, 1 }
 0x4be   :  { %v5981_v35 = vrot.slane %v5980_v58, 2  ;;  %v5993_v18 = vrot.slane %v5992_v21, 4  ;;  %v5988_v63 = vrot.slane %v5987_v1, 2  ;;  %v5962_v47 = vrot.slane %v5961_v51, 1 }
 0x4bf   :  { %v5968_v7 = vmax.f32 %v5966_v4, %v5967_v48  ;;  %v5975_v45 = vmax.f32 %v5973_v60, %v5974_v11  ;;  %v5949_v43 = vmax.f32 %v5947_v22, %v5948_v59  ;;  %v5956_v28 = vmax.f32 %v5954_v33, %v5955_v10  ;;  %v18504_v59 = vpop.f32.mrb[30].mxu1 }
 0x4c0   :  { %v5982_v42 = vmax.f32 %v5980_v58, %v5981_v35  ;;  %v5994_v30 = vmax.f32 %v5992_v21, %v5993_v18  ;;  %v5989_v23 = vmax.f32 %v5987_v1, %v5988_v63  ;;  %v5963_v9 = vmax.f32 %v5961_v51, %v5962_v47  ;;  %v18502_v18 = vpop.f32.mrb[30].mxu0  ;;  %21980 = vst [vmem:[#allocation155_spill] sm:$0xff] %v18504_v59  ;;  %v21984_v47 = vld [vmem:[#allocation28_spill] sm:$0xff] }
 0x4c1   :  { %v5969_v41 = vrot.slane %v5968_v7, 1  ;;  %v5976_v32 = vrot.slane %v5975_v45, 1  ;;  %v18453_v38 = vmax.f32 %v5893_v55, %v5907_v34  ;;  %v18455_v8 = vmax.f32 %v5900_v0, %v5914_v29 }
 0x4c2   :  { %v5983_v3 = vrot.slane %v5982_v42, 1  ;;  %v5995_v54 = vrot.slane %v5994_v30, 2  ;;  %v5990_v15 = vrot.slane %v5989_v23, 1  ;;  %v18457_v60 = vmax.f32 %v5921_v2, %v5935_v53 }
 0x4c3   :  { %v5970_v39 = vmax.f32 %v5968_v7, %v5969_v41  ;;  %21965 = vst [vmem:[#allocation85_spill] sm:$0xff] %v18453_v38  ;;  %21966 = vst [vmem:[#allocation96_spill] sm:$0xff] %v18455_v8  ;;  %v5977_v4 = vmax.f32 %v5975_v45, %v5976_v32  ;;  %v18459_v21 = vmax.f32 %v5928_v6, %v5942_v52  ;;  %v2292_v6 = vmax.f32 %v18390_v17, 0.0  ;;  %v18517_v45 = vpop.f32.mrb[31].mxu0  ;;  %v21992_v32 = vld [vmem:[#allocation24_spill] sm:$0xff] }
 0x4c4   :  { %v5984_v48 = vmax.f32 %v5982_v42, %v5983_v3  ;;  %v5996_v57 = vmax.f32 %v5994_v30, %v5995_v54  ;;  %21967 = vst [vmem:[#allocation144_spill] sm:$0xff] %v18457_v60  ;;  %v5991_v58 = vmax.f32 %v5989_v23, %v5990_v15  ;;  %v18461_v22 = vmax.f32 %v5949_v43, %v5963_v9  ;;  %v21991_v9 = vld [vmem:[#allocation23_spill] sm:$0xff]  ;;  %v21994_v3 = vld [vmem:[#allocation25_spill] sm:$0xff] }
 0x4c5   :  { %21968 = vst [vmem:[#allocation145_spill] sm:$0xff] %v18459_v21  ;;  %v18463_v33 = vmax.f32 %v5956_v28, %v5970_v39  ;;  %v18468_v41 = vsel %vm6783_vm11, %v18453_v38, %v18370_v62  ;;  %v18473_v0 = vsel %vm6783_vm11, %v18455_v8, %v18372_v27  ;;  %v7067_v55 = vsel %vm6783_vm11, %v18457_v60, %v18453_v38 }
 0x4c6   :  { %21969 = vst [vmem:[#allocation146_spill] sm:$0xff] %v18461_v22  ;;  %v5997_v1 = vrot.slane %v5996_v57, 1  ;;  %21971 = vst [vmem:[#allocation148_spill] sm:$0xff] %v18468_v41  ;;  %v18481_v34 = vsel %vm6783_vm11, %v18124_v44, %v18120_v46  ;;  %v18486_v29 = vsel %vm6783_vm11, %v18143_v56, %v18124_v44  ;;  %v18488_v2 = vmax.f32 %v5977_v4, %v5991_v58  ;;  %v21995_v4 = vld [vmem:[#allocation27_spill] sm:$0xff]  ;;  %v21996_v58 = vld [vmem:[#allocation48_spill] sm:$0xff] }
 0x4c7   :  { %21970 = vst [vmem:[#allocation147_spill] sm:$0xff] %v18463_v33  ;;  %21972 = vst [vmem:[#allocation149_spill] sm:$0xff] %v18473_v0  ;;  %v21976_v53 = vrot.slane %v18305_v36, 1  ;;  %v21978_v51 = vrot.slane %v18316_v19, 1  ;;  %v2294_v35 = vmax.f32 %v18394_v40, 0.0  ;;  %v18508_v17 = vsel %vm6785_vm12, %v18461_v22, %v7067_v55  ;;  %v18519_v40 = vpop.f32.mrb[31].mxu1 }
 0x4c8   :  { %21973 = vst [vmem:[#allocation150_spill] sm:$0xff] %v18481_v34  ;;  %21974 = vst [vmem:[#allocation151_spill] sm:$0xff] %v18486_v29  ;;  %v5998_v46 = vmax.f32 %v5996_v57, %v5997_v1  ;;  %v21982_v10 = vmax.f32 %v18352_v12, 0.0  ;;  %v21989_v30 = vmax.f32 %v18359_v20, 0.0  ;;  %v21993_v12 = vmax.f32 %v21991_v9, %v21992_v32  ;;  %v21997_v1 = vld [vmem:[#allocation47_spill] sm:$0xff] }
 0x4c9   :  { %21975 = vst [vmem:[#allocation152_spill] sm:$0xff] %v18488_v2  ;;  %v18494_v52 = vmax.f32 %v18305_v36, %v21976_v53  ;;  %v18499_v11 = vmax.f32 %v18316_v19, %v21978_v51  ;;  %21981 = vst [vmem:[#allocation156_spill] sm:$0xff] %v18508_v17  ;;  %v21985_v19 = vld [vmem:[#allocation26_spill] sm:$0xff]  ;;  %v6796_v55 = vsel %vm6785_vm12, %v21997_v1, %v21996_v58  ;;  %v21999_v51 = vld [vmem:[#allocation53_spill] sm:$0xff] }
 0x4ca   :  { %v2851_v36 = vcombine.low %v21982_v10, %v2292_v6  ;;  %v21983_v7 = vmov %v21982_v10  ;;  %v6786_v57 = vsel %vm6785_vm12, %v21985_v19, %v21984_v47  ;;  %21986 = vst [vmem:[#allocation28_spill] sm:$0xff] %v18517_v45  ;;  %21987 = vst [vmem:[#allocation26_spill] sm:$0xff] %v18519_v40  ;;  %v18521_v42 = vmax.f32 %v5984_v48, %v5998_v46  ;;  %v22003_v47 = vld [vmem:[#allocation45_spill] sm:$0xff] }
 0x4cb   :  { %21977 = vst [vmem:[#allocation153_spill] sm:$0xff] %v18494_v52  ;;  %21979 = vst [vmem:[#allocation154_spill] sm:$0xff] %v18499_v11  ;;  %v2852_v63 = vcombine.high %v21983_v7, %v2292_v6  ;;  %v2853_v43 = vcombine.low %v21989_v30, %v2294_v35  ;;  %v21990_v28 = vmov %v21989_v30  ;;  %v6791_v54 = vsel %vm6783_vm11, %v21994_v3, %v21993_v12  ;;  %v22005_v30 = vld [vmem:[#allocation46_spill] sm:$0xff] }
 0x4cc   :  { %21988 = vst [vmem:[#allocation157_spill] sm:$0xff] %v18521_v42  ;;  %v2854_v23 = vcombine.high %v21990_v28, %v2294_v35  ;;  %v2861_v39 = vrot.slane %v2851_v36, %v16498_v50  ;;  %v6792_v48 = vsel %vm6785_vm12, %v21995_v4, %v6791_v54  ;;  %v18542_v20 = vsel %vm6783_vm11, %v18459_v21, %v18455_v8  ;;  %v22000_v35 = vld [vmem:[#allocation29_spill] sm:$0xff]  ;;  %v22001_v36 = vld [vmem:[#allocation30_spill] sm:$0xff] }
 0x4cd   :  { %v2868_v15 = vrot.slane %v2852_v63, %v16498_v50  ;;  %21998 = vst [vmem:[#allocation23_spill] sm:$0xff] %v18542_v20  ;;  %v2875_v6 = vrot.slane %v2853_v43, %v16498_v50  ;;  %v6797_v46 = vsel %vm6787_vm13, %v21999_v51, %v6796_v55  ;;  %v6788_v10 = vsel %vm6787_vm13, %v22000_v35, %v6786_v57  ;;  %v22002_v63 = vld [vmem:[#allocation44_spill] sm:$0xff] }
 0x4ce   :  { %v2882_v53 = vrot.slane %v2854_v23, %v16498_v50  ;;  %v6793_v7 = vsel %vm6787_vm13, %v22001_v36, %v6792_v48  ;;  %v22004_v19 = vmax.f32 %v22002_v63, %v22003_v47  ;;  %v22006_v63 = vld [vmem:[#allocation33_spill] sm:$0xff] }
 0x4cf   :  { %v2883_v43 = vcombine.low %v2861_v39, %v2875_v6  ;;  %v2884_v9 = vcombine.high %v2861_v39, %v2875_v6  ;;  %v14136_v12 = vcombine.low %v2875_v6, %v2875_v6  ;;  %v14137_v54 = vcombine.high %v2875_v6, %v2875_v6 }
 0x4d0   :  { %v18557_v28 = vsel %vm6783_vm11, %v22005_v30, %v22004_v19  ;;  %v2885_v23 = vcombine.low %v2868_v15, %v2882_v53  ;;  %v2886_v32 = vcombine.high %v2868_v15, %v2882_v53  ;;  %v14138_v58 = vcombine.low %v2882_v53, %v2882_v53  ;;  %v22007_v15 = vld [vmem:[#allocation34_spill] sm:$0xff] }
 0x4d1   :  { %v14139_v1 = vcombine.high %v2882_v53, %v2882_v53  ;;  %v3922_v57 = vrot.slane %v2883_v43, %v16498_v50  ;;  %v3939_v55 = vrot.slane %v2884_v9, %v16498_v50  ;;  %v18566_v47 = vsel %vm6789_vm14, %v22006_v63, %v6788_v10  ;;  %v22008_v53 = vld [vmem:[#allocation55_spill] sm:$0xff] }
 0x4d2   :  { %v18562_v48 = vrot.slane %v2885_v23, %v16498_v50  ;;  %v3929_v19 = vrot.slane %v14136_v12, %v16498_v50  ;;  %v3946_v39 = vrot.slane %v14137_v54, %v16498_v50  ;;  %v18572_v6 = vsel %vm6789_vm14, %v22007_v15, %v6793_v7 }
 0x4d3   :  { %v18576_v43 = vsel %vm6789_vm14, %v22008_v53, %v6797_v46  ;;  %v3930_v9 = vcombine.high %v3922_v57, %v3922_v57  ;;  %v3947_v52 = vcombine.high %v3939_v55, %v3939_v55  ;;  %v18579_v23 = vrot.slane %v14138_v58, %v16498_v50 }
 0x4d4   :  { %v18582_v10 = vrot.slane %v2886_v32, %v16498_v50  ;;  %v3931_v11 = vcombine.high %v3929_v19, %v3929_v19  ;;  %v3948_v12 = vcombine.high %v3946_v39, %v3946_v39  ;;  %v3964_v54 = vcombine.high %v18562_v48, %v18562_v48 }
 0x4d5   :  { %v18587_v7 = vrot.slane %v14139_v1, %v16498_v50  ;;  %v5999_v29 = vsel %vm211_vm0, %v3922_v57, -inf  ;;  %v6006_v46 = vsel %vm211_vm0, %v3930_v9, -inf  ;;  %v6013_v20 = vsel %vm211_vm0, %v3929_v19, -inf }
 0x4d6   :  { %v6027_v58 = vsel %vm211_vm0, %v3939_v55, -inf  ;;  %v6000_v42 = vrot.slane %v5999_v29, 4  ;;  %v6007_v0 = vrot.slane %v6006_v46, 4  ;;  %v6014_v32 = vrot.slane %v6013_v20, 4 }
 0x4d7   :  { %v6020_v41 = vsel %vm211_vm0, %v3931_v11, -inf  ;;  %v6028_v22 = vrot.slane %v6027_v58, 4  ;;  %v6034_v34 = vsel %vm211_vm0, %v3947_v52, -inf  ;;  %v6041_v1 = vsel %vm211_vm0, %v3946_v39, -inf }
 0x4d8   :  { %v6021_v33 = vrot.slane %v6020_v41, 4  ;;  %v6001_v21 = vmax.f32 %v5999_v29, %v6000_v42  ;;  %v6008_v60 = vmax.f32 %v6006_v46, %v6007_v0  ;;  %v6015_v57 = vmax.f32 %v6013_v20, %v6014_v32  ;;  %v22010_v32 = vld [vmem:[#allocation71_spill] sm:$0xff] }
 0x4d9   :  { %v6035_v8 = vrot.slane %v6034_v34, 4  ;;  %v6029_v27 = vmax.f32 %v6027_v58, %v6028_v22  ;;  %v6042_v19 = vrot.slane %v6041_v1, 4  ;;  %v6048_v55 = vsel %vm211_vm0, %v3948_v12, -inf }
 0x4da   :  { %v6022_v9 = vmax.f32 %v6020_v41, %v6021_v33  ;;  %v6002_v38 = vrot.slane %v6001_v21, 2  ;;  %v6009_v56 = vrot.slane %v6008_v60, 2  ;;  %v6016_v62 = vrot.slane %v6015_v57, 2 }
 0x4db   :  { %v6036_v44 = vmax.f32 %v6034_v34, %v6035_v8  ;;  %v6030_v14 = vrot.slane %v6029_v27, 2  ;;  %v6043_v13 = vmax.f32 %v6041_v1, %v6042_v19  ;;  %v6049_v2 = vrot.slane %v6048_v55, 4  ;;  %v22011_v1 = vld [vmem:[#allocation73_spill] sm:$0xff] }
 0x4dc   :  { %v6023_v11 = vrot.slane %v6022_v9, 2  ;;  %v6003_v52 = vmax.f32 %v6001_v21, %v6002_v38  ;;  %v6010_v17 = vmax.f32 %v6008_v60, %v6009_v56  ;;  %v6017_v39 = vmax.f32 %v6015_v57, %v6016_v62 }
 0x4dd   :  { %v6037_v29 = vrot.slane %v6036_v44, 2  ;;  %v6031_v42 = vmax.f32 %v6029_v27, %v6030_v14  ;;  %v6044_v20 = vrot.slane %v6043_v13, 2  ;;  %v18597_v33 = vmax.f32 %v6048_v55, %v6049_v2 }
 0x4de   :  { %v6024_v0 = vmax.f32 %v6022_v9, %v6023_v11  ;;  %v6004_v22 = vrot.slane %v6003_v52, 1  ;;  %v6011_v41 = vrot.slane %v6010_v17, 1  ;;  %v6018_v12 = vrot.slane %v6017_v39, 1 }
 0x4df   :  { %v18599_v46 = vmax.f32 %v6036_v44, %v6037_v29  ;;  %v6032_v8 = vrot.slane %v6031_v42, 1  ;;  %v6045_v34 = vmax.f32 %v6043_v13, %v6044_v20  ;;  %v18604_v38 = vsel %vm6785_vm12, %v22011_v1, %v22010_v32 }
 0x4e0   :  { %v6025_v58 = vrot.slane %v6024_v0, 1  ;;  %v3965_v56 = vcombine.high %v18579_v23, %v18579_v23  ;;  %v3981_v14 = vcombine.high %v18582_v10, %v18582_v10  ;;  %v3982_v62 = vcombine.high %v18587_v7, %v18587_v7 }
 0x4e1   :  { %22009 = vst [vmem:[#allocation24_spill] sm:$0xff] %v18599_v46  ;;  %v6005_v27 = vmax.f32 %v6003_v52, %v6004_v22  ;;  %v6012_v60 = vmax.f32 %v6010_v17, %v6011_v41  ;;  %v6019_v21 = vmax.f32 %v6017_v39, %v6018_v12  ;;  %v6046_v13 = vrot.slane %v6045_v34, 1 }
 0x4e2   :  { %v6055_v57 = vsel %vm211_vm0, %v18562_v48, -inf  ;;  %v6062_v9 = vsel %vm211_vm0, %v3964_v54, -inf  ;;  %v6069_v19 = vsel %vm211_vm0, %v18579_v23, -inf  ;;  %v6026_v55 = vmax.f32 %v6024_v0, %v6025_v58 }
 0x4e3   :  { %v18619_v11 = vmax.f32 %v6031_v42, %v6032_v8  ;;  %v6056_v29 = vrot.slane %v6055_v57, 4  ;;  %v6063_v20 = vrot.slane %v6062_v9, 4  ;;  %v6070_v32 = vrot.slane %v6069_v19, 4 }
 0x4e4   :  { %v6076_v17 = vsel %vm211_vm0, %v3965_v56, -inf  ;;  %v6083_v52 = vsel %vm211_vm0, %v18582_v10, -inf  ;;  %v6090_v39 = vsel %vm211_vm0, %v3981_v14, -inf  ;;  %v18625_v22 = vmax.f32 %v6045_v34, %v6046_v13 }
 0x4e5   :  { %22012 = vst [vmem:[#allocation25_spill] sm:$0xff] %v18619_v11  ;;  %v6057_v48 = vmax.f32 %v6055_v57, %v6056_v29  ;;  %v6064_v54 = vmax.f32 %v6062_v9, %v6063_v20  ;;  %v6077_v41 = vrot.slane %v6076_v17, 4  ;;  %v6071_v12 = vmax.f32 %v6069_v19, %v6070_v32  ;;  %v22046_v11 = vld [vmem:[#allocation57_spill] sm:$0xff] }
 0x4e6   :  { %22013 = vst [vmem:[#allocation48_spill] sm:$0xff] %v18625_v22  ;;  %v6084_v23 = vrot.slane %v6083_v52, 4  ;;  %v6091_v0 = vrot.slane %v6090_v39, 4  ;;  %v6097_v42 = vsel %vm211_vm0, %v18587_v7, -inf  ;;  %v6104_v14 = vsel %vm211_vm0, %v3982_v62, -inf  ;;  %v22044_v22 = vld [vmem:[#allocation35_spill] sm:$0xff] }
 0x4e7   :  { %v6058_v58 = vrot.slane %v6057_v48, 2  ;;  %v6065_v8 = vrot.slane %v6064_v54, 2  ;;  %v6078_v1 = vmax.f32 %v6076_v17, %v6077_v41  ;;  %v6098_v56 = vrot.slane %v6097_v42, 4 }
 0x4e8   :  { %v6072_v2 = vrot.slane %v6071_v12, 2  ;;  %v6085_v44 = vmax.f32 %v6083_v52, %v6084_v23  ;;  %v6092_v10 = vmax.f32 %v6090_v39, %v6091_v0  ;;  %v6105_v32 = vrot.slane %v6104_v14, 4 }
 0x4e9   :  { %v6059_v34 = vmax.f32 %v6057_v48, %v6058_v58  ;;  %v6066_v13 = vmax.f32 %v6064_v54, %v6065_v8  ;;  %v6079_v57 = vrot.slane %v6078_v1, 2  ;;  %v6099_v9 = vmax.f32 %v6097_v42, %v6098_v56  ;;  %v18634_v42 = vpop.f32.mrb[32].mxu1 }
 0x4ea   :  { %v6073_v29 = vmax.f32 %v6071_v12, %v6072_v2  ;;  %v6086_v19 = vrot.slane %v6085_v44, 2  ;;  %v6093_v20 = vrot.slane %v6092_v10, 2  ;;  %v6106_v59 = vmax.f32 %v6104_v14, %v6105_v32  ;;  %v18632_v12 = vpop.f32.mrb[32].mxu0  ;;  %v22022_v32 = vld [vmem:[#allocation72_spill] sm:$0xff] }
 0x4eb   :  { %v6060_v46 = vrot.slane %v6059_v34, 1  ;;  %v6067_v40 = vrot.slane %v6066_v13, 1  ;;  %v6080_v7 = vmax.f32 %v6078_v1, %v6079_v57  ;;  %v6100_v50 = vrot.slane %v6099_v9, 2 }
 0x4ec   :  { %v6074_v45 = vrot.slane %v6073_v29, 1  ;;  %v6087_v17 = vmax.f32 %v6085_v44, %v6086_v19  ;;  %v6094_v41 = vmax.f32 %v6092_v10, %v6093_v20  ;;  %v6107_v2 = vrot.slane %v6106_v59, 2  ;;  %v22020_v19 = vld [vmem:[#allocation68_spill] sm:$0xff] }
 0x4ed   :  { %v6061_v52 = vmax.f32 %v6059_v34, %v6060_v46  ;;  %v18630_v39 = vmax.f32 %v6066_v13, %v6067_v40  ;;  %v6081_v62 = vrot.slane %v6080_v7, 1  ;;  %v6101_v48 = vmax.f32 %v6099_v9, %v6100_v50  ;;  %v18642_v46 = vpop.f32.mrb[33].mxu0  ;;  %v18644_v40 = vpop.f32.mrb[33].mxu1  ;;  %v22018_v9 = vld [vmem:[#allocation75_spill] sm:$0xff]  ;;  %v22039_v10 = vld [vmem:[#allocation104_spill] sm:$0xff] }
 0x4ee   :  { %v6075_v54 = vmax.f32 %v6073_v29, %v6074_v45  ;;  %v6088_v23 = vrot.slane %v6087_v17, 1  ;;  %v6095_v0 = vrot.slane %v6094_v41, 1  ;;  %v18638_v1 = vmax.f32 %v6005_v27, %v6019_v21  ;;  %v22016_v27 = vld [vmem:[#allocation50_spill] sm:$0xff]  ;;  %v22019_v29 = vld [vmem:[#allocation67_spill] sm:$0xff] }
 0x4ef   :  { %v18636_v58 = vmax.f32 %v6080_v7, %v6081_v62  ;;  %v6102_v8 = vrot.slane %v6101_v48, 1  ;;  %v18640_v44 = vmax.f32 %v6012_v60, %v6026_v55  ;;  %v6108_v56 = vmax.f32 %v6106_v59, %v6107_v2  ;;  %v22017_v55 = vld [vmem:[#allocation54_spill] sm:$0xff]  ;;  %v22027_v2 = vld [vmem:[#allocation103_spill] sm:$0xff] }
 0x4f0   :  { %22014 = vst [vmem:[#allocation47_spill] sm:$0xff] %v18638_v1  ;;  %v6089_v50 = vmax.f32 %v6087_v17, %v6088_v23  ;;  %v6096_v45 = vmax.f32 %v6094_v41, %v6095_v0  ;;  %v6667_v34 = vmax.f32 %v6061_v52, %v6075_v54  ;;  %v6800_v60 = vsel %vm6785_vm12, %v22016_v27, %v18557_v28  ;;  %v22024_v52 = vld [vmem:[#allocation56_spill] sm:$0xff] }
 0x4f1   :  { %22015 = vst [vmem:[#allocation53_spill] sm:$0xff] %v18640_v44  ;;  %v6103_v14 = vmax.f32 %v6101_v48, %v6102_v8  ;;  %v6109_v21 = vrot.slane %v6108_v56, 1  ;;  %v6801_v57 = vsel %vm6787_vm13, %v22017_v55, %v6800_v60  ;;  %v6805_v59 = vsel %vm6787_vm13, %v22018_v9, %v18604_v38  ;;  %v22025_v48 = vld [vmem:[#allocation74_spill] sm:$0xff]  ;;  %v22026_v23 = vld [vmem:[#allocation76_spill] sm:$0xff]  ;;  %v22028_v8 = vld [vmem:[#allocation99_spill] sm:$0xff] }
 0x4f2   :  { %v22021_v20 = vmax.f32 %v22019_v29, %v22020_v19  ;;  %v22023_v17 = vrot.slane %v18597_v33, 2  ;;  %v18672_v62 = vsel %vm6789_vm14, %v22024_v52, %v6801_v57  ;;  %v6812_v60 = vsel %vm6785_vm12, %v22028_v8, %v22027_v2  ;;  %v22029_v29 = vld [vmem:[#allocation92_spill] sm:$0xff]  ;;  %v22036_v8 = vld [vmem:[#allocation78_spill] sm:$0xff] }
 0x4f3   :  { %v18668_v28 = vmax.f32 %v6089_v50, %v6103_v14  ;;  %v6110_v54 = vmax.f32 %v6108_v56, %v6109_v21  ;;  %v22032_v50 = vld [vmem:[#allocation98_spill] sm:$0xff]  ;;  %v22034_v21 = vld [vmem:[#allocation101_spill] sm:$0xff] }
 0x4f4   :  { %v6807_v7 = vsel %vm6783_vm11, %v22022_v32, %v22021_v20  ;;  %v18666_v41 = vmax.f32 %v18597_v33, %v22023_v17  ;;  %v22030_v33 = vld [vmem:[#allocation93_spill] sm:$0xff]  ;;  %v22035_v17 = vld [vmem:[#allocation100_spill] sm:$0xff] }
 0x4f5   :  { %v6808_v38 = vsel %vm6785_vm12, %v22025_v48, %v6807_v7  ;;  %v22031_v19 = vmax.f32 %v22029_v29, %v22030_v33  ;;  %v18688_v57 = vsel %vm6783_vm11, %v18668_v28, %v6667_v34  ;;  %v22033_v20 = vld [vmem:[#allocation77_spill] sm:$0xff]  ;;  %v6813_v7 = vsel %vm6787_vm13, %v22034_v21, %v6812_v60  ;;  %v22037_v33 = vld [vmem:[#allocation102_spill] sm:$0xff] }
 0x4f6   :  { %v6809_v0 = vsel %vm6787_vm13, %v22026_v23, %v6808_v38  ;;  %v18692_v56 = vsel %vm6789_vm14, %v22033_v20, %v6805_v59  ;;  %v18698_v2 = vmax.f32 %v6096_v45, %v6110_v54  ;;  %v18711_v13 = vsel %vm6789_vm14, %v22039_v10, %v6813_v7  ;;  %v22041_v54 = vld [vmem:[#allocation49_spill] sm:$0xff] }
 0x4f7   :  { %v6815_v14 = vsel %vm6783_vm11, %v22032_v50, %v22031_v19  ;;  %v18702_v29 = vsel %vm6789_vm14, %v22036_v8, %v6809_v0  ;;  %v22038_v19 = vld [vmem:[#allocation41_spill] sm:$0xff]  ;;  %22040 = vst [vmem:[#allocation44_spill] sm:$0xff] %v18711_v13  ;;  %v6871_v45 = vsel %vm6783_vm11, %v21995_v4, %v21994_v3  ;;  %v6876_v0 = vsel %vm6785_vm12, %v21999_v51, %v22041_v54  ;;  %v22045_v54 = vld [vmem:[#allocation84_spill] sm:$0xff] }
 0x4f8   :  { %v6816_v38 = vsel %vm6785_vm12, %v22035_v17, %v6815_v14  ;;  %v6868_v59 = vsel %vm6785_vm12, %v22000_v35, %v22038_v19  ;;  %v22042_v14 = vld [vmem:[#allocation105_spill] sm:$0xff]  ;;  %v6872_v19 = vsel %vm6785_vm12, %v22001_v36, %v6871_v45  ;;  %v6877_v7 = vsel %vm6787_vm13, %v22008_v53, %v6876_v0  ;;  %v14943_v35 = vld [vmem:[#allocation6 + $0x20c] ss:$16 sps:$4 sm:$0xff]  }
 0x4f9   :  { %v6817_v34 = vsel %vm6787_vm13, %v22037_v33, %v6816_v38  ;;  %v6869_v60 = vsel %vm6787_vm13, %v22006_v63, %v6868_v59  ;;  %v6879_v59 = vsel %vm6783_vm11, %v22016_v27, %v22005_v30  ;;  %v6873_v51 = vsel %vm6787_vm13, %v22007_v15, %v6872_v19  ;;  %v22047_v19 = vld [vmem:[#allocation36_spill] sm:$0xff]  ;;  %11825 = vmatprep.subr.bf16.mxu1 %v14943_v35 }
 0x4fa   :  { %v18723_v38 = vsel %vm6789_vm14, %v22042_v14, %v6817_v34  ;;  %v18734_v3 = vsel %vm6789_vm14, %v22044_v22, %v6869_v60  ;;  %v6880_v34 = vsel %vm6785_vm12, %v22017_v55, %v6879_v59  ;;  %v6884_v45 = vsel %vm6785_vm12, %v22018_v9, %v22045_v54  ;;  %v22048_v59 = vld [vmem:[#allocation58_spill] sm:$0xff]  ;;  %v22049_v9 = vld [vmem:[#allocation109_spill] sm:$0xff] }
 0x4fb   :  { %22043 = vst [vmem:[#allocation45_spill] sm:$0xff] %v18723_v38  ;;  %v18745_v0 = vsel %vm6789_vm14, %v22046_v11, %v6877_v7  ;;  %v6881_v30 = vsel %vm6787_vm13, %v22024_v52, %v6880_v34  ;;  %v6885_v27 = vsel %vm6787_vm13, %v22033_v20, %v6884_v45  ;;  %v6887_v60 = vsel %vm6783_vm11, %v22025_v48, %v22022_v32  ;;  %v14940_v45 = vld [vmem:[#allocation6 + $0x204] ss:$16 sps:$4 sm:$0xff]   ;;  %v22050_v20 = vld [vmem:[#allocation80_spill] sm:$0xff] }
 0x4fc   :  { %v18756_v55 = vsel %vm6789_vm14, %v22047_v19, %v6873_v51  ;;  %v18760_v54 = vsel %vm6789_vm14, %v22048_v59, %v6881_v30  ;;  %v6888_v7 = vsel %vm6785_vm12, %v22026_v23, %v6887_v60  ;;  %v6892_v34 = vsel %vm6785_vm12, %v22034_v21, %v22049_v9  ;;  %v22051_v48 = vld [vmem:[#allocation59_spill] sm:$0xff]  ;;  %11520 = vmatprep.subr.bf16.mxu0 %v14940_v45 }
 0x4fd   :  { %v18769_v32 = vsel %vm6789_vm14, %v22050_v20, %v6885_v27  ;;  %v6889_v51 = vsel %vm6787_vm13, %v22036_v8, %v6888_v7  ;;  %v6895_v30 = vsel %vm6783_vm11, %v22035_v17, %v22032_v50  ;;  %v6956_v60 = vsel %vm6785_vm12, %v22008_v53, %v22051_v48  ;;  %v22052_v23 = vld [vmem:[#allocation83_spill] sm:$0xff]  ;;  %v18789_v8 = vpop.f32.mrb[34].mxu0  ;;  %v18791_v50 = vpop.f32.mrb[34].mxu1 }
 0x4fe   :  { %v18781_v9 = vsel %vm6789_vm14, %v22052_v23, %v6889_v51  ;;  %v6893_v21 = vsel %vm6787_vm13, %v22039_v10, %v6892_v34  ;;  %v6896_v27 = vsel %vm6785_vm12, %v22037_v33, %v6895_v30  ;;  %v6957_v7 = vsel %vm6787_vm13, %v22046_v11, %v6956_v60  ;;  %v22054_v51 = vld [vmem:[#allocation62_spill] sm:$0xff]  ;;  %v22056_v33 = vld [vmem:[#allocation60_spill] sm:$0xff]  ;;  %v18806_v60 = vpop.f32.mrb[35].mxu0  ;;  %v22057_v10 = vld [vmem:[#allocation79_spill] sm:$0xff] }
 0x4ff   :  { %v18795_v48 = vsel %vm6789_vm14, %v17967_v16, %v6893_v21  ;;  %v6897_v17 = vsel %vm6787_vm13, %v22042_v14, %v6896_v27  ;;  %v18801_v34 = vsel %vm6789_vm14, %v22054_v51, %v6957_v7  ;;  %v6960_v30 = vsel %vm6785_vm12, %v22024_v52, %v22056_v33  ;;  %v22058_v21 = vld [vmem:[#allocation69_spill] sm:$0xff]  ;;  %v22060_v27 = vld [vmem:[#allocation64_spill] sm:$0xff]  ;;  %v22061_v53 = vld [vmem:[#allocation63_spill] sm:$0xff] }
 0x500   :  { %22053 = vst [vmem:[#allocation46_spill] sm:$0xff] %v18795_v48  ;;  %22055 = vst [vmem:[#allocation71_spill] sm:$0xff] %v18801_v34  ;;  %v6961_v45 = vsel %vm6787_vm13, %v22048_v59, %v6960_v30  ;;  %v18813_v11 = vsel %vm6789_vm14, %v22058_v21, %v22057_v10  ;;  %v7040_v7 = vsel %vm6785_vm12, %v22048_v59, %v22060_v27  ;;  %v22063_v52 = vld [vmem:[#allocation70_spill] sm:$0xff]  ;;  %v15588_v59 = vmov 1966171168  }
 0x501   :  { %22059 = vst [vmem:[#allocation73_spill] sm:$0xff] %v18813_v11  ;;  %v7171_v51 = vcombine.low %v18566_v47, %v18572_v6  ;;  %v18822_v35 = vsel %vm6789_vm14, %v22061_v53, %v6961_v45  ;;  %v7041_v33 = vsel %vm6787_vm13, %v22061_v53, %v7040_v7  ;;  %v7172_v30 = vcombine.high %v18566_v47, %v18572_v6  ;;  %v22065_v53 = vld [vmem:[#allocation112_spill] sm:$0xff]  ;;  %v14982_v14 = vld [vmem:[#allocation6 + $0x2e4] ss:$16 sps:$4 sm:$0xff]  }
 0x502   :  { %22062 = vst [vmem:[#allocation50_spill] sm:$0xff] %v18822_v35  ;;  %v7173_v10 = vcombine.low %v18734_v3, %v18756_v55  ;;  %v18832_v21 = vsel %vm6789_vm14, %v22063_v52, %v7041_v33  ;;  %v7174_v27 = vcombine.high %v18734_v3, %v18756_v55  ;;  %v7328_v45 = vcombine.low %v18576_v43, %v18672_v62 }
 0x503   :  { %22064 = vst [vmem:[#allocation54_spill] sm:$0xff] %v18832_v21  ;;  %v7180_v23 = vunpack.c.l.s4 %v15588_v59  ;;  %v7329_v7 = vcombine.high %v18576_v43, %v18672_v62  ;;  %v7330_v47 = vcombine.low %v18745_v0, %v18760_v54  ;;  %v7331_v6 = vcombine.high %v18745_v0, %v18760_v54 }
 0x504   :  { %v18846_v33 = vsel %vm6789_vm14, %v22065_v53, %v6897_v17  ;;  %v7332_v3 = vcombine.low %v18801_v34, %v18822_v35  ;;  %v7485_v55 = vcombine.low %v18692_v56, %v18702_v29  ;;  %v7486_v59 = vcombine.high %v18692_v56, %v18702_v29  ;;  %v22067_v29 = vld [vmem:[#allocation21_spill] sm:$0xff] }
 0x505   :  { %22066 = vst [vmem:[#allocation67_spill] sm:$0xff] %v18846_v33  ;;  %v7181_v43 = vunpack.c.0.s8 %v7180_v23  ;;  %v7334_v62 = vcombine.low %v18813_v11, %v18832_v21  ;;  %v7487_v0 = vcombine.low %v18769_v32, %v18781_v9  ;;  %v7488_v54 = vcombine.high %v18769_v32, %v18781_v9 }
 0x506   :  { %v7642_v17 = vcombine.low %v18711_v13, %v18723_v38  ;;  %v18864_v52 = vadd.f32 %v18379_v31, %v16777_v24  ;;  %v18868_v56 = vadd.f32 %v18381_v61, %v16781_v37  ;;  %v18872_v23 = vadd.f32 %v18396_v26, %v16785_v49 }
 0x507   :  { %v18875_v11 = vsub.s32 %v7181_v43, %v22067_v29  ;;  %v7644_v32 = vcombine.low %v18795_v48, %v18846_v33  ;;  %v18881_v9 = vadd.f32 %v18398_v25, %v16789_v5  ;;  %v18885_v31 = vadd.f32 %v18502_v18, %v16777_v24  ;;  %v22069_v43 = vld [vmem:[#allocation155_spill] sm:$0xff] }
 0x508   :  { %v18892_v29 = vadd.f32 %v22069_v43, %v16781_v37 }
 0x509   :  { %22068 = vst [vmem:[#allocation68_spill] sm:$0xff] %v18875_v11  ;;  %v7185_v34 = vrot.slane %v7171_v51, %v18875_v11  ;;  %v7192_v35 = vrot.slane %v7172_v30, %v18875_v11  ;;  %v7199_v25 = vrot.slane %v7173_v10, %v18875_v11  ;;  %v7206_v20 = vrot.slane %v7174_v27, %v18875_v11 }
 0x50a   :  { %v7342_v18 = vrot.slane %v7328_v45, %v18875_v11  ;;  %v7349_v61 = vrot.slane %v7329_v7, %v18875_v11  ;;  %v7356_v21 = vrot.slane %v7330_v47, %v18875_v11  ;;  %v7363_v26 = vrot.slane %v7331_v6, %v18875_v11 }
 0x50b   :  { %v7235_v19 = vcombine.low %v7185_v34, %v7199_v25  ;;  %v7236_v15 = vcombine.high %v7185_v34, %v7199_v25  ;;  %v7237_v43 = vcombine.low %v7192_v35, %v7206_v20  ;;  %v7370_v36 = vrot.slane %v7332_v3, %v18875_v11  ;;  %v18912_v35 = vpop.f32.mrb[35].mxu1 }
 0x50c   :  { %v7384_v51 = vrot.slane %v7334_v62, %v18875_v11  ;;  %v7392_v30 = vcombine.low %v7342_v18, %v7356_v21  ;;  %v7393_v4 = vcombine.high %v7342_v18, %v7356_v21  ;;  %v7394_v10 = vcombine.low %v7349_v61, %v7363_v26 }
 0x50d   :  { %v7247_v27 = vrot.slane %v7235_v19, %v18875_v11  ;;  %v7254_v45 = vrot.slane %v7237_v43, %v18875_v11  ;;  %v7261_v7 = vrot.slane %v7236_v15, %v18875_v11  ;;  %v7499_v47 = vrot.slane %v7485_v55, %v18875_v11 }
 0x50e   :  { %v7395_v22 = vcombine.low %v7370_v36, %v7384_v51  ;;  %v7396_v6 = vcombine.high %v7370_v36, %v7384_v51  ;;  %v7404_v34 = vrot.slane %v7392_v30, %v18875_v11  ;;  %v18910_v20 = vrot.slane %v7394_v10, %v18875_v11 }
 0x50f   :  { %v18915_v21 = vrot.slane %v7393_v4, %v18875_v11  ;;  %v7506_v19 = vrot.slane %v7486_v59, %v18875_v11  ;;  %v7513_v3 = vrot.slane %v7487_v0, %v18875_v11  ;;  %v7520_v15 = vrot.slane %v7488_v54, %v18875_v11 }
 0x510   :  { %22070 = vst [vmem:[#allocation72_spill] sm:$0xff] %v18910_v20  ;;  %v18921_v55 = vrot.slane %v7395_v22, %v18875_v11  ;;  %v18924_v36 = vrot.slane %v7396_v6, %v18875_v11  ;;  %v18927_v62 = vrot.slane %v7642_v17, %v18875_v11  ;;  %v18930_v61 = vrot.slane %v7644_v32, %v18875_v11 }
 0x511   :  { %22071 = vst [vmem:[#allocation103_spill] sm:$0xff] %v18915_v21  ;;  %v7549_v4 = vcombine.low %v7499_v47, %v7513_v3  ;;  %v7550_v26 = vcombine.high %v7499_v47, %v7513_v3  ;;  %v7551_v25 = vcombine.low %v7506_v19, %v7520_v15  ;;  %v14156_v59 = vcombine.low %v7247_v27, %v7261_v7 }
 0x512   :  { %22072 = vst [vmem:[#allocation99_spill] sm:$0xff] %v18921_v55  ;;  %22073 = vst [vmem:[#allocation92_spill] sm:$0xff] %v18924_v36  ;;  %v7441_v0 = vcombine.high %v7404_v34, %v18921_v55  ;;  %v7444_v54 = vcombine.high %v18915_v21, %v18924_v36  ;;  %v7706_v22 = vcombine.low %v18927_v62, %v18930_v61 }
 0x513   :  { %22074 = vst [vmem:[#allocation93_spill] sm:$0xff] %v18927_v62  ;;  %22075 = vst [vmem:[#allocation98_spill] sm:$0xff] %v18930_v61  ;;  %v14158_v18 = vcombine.high %v7247_v27, %v7261_v7  ;;  %v7561_v43 = vrot.slane %v7549_v4, %v18875_v11  ;;  %v7568_v17 = vrot.slane %v7551_v25, %v18875_v11  ;;  %v14953_v61 = vld [vmem:[#allocation6 + $0x248] ss:$16 sps:$4 sm:$0xff]  }
 0x514   :  { %v7575_v32 = vrot.slane %v7550_v26, %v18875_v11  ;;  %v14160_v51 = vcombine.low %v7254_v45, %v7404_v34  ;;  %v18941_v30 = vrot.slane %v7706_v22, %v18875_v11  ;;  %v14162_v10 = vcombine.low %v18915_v21, %v7441_v0  ;;  %v22095_v21 = vld [vmem:[#allocation152_spill] sm:$0xff] }
 0x515   :  { %v8441_v47 = vrot.slane %v14156_v59, %v18875_v11  ;;  %v8455_v6 = vrot.slane %v14158_v18, %v18875_v11  ;;  %v14165_v27 = vcombine.low %v7444_v54, %v18910_v20  ;;  %v22077_v59 = vmax.f32 %v18872_v23, 0.0  ;;  %v22079_v18 = vld [vmem:[#allocation28_spill] sm:$0xff]  ;;  %v22088_v23 = vld [vmem:[#allocation22_spill] sm:$0xff] }
 0x516   :  { %22076 = vst [vmem:[#allocation101_spill] sm:$0xff] %v18941_v30  ;;  %v8469_v19 = vrot.slane %v14160_v51, %v18875_v11  ;;  %v14167_v7 = vcombine.low %v7561_v43, %v7575_v32  ;;  %v14169_v3 = vcombine.high %v7561_v43, %v7575_v32  ;;  %v8483_v15 = vrot.slane %v14162_v10, %v18875_v11 }
 0x517   :  { %v8491_v4 = vcombine.low %v8441_v47, %v8455_v6  ;;  %v8492_v26 = vcombine.high %v8441_v47, %v8455_v6  ;;  %v14171_v45 = vcombine.low %v7568_v17, %v18941_v30  ;;  %v8643_v34 = vrot.slane %v14165_v27, %v18875_v11  ;;  %v14952_v30 = vld [vmem:[#allocation6 + $0x244] ss:$16 sps:$4 sm:$0xff]  }
 0x518   :  { %v8657_v25 = vrot.slane %v14167_v7, %v18875_v11  ;;  %v22078_v0 = vmax.f32 %v18864_v52, 0.0  ;;  %v2104_v54 = vadd.f32 %v22079_v18, %v16785_v49  ;;  %v8495_v51 = vcombine.low %v8469_v19, %v8483_v15 }
 0x519   :  { %v8496_v43 = vcombine.high %v8469_v19, %v8483_v15  ;;  %v8671_v32 = vrot.slane %v14169_v3, %v18875_v11  ;;  %v8685_v10 = vrot.slane %v14171_v45, %v18875_v11  ;;  %v18961_v17 = vrot.slane %v8492_v26, %v18875_v11 }
 0x51a   :  { %v2887_v22 = vcombine.low %v22078_v0, %v22077_v59  ;;  %v8693_v47 = vcombine.low %v8643_v34, %v8657_v25  ;;  %v8694_v6 = vcombine.high %v8643_v34, %v8657_v25  ;;  %v22081_v27 = vmov %v22077_v59 }
 0x51b   :  { %22080 = vst [vmem:[#allocation100_spill] sm:$0xff] %v18961_v17  ;;  %v22082_v7 = vmov %v22078_v0  ;;  %v18968_v59 = vrot.slane %v8496_v43, %v18875_v11  ;;  %v8697_v0 = vcombine.low %v8671_v32, %v8685_v10  ;;  %v8698_v18 = vcombine.high %v8671_v32, %v8685_v10 }
 0x51c   :  { %v2888_v20 = vcombine.high %v22082_v7, %v22081_v27  ;;  %v18971_v19 = vrot.slane %v8495_v51, %v18875_v11  ;;  %v18974_v3 = vrot.slane %v8694_v6, %v18875_v11  ;;  %v18977_v15 = vrot.slane %v8491_v4, %v18875_v11  ;;  %v22091_v27 = vld [vmem:[#allocation26_spill] sm:$0xff] }
 0x51d   :  { %22083 = vst [vmem:[#allocation102_spill] sm:$0xff] %v18968_v59  ;;  %v18980_v26 = vrot.slane %v8693_v47, %v18875_v11  ;;  %v2897_v52 = vrot.slane %v2887_v22, %v22088_v23  ;;  %v8559_v45 = vcombine.low %v18961_v17, %v18968_v59  ;;  %v18986_v34 = vrot.slane %v8698_v18, %v18875_v11 }
 0x51e   :  { %22084 = vst [vmem:[#allocation41_spill] sm:$0xff] %v18971_v19  ;;  %22085 = vst [vmem:[#allocation49_spill] sm:$0xff] %v18974_v3  ;;  %v18989_v25 = vrot.slane %v8697_v0, %v18875_v11  ;;  %v2904_v51 = vrot.slane %v2888_v20, %v22088_v23  ;;  %v8555_v4 = vcombine.low %v18977_v15, %v18971_v19  ;;  %v2298_v43 = vmax.f32 %v18881_v9, 0.0  ;;  %v14938_v19 = vld [vmem:[#allocation6 + $0x200] ss:$16 sps:$4 sm:$0xff]  }
 0x51f   :  { %22086 = vst [vmem:[#allocation84_spill] sm:$0xff] %v18977_v15  ;;  %22087 = vst [vmem:[#allocation109_spill] sm:$0xff] %v18980_v26  ;;  %v2299_v32 = vmax.f32 %v18885_v31, 0.0  ;;  %v2300_v10 = vmax.f32 %v2104_v54, 0.0  ;;  %v8761_v22 = vcombine.low %v18974_v3, %v18986_v34  ;;  %v2301_v6 = vmax.f32 %v18892_v29, 0.0  ;;  %v22094_v54 = vld [vmem:[#allocation156_spill] sm:$0xff] }
 0x520   :  { %22089 = vst [vmem:[#allocation59_spill] sm:$0xff] %v18986_v34  ;;  %22090 = vst [vmem:[#allocation60_spill] sm:$0xff] %v18989_v25  ;;  %v8757_v47 = vcombine.low %v18980_v26, %v18989_v25  ;;  %v2227_v7 = vadd.f32 %v22091_v27, %v16789_v5  ;;  %v22092_v20 = vmax.f32 %v18868_v56, 0.0  ;;  %v19012_v36 = vsel %vm6787_vm13, %v22095_v21, %v22094_v54  ;;  %v22097_v26 = vld [vmem:[#allocation24_spill] sm:$0xff] }
 0x521   :  { %v2923_v55 = vcombine.low %v2299_v32, %v2300_v10  ;;  %v19007_v31 = vcombine.high %v2299_v32, %v2300_v10  ;;  %22096 = vst [vmem:[#allocation79_spill] sm:$0xff] %v19012_v36  ;;  %v9488_v63 = vpack.c.bf16 %v8761_v22, %v8559_v45  ;;  %v22098_v27 = vrot.slane %v22097_v26, 1  ;;  %v14941_v10 = vld [vmem:[#allocation6 + $0x208] ss:$16 sps:$4 sm:$0xff]  }
 0x522   :  { %v2889_v0 = vcombine.low %v22092_v20, %v2298_v43  ;;  %v22093_v18 = vmov %v22092_v20  ;;  %v9487_v15 = vpack.c.bf16 %v8757_v47, %v8555_v4  ;;  %v2302_v29 = vmax.f32 %v2227_v7, 0.0 }
 0x523   :  { %v2890_v9 = vcombine.high %v22093_v18, %v2298_v43  ;;  %v19017_v25 = vmax.f32 %v22097_v26, %v22098_v27  ;;  %v19023_v32 = vadd.f32 %v18632_v12, %v16777_v24  ;;  %11491 = vmatprep.mubr.bf16.mxu0 %v9488_v63  ;;  %11796 = vmatprep.mubr.bf16.mxu1 %v9488_v63 }
 0x524   :  { %v2911_v56 = vrot.slane %v2889_v0, %v22088_v23  ;;  %v19026_v45 = vrot.slane %v2923_v55, %v22088_v23  ;;  %v19028_v4 = vcombine.low %v2301_v6, %v2302_v29  ;;  %v19030_v22 = vcombine.high %v2301_v6, %v2302_v29  ;;  %11492 = vmatmul.mubr.bf16.vlgmr.msra.gmra.mrb[36].mxu0 %v9487_v15 }
 0x525   :  { %22099 = vst [vmem:[#allocation64_spill] sm:$0xff] %v19017_v25  ;;  %v2918_v43 = vrot.slane %v2890_v9, %v22088_v23  ;;  %11797 = vmatmul.mubr.bf16.vlgmr.msra.gmra.mrb[36].mxu1 %v9487_v15  ;;  %11521 = vmatpush1.bf16.msra.mxu0 %v14938_v19 }
 0x526   :  { %v2919_v47 = vcombine.low %v2897_v52, %v2911_v56  ;;  %v2920_v7 = vcombine.high %v2897_v52, %v2911_v56  ;;  %v14140_v12 = vcombine.low %v2911_v56, %v2911_v56  ;;  %v14141_v18 = vcombine.high %v2911_v56, %v2911_v56  ;;  %11826 = vmatpush1.bf16.msra.mxu1 %v14941_v10  ;;  %v14949_v10 = vld [vmem:[#allocation6 + $0x22c] ss:$16 sps:$4 sm:$0xff]  }
 0x527   :  { %v2921_v20 = vcombine.low %v2904_v51, %v2918_v43  ;;  %v2922_v0 = vcombine.high %v2904_v51, %v2918_v43  ;;  %v14142_v9 = vcombine.low %v2918_v43, %v2918_v43  ;;  %v14143_v6 = vcombine.high %v2918_v43, %v2918_v43  ;;  %v14946_v43 = vld [vmem:[#allocation6 + $0x224] ss:$16 sps:$4 sm:$0xff]   ;;  %11827 = vmatprep.subr.bf16.mxu1 %v14949_v10  ;;  %v14950_v10 = vld [vmem:[#allocation6 + $0x240] ss:$16 sps:$4 sm:$0xff]  }
 0x528   :  { %v3990_v63 = vrot.slane %v2919_v47, %v22088_v23  ;;  %v4007_v55 = vrot.slane %v2920_v7, %v22088_v23  ;;  %v3997_v29 = vrot.slane %v14140_v12, %v22088_v23  ;;  %v4014_v15 = vrot.slane %v14141_v18, %v22088_v23  ;;  %11522 = vmatprep.subr.bf16.mxu0 %v14946_v43 }
 0x529   :  { %v19036_v54 = vrot.slane %v2921_v20, %v22088_v23  ;;  %v19041_v52 = vrot.slane %v14142_v9, %v22088_v23  ;;  %v19044_v51 = vrot.slane %v2922_v0, %v22088_v23  ;;  %v19049_v47 = vrot.slane %v14143_v6, %v22088_v23  ;;  %v14944_v0 = vld [vmem:[#allocation6 + $0x220] ss:$16 sps:$4 sm:$0xff]   ;;  %v14947_v9 = vld [vmem:[#allocation6 + $0x228] ss:$16 sps:$4 sm:$0xff]  }
 0x52a   :  { %v3998_v19 = vcombine.high %v3990_v63, %v3990_v63  ;;  %v4015_v27 = vcombine.high %v4007_v55, %v4007_v55  ;;  %v3999_v7 = vcombine.high %v3997_v29, %v3997_v29  ;;  %v4016_v20 = vcombine.high %v4014_v15, %v4014_v15  ;;  %11523 = vmatpush1.bf16.msra.mxu0 %v14944_v0  ;;  %v14955_v0 = vld [vmem:[#allocation6 + $0x24c] ss:$16 sps:$4 sm:$0xff]  }
 0x52b   :  { %v6111_v56 = vsel %vm211_vm0, %v3990_v63, -inf  ;;  %v6125_v25 = vsel %vm211_vm0, %v3997_v29, -inf  ;;  %11828 = vmatpush1.bf16.msra.mxu1 %v14947_v9  ;;  %v6139_v34 = vsel %vm211_vm0, %v4007_v55, -inf  ;;  %v6153_v63 = vsel %vm211_vm0, %v4014_v15, -inf  ;;  %11524 = vmatprep.subr.bf16.mxu0 %v14952_v30  ;;  %v14959_v30 = vld [vmem:[#allocation6 + $0x268] ss:$16 sps:$4 sm:$0xff]  }
 0x52c   :  { %v6118_v6 = vsel %vm211_vm0, %v3998_v19, -inf  ;;  %v6112_v17 = vrot.slane %v6111_v56, 4  ;;  %v6126_v3 = vrot.slane %v6125_v25, 4  ;;  %v6132_v12 = vsel %vm211_vm0, %v3999_v7, -inf  ;;  %11829 = vmatprep.subr.bf16.mxu1 %v14955_v0  ;;  %v14962_v0 = vld [vmem:[#allocation6 + $0x280] ss:$16 sps:$4 sm:$0xff]  }
 0x52d   :  { %v6119_v59 = vrot.slane %v6118_v6, 4  ;;  %v6133_v18 = vrot.slane %v6132_v12, 4  ;;  %v6146_v26 = vsel %vm211_vm0, %v4015_v27, -inf  ;;  %v6140_v43 = vrot.slane %v6139_v34, 4 }
 0x52e   :  { %v6113_v19 = vmax.f32 %v6111_v56, %v6112_v17  ;;  %v6127_v29 = vmax.f32 %v6125_v25, %v6126_v3  ;;  %v6147_v44 = vrot.slane %v6146_v26, 4  ;;  %v6154_v48 = vrot.slane %v6153_v63, 4  ;;  %11525 = vmatpush1.bf16.msra.mxu0 %v14950_v10  ;;  %v14958_v3 = vld [vmem:[#allocation6 + $0x264] ss:$16 sps:$4 sm:$0xff]   ;;  %v14961_v25 = vld [vmem:[#allocation6 + $0x26c] ss:$16 sps:$4 sm:$0xff]  }
 0x52f   :  { %v6120_v62 = vmax.f32 %v6118_v6, %v6119_v59  ;;  %v6134_v11 = vmax.f32 %v6132_v12, %v6133_v18  ;;  %v6160_v7 = vsel %vm211_vm0, %v4016_v20, -inf  ;;  %v6141_v27 = vmax.f32 %v6139_v34, %v6140_v43  ;;  %11830 = vmatpush1.bf16.msra.mxu1 %v14953_v61  ;;  %v14956_v20 = vld [vmem:[#allocation6 + $0x260] ss:$16 sps:$4 sm:$0xff]   ;;  %11526 = vmatprep.subr.bf16.mxu0 %v14958_v3 }
 0x530   :  { %v6114_v9 = vrot.slane %v6113_v19, 2  ;;  %v6128_v33 = vrot.slane %v6127_v29, 2  ;;  %v6148_v13 = vmax.f32 %v6146_v26, %v6147_v44  ;;  %v6155_v17 = vmax.f32 %v6153_v63, %v6154_v48  ;;  %11831 = vmatprep.subr.bf16.mxu1 %v14961_v25 }
 0x531   :  { %v6121_v55 = vrot.slane %v6120_v62, 2  ;;  %v6135_v15 = vrot.slane %v6134_v11, 2  ;;  %v6161_v59 = vrot.slane %v6160_v7, 4  ;;  %v6142_v6 = vrot.slane %v6141_v27, 2 }
 0x532   :  { %v6115_v56 = vmax.f32 %v6113_v19, %v6114_v9  ;;  %v6129_v18 = vmax.f32 %v6127_v29, %v6128_v33  ;;  %v6149_v1 = vrot.slane %v6148_v13, 2  ;;  %v6156_v36 = vrot.slane %v6155_v17, 2  ;;  %11527 = vmatpush1.bf16.msra.mxu0 %v14956_v20  ;;  %v14964_v33 = vld [vmem:[#allocation6 + $0x284] ss:$16 sps:$4 sm:$0xff]   ;;  %v14967_v29 = vld [vmem:[#allocation6 + $0x28c] ss:$16 sps:$4 sm:$0xff]  }
 0x533   :  { %v6122_v12 = vmax.f32 %v6120_v62, %v6121_v55  ;;  %v6136_v38 = vmax.f32 %v6134_v11, %v6135_v15  ;;  %v6162_v21 = vmax.f32 %v6160_v7, %v6161_v59  ;;  %v6143_v26 = vmax.f32 %v6141_v27, %v6142_v6  ;;  %11832 = vmatpush1.bf16.msra.mxu1 %v14959_v30  ;;  %v14965_v9 = vld [vmem:[#allocation6 + $0x288] ss:$16 sps:$4 sm:$0xff]  }
 0x534   :  { %v6116_v34 = vrot.slane %v6115_v56, 1  ;;  %v6130_v48 = vrot.slane %v6129_v18, 1  ;;  %v6150_v43 = vmax.f32 %v6148_v13, %v6149_v1  ;;  %v6157_v19 = vmax.f32 %v6155_v17, %v6156_v36  ;;  %11528 = vmatprep.subr.bf16.mxu0 %v14964_v33  ;;  %11833 = vmatprep.subr.bf16.mxu1 %v14967_v29 }
 0x535   :  { %v6123_v44 = vrot.slane %v6122_v12, 1  ;;  %v6137_v63 = vrot.slane %v6136_v38, 1  ;;  %v6163_v62 = vrot.slane %v6162_v21, 2  ;;  %v6144_v7 = vrot.slane %v6143_v26, 1 }
 0x536   :  { %v19065_v61 = vmax.f32 %v6115_v56, %v6116_v34  ;;  %v19069_v11 = vmax.f32 %v6129_v18, %v6130_v48  ;;  %v6151_v27 = vrot.slane %v6150_v43, 1  ;;  %v6158_v15 = vrot.slane %v6157_v19, 1  ;;  %11529 = vmatpush1.bf16.msra.mxu0 %v14962_v0  ;;  %v14973_v18 = vld [vmem:[#allocation6 + $0x2ac] ss:$16 sps:$4 sm:$0xff]  }
 0x537   :  { %v19067_v10 = vmax.f32 %v6122_v12, %v6123_v44  ;;  %v19071_v55 = vmax.f32 %v6136_v38, %v6137_v63  ;;  %v6164_v59 = vmax.f32 %v6162_v21, %v6163_v62  ;;  %v19073_v1 = vmax.f32 %v6143_v26, %v6144_v7  ;;  %v14970_v12 = vld [vmem:[#allocation6 + $0x2a4] ss:$16 sps:$4 sm:$0xff]   ;;  %11834 = vmatpush1.bf16.msra.mxu1 %v14965_v9  ;;  %v14968_v44 = vld [vmem:[#allocation6 + $0x2a0] ss:$16 sps:$4 sm:$0xff]  }
 0x538   :  { %v6167_v13 = vsel %vm211_vm0, %v19036_v54, -inf  ;;  %v22100_v36 = vcombine.high %v19036_v54, %v19036_v54  ;;  %v6181_v3 = vsel %vm211_vm0, %v19041_v52, -inf  ;;  %v19083_v38 = vmax.f32 %v6150_v43, %v6151_v27  ;;  %11530 = vmatprep.subr.bf16.mxu0 %v14970_v12  ;;  %11835 = vmatprep.subr.bf16.mxu1 %v14973_v18 }
 0x539   :  { %v19085_v25 = vmax.f32 %v6157_v19, %v6158_v15  ;;  %v6165_v21 = vrot.slane %v6164_v59, 1  ;;  %v6168_v56 = vrot.slane %v6167_v13, 4  ;;  %v6182_v20 = vrot.slane %v6181_v3, 4  ;;  %v14971_v19 = vld [vmem:[#allocation6 + $0x2a8] ss:$16 sps:$4 sm:$0xff]  }
 0x53a   :  { %v6174_v17 = vsel %vm211_vm0, %v22100_v36, -inf  ;;  %v22101_v30 = vcombine.high %v19041_v52, %v19041_v52  ;;  %v6195_v34 = vsel %vm211_vm0, %v19044_v51, -inf  ;;  %v22102_v52 = vcombine.high %v19044_v51, %v19044_v51  ;;  %11531 = vmatpush1.bf16.msra.mxu0 %v14968_v44 }
 0x53b   :  { %v6175_v6 = vrot.slane %v6174_v17, 4  ;;  %v19093_v48 = vmax.f32 %v6164_v59, %v6165_v21  ;;  %v6169_v26 = vmax.f32 %v6167_v13, %v6168_v56  ;;  %v6196_v43 = vrot.slane %v6195_v34, 4  ;;  %v14976_v59 = vld [vmem:[#allocation6 + $0x2c4] ss:$16 sps:$4 sm:$0xff]   ;;  %v14979_v13 = vld [vmem:[#allocation6 + $0x2cc] ss:$16 sps:$4 sm:$0xff]   ;;  %11836 = vmatpush1.bf16.msra.mxu1 %v14971_v19 }
 0x53c   :  { %v6188_v54 = vsel %vm211_vm0, %v22101_v30, -inf  ;;  %v6183_v33 = vmax.f32 %v6181_v3, %v6182_v20  ;;  %v6202_v29 = vsel %vm211_vm0, %v22102_v52, -inf  ;;  %v6209_v7 = vsel %vm211_vm0, %v19049_v47, -inf  ;;  %v14974_v3 = vld [vmem:[#allocation6 + $0x2c0] ss:$16 sps:$4 sm:$0xff]   ;;  %11532 = vmatprep.subr.bf16.mxu0 %v14976_v59  ;;  %11837 = vmatprep.subr.bf16.mxu1 %v14979_v13 }
 0x53d   :  { %v6189_v63 = vrot.slane %v6188_v54, 4  ;;  %v6176_v62 = vmax.f32 %v6174_v17, %v6175_v6  ;;  %v6170_v0 = vrot.slane %v6169_v26, 2  ;;  %v6197_v27 = vmax.f32 %v6195_v34, %v6196_v43  ;;  %v14977_v30 = vld [vmem:[#allocation6 + $0x2c8] ss:$16 sps:$4 sm:$0xff]  }
 0x53e   :  { %v6203_v15 = vrot.slane %v6202_v29, 4  ;;  %v6184_v21 = vrot.slane %v6183_v33, 2  ;;  %v6210_v56 = vrot.slane %v6209_v7, 4  ;;  %v22103_v17 = vcombine.high %v19049_v47, %v19049_v47  ;;  %11533 = vmatpush1.bf16.msra.mxu0 %v14974_v3 }
 0x53f   :  { %v6190_v9 = vmax.f32 %v6188_v54, %v6189_v63  ;;  %v6177_v36 = vrot.slane %v6176_v62, 2  ;;  %v6171_v12 = vmax.f32 %v6169_v26, %v6170_v0  ;;  %v6198_v6 = vrot.slane %v6197_v27, 2  ;;  %11838 = vmatpush1.bf16.msra.mxu1 %v14977_v30  ;;  %11534 = vmatprep.subr.bf16.mxu0 %v14982_v14 }
 0x540   :  { %v6216_v51 = vsel %vm211_vm0, %v22103_v17, -inf  ;;  %v6204_v20 = vmax.f32 %v6202_v29, %v6203_v15  ;;  %v6185_v34 = vmax.f32 %v6183_v33, %v6184_v21  ;;  %v6211_v44 = vmax.f32 %v6209_v7, %v6210_v56  ;;  %v14985_v17 = vld [vmem:[#allocation6 + $0x2ec] ss:$16 sps:$4 sm:$0xff]   ;;  %v14980_v29 = vld [vmem:[#allocation6 + $0x2e0] ss:$16 sps:$4 sm:$0xff]  }
 0x541   :  { %v6191_v18 = vrot.slane %v6190_v9, 2  ;;  %v6178_v54 = vmax.f32 %v6176_v62, %v6177_v36  ;;  %v6217_v63 = vrot.slane %v6216_v51, 4  ;;  %v6172_v43 = vrot.slane %v6171_v12, 1  ;;  %v14983_v33 = vld [vmem:[#allocation6 + $0x2e8] ss:$16 sps:$4 sm:$0xff]   ;;  %11839 = vmatprep.subr.bf16.mxu1 %v14985_v17 }
 0x542   :  { %v6199_v53 = vmax.f32 %v6197_v27, %v6198_v6  ;;  %v6205_v47 = vrot.slane %v6204_v20, 2  ;;  %v6186_v16 = vrot.slane %v6185_v34, 1  ;;  %v6212_v26 = vrot.slane %v6211_v44, 2  ;;  %11535 = vmatpush1.bf16.msra.mxu0 %v14980_v29  ;;  %v14986_v21 = vld [vmem:[#allocation6 + $0x300] ss:$16 sps:$4 sm:$0xff]  }
 0x543   :  { %v6192_v52 = vmax.f32 %v6190_v9, %v6191_v18  ;;  %v6179_v19 = vrot.slane %v6178_v54, 1  ;;  %v6218_v0 = vmax.f32 %v6216_v51, %v6217_v63  ;;  %v6173_v15 = vmax.f32 %v6171_v12, %v6172_v43  ;;  %v14988_v56 = vld [vmem:[#allocation6 + $0x304] ss:$16 sps:$4 sm:$0xff]   ;;  %v14991_v12 = vld [vmem:[#allocation6 + $0x30c] ss:$16 sps:$4 sm:$0xff]   ;;  %11840 = vmatpush1.bf16.msra.mxu1 %v14983_v33 }
 0x544   :  { %v6200_v13 = vrot.slane %v6199_v53, 1  ;;  %v6206_v62 = vmax.f32 %v6204_v20, %v6205_v47  ;;  %v6187_v36 = vmax.f32 %v6185_v34, %v6186_v16  ;;  %v6213_v9 = vmax.f32 %v6211_v44, %v6212_v26  ;;  %11536 = vmatprep.subr.bf16.mxu0 %v14988_v56  ;;  %11841 = vmatprep.subr.bf16.mxu1 %v14991_v12 }
 0x545   :  { %v6193_v59 = vrot.slane %v6192_v52, 1  ;;  %v6180_v7 = vmax.f32 %v6178_v54, %v6179_v19  ;;  %v6219_v27 = vrot.slane %v6218_v0, 2  ;;  %v19107_v51 = vmax.f32 %v19065_v61, %v19069_v11  ;;  %v14989_v54 = vld [vmem:[#allocation6 + $0x308] ss:$16 sps:$4 sm:$0xff]  }
 0x546   :  { %v6201_v18 = vmax.f32 %v6199_v53, %v6200_v13  ;;  %v6207_v6 = vrot.slane %v6206_v62, 1  ;;  %v6214_v30 = vrot.slane %v6213_v9, 1  ;;  %v19111_v14 = vmax.f32 %v19067_v10, %v19071_v55  ;;  %11537 = vmatpush1.bf16.msra.mxu0 %v14986_v21 }
 0x547   :  { %v6194_v3 = vmax.f32 %v6192_v52, %v6193_v59  ;;  %v6220_v20 = vmax.f32 %v6218_v0, %v6219_v27  ;;  %v19115_v16 = vmax.f32 %v19073_v1, %v19085_v25  ;;  %v19119_v53 = vmax.f32 %v19083_v38, %v19093_v48  ;;  %11842 = vmatpush1.bf16.msra.mxu1 %v14989_v54 }
 0x548   :  { %v19121_v61 = vmax.f32 %v6173_v15, %v6187_v36  ;;  %v2940_v34 = vrot.slane %v19007_v31, %v22088_v23  ;;  %v22106_v10 = vrot.slane %v18666_v41, 1  ;;  %v6208_v1 = vmax.f32 %v6206_v62, %v6207_v6 }
 0x549   :  { %v19123_v11 = vmax.f32 %v6180_v7, %v6194_v3  ;;  %v6215_v25 = vmax.f32 %v6213_v9, %v6214_v30  ;;  %v6221_v44 = vrot.slane %v6220_v20, 1  ;;  %v2947_v38 = vrot.slane %v19028_v4, %v22088_v23 }
 0x54a   :  { %22104 = vst [vmem:[#allocation155_spill] sm:$0xff] %v19121_v61  ;;  %v19130_v55 = vmax.f32 %v18666_v41, %v22106_v10  ;;  %v2954_v48 = vrot.slane %v19030_v22, %v22088_v23  ;;  %v19139_v31 = vadd.f32 %v18634_v42, %v16781_v37  ;;  %v19146_v41 = vsel %vm6783_vm11, %v19107_v51, %v18668_v28 }
 0x54b   :  { %22105 = vst [vmem:[#allocation28_spill] sm:$0xff] %v19123_v11  ;;  %v6222_v43 = vmax.f32 %v6220_v20, %v6221_v44  ;;  %v19141_v52 = vmax.f32 %v6201_v18, %v6215_v25  ;;  %22109 = vst [vmem:[#allocation156_spill] sm:$0xff] %v19146_v41  ;;  %v19151_v4 = vsel %vm6783_vm11, %v19115_v16, %v19107_v51 }
 0x54c   :  { %22107 = vst [vmem:[#allocation22_spill] sm:$0xff] %v19130_v55  ;;  %22110 = vst [vmem:[#allocation24_spill] sm:$0xff] %v19151_v4  ;;  %v2955_v22 = vcombine.low %v19026_v45, %v2947_v38  ;;  %v2956_v47 = vcombine.high %v19026_v45, %v2947_v38  ;;  %v2957_v42 = vcombine.low %v2940_v34, %v2954_v48 }
 0x54d   :  { %22108 = vst [vmem:[#allocation26_spill] sm:$0xff] %v19141_v52  ;;  %v2958_v17 = vcombine.high %v2940_v34, %v2954_v48  ;;  %v19155_v19 = vmax.f32 %v6208_v1, %v6222_v43  ;;  %v14144_v26 = vcombine.low %v2947_v38, %v2947_v38  ;;  %v14145_v0 = vcombine.high %v2947_v38, %v2947_v38 }
 0x54e   :  { %v14146_v29 = vcombine.low %v2954_v48, %v2954_v48  ;;  %v4058_v28 = vrot.slane %v2955_v22, %v22088_v23  ;;  %v4075_v15 = vrot.slane %v2956_v47, %v22088_v23  ;;  %v19160_v59 = vrot.slane %v2957_v42, %v22088_v23 }
 0x54f   :  { %22111 = vst [vmem:[#allocation158_spill] sm:$0xff] %v19155_v19  ;;  %v14147_v13 = vcombine.high %v2954_v48, %v2954_v48  ;;  %v4065_v62 = vrot.slane %v14144_v26, %v22088_v23  ;;  %v4082_v33 = vrot.slane %v14145_v0, %v22088_v23  ;;  %v19167_v7 = vadd.f32 %v18642_v46, %v16785_v49 }
 0x550   :  { %v4066_v36 = vcombine.high %v4058_v28, %v4058_v28  ;;  %v4083_v9 = vcombine.high %v4075_v15, %v4075_v15  ;;  %v19170_v27 = vrot.slane %v14146_v29, %v22088_v23  ;;  %v19174_v21 = vadd.f32 %v18644_v40, %v16789_v5 }
 0x551   :  { %v4067_v56 = vcombine.high %v4065_v62, %v4065_v62  ;;  %v4100_v3 = vcombine.high %v19160_v59, %v19160_v59  ;;  %v19179_v18 = vrot.slane %v2958_v17, %v22088_v23  ;;  %v19182_v6 = vrot.slane %v14147_v13, %v22088_v23 }
 0x552   :  { %v4084_v46 = vcombine.high %v4082_v33, %v4082_v33  ;;  %v6223_v12 = vsel %vm211_vm0, %v4058_v28, -inf  ;;  %v6230_v30 = vsel %vm211_vm0, %v4066_v36, -inf  ;;  %v6237_v20 = vsel %vm211_vm0, %v4065_v62, -inf }
 0x553   :  { %v6224_v54 = vrot.slane %v6223_v12, 4  ;;  %v6231_v40 = vrot.slane %v6230_v30, 4  ;;  %v6238_v34 = vrot.slane %v6237_v20, 4  ;;  %v6244_v10 = vsel %vm211_vm0, %v4067_v56, -inf }
 0x554   :  { %v6245_v1 = vrot.slane %v6244_v10, 4  ;;  %v6251_v25 = vsel %vm211_vm0, %v4075_v15, -inf  ;;  %v6258_v44 = vsel %vm211_vm0, %v4083_v9, -inf  ;;  %v6265_v38 = vsel %vm211_vm0, %v4082_v33, -inf }
 0x555   :  { %v6225_v48 = vmax.f32 %v6223_v12, %v6224_v54  ;;  %v6232_v43 = vmax.f32 %v6230_v30, %v6231_v40  ;;  %v6239_v22 = vmax.f32 %v6237_v20, %v6238_v34  ;;  %v6252_v47 = vrot.slane %v6251_v25, 4 }
 0x556   :  { %v6246_v42 = vmax.f32 %v6244_v10, %v6245_v1  ;;  %v6259_v17 = vrot.slane %v6258_v44, 4  ;;  %v6266_v26 = vrot.slane %v6265_v38, 4  ;;  %v6272_v0 = vsel %vm211_vm0, %v4084_v46, -inf }
 0x557   :  { %v6226_v29 = vrot.slane %v6225_v48, 2  ;;  %v6233_v28 = vrot.slane %v6232_v43, 2  ;;  %v6240_v13 = vrot.slane %v6239_v22, 2  ;;  %v6253_v62 = vmax.f32 %v6251_v25, %v6252_v47 }
 0x558   :  { %v6247_v36 = vrot.slane %v6246_v42, 2  ;;  %v6260_v56 = vmax.f32 %v6258_v44, %v6259_v17  ;;  %v6267_v15 = vmax.f32 %v6265_v38, %v6266_v26  ;;  %v6273_v45 = vrot.slane %v6272_v0, 4 }
 0x559   :  { %v6227_v9 = vmax.f32 %v6225_v48, %v6226_v29  ;;  %v6234_v63 = vmax.f32 %v6232_v43, %v6233_v28  ;;  %v6241_v33 = vmax.f32 %v6239_v22, %v6240_v13  ;;  %v6254_v12 = vrot.slane %v6253_v62, 2 }
 0x55a   :  { %v6248_v30 = vmax.f32 %v6246_v42, %v6247_v36  ;;  %v6261_v20 = vrot.slane %v6260_v56, 2  ;;  %v6268_v54 = vrot.slane %v6267_v15, 2  ;;  %v6274_v40 = vmax.f32 %v6272_v0, %v6273_v45 }
 0x55b   :  { %v6228_v34 = vrot.slane %v6227_v9, 1  ;;  %v6235_v10 = vrot.slane %v6234_v63, 1  ;;  %v6242_v1 = vrot.slane %v6241_v33, 1  ;;  %v6255_v46 = vmax.f32 %v6253_v62, %v6254_v12 }
 0x55c   :  { %v6249_v55 = vrot.slane %v6248_v30, 1  ;;  %v6262_v4 = vmax.f32 %v6260_v56, %v6261_v20  ;;  %v6269_v19 = vmax.f32 %v6267_v15, %v6268_v54  ;;  %v6275_v25 = vrot.slane %v6274_v40, 2 }
 0x55d   :  { %v4101_v44 = vcombine.high %v19170_v27, %v19170_v27  ;;  %v4117_v38 = vcombine.high %v19179_v18, %v19179_v18  ;;  %v4118_v48 = vcombine.high %v19182_v6, %v19182_v6  ;;  %v6256_v43 = vrot.slane %v6255_v46, 1 }
 0x55e   :  { %v6229_v22 = vmax.f32 %v6227_v9, %v6228_v34  ;;  %v6236_v45 = vmax.f32 %v6234_v63, %v6235_v10  ;;  %v6243_v47 = vmax.f32 %v6241_v33, %v6242_v1  ;;  %v6263_v42 = vrot.slane %v6262_v4, 1 }
 0x55f   :  { %v6250_v17 = vmax.f32 %v6248_v30, %v6249_v55  ;;  %v6279_v26 = vsel %vm211_vm0, %v19160_v59, -inf  ;;  %v6286_v0 = vsel %vm211_vm0, %v4100_v3, -inf  ;;  %v6293_v29 = vsel %vm211_vm0, %v19170_v27, -inf }
 0x560   :  { %v6257_v28 = vmax.f32 %v6255_v46, %v6256_v43  ;;  %v6270_v13 = vrot.slane %v6269_v19, 1  ;;  %v6276_v62 = vmax.f32 %v6274_v40, %v6275_v25  ;;  %v6280_v36 = vrot.slane %v6279_v26, 4 }
 0x561   :  { %v6287_v56 = vrot.slane %v6286_v0, 4  ;;  %v6294_v15 = vrot.slane %v6293_v29, 4  ;;  %v6300_v9 = vsel %vm211_vm0, %v4101_v44, -inf  ;;  %v6307_v63 = vsel %vm211_vm0, %v19179_v18, -inf }
 0x562   :  { %v6264_v55 = vmax.f32 %v6262_v4, %v6263_v42  ;;  %v6281_v33 = vmax.f32 %v6279_v26, %v6280_v36  ;;  %v6301_v12 = vrot.slane %v6300_v9, 4  ;;  %v6308_v59 = vrot.slane %v6307_v63, 4 }
 0x563   :  { %v6288_v30 = vmax.f32 %v6286_v0, %v6287_v56  ;;  %v6295_v3 = vmax.f32 %v6293_v29, %v6294_v15  ;;  %v6314_v20 = vsel %vm211_vm0, %v4117_v38, -inf  ;;  %v6321_v27 = vsel %vm211_vm0, %v19182_v6, -inf }
 0x564   :  { %v6282_v54 = vrot.slane %v6281_v33, 2  ;;  %v6302_v40 = vmax.f32 %v6300_v9, %v6301_v12  ;;  %v6309_v34 = vmax.f32 %v6307_v63, %v6308_v59  ;;  %v6315_v10 = vrot.slane %v6314_v20, 4 }
 0x565   :  { %v6277_v1 = vrot.slane %v6276_v62, 1  ;;  %v6296_v46 = vrot.slane %v6295_v3, 2  ;;  %v6322_v25 = vrot.slane %v6321_v27, 4  ;;  %v6328_v18 = vsel %vm211_vm0, %v4118_v48, -inf }
 0x566   :  { %v6283_v4 = vmax.f32 %v6281_v33, %v6282_v54  ;;  %v6289_v44 = vrot.slane %v6288_v30, 2  ;;  %v6310_v43 = vrot.slane %v6309_v34, 2  ;;  %v6316_v42 = vmax.f32 %v6314_v20, %v6315_v10 }
 0x567   :  { %v6271_v26 = vmax.f32 %v6269_v19, %v6270_v13  ;;  %v6297_v0 = vmax.f32 %v6295_v3, %v6296_v46  ;;  %v6323_v29 = vmax.f32 %v6321_v27, %v6322_v25  ;;  %v6329_v38 = vrot.slane %v6328_v18, 4  ;;  %v14992_v25 = vld [vmem:[#allocation6 + $0x320] ss:$16 sps:$4 sm:$0xff]  }
 0x568   :  { %v6284_v36 = vrot.slane %v6283_v4, 1  ;;  %v6303_v56 = vrot.slane %v6302_v40, 2  ;;  %v6311_v6 = vmax.f32 %v6309_v34, %v6310_v43  ;;  %v6317_v15 = vrot.slane %v6316_v42, 2 }
 0x569   :  { %v6278_v9 = vmax.f32 %v6276_v62, %v6277_v1  ;;  %v6298_v63 = vrot.slane %v6297_v0, 1  ;;  %v6324_v12 = vrot.slane %v6323_v29, 2  ;;  %v6330_v59 = vmax.f32 %v6328_v18, %v6329_v38  ;;  %v14994_v18 = vld [vmem:[#allocation6 + $0x324] ss:$16 sps:$4 sm:$0xff]   ;;  %v15003_v38 = vld [vmem:[#allocation6 + $0x34c] ss:$16 sps:$4 sm:$0xff]  }
 0x56a   :  { %v19210_v52 = vmax.f32 %v6283_v4, %v6284_v36  ;;  %v19212_v41 = vmax.f32 %v6288_v30, %v6289_v44  ;;  %v6312_v48 = vrot.slane %v6311_v6, 1  ;;  %v6318_v33 = vmax.f32 %v6316_v42, %v6317_v15  ;;  %11538 = vmatprep.subr.bf16.mxu0 %v14994_v18 }
 0x56b   :  { %v19214_v54 = vmax.f32 %v6297_v0, %v6298_v63  ;;  %v6325_v19 = vmax.f32 %v6323_v29, %v6324_v12  ;;  %v6331_v13 = vrot.slane %v6330_v59, 2  ;;  %v2112_v3 = vadd.f32 %v18789_v8, %v16777_v24  ;;  %v15000_v29 = vld [vmem:[#allocation6 + $0x344] ss:$16 sps:$4 sm:$0xff]   ;;  %11539 = vmatpush1.bf16.msra.mxu0 %v14992_v25 }
 0x56c   :  { %22112 = vst [vmem:[#allocation159_spill] sm:$0xff] %v19210_v52  ;;  %v19218_v20 = vmax.f32 %v6302_v40, %v6303_v56  ;;  %v19220_v27 = vmax.f32 %v6311_v6, %v6312_v48  ;;  %v6319_v62 = vrot.slane %v6318_v33, 1  ;;  %v19222_v34 = vmax.f32 %v6229_v22, %v6243_v47  ;;  %v14995_v40 = vld [vmem:[#allocation6 + $0x328] ss:$16 sps:$4 sm:$0xff]   ;;  %v14997_v22 = vld [vmem:[#allocation6 + $0x32c] ss:$16 sps:$4 sm:$0xff]   ;;  %11540 = vmatprep.subr.bf16.mxu0 %v15000_v29 }
 0x56d   :  { %22113 = vst [vmem:[#allocation160_spill] sm:$0xff] %v19214_v54  ;;  %v6326_v10 = vrot.slane %v6325_v19, 1  ;;  %v6332_v1 = vmax.f32 %v6330_v59, %v6331_v13  ;;  %v19224_v30 = vmax.f32 %v6236_v45, %v6250_v17  ;;  %v19226_v46 = vmax.f32 %v6257_v28, %v6271_v26  ;;  %11843 = vmatprep.subr.bf16.mxu1 %v14997_v22  ;;  %v15001_v59 = vld [vmem:[#allocation6 + $0x348] ss:$16 sps:$4 sm:$0xff]   ;;  %v15006_v13 = vld [vmem:[#allocation6 + $0x364] ss:$16 sps:$4 sm:$0xff]  }
 0x56e   :  { %22114 = vst [vmem:[#allocation161_spill] sm:$0xff] %v19220_v27  ;;  %22115 = vst [vmem:[#allocation162_spill] sm:$0xff] %v19222_v34  ;;  %v19229_v44 = vmax.f32 %v6264_v55, %v6278_v9  ;;  %v2304_v8 = vmax.f32 %v19167_v7, 0.0  ;;  %v19234_v47 = vmax.f32 %v6318_v33, %v6319_v62  ;;  %v2306_v17 = vmax.f32 %v19174_v21, 0.0  ;;  %11844 = vmatpush1.bf16.msra.mxu1 %v14995_v40  ;;  %v22127_v25 = vld [vmem:[#allocation95_spill] sm:$0xff] }
 0x56f   :  { %22116 = vst [vmem:[#allocation163_spill] sm:$0xff] %v19224_v30  ;;  %22117 = vst [vmem:[#allocation164_spill] sm:$0xff] %v19226_v46  ;;  %v19236_v43 = vmax.f32 %v6325_v19, %v6326_v10  ;;  %v6333_v45 = vrot.slane %v6332_v1, 1  ;;  %v22121_v28 = vmax.f32 %v19023_v32, 0.0  ;;  %v2307_v0 = vmax.f32 %v2112_v3, 0.0  ;;  %11845 = vmatprep.subr.bf16.mxu1 %v15003_v38 }
 0x570   :  { %22118 = vst [vmem:[#allocation165_spill] sm:$0xff] %v19229_v44  ;;  %22119 = vst [vmem:[#allocation166_spill] sm:$0xff] %v19234_v47  ;;  %v2114_v7 = vadd.f32 %v18806_v60, %v16785_v49  ;;  %v22124_v21 = vmax.f32 %v19139_v31, 0.0  ;;  %v14998_v32 = vld [vmem:[#allocation6 + $0x340] ss:$16 sps:$4 sm:$0xff]   ;;  %v19262_v19 = vadd.f32 %v18791_v50, %v16781_v37  ;;  %v19270_v10 = vadd.f32 %v18912_v35, %v16789_v5 }
 0x571   :  { %22120 = vst [vmem:[#allocation167_spill] sm:$0xff] %v19236_v43  ;;  %v2959_v42 = vcombine.low %v22121_v28, %v2304_v8  ;;  %v22122_v55 = vmov %v22121_v28  ;;  %v19245_v36 = vmax.f32 %v6332_v1, %v6333_v45  ;;  %v22126_v1 = vld [vmem:[#allocation94_spill] sm:$0xff]  ;;  %11541 = vmatpush1.bf16.msra.mxu0 %v14998_v32  ;;  %v15007_v5 = vld [vmem:[#allocation6 + $0x368] ss:$16 sps:$4 sm:$0xff]  }
 0x572   :  { %v2960_v26 = vcombine.high %v22122_v55, %v2304_v8  ;;  %v2961_v6 = vcombine.low %v22124_v21, %v2306_v17  ;;  %v22125_v15 = vmov %v22124_v21  ;;  %v2308_v12 = vmax.f32 %v2114_v7, 0.0  ;;  %v22129_v8 = vld [vmem:[#allocation97_spill] sm:$0xff]  ;;  %v15009_v22 = vld [vmem:[#allocation6 + $0x36c] ss:$16 sps:$4 sm:$0xff]   ;;  %v15004_v28 = vld [vmem:[#allocation6 + $0x360] ss:$16 sps:$4 sm:$0xff]   ;;  %11846 = vmatpush1.bf16.msra.mxu1 %v15001_v59  ;;  %11542 = vmatprep.subr.bf16.mxu0 %v15006_v13 }
 0x573   :  { %22123 = vst [vmem:[#allocation168_spill] sm:$0xff] %v19245_v36  ;;  %v2962_v9 = vcombine.high %v22125_v15, %v2306_v17  ;;  %v2969_v49 = vrot.slane %v2959_v42, %v22088_v23  ;;  %v22128_v18 = vmax.f32 %v22126_v1, %v22127_v25  ;;  %v15012_v21 = vld [vmem:[#allocation6 + $0x384] ss:$16 sps:$4 sm:$0xff]   ;;  %11847 = vmatprep.subr.bf16.mxu1 %v15009_v22  ;;  %v15013_v22 = vld [vmem:[#allocation6 + $0x388] ss:$16 sps:$4 sm:$0xff]  }
 0x574   :  { %v2976_v60 = vrot.slane %v2960_v26, %v22088_v23  ;;  %v2983_v33 = vrot.slane %v2961_v6, %v22088_v23  ;;  %v19264_v3 = vcombine.low %v2307_v0, %v2308_v12  ;;  %v19266_v62 = vcombine.high %v2307_v0, %v2308_v12  ;;  %v15015_v6 = vld [vmem:[#allocation6 + $0x38c] ss:$16 sps:$4 sm:$0xff]  }
 0x575   :  { %v2990_v31 = vrot.slane %v2962_v9, %v22088_v23  ;;  %v19277_v40 = vsel %vm6783_vm11, %v22129_v8, %v22128_v18  ;;  %11543 = vmatpush1.bf16.msra.mxu0 %v15004_v28 }
 0x576   :  { %v2991_v37 = vcombine.low %v2969_v49, %v2983_v33  ;;  %v2992_v50 = vcombine.high %v2969_v49, %v2983_v33  ;;  %v14148_v42 = vcombine.low %v2983_v33, %v2983_v33  ;;  %v14149_v55 = vcombine.high %v2983_v33, %v2983_v33  ;;  %11848 = vmatpush1.bf16.msra.mxu1 %v15007_v5 }
 0x577   :  { %v2993_v45 = vcombine.low %v2976_v60, %v2990_v31  ;;  %v2994_v17 = vcombine.high %v2976_v60, %v2990_v31  ;;  %v14150_v26 = vcombine.low %v2990_v31, %v2990_v31  ;;  %v14151_v0 = vcombine.high %v2990_v31, %v2990_v31  ;;  %v15010_v31 = vld [vmem:[#allocation6 + $0x380] ss:$16 sps:$4 sm:$0xff]   ;;  %11544 = vmatprep.subr.bf16.mxu0 %v15012_v21  ;;  %v15019_v21 = vld [vmem:[#allocation6 + $0x3a8] ss:$16 sps:$4 sm:$0xff]  }
 0x578   :  { %v4126_v35 = vrot.slane %v2991_v37, %v22088_v23  ;;  %v4143_v7 = vrot.slane %v2992_v50, %v22088_v23  ;;  %v4133_v15 = vrot.slane %v14148_v42, %v22088_v23  ;;  %v4150_v9 = vrot.slane %v14149_v55, %v22088_v23  ;;  %v15018_v37 = vld [vmem:[#allocation6 + $0x3a4] ss:$16 sps:$4 sm:$0xff]   ;;  %11849 = vmatprep.subr.bf16.mxu1 %v15015_v6  ;;  %v15021_v42 = vld [vmem:[#allocation6 + $0x3ac] ss:$16 sps:$4 sm:$0xff]  }
 0x579   :  { %v19282_v29 = vrot.slane %v2993_v45, %v22088_v23  ;;  %v19285_v38 = vrot.slane %v2994_v17, %v22088_v23  ;;  %v19290_v32 = vrot.slane %v14150_v26, %v22088_v23  ;;  %v19293_v49 = vrot.slane %v14151_v0, %v22088_v23  ;;  %11545 = vmatpush1.bf16.msra.mxu0 %v15010_v31 }
 0x57a   :  { %v4134_v60 = vcombine.high %v4126_v35, %v4126_v35  ;;  %v4151_v12 = vcombine.high %v4143_v7, %v4143_v7  ;;  %v4135_v13 = vcombine.high %v4133_v15, %v4133_v15  ;;  %v4152_v1 = vcombine.high %v4150_v9, %v4150_v9  ;;  %11850 = vmatpush1.bf16.msra.mxu1 %v15013_v22 }
 0x57b   :  { %v6335_v50 = vsel %vm211_vm0, %v4126_v35, -inf  ;;  %v6349_v17 = vsel %vm211_vm0, %v4133_v15, -inf  ;;  %v6363_v28 = vsel %vm211_vm0, %v4143_v7, -inf  ;;  %v6377_v35 = vsel %vm211_vm0, %v4150_v9, -inf  ;;  %11546 = vmatprep.subr.bf16.mxu0 %v15018_v37  ;;  %11851 = vmatprep.subr.bf16.mxu1 %v15021_v42 }
 0x57c   :  { %v6342_v45 = vsel %vm211_vm0, %v4134_v60, -inf  ;;  %v6336_v55 = vrot.slane %v6335_v50, 4  ;;  %v6350_v0 = vrot.slane %v6349_v17, 4  ;;  %v6356_v24 = vsel %vm211_vm0, %v4135_v13, -inf  ;;  %v15016_v60 = vld [vmem:[#allocation6 + $0x3a0] ss:$16 sps:$4 sm:$0xff]  }
 0x57d   :  { %v6343_v26 = vrot.slane %v6342_v45, 4  ;;  %v6357_v48 = vrot.slane %v6356_v24, 4  ;;  %v6364_v5 = vrot.slane %v6363_v28, 4  ;;  %v6370_v56 = vsel %vm211_vm0, %v4151_v12, -inf  ;;  %11547 = vmatpush1.bf16.msra.mxu0 %v15016_v60 }
 0x57e   :  { %v6337_v63 = vmax.f32 %v6335_v50, %v6336_v55  ;;  %v6351_v4 = vmax.f32 %v6349_v17, %v6350_v0  ;;  %v6371_v7 = vrot.slane %v6370_v56, 4  ;;  %v6378_v33 = vrot.slane %v6377_v35, 4  ;;  %11852 = vmatpush1.bf16.msra.mxu1 %v15019_v21  ;;  %v15024_v21 = vld [vmem:[#allocation6 + $0x3c4] ss:$16 sps:$4 sm:$0xff]  }
 0x57f   :  { %v6344_v15 = vmax.f32 %v6342_v45, %v6343_v26  ;;  %v6358_v6 = vmax.f32 %v6356_v24, %v6357_v48  ;;  %v6365_v18 = vmax.f32 %v6363_v28, %v6364_v5  ;;  %v6384_v13 = vsel %vm211_vm0, %v4152_v1, -inf  ;;  %11548 = vmatprep.subr.bf16.mxu0 %v15024_v21  ;;  %v15033_v21 = vld [vmem:[#allocation6 + $0x3ec] ss:$16 sps:$4 sm:$0xff]  }
 0x580   :  { %v6338_v25 = vrot.slane %v6337_v63, 2  ;;  %v6352_v12 = vrot.slane %v6351_v4, 2  ;;  %v6372_v54 = vmax.f32 %v6370_v56, %v6371_v7  ;;  %v6379_v52 = vmax.f32 %v6377_v35, %v6378_v33 }
 0x581   :  { %v6345_v59 = vrot.slane %v6344_v15, 2  ;;  %v6359_v9 = vrot.slane %v6358_v6, 2  ;;  %v6366_v31 = vrot.slane %v6365_v18, 2  ;;  %v6385_v50 = vrot.slane %v6384_v13, 4 }
 0x582   :  { %v6339_v45 = vmax.f32 %v6337_v63, %v6338_v25  ;;  %v6353_v22 = vmax.f32 %v6351_v4, %v6352_v12  ;;  %v6373_v37 = vrot.slane %v6372_v54, 2  ;;  %v6380_v28 = vrot.slane %v6379_v52, 2 }
 0x583   :  { %v6346_v17 = vmax.f32 %v6344_v15, %v6345_v59  ;;  %v6360_v24 = vmax.f32 %v6358_v6, %v6359_v9  ;;  %v6367_v48 = vmax.f32 %v6365_v18, %v6366_v31  ;;  %v6386_v55 = vmax.f32 %v6384_v13, %v6385_v50  ;;  %v15022_v15 = vld [vmem:[#allocation6 + $0x3c0] ss:$16 sps:$4 sm:$0xff]   ;;  %v15025_v9 = vld [vmem:[#allocation6 + $0x3c8] ss:$16 sps:$4 sm:$0xff]  }
 0x584   :  { %v6340_v1 = vrot.slane %v6339_v45, 1  ;;  %v6354_v26 = vrot.slane %v6353_v22, 1  ;;  %v6374_v0 = vmax.f32 %v6372_v54, %v6373_v37  ;;  %v6381_v7 = vmax.f32 %v6379_v52, %v6380_v28  ;;  %11549 = vmatpush1.bf16.msra.mxu0 %v15022_v15 }
 0x585   :  { %v6347_v42 = vrot.slane %v6346_v17, 1  ;;  %v6361_v5 = vrot.slane %v6360_v24, 1  ;;  %v6368_v56 = vrot.slane %v6367_v48, 1  ;;  %v6387_v44 = vrot.slane %v6386_v55, 2 }
 0x586   :  { %v19311_v33 = vmax.f32 %v6339_v45, %v6340_v1  ;;  %v19315_v63 = vmax.f32 %v6353_v22, %v6354_v26  ;;  %v6375_v4 = vrot.slane %v6374_v0, 1  ;;  %v6382_v18 = vrot.slane %v6381_v7, 1 }
 0x587   :  { %v19313_v35 = vmax.f32 %v6346_v17, %v6347_v42  ;;  %v19317_v59 = vmax.f32 %v6360_v24, %v6361_v5  ;;  %v19319_v25 = vmax.f32 %v6367_v48, %v6368_v56  ;;  %v6388_v60 = vmax.f32 %v6386_v55, %v6387_v44  ;;  %v15027_v17 = vld [vmem:[#allocation6 + $0x3cc] ss:$16 sps:$4 sm:$0xff]   ;;  %v15028_v55 = vld [vmem:[#allocation6 + $0x3e0] ss:$16 sps:$4 sm:$0xff]   ;;  %v15030_v5 = vld [vmem:[#allocation6 + $0x3e4] ss:$16 sps:$4 sm:$0xff]  }
 0x588   :  { %v19321_v54 = vmax.f32 %v6374_v0, %v6375_v4  ;;  %v6391_v52 = vsel %vm211_vm0, %v19282_v29, -inf  ;;  %v22130_v6 = vcombine.high %v19282_v29, %v19282_v29  ;;  %v6405_v12 = vsel %vm211_vm0, %v19290_v32, -inf  ;;  %11853 = vmatprep.subr.bf16.mxu1 %v15027_v17  ;;  %v15031_v56 = vld [vmem:[#allocation6 + $0x3e8] ss:$16 sps:$4 sm:$0xff]   ;;  %11550 = vmatprep.subr.bf16.mxu0 %v15030_v5 }
 0x589   :  { %v19331_v31 = vmax.f32 %v6381_v7, %v6382_v18  ;;  %v6389_v50 = vrot.slane %v6388_v60, 1  ;;  %v6392_v44 = vrot.slane %v6391_v52, 4  ;;  %v6406_v22 = vrot.slane %v6405_v12, 4  ;;  %11854 = vmatpush1.bf16.msra.mxu1 %v15025_v9  ;;  %11551 = vmatpush1.bf16.msra.mxu0 %v15028_v55 }
 0x58a   :  { %v6398_v13 = vsel %vm211_vm0, %v22130_v6, -inf  ;;  %v22131_v37 = vcombine.high %v19290_v32, %v19290_v32  ;;  %v6419_v29 = vsel %vm211_vm0, %v19285_v38, -inf  ;;  %v22132_v48 = vcombine.high %v19285_v38, %v19285_v38  ;;  %11855 = vmatprep.subr.bf16.mxu1 %v15033_v21 }
 0x58b   :  { %v6399_v45 = vrot.slane %v6398_v13, 4  ;;  %v6390_v1 = vmax.f32 %v6388_v60, %v6389_v50  ;;  %v6393_v42 = vmax.f32 %v6391_v52, %v6392_v44  ;;  %v6407_v32 = vmax.f32 %v6405_v12, %v6406_v22  ;;  %v15036_v44 = vld [vmem:[#allocation6 + $0x404] ss:$16 sps:$4 sm:$0xff]  }
 0x58c   :  { %v6412_v24 = vsel %vm211_vm0, %v22131_v37, -inf  ;;  %v6426_v28 = vsel %vm211_vm0, %v22132_v48, -inf  ;;  %v6420_v7 = vrot.slane %v6419_v29, 4  ;;  %v6433_v18 = vsel %vm211_vm0, %v19293_v49, -inf  ;;  %v15039_v48 = vld [vmem:[#allocation6 + $0x40c] ss:$16 sps:$4 sm:$0xff]   ;;  %11581 = vmatprep.subr.bf16.mxu0 %v15036_v44 }
 0x58d   :  { %v6400_v26 = vmax.f32 %v6398_v13, %v6399_v45  ;;  %v6413_v0 = vrot.slane %v6412_v24, 4  ;;  %v6427_v4 = vrot.slane %v6426_v28, 4  ;;  %v6394_v38 = vrot.slane %v6393_v42, 2  ;;  %11856 = vmatpush1.bf16.msra.mxu1 %v15031_v56 }
 0x58e   :  { %v6434_v15 = vrot.slane %v6433_v18, 4  ;;  %v6408_v60 = vrot.slane %v6407_v32, 2  ;;  %v6421_v52 = vmax.f32 %v6419_v29, %v6420_v7  ;;  %v22133_v50 = vcombine.high %v19293_v49, %v19293_v49  ;;  %11886 = vmatprep.subr.bf16.mxu1 %v15039_v48  ;;  %v22140_v48 = vld [vmem:[#allocation119_spill] sm:$0xff] }
 0x58f   :  { %v6401_v6 = vrot.slane %v6400_v26, 2  ;;  %v6414_v37 = vmax.f32 %v6412_v24, %v6413_v0  ;;  %v6428_v13 = vmax.f32 %v6426_v28, %v6427_v4  ;;  %v6395_v45 = vmax.f32 %v6393_v42, %v6394_v38 }
 0x590   :  { %v6440_v12 = vsel %vm211_vm0, %v22133_v50, -inf  ;;  %v6435_v22 = vmax.f32 %v6433_v18, %v6434_v15  ;;  %v6409_v46 = vmax.f32 %v6407_v32, %v6408_v60  ;;  %v6422_v24 = vrot.slane %v6421_v52, 2 }
 0x591   :  { %v6402_v17 = vmax.f32 %v6400_v26, %v6401_v6  ;;  %v6415_v9 = vrot.slane %v6414_v37, 2  ;;  %v6429_v0 = vrot.slane %v6428_v13, 2  ;;  %v6441_v5 = vrot.slane %v6440_v12, 4 }
 0x592   :  { %v6396_v29 = vrot.slane %v6395_v45, 1  ;;  %v6436_v49 = vrot.slane %v6435_v22, 2  ;;  %v6410_v4 = vrot.slane %v6409_v46, 1  ;;  %v6423_v21 = vmax.f32 %v6421_v52, %v6422_v24 }
 0x593   :  { %v6403_v28 = vrot.slane %v6402_v17, 1  ;;  %v6416_v7 = vmax.f32 %v6414_v37, %v6415_v9  ;;  %v6430_v55 = vmax.f32 %v6428_v13, %v6429_v0  ;;  %v6442_v50 = vmax.f32 %v6440_v12, %v6441_v5 }
 0x594   :  { %v6397_v42 = vmax.f32 %v6395_v45, %v6396_v29  ;;  %v6437_v18 = vmax.f32 %v6435_v22, %v6436_v49  ;;  %v6411_v6 = vmax.f32 %v6409_v46, %v6410_v4  ;;  %v6424_v32 = vrot.slane %v6423_v21, 1  ;;  %v22148_v49 = vld [vmem:[#allocation140_spill] sm:$0xff]  ;;  %v22149_v4 = vld [vmem:[#allocation141_spill] sm:$0xff] }
 0x595   :  { %v6404_v26 = vmax.f32 %v6402_v17, %v6403_v28  ;;  %v6417_v38 = vrot.slane %v6416_v7, 1  ;;  %v6431_v15 = vrot.slane %v6430_v55, 1  ;;  %v6443_v60 = vrot.slane %v6442_v50, 2 }
 0x596   :  { %v6438_v56 = vrot.slane %v6437_v18, 1  ;;  %v19351_v44 = vmax.f32 %v19311_v33, %v19315_v63  ;;  %v19355_v37 = vmax.f32 %v19313_v35, %v19317_v59  ;;  %v6425_v52 = vmax.f32 %v6423_v21, %v6424_v32  ;;  %v22139_v59 = vld [vmem:[#allocation121_spill] sm:$0xff] }
 0x597   :  { %v6418_v30 = vmax.f32 %v6416_v7, %v6417_v38  ;;  %v6444_v13 = vmax.f32 %v6442_v50, %v6443_v60  ;;  %v19359_v12 = vmax.f32 %v19319_v25, %v19331_v31  ;;  %v2309_v46 = vmax.f32 %v19262_v19, 0.0  ;;  %v22150_v21 = vld [vmem:[#allocation137_spill] sm:$0xff] }
 0x598   :  { %22134 = vst [vmem:[#allocation94_spill] sm:$0xff] %v19351_v44  ;;  %22135 = vst [vmem:[#allocation95_spill] sm:$0xff] %v19355_v37  ;;  %v6439_v45 = vmax.f32 %v6437_v18, %v6438_v56  ;;  %v19363_v17 = vmax.f32 %v19321_v54, %v6390_v1  ;;  %v19365_v9 = vmax.f32 %v6397_v42, %v6411_v6  ;;  %v2310_v35 = vmax.f32 %v19270_v10, 0.0  ;;  %v22155_v18 = vld [vmem:[#allocation122_spill] sm:$0xff]  ;;  %v22156_v6 = vld [vmem:[#allocation127_spill] sm:$0xff] }
 0x599   :  { %22136 = vst [vmem:[#allocation97_spill] sm:$0xff] %v19359_v12  ;;  %v19367_v33 = vmax.f32 %v6404_v26, %v6418_v30  ;;  %v6432_v63 = vmax.f32 %v6430_v55, %v6431_v15  ;;  %v6445_v22 = vrot.slane %v6444_v13, 1  ;;  %v6820_v24 = vsel %vm6785_vm12, %v22140_v48, %v22139_v59  ;;  %v22151_v55 = vld [vmem:[#allocation138_spill] sm:$0xff]  ;;  %v22158_v15 = vld [vmem:[#allocation120_spill] sm:$0xff]  ;;  %v22159_v56 = vld [vmem:[#allocation85_spill] sm:$0xff] }
 0x59a   :  { %22137 = vst [vmem:[#allocation169_spill] sm:$0xff] %v19363_v17  ;;  %v19373_v25 = vmax.f32 %v6425_v52, %v6439_v45  ;;  %v19378_v19 = vsel %vm6783_vm11, %v19365_v9, %v19359_v12  ;;  %v3005_v54 = vrot.slane %v19264_v3, %v22088_v23  ;;  %v3012_v31 = vrot.slane %v19266_v62, %v22088_v23  ;;  %v22153_v62 = vld [vmem:[#allocation139_spill] sm:$0xff] }
 0x59b   :  { %22138 = vst [vmem:[#allocation170_spill] sm:$0xff] %v19367_v33  ;;  %22142 = vst [vmem:[#allocation119_spill] sm:$0xff] %v19378_v19  ;;  %v19383_v30 = vsel %vm6783_vm11, %v19367_v33, %v19363_v17  ;;  %v6446_v10 = vmax.f32 %v6444_v13, %v6445_v22  ;;  %v2997_v1 = vcombine.low %v2309_v46, %v2310_v35  ;;  %v22144_v5 = vrot.slane %v19212_v41, 1  ;;  %v22160_v13 = vld [vmem:[#allocation142_spill] sm:$0xff] }
 0x59c   :  { %22141 = vst [vmem:[#allocation121_spill] sm:$0xff] %v19373_v25  ;;  %22143 = vst [vmem:[#allocation171_spill] sm:$0xff] %v19383_v30  ;;  %v2998_v0 = vcombine.high %v2309_v46, %v2310_v35  ;;  %v22146_v28 = vrot.slane %v19218_v20, 1  ;;  %v6828_v3 = vsel %vm6785_vm12, %v22149_v4, %v22148_v49  ;;  %v22152_v50 = vmax.f32 %v22150_v21, %v22151_v55  ;;  %v22161_v49 = vld [vmem:[#allocation125_spill] sm:$0xff] }
 0x59d   :  { %v19392_v29 = vmax.f32 %v19212_v41, %v22144_v5  ;;  %v19407_v26 = vmax.f32 %v6432_v63, %v6446_v10  ;;  %v3019_v41 = vrot.slane %v2997_v1, %v22088_v23  ;;  %v6824_v60 = vsel %vm6785_vm12, %v22158_v15, %v19277_v40 }
 0x59e   :  { %v19397_v7 = vmax.f32 %v19218_v20, %v22146_v28  ;;  %v6831_v42 = vsel %vm6783_vm11, %v22153_v62, %v22152_v50  ;;  %v3026_v38 = vrot.slane %v2998_v0, %v22088_v23  ;;  %v6821_v20 = vsel %vm6787_vm13, %v22155_v18, %v6820_v24 }
 0x59f   :  { %22145 = vst [vmem:[#allocation172_spill] sm:$0xff] %v19392_v29  ;;  %22154 = vst [vmem:[#allocation140_spill] sm:$0xff] %v19407_v26  ;;  %v19415_v32 = vsel %vm6789_vm14, %v22156_v6, %v6821_v20  ;;  %v19422_v52 = vsel %vm6787_vm13, %v22159_v56, %v6828_v3  ;;  %v19426_v46 = vsel %vm6785_vm12, %v22160_v13, %v6831_v42 }
 0x5a0   :  { %22147 = vst [vmem:[#allocation173_spill] sm:$0xff] %v19397_v7  ;;  %22157 = vst [vmem:[#allocation141_spill] sm:$0xff] %v19415_v32  ;;  %v3027_v45 = vcombine.low %v3005_v54, %v3019_v41  ;;  %v3028_v63 = vcombine.high %v3005_v54, %v3019_v41  ;;  %v3029_v22 = vcombine.low %v3012_v31, %v3026_v38 }
 0x5a1   :  { %v3030_v35 = vcombine.high %v3012_v31, %v3026_v38  ;;  %v14152_v59 = vcombine.low %v3019_v41, %v3019_v41  ;;  %v14153_v48 = vcombine.high %v3019_v41, %v3019_v41  ;;  %v14154_v24 = vcombine.low %v3026_v38, %v3026_v38 }
 0x5a2   :  { %v14155_v10 = vcombine.high %v3026_v38, %v3026_v38  ;;  %v4194_v1 = vrot.slane %v3027_v45, %v22088_v23  ;;  %v4211_v40 = vrot.slane %v3028_v63, %v22088_v23  ;;  %v19431_v0 = vrot.slane %v3029_v22, %v22088_v23 }
 0x5a3   :  { %v19434_v5 = vrot.slane %v3030_v35, %v22088_v23  ;;  %v4201_v28 = vrot.slane %v14152_v59, %v22088_v23  ;;  %v4218_v54 = vrot.slane %v14153_v48, %v22088_v23  ;;  %v19439_v31 = vrot.slane %v14154_v24, %v22088_v23 }
 0x5a4   :  { %v19443_v4 = vsel %vm6787_vm13, %v22161_v49, %v6824_v60  ;;  %v4202_v3 = vcombine.high %v4194_v1, %v4194_v1  ;;  %v4219_v21 = vcombine.high %v4211_v40, %v4211_v40  ;;  %v4236_v55 = vcombine.high %v19431_v0, %v19431_v0 }
 0x5a5   :  { %v19448_v50 = vrot.slane %v14155_v10, %v22088_v23  ;;  %v4203_v42 = vcombine.high %v4201_v28, %v4201_v28  ;;  %v4220_v41 = vcombine.high %v4218_v54, %v4218_v54  ;;  %v6447_v45 = vsel %vm211_vm0, %v4194_v1, -inf }
 0x5a6   :  { %v6454_v60 = vsel %vm211_vm0, %v4202_v3, -inf  ;;  %v6461_v63 = vsel %vm211_vm0, %v4201_v28, -inf  ;;  %v6475_v22 = vsel %vm211_vm0, %v4211_v40, -inf  ;;  %v6448_v35 = vrot.slane %v6447_v45, 4 }
 0x5a7   :  { %v6455_v59 = vrot.slane %v6454_v60, 4  ;;  %v6462_v23 = vrot.slane %v6461_v63, 4  ;;  %v6468_v48 = vsel %vm211_vm0, %v4203_v42, -inf  ;;  %v6476_v10 = vrot.slane %v6475_v22, 4 }
 0x5a8   :  { %v6469_v24 = vrot.slane %v6468_v48, 4  ;;  %v6482_v38 = vsel %vm211_vm0, %v4219_v21, -inf  ;;  %v6489_v29 = vsel %vm211_vm0, %v4218_v54, -inf  ;;  %v6449_v20 = vmax.f32 %v6447_v45, %v6448_v35 }
 0x5a9   :  { %v6456_v7 = vmax.f32 %v6454_v60, %v6455_v59  ;;  %v6463_v1 = vmax.f32 %v6461_v63, %v6462_v23  ;;  %v6483_v34 = vrot.slane %v6482_v38, 4  ;;  %v6477_v30 = vmax.f32 %v6475_v22, %v6476_v10 }
 0x5aa   :  { %v6470_v3 = vmax.f32 %v6468_v48, %v6469_v24  ;;  %v6490_v28 = vrot.slane %v6489_v29, 4  ;;  %v6496_v40 = vsel %vm211_vm0, %v4220_v41, -inf  ;;  %v6450_v19 = vrot.slane %v6449_v20, 2 }
 0x5ab   :  { %v6457_v26 = vrot.slane %v6456_v7, 2  ;;  %v6464_v33 = vrot.slane %v6463_v1, 2  ;;  %v6484_v17 = vmax.f32 %v6482_v38, %v6483_v34  ;;  %v6478_v37 = vrot.slane %v6477_v30, 2 }
 0x5ac   :  { %v6471_v42 = vrot.slane %v6470_v3, 2  ;;  %v6491_v36 = vmax.f32 %v6489_v29, %v6490_v28  ;;  %v6497_v47 = vrot.slane %v6496_v40, 4  ;;  %v6451_v21 = vmax.f32 %v6449_v20, %v6450_v19 }
 0x5ad   :  { %v6458_v12 = vmax.f32 %v6456_v7, %v6457_v26  ;;  %v6465_v54 = vmax.f32 %v6463_v1, %v6464_v33  ;;  %v6485_v45 = vrot.slane %v6484_v17, 2  ;;  %v6479_v63 = vmax.f32 %v6477_v30, %v6478_v37 }
 0x5ae   :  { %v6472_v60 = vmax.f32 %v6470_v3, %v6471_v42  ;;  %v6492_v35 = vrot.slane %v6491_v36, 2  ;;  %v6498_v59 = vmax.f32 %v6496_v40, %v6497_v47  ;;  %v6452_v22 = vrot.slane %v6451_v21, 1 }
 0x5af   :  { %v6459_v23 = vrot.slane %v6458_v12, 1  ;;  %v6466_v48 = vrot.slane %v6465_v54, 1  ;;  %v6486_v41 = vmax.f32 %v6484_v17, %v6485_v45  ;;  %v6480_v10 = vrot.slane %v6479_v63, 1 }
 0x5b0   :  { %v6473_v24 = vrot.slane %v6472_v60, 1  ;;  %v6493_v44 = vmax.f32 %v6491_v36, %v6492_v35  ;;  %v6499_v34 = vrot.slane %v6498_v59, 2  ;;  %v4254_v29 = vcombine.high %v19448_v50, %v19448_v50 }
 0x5b1   :  { %v6453_v38 = vmax.f32 %v6451_v21, %v6452_v22  ;;  %v6460_v19 = vmax.f32 %v6458_v12, %v6459_v23  ;;  %v6487_v7 = vrot.slane %v6486_v41, 1  ;;  %v6467_v33 = vmax.f32 %v6465_v54, %v6466_v48 }
 0x5b2   :  { %v6474_v26 = vmax.f32 %v6472_v60, %v6473_v24  ;;  %v6494_v20 = vrot.slane %v6493_v44, 1  ;;  %v6500_v37 = vmax.f32 %v6498_v59, %v6499_v34  ;;  %v6481_v30 = vmax.f32 %v6479_v63, %v6480_v10 }
 0x5b3   :  { %v6503_v47 = vsel %vm211_vm0, %v19431_v0, -inf  ;;  %v6510_v17 = vsel %vm211_vm0, %v4236_v55, -inf  ;;  %v6517_v36 = vsel %vm211_vm0, %v19439_v31, -inf  ;;  %v6488_v1 = vmax.f32 %v6486_v41, %v6487_v7 }
 0x5b4   :  { %v6495_v3 = vmax.f32 %v6493_v44, %v6494_v20  ;;  %v6504_v28 = vrot.slane %v6503_v47, 4  ;;  %v6511_v40 = vrot.slane %v6510_v17, 4  ;;  %v6518_v42 = vrot.slane %v6517_v36, 4 }
 0x5b5   :  { %v22162_v12 = vcombine.high %v19439_v31, %v19439_v31  ;;  %v6531_v54 = vsel %vm211_vm0, %v19434_v5, -inf  ;;  %v22163_v0 = vcombine.high %v19434_v5, %v19434_v5  ;;  %v6501_v45 = vrot.slane %v6500_v37, 1 }
 0x5b6   :  { %v6505_v60 = vmax.f32 %v6503_v47, %v6504_v28  ;;  %v6512_v63 = vmax.f32 %v6510_v17, %v6511_v40  ;;  %v6519_v35 = vmax.f32 %v6517_v36, %v6518_v42  ;;  %v6532_v59 = vrot.slane %v6531_v54, 4 }
 0x5b7   :  { %v6524_v21 = vsel %vm211_vm0, %v22162_v12, -inf  ;;  %v6538_v55 = vsel %vm211_vm0, %v22163_v0, -inf  ;;  %v6545_v31 = vsel %vm211_vm0, %v19448_v50, -inf  ;;  %v6552_v5 = vsel %vm211_vm0, %v4254_v29, -inf }
 0x5b8   :  { %v6525_v44 = vrot.slane %v6524_v21, 4  ;;  %v6539_v22 = vrot.slane %v6538_v55, 4  ;;  %v6506_v23 = vrot.slane %v6505_v60, 2  ;;  %v6513_v48 = vrot.slane %v6512_v63, 2 }
 0x5b9   :  { %v6546_v24 = vrot.slane %v6545_v31, 4  ;;  %v6520_v10 = vrot.slane %v6519_v35, 2  ;;  %v6533_v34 = vmax.f32 %v6531_v54, %v6532_v59  ;;  %v6553_v42 = vrot.slane %v6552_v5, 4 }
 0x5ba   :  { %v6526_v41 = vmax.f32 %v6524_v21, %v6525_v44  ;;  %v6540_v7 = vmax.f32 %v6538_v55, %v6539_v22  ;;  %v6507_v20 = vmax.f32 %v6505_v60, %v6506_v23  ;;  %v6514_v12 = vmax.f32 %v6512_v63, %v6513_v48 }
 0x5bb   :  { %v6547_v17 = vmax.f32 %v6545_v31, %v6546_v24  ;;  %v6521_v28 = vmax.f32 %v6519_v35, %v6520_v10  ;;  %v6534_v36 = vrot.slane %v6533_v34, 2  ;;  %v6554_v13 = vmax.f32 %v6552_v5, %v6553_v42  ;;  %v22176_v10 = vld [vmem:[#allocation145_spill] sm:$0xff]  ;;  %v22178_v5 = vld [vmem:[#allocation150_spill] sm:$0xff] }
 0x5bc   :  { %v6527_v47 = vrot.slane %v6526_v41, 2  ;;  %v6541_v40 = vrot.slane %v6540_v7, 2  ;;  %v6508_v0 = vrot.slane %v6507_v20, 1  ;;  %v6515_v43 = vrot.slane %v6514_v12, 1 }
 0x5bd   :  { %v6548_v27 = vrot.slane %v6547_v17, 2  ;;  %v6522_v32 = vrot.slane %v6521_v28, 1  ;;  %v6535_v21 = vmax.f32 %v6533_v34, %v6534_v36  ;;  %v6502_v54 = vmax.f32 %v6500_v37, %v6501_v45  ;;  %v22167_v45 = vld [vmem:[#allocation128_spill] sm:$0xff]  ;;  %v22180_v36 = vld [vmem:[#allocation143_spill] sm:$0xff] }
 0x5be   :  { %v6528_v50 = vmax.f32 %v6526_v41, %v6527_v47  ;;  %v6542_v44 = vmax.f32 %v6540_v7, %v6541_v40  ;;  %v6509_v55 = vmax.f32 %v6507_v20, %v6508_v0  ;;  %v6516_v59 = vmax.f32 %v6514_v12, %v6515_v43  ;;  %v22179_v47 = vld [vmem:[#allocation129_spill] sm:$0xff] }
 0x5bf   :  { %v6523_v60 = vmax.f32 %v6521_v28, %v6522_v32  ;;  %v6536_v63 = vrot.slane %v6535_v21, 1  ;;  %v6555_v31 = vrot.slane %v6554_v13, 2  ;;  %v19482_v23 = vmax.f32 %v6453_v38, %v6467_v33 }
 0x5c0   :  { %v6529_v29 = vrot.slane %v6528_v50, 1  ;;  %v6543_v22 = vrot.slane %v6542_v44, 1  ;;  %v19484_v48 = vmax.f32 %v6460_v19, %v6474_v26  ;;  %v6836_v41 = vsel %vm6785_vm12, %v19107_v51, %v18688_v57 }
 0x5c1   :  { %22164 = vst [vmem:[#allocation137_spill] sm:$0xff] %v19482_v23  ;;  %v19492_v37 = vsel %vm6783_vm11, %v19373_v25, %v19365_v9  ;;  %v19494_v43 = vmax.f32 %v6547_v17, %v6548_v27  ;;  %v19496_v32 = vmax.f32 %v6481_v30, %v6495_v3  ;;  %v19501_v38 = vsel %vm6789_vm14, %v22167_v45, %v19443_v4  ;;  %v22174_v27 = vld [vmem:[#allocation96_spill] sm:$0xff] }
 0x5c2   :  { %v6530_v35 = vmax.f32 %v6528_v50, %v6529_v29  ;;  %22165 = vst [vmem:[#allocation138_spill] sm:$0xff] %v19484_v48  ;;  %v19503_v19 = vmax.f32 %v6535_v21, %v6536_v63  ;;  %v19505_v33 = vmax.f32 %v6488_v1, %v6502_v54  ;;  %v19507_v26 = vmax.f32 %v6509_v55, %v6523_v60  ;;  %v22175_v3 = vld [vmem:[#allocation144_spill] sm:$0xff]  ;;  %v22181_v50 = vld [vmem:[#allocation142_spill] sm:$0xff] }
 0x5c3   :  { %22166 = vst [vmem:[#allocation139_spill] sm:$0xff] %v19496_v32  ;;  %v19511_v51 = vmax.f32 %v6542_v44, %v6543_v22  ;;  %v19513_v24 = vmax.f32 %v6554_v13, %v6555_v31  ;;  %v6833_v30 = vsel %vm6787_vm13, %v22174_v27, %v19426_v46  ;;  %v6837_v4 = vsel %vm6787_vm13, %v19115_v16, %v6836_v41  ;;  %v22182_v44 = vld [vmem:[#allocation130_spill] sm:$0xff]  ;;  %v22184_v29 = vld [vmem:[#allocation156_spill] sm:$0xff]  ;;  %v22185_v31 = vld [vmem:[#allocation111_spill] sm:$0xff] }
 0x5c4   :  { %22168 = vst [vmem:[#allocation122_spill] sm:$0xff] %v19503_v19  ;;  %22169 = vst [vmem:[#allocation127_spill] sm:$0xff] %v19505_v33  ;;  %v19509_v57 = vmax.f32 %v6516_v59, %v6530_v35  ;;  %v19523_v1 = vsel %vm6789_vm14, %v22175_v3, %v19422_v52  ;;  %v19527_v34 = vsel %vm6789_vm14, %v22176_v10, %v6833_v30  ;;  %v22183_v55 = vld [vmem:[#allocation146_spill] sm:$0xff]  ;;  %v22186_v35 = vld [vmem:[#allocation51_spill] sm:$0xff] }
 0x5c5   :  { %22170 = vst [vmem:[#allocation120_spill] sm:$0xff] %v19507_v26  ;;  %22172 = vst [vmem:[#allocation125_spill] sm:$0xff] %v19511_v51  ;;  %v22177_v13 = vmax.f32 %v18630_v39, %v18636_v58  ;;  %v6900_v46 = vsel %vm6785_vm12, %v22155_v18, %v22178_v5  ;;  %v19539_v20 = vsel %vm6789_vm14, %v19121_v61, %v6837_v4  ;;  %v22187_v30 = vld [vmem:[#allocation147_spill] sm:$0xff]  ;;  %v22188_v4 = vld [vmem:[#allocation26_spill] sm:$0xff] }
 0x5c6   :  { %22171 = vst [vmem:[#allocation85_spill] sm:$0xff] %v19509_v57  ;;  %22173 = vst [vmem:[#allocation128_spill] sm:$0xff] %v19513_v24  ;;  %v6901_v12 = vsel %vm6787_vm13, %v22156_v6, %v6900_v46  ;;  %v6903_v39 = vsel %vm6783_vm11, %v22158_v15, %v22129_v8  ;;  %v6908_v40 = vsel %vm6785_vm12, %v22159_v56, %v22180_v36  ;;  %v22189_v5 = vld [vmem:[#allocation114_spill] sm:$0xff]  ;;  %v22193_v36 = vld [vmem:[#allocation149_spill] sm:$0xff] }
 0x5c7   :  { %v6839_v7 = vsel %vm6783_vm11, %v18698_v2, %v22177_v13  ;;  %v6902_v17 = vsel %vm6789_vm14, %v22179_v47, %v6901_v12  ;;  %v6904_v28 = vsel %vm6785_vm12, %v22161_v49, %v6903_v39  ;;  %v6909_v0 = vsel %vm6787_vm13, %v22175_v3, %v6908_v40  ;;  %v22191_v12 = vld [vmem:[#allocation105_spill] sm:$0xff]  ;;  %v22209_v51 = vld [vmem:[#allocation44_spill] sm:$0xff] }
 0x5c8   :  { %v6840_v52 = vsel %vm6785_vm12, %v19111_v14, %v6839_v7  ;;  %v6905_v8 = vsel %vm6787_vm13, %v22167_v45, %v6904_v28  ;;  %v6911_v21 = vsel %vm6783_vm11, %v22181_v50, %v22153_v62  ;;  %v19572_v56 = vsel %vm6789_vm14, %v22183_v55, %v6909_v0  ;;  %v22195_v50 = vld [vmem:[#allocation112_spill] sm:$0xff] }
 0x5c9   :  { %v6841_v58 = vsel %vm6787_vm13, %v19119_v53, %v6840_v52  ;;  %v6906_v54 = vsel %vm6789_vm14, %v22182_v44, %v6905_v8  ;;  %v6912_v59 = vsel %vm6785_vm12, %v22174_v27, %v6911_v21  ;;  %v6916_v60 = vsel %vm6785_vm12, %v19115_v16, %v22184_v29  ;;  %v22190_v52 = vld [vmem:[#allocation110_spill] sm:$0xff] }
 0x5ca   :  { %v19559_v42 = vsel %vm6789_vm14, %v19123_v11, %v6841_v58  ;;  %v6913_v63 = vsel %vm6787_vm13, %v22176_v10, %v6912_v59  ;;  %v6917_v62 = vsel %vm6787_vm13, %v19121_v61, %v6916_v60  ;;  %v6919_v22 = vsel %vm6783_vm11, %v19111_v14, %v18698_v2  ;;  %v22192_v58 = vld [vmem:[#allocation148_spill] sm:$0xff]  ;;  %v22194_v8 = vld [vmem:[#allocation158_spill] sm:$0xff]  ;;  %v22196_v60 = vld [vmem:[#allocation115_spill] sm:$0xff] }
 0x5cb   :  { %v6973_v41 = vsel %vm6787_vm13, %v22186_v35, %v22185_v31  ;;  %v19591_v27 = vsel %vm6789_vm14, %v22187_v30, %v6913_v63  ;;  %v19595_v13 = vsel %vm6789_vm14, %v22188_v4, %v6917_v62  ;;  %v6920_v7 = vsel %vm6785_vm12, %v19119_v53, %v6919_v22  ;;  %v22197_v62 = vld [vmem:[#allocation152_spill] sm:$0xff]  ;;  %v22199_v31 = vld [vmem:[#allocation157_spill] sm:$0xff] }
 0x5cc   :  { %v19601_v46 = vsel %vm6789_vm14, %v22189_v5, %v6973_v41  ;;  %v6921_v2 = vsel %vm6787_vm13, %v19123_v11, %v6920_v7  ;;  %v6976_v39 = vsel %vm6785_vm12, %v22191_v12, %v22190_v52  ;;  %v6988_v28 = vsel %vm6785_vm12, %v22175_v3, %v22192_v58  ;;  %v22201_v7 = vld [vmem:[#allocation124_spill] sm:$0xff] }
 0x5cd   :  { %v6992_v40 = vsel %vm6785_vm12, %v22176_v10, %v22193_v36  ;;  %v19616_v0 = vsel %vm6789_vm14, %v22194_v8, %v6921_v2  ;;  %v6977_v21 = vsel %vm6787_vm13, %v22195_v50, %v6976_v39  ;;  %v6989_v59 = vsel %vm6787_vm13, %v22183_v55, %v6988_v28  ;;  %v22202_v2 = vld [vmem:[#allocation116_spill] sm:$0xff]  ;;  %v22203_v39 = vld [vmem:[#allocation118_spill] sm:$0xff]  ;;  %v22204_v28 = vld [vmem:[#allocation79_spill] sm:$0xff] }
 0x5ce   :  { %v6993_v29 = vsel %vm6787_vm13, %v22187_v30, %v6992_v40  ;;  %v19626_v63 = vsel %vm6789_vm14, %v22196_v60, %v6977_v21  ;;  %v19630_v22 = vsel %vm6789_vm14, %v22197_v62, %v6989_v59  ;;  %v19639_v52 = vsel %vm6789_vm14, %v22202_v2, %v22201_v7  ;;  %v22205_v36 = vld [vmem:[#allocation47_spill] sm:$0xff]  ;;  %v22217_v2 = vld [vmem:[#allocation93_spill] sm:$0xff] }
 0x5cf   :  { %22198 = vst [vmem:[#allocation96_spill] sm:$0xff] %v19630_v22  ;;  %v19634_v41 = vsel %vm6789_vm14, %v22199_v31, %v6993_v29  ;;  %v7056_v58 = vsel %vm6785_vm12, %v22195_v50, %v22203_v39  ;;  %v19647_v40 = vsel %vm6789_vm14, %v22205_v36, %v22204_v28  ;;  %v22207_v21 = vld [vmem:[#allocation23_spill] sm:$0xff]  ;;  %v22208_v29 = vld [vmem:[#allocation45_spill] sm:$0xff]  ;;  %v22211_v39 = vld [vmem:[#allocation46_spill] sm:$0xff]  ;;  %v7646_v28 = vcombine.low %v19601_v46, %v19626_v63 }
 0x5d0   :  { %22200 = vst [vmem:[#allocation150_spill] sm:$0xff] %v19634_v41  ;;  %22206 = vst [vmem:[#allocation129_spill] sm:$0xff] %v19647_v40  ;;  %v7072_v59 = vsel %vm6785_vm12, %v22187_v30, %v22207_v21  ;;  %v7643_v19 = vcombine.high %v22209_v51, %v22208_v29  ;;  %v7057_v7 = vsel %vm6787_vm13, %v22196_v60, %v7056_v58  ;;  %v22210_v10 = vld [vmem:[#allocation67_spill] sm:$0xff]  ;;  %v22212_v36 = vld [vmem:[#allocation117_spill] sm:$0xff] }
 0x5d1   :  { %v7073_v62 = vsel %vm6787_vm13, %v22199_v31, %v7072_v59  ;;  %v7645_v55 = vcombine.high %v22211_v39, %v22210_v10  ;;  %v19664_v3 = vsel %vm6789_vm14, %v22212_v36, %v7057_v7  ;;  %v22213_v21 = vld [vmem:[#allocation53_spill] sm:$0xff]  ;;  %v22215_v51 = vld [vmem:[#allocation68_spill] sm:$0xff]  ;;  %v22216_v58 = vld [vmem:[#allocation98_spill] sm:$0xff]  ;;  %v7957_v12 = vcombine.high %v19523_v1, %v19527_v34 }
 0x5d2   :  { %v19668_v30 = vsel %vm6789_vm14, %v22213_v21, %v7073_v62  ;;  %v7663_v29 = vrot.slane %v7643_v19, %v22215_v51  ;;  %v7707_v60 = vcombine.high %v22217_v2, %v22216_v58  ;;  %v7648_v59 = vcombine.low %v19639_v52, %v19664_v3  ;;  %v22218_v31 = vld [vmem:[#allocation141_spill] sm:$0xff] }
 0x5d3   :  { %22214 = vst [vmem:[#allocation143_spill] sm:$0xff] %v19668_v30  ;;  %v7677_v10 = vrot.slane %v7645_v55, %v22215_v51  ;;  %v7684_v39 = vrot.slane %v7646_v28, %v22215_v51  ;;  %v7799_v7 = vcombine.low %v22218_v31, %v19501_v38  ;;  %v7800_v62 = vcombine.high %v22218_v31, %v19501_v38 }
 0x5d4   :  { %v19680_v36 = vrot.slane %v7707_v60, %v22215_v51  ;;  %v7801_v19 = vcombine.low %v6902_v17, %v6906_v54  ;;  %v7802_v21 = vcombine.high %v6902_v17, %v6906_v54  ;;  %v7698_v2 = vrot.slane %v7648_v59, %v22215_v51 }
 0x5d5   :  { %v7708_v58 = vcombine.low %v7663_v29, %v7677_v10  ;;  %v7813_v5 = vrot.slane %v7799_v7, %v22215_v51  ;;  %v7956_v55 = vcombine.low %v19523_v1, %v19527_v34  ;;  %v7820_v28 = vrot.slane %v7800_v62, %v22215_v51 }
 0x5d6   :  { %22219 = vst [vmem:[#allocation142_spill] sm:$0xff] %v19680_v36  ;;  %v7827_v50 = vrot.slane %v7801_v19, %v22215_v51  ;;  %v7834_v60 = vrot.slane %v7802_v21, %v22215_v51  ;;  %v7709_v38 = vcombine.low %v7684_v39, %v7698_v2  ;;  %v7710_v31 = vcombine.high %v7684_v39, %v7698_v2 }
 0x5d7   :  { %v19694_v17 = vrot.slane %v7708_v58, %v22215_v51  ;;  %v7958_v54 = vcombine.low %v19572_v56, %v19591_v27  ;;  %v7959_v7 = vcombine.high %v19572_v56, %v19591_v27  ;;  %v7960_v1 = vcombine.low %v19630_v22, %v19634_v41  ;;  %v22222_v27 = vld [vmem:[#allocation101_spill] sm:$0xff] }
 0x5d8   :  { %v7863_v29 = vcombine.low %v7813_v5, %v7827_v50  ;;  %v7864_v59 = vcombine.high %v7813_v5, %v7827_v50  ;;  %v7865_v10 = vcombine.low %v7820_v28, %v7834_v60  ;;  %v19701_v62 = vrot.slane %v7709_v38, %v22215_v51 }
 0x5d9   :  { %22220 = vst [vmem:[#allocation130_spill] sm:$0xff] %v19694_v17  ;;  %v19704_v21 = vrot.slane %v7710_v31, %v22215_v51  ;;  %v7962_v34 = vcombine.low %v19647_v40, %v19668_v30  ;;  %v7970_v56 = vrot.slane %v7956_v55, %v22215_v51  ;;  %v7977_v58 = vrot.slane %v7957_v12, %v22215_v51 }
 0x5da   :  { %v7875_v39 = vrot.slane %v7863_v29, %v22215_v51  ;;  %v7882_v5 = vrot.slane %v7865_v10, %v22215_v51  ;;  %v7889_v50 = vrot.slane %v7864_v59, %v22215_v51  ;;  %v7755_v19 = vcombine.high %v22222_v27, %v19701_v62 }
 0x5db   :  { %22221 = vst [vmem:[#allocation156_spill] sm:$0xff] %v19704_v21  ;;  %v7758_v2 = vcombine.high %v19680_v36, %v19704_v21  ;;  %v7984_v28 = vrot.slane %v7958_v54, %v22215_v51  ;;  %v7991_v60 = vrot.slane %v7959_v7, %v22215_v51  ;;  %v7998_v38 = vrot.slane %v7960_v1, %v22215_v51 }
 0x5dc   :  { %v8012_v31 = vrot.slane %v7962_v34, %v22215_v51  ;;  %v8113_v29 = vcombine.low %v19539_v20, %v19559_v42  ;;  %v8115_v10 = vcombine.low %v19595_v13, %v19616_v0  ;;  %v14174_v27 = vcombine.low %v19680_v36, %v7755_v19 }
 0x5dd   :  { %v8020_v55 = vcombine.low %v7970_v56, %v7984_v28  ;;  %v8021_v59 = vcombine.high %v7970_v56, %v7984_v28  ;;  %v8022_v35 = vcombine.low %v7977_v58, %v7991_v60  ;;  %v14176_v40 = vcombine.low %v7758_v2, %v19694_v17 }
 0x5de   :  { %v8023_v12 = vcombine.low %v7998_v38, %v8012_v31  ;;  %v8024_v24 = vcombine.high %v7998_v38, %v8012_v31  ;;  %v8127_v54 = vrot.slane %v8113_v29, %v22215_v51  ;;  %v8141_v34 = vrot.slane %v8115_v10, %v22215_v51 }
 0x5df   :  { %v8032_v7 = vrot.slane %v8020_v55, %v22215_v51  ;;  %v19731_v1 = vrot.slane %v8021_v59, %v22215_v51  ;;  %v19736_v56 = vrot.slane %v8022_v35, %v22215_v51  ;;  %v14178_v58 = vcombine.low %v7875_v39, %v7889_v50 }
 0x5e0   :  { %v19739_v28 = vrot.slane %v8023_v12, %v22215_v51  ;;  %v19742_v19 = vrot.slane %v8024_v24, %v22215_v51  ;;  %v8177_v60 = vcombine.low %v8127_v54, %v8141_v34  ;;  %v8178_v38 = vcombine.high %v8127_v54, %v8141_v34 }
 0x5e1   :  { %22223 = vst [vmem:[#allocation111_spill] sm:$0xff] %v19731_v1  ;;  %22224 = vst [vmem:[#allocation110_spill] sm:$0xff] %v19736_v56  ;;  %v14180_v31 = vcombine.high %v7875_v39, %v7889_v50  ;;  %v8845_v29 = vrot.slane %v14174_v27, %v22215_v51  ;;  %v8859_v35 = vrot.slane %v14176_v40, %v22215_v51 }
 0x5e2   :  { %22225 = vst [vmem:[#allocation148_spill] sm:$0xff] %v19739_v28  ;;  %22226 = vst [vmem:[#allocation149_spill] sm:$0xff] %v19742_v19  ;;  %v8069_v55 = vcombine.high %v8032_v7, %v19739_v28  ;;  %v8072_v2 = vcombine.high %v19731_v1, %v19742_v19  ;;  %v8873_v59 = vrot.slane %v14178_v58, %v22215_v51  ;;  %v22235_v19 = vld [vmem:[#allocation95_spill] sm:$0xff] }
 0x5e3   :  { %v19751_v10 = vrot.slane %v8177_v60, %v22215_v51  ;;  %v19754_v24 = vrot.slane %v8178_v38, %v22215_v51  ;;  %v8887_v12 = vrot.slane %v14180_v31, %v22215_v51  ;;  %v14183_v39 = vcombine.low %v7882_v5, %v8032_v7 }
 0x5e4   :  { %v8896_v50 = vcombine.high %v8845_v29, %v8859_v35  ;;  %v14185_v27 = vcombine.low %v19731_v1, %v8069_v55  ;;  %v14187_v54 = vcombine.low %v8072_v2, %v19736_v56  ;;  %v8895_v34 = vcombine.low %v8845_v29, %v8859_v35  ;;  %v22227_v2 = vld [vmem:[#allocation161_spill] sm:$0xff]  ;;  %v22228_v35 = vld [vmem:[#allocation167_spill] sm:$0xff]  ;;  %v22232_v56 = vld [vmem:[#allocation166_spill] sm:$0xff] }
 0x5e5   :  { %v8900_v28 = vcombine.high %v8873_v59, %v8887_v12  ;;  %v14189_v40 = vcombine.low %v19751_v10, %v19754_v24  ;;  %v9047_v58 = vrot.slane %v14183_v39, %v22215_v51  ;;  %v8899_v60 = vcombine.low %v8873_v59, %v8887_v12  ;;  %v22230_v12 = vld [vmem:[#allocation94_spill] sm:$0xff]  ;;  %v22233_v1 = vld [vmem:[#allocation168_spill] sm:$0xff] }
 0x5e6   :  { %v19763_v17 = vrot.slane %v8896_v50, %v22215_v51  ;;  %v9061_v38 = vrot.slane %v14185_v27, %v22215_v51  ;;  %v9075_v5 = vrot.slane %v14187_v54, %v22215_v51  ;;  %v19768_v7 = vrot.slane %v8895_v34, %v22215_v51  ;;  %v22231_v54 = vld [vmem:[#allocation97_spill] sm:$0xff] }
 0x5e7   :  { %v19771_v31 = vrot.slane %v8900_v28, %v22215_v51  ;;  %v9089_v29 = vrot.slane %v14189_v40, %v22215_v51  ;;  %v19775_v55 = vrot.slane %v8899_v60, %v22215_v51  ;;  %v22229_v59 = vmax.f32 %v22227_v2, %v22228_v35 }
 0x5e8   :  { %v9098_v50 = vcombine.high %v9047_v58, %v9061_v38  ;;  %v9097_v27 = vcombine.low %v9047_v58, %v9061_v38  ;;  %v22234_v28 = vmax.f32 %v22232_v56, %v22233_v1  ;;  %v22236_v56 = vld [vmem:[#allocation169_spill] sm:$0xff] }
 0x5e9   :  { %v6843_v39 = vsel %vm6783_vm11, %v22230_v12, %v22229_v59  ;;  %v8963_v60 = vcombine.low %v19763_v17, %v19771_v31  ;;  %v9102_v30 = vcombine.high %v9075_v5, %v9089_v29  ;;  %v8959_v2 = vcombine.low %v19768_v7, %v19775_v55 }
 0x5ea   :  { %v6844_v34 = vsel %vm6785_vm12, %v22231_v54, %v6843_v39  ;;  %v6847_v40 = vsel %vm6783_vm11, %v22235_v19, %v22234_v28  ;;  %v9101_v35 = vcombine.low %v9075_v5, %v9089_v29  ;;  %v19794_v59 = vrot.slane %v9098_v50, %v22215_v51  ;;  %v22237_v29 = vld [vmem:[#allocation170_spill] sm:$0xff] }
 0x5eb   :  { %v19797_v58 = vrot.slane %v9097_v27, %v22215_v51  ;;  %v6845_v1 = vsel %vm6787_vm13, %v19365_v9, %v6844_v34  ;;  %v6848_v38 = vsel %vm6785_vm12, %v22236_v56, %v6847_v40  ;;  %v19804_v39 = vrot.slane %v9102_v30, %v22215_v51  ;;  %v22238_v27 = vld [vmem:[#allocation140_spill] sm:$0xff]  ;;  %v22239_v40 = vld [vmem:[#allocation119_spill] sm:$0xff] }
 0x5ec   :  { %v19807_v28 = vrot.slane %v9101_v35, %v22215_v51  ;;  %v6846_v5 = vsel %vm6789_vm14, %v19373_v25, %v6845_v1  ;;  %v6849_v50 = vsel %vm6787_vm13, %v22237_v29, %v6848_v38  ;;  %v6923_v34 = vsel %vm6783_vm11, %v22231_v54, %v22230_v12 }
 0x5ed   :  { %v6850_v22 = vsel %vm6789_vm14, %v22238_v27, %v6849_v50  ;;  %v6927_v30 = vsel %vm6783_vm11, %v22236_v56, %v22235_v19  ;;  %v7004_v35 = vsel %vm6785_vm12, %v19373_v25, %v22239_v40  ;;  %v9165_v1 = vcombine.low %v19794_v59, %v19804_v39  ;;  %v22240_v40 = vld [vmem:[#allocation171_spill] sm:$0xff] }
 0x5ee   :  { %v9161_v38 = vcombine.low %v19797_v58, %v19807_v28  ;;  %v6924_v50 = vsel %vm6785_vm12, %v19365_v9, %v6923_v34  ;;  %v6928_v12 = vsel %vm6785_vm12, %v22237_v29, %v6927_v30  ;;  %v7005_v56 = vsel %vm6787_vm13, %v19482_v23, %v7004_v35 }
 0x5ef   :  { %v6925_v54 = vsel %vm6787_vm13, %v19373_v25, %v6924_v50  ;;  %v6929_v19 = vsel %vm6787_vm13, %v22238_v27, %v6928_v12  ;;  %v7008_v41 = vsel %vm6785_vm12, %v22238_v27, %v22240_v40  ;;  %v9498_v36 = vpack.c.bf16 %v9165_v1, %v8963_v60  ;;  %v22269_v25 = vld [vmem:[#allocation89_spill] sm:$0xff] }
 0x5f0   :  { %v9497_v21 = vpack.c.bf16 %v9161_v38, %v8959_v2  ;;  %v6926_v9 = vsel %vm6789_vm14, %v19482_v23, %v6925_v54  ;;  %v6930_v34 = vsel %vm6789_vm14, %v19484_v48, %v6929_v19  ;;  %v19847_v30 = vsel %vm6789_vm14, %v19496_v32, %v7005_v56 }
 0x5f1   :  { %v7009_v50 = vsel %vm6787_vm13, %v19484_v48, %v7008_v41  ;;  %v7084_v35 = vsel %vm6785_vm12, %v19482_v23, %v19492_v37  ;;  %v7087_v60 = vsel %vm6783_vm11, %v22238_v27, %v22237_v29  ;;  %11501 = vmatprep.mubr.bf16.mxu0 %v9498_v36  ;;  %11806 = vmatprep.mubr.bf16.mxu1 %v9498_v36  ;;  %v6550_v38 = vrot.slane %v19494_v43, 1  ;;  %v22265_v27 = vld [vmem:[#allocation78_spill] sm:$0xff]  ;;  %v22268_v23 = vld [vmem:[#allocation83_spill] sm:$0xff] }
 0x5f2   :  { %v19859_v2 = vsel %vm6789_vm14, %v19505_v33, %v7009_v50  ;;  %v7085_v1 = vsel %vm6787_vm13, %v19496_v32, %v7084_v35  ;;  %v7088_v41 = vsel %vm6785_vm12, %v19484_v48, %v7087_v60  ;;  %11502 = vmatmul.mubr.bf16.gmra.mrb[40].mxu0 %v9497_v21  ;;  %11807 = vmatmul.mubr.bf16.gmra.mrb[40].mxu1 %v9497_v21  ;;  %v22267_v32 = vld [vmem:[#allocation88_spill] sm:$0xff] }
 0x5f3   :  { %v19868_v37 = vsel %vm6789_vm14, %v19507_v26, %v7085_v1  ;;  %v7089_v36 = vsel %vm6787_vm13, %v19505_v33, %v7088_v41  ;;  %v8114_v29 = vcombine.high %v19539_v20, %v19559_v42  ;;  %v8116_v54 = vcombine.high %v19595_v13, %v19616_v0  ;;  %v22245_v33 = vld [vmem:[#allocation100_spill] sm:$0xff] }
 0x5f4   :  { %v19876_v12 = vsel %vm6789_vm14, %v19509_v57, %v7089_v36  ;;  %v8270_v19 = vcombine.low %v6846_v5, %v6850_v22  ;;  %v8271_v56 = vcombine.high %v6846_v5, %v6850_v22  ;;  %v8272_v40 = vcombine.low %v6926_v9, %v6930_v34  ;;  %v22242_v36 = vld [vmem:[#allocation59_spill] sm:$0xff] }
 0x5f5   :  { %v8134_v21 = vrot.slane %v8114_v29, %v22215_v51  ;;  %v8273_v50 = vcombine.high %v6926_v9, %v6930_v34  ;;  %v8274_v35 = vcombine.low %v19847_v30, %v19859_v2  ;;  %v8148_v60 = vrot.slane %v8116_v54, %v22215_v51  ;;  %v22243_v29 = vld [vmem:[#allocation49_spill] sm:$0xff] }
 0x5f6   :  { %v8276_v20 = vcombine.low %v19868_v37, %v19876_v12  ;;  %v8284_v42 = vrot.slane %v8270_v19, %v22215_v51  ;;  %v8291_v1 = vrot.slane %v8271_v56, %v22215_v51  ;;  %v8298_v13 = vrot.slane %v8272_v40, %v22215_v51  ;;  %v22244_v40 = vld [vmem:[#allocation102_spill] sm:$0xff] }
 0x5f7   :  { %v8305_v0 = vrot.slane %v8273_v50, %v22215_v51  ;;  %v8312_v22 = vrot.slane %v8274_v35, %v22215_v51  ;;  %v14191_v5 = vcombine.high %v19751_v10, %v19754_v24  ;;  %v19894_v9 = vmax.f32 %v19494_v43, %v6550_v38 }
 0x5f8   :  { %v8179_v34 = vcombine.low %v8134_v21, %v8148_v60  ;;  %v8326_v41 = vrot.slane %v8276_v20, %v22215_v51  ;;  %v8762_v54 = vcombine.high %v22243_v29, %v22242_v36  ;;  %v8334_v19 = vcombine.low %v8284_v42, %v8298_v13  ;;  %v22246_v20 = vld [vmem:[#allocation60_spill] sm:$0xff]  ;;  %v22250_v29 = vld [vmem:[#allocation61_spill] sm:$0xff] }
 0x5f9   :  { %22241 = vst [vmem:[#allocation124_spill] sm:$0xff] %v19894_v9  ;;  %v8335_v56 = vcombine.high %v8284_v42, %v8298_v13  ;;  %v8336_v57 = vcombine.low %v8291_v1, %v8305_v0  ;;  %v8560_v50 = vcombine.high %v22245_v33, %v22244_v40  ;;  %v9249_v10 = vrot.slane %v14191_v5, %v22215_v51  ;;  %v22247_v42 = vld [vmem:[#allocation109_spill] sm:$0xff]  ;;  %v22254_v40 = vld [vmem:[#allocation30_spill] sm:$0xff] }
 0x5fa   :  { %v8196_v35 = vrot.slane %v8179_v34, %v22215_v51  ;;  %v8337_v26 = vcombine.low %v8312_v22, %v8326_v41  ;;  %v8338_v48 = vcombine.high %v8312_v22, %v8326_v41  ;;  %v8346_v43 = vrot.slane %v8334_v19, %v22215_v51  ;;  %v22248_v34 = vld [vmem:[#allocation41_spill] sm:$0xff]  ;;  %v22249_v41 = vld [vmem:[#allocation84_spill] sm:$0xff] }
 0x5fb   :  { %v19905_v24 = vrot.slane %v8336_v57, %v22215_v51  ;;  %v19908_v38 = vrot.slane %v8335_v56, %v22215_v51  ;;  %v19910_v21 = vpack.c.bf16 %v8762_v54, %v8560_v50  ;;  %v8758_v1 = vcombine.high %v22247_v42, %v22246_v20  ;;  %v22253_v56 = vld [vmem:[#allocation27_spill] sm:$0xff]  ;;  %v22255_v20 = vld [vmem:[#allocation34_spill] sm:$0xff] }
 0x5fc   :  { %v19913_v60 = vrot.slane %v8337_v26, %v22215_v51  ;;  %v19916_v33 = vrot.slane %v8338_v48, %v22215_v51  ;;  %v8964_v13 = vcombine.high %v19763_v17, %v19771_v31  ;;  %v14193_v0 = vcombine.low %v8196_v35, %v8346_v43  ;;  %v22251_v17 = vld [vmem:[#allocation33_spill] sm:$0xff] }
 0x5fd   :  { %v9166_v57 = vcombine.high %v19794_v59, %v19804_v39  ;;  %v8960_v22 = vcombine.high %v19768_v7, %v19775_v55  ;;  %v9162_v26 = vcombine.high %v19797_v58, %v19807_v28  ;;  %v8556_v36 = vcombine.high %v22249_v41, %v22248_v34  ;;  %v22252_v55 = vld [vmem:[#allocation35_spill] sm:$0xff] }
 0x5fe   :  { %v8383_v5 = vcombine.high %v8346_v43, %v19913_v60  ;;  %v8386_v48 = vcombine.high %v19908_v38, %v19916_v33  ;;  %v6948_v31 = vsel %vm6785_vm12, %v22251_v17, %v22250_v29  ;;  %v9263_v59 = vrot.slane %v14193_v0, %v22215_v51  ;;  %v22257_v0 = vld [vmem:[#allocation77_spill] sm:$0xff] }
 0x5ff   :  { %v19937_v39 = vpack.c.bf16 %v9166_v57, %v8964_v13  ;;  %v19939_v7 = vpack.c.bf16 %v9162_v26, %v8960_v22  ;;  %v6949_v58 = vsel %vm6787_vm13, %v22252_v55, %v6948_v31  ;;  %v19945_v19 = vpack.c.bf16 %v8758_v1, %v8556_v36  ;;  %v22256_v13 = vld [vmem:[#allocation106_spill] sm:$0xff]  ;;  %v22261_v31 = vld [vmem:[#allocation80_spill] sm:$0xff] }
 0x600   :  { %v14195_v28 = vcombine.low %v19908_v38, %v8383_v5  ;;  %v14197_v54 = vcombine.low %v8386_v48, %v19905_v24  ;;  %v6951_v50 = vsel %vm6783_vm11, %v22254_v40, %v22253_v56  ;;  %v9300_v35 = vcombine.high %v9249_v10, %v9263_v59  ;;  %v22258_v5 = vld [vmem:[#allocation37_spill] sm:$0xff]  ;;  %v22259_v48 = vld [vmem:[#allocation36_spill] sm:$0xff]  ;;  %v22260_v36 = vld [vmem:[#allocation38_spill] sm:$0xff] }
 0x601   :  { %v9299_v43 = vcombine.low %v9249_v10, %v9263_v59  ;;  %v6952_v42 = vsel %vm6785_vm12, %v22255_v20, %v6951_v50  ;;  %v6964_v57 = vsel %vm6785_vm12, %v22257_v0, %v22256_v13  ;;  %v6950_v1 = vsel %vm6789_vm14, %v22258_v5, %v6949_v58  ;;  %v22262_v50 = vld [vmem:[#allocation74_spill] sm:$0xff]  ;;  %v22264_v58 = vld [vmem:[#allocation29_spill] sm:$0xff] }
 0x602   :  { %v9277_v22 = vrot.slane %v14195_v28, %v22215_v51  ;;  %v9291_v26 = vrot.slane %v14197_v54, %v22215_v51  ;;  %v6953_v34 = vsel %vm6787_vm13, %v22259_v48, %v6952_v42  ;;  %v9327_v41 = vrot.slane %v9300_v35, %v22215_v51  ;;  %v22263_v54 = vld [vmem:[#allocation76_spill] sm:$0xff] }
 0x603   :  { %v9313_v10 = vrot.slane %v9299_v43, %v22215_v51  ;;  %v6954_v29 = vsel %vm6789_vm14, %v22260_v36, %v6953_v34  ;;  %v6965_v59 = vsel %vm6787_vm13, %v22261_v31, %v6964_v57  ;;  %v6967_v13 = vsel %vm6783_vm11, %v22263_v54, %v22262_v50  ;;  %v22266_v34 = vld [vmem:[#allocation75_spill] sm:$0xff] }
 0x604   :  { %v9304_v56 = vcombine.high %v9277_v22, %v9291_v26  ;;  %v9303_v28 = vcombine.low %v9277_v22, %v9291_v26  ;;  %v7027_v42 = vsel %vm6783_vm11, %v22251_v17, %v22264_v58  ;;  %v6968_v35 = vsel %vm6785_vm12, %v22265_v27, %v6967_v13 }
 0x605   :  { %v7028_v43 = vsel %vm6785_vm12, %v22252_v55, %v7027_v42  ;;  %v7031_v57 = vsel %vm6783_vm11, %v22255_v20, %v22254_v40  ;;  %v7043_v22 = vsel %vm6783_vm11, %v22257_v0, %v22266_v34  ;;  %v6966_v58 = vsel %vm6789_vm14, %v22267_v32, %v6965_v59 }
 0x606   :  { %v9355_v26 = vrot.slane %v9304_v56, %v22215_v51  ;;  %v9341_v50 = vrot.slane %v9303_v28, %v22215_v51  ;;  %v6969_v13 = vsel %vm6787_vm13, %v22268_v23, %v6968_v35  ;;  %v7029_v40 = vsel %vm6787_vm13, %v22258_v5, %v7028_v43 }
 0x607   :  { %v6970_v42 = vsel %vm6789_vm14, %v22269_v25, %v6969_v13  ;;  %v7032_v9 = vsel %vm6785_vm12, %v22259_v48, %v7031_v57  ;;  %v7044_v56 = vsel %vm6785_vm12, %v22261_v31, %v7043_v22  ;;  %v7047_v43 = vsel %vm6783_vm11, %v22265_v27, %v22263_v54  ;;  %v22270_v22 = vld [vmem:[#allocation39_spill] sm:$0xff] }
 0x608   :  { %v9367_v34 = vcombine.low %v9327_v41, %v9355_v26  ;;  %v9363_v28 = vcombine.low %v9313_v10, %v9341_v50  ;;  %v9368_v0 = vcombine.high %v9327_v41, %v9355_v26  ;;  %v9364_v20 = vcombine.high %v9313_v10, %v9341_v50  ;;  %v22271_v41 = vld [vmem:[#allocation40_spill] sm:$0xff]  ;;  %v22272_v26 = vld [vmem:[#allocation90_spill] sm:$0xff] }
 0x609   :  { %v7033_v59 = vsel %vm6787_vm13, %v22260_v36, %v7032_v9  ;;  %v7045_v35 = vsel %vm6787_vm13, %v22267_v32, %v7044_v56  ;;  %v7175_v13 = vcombine.low %v6950_v1, %v6954_v29  ;;  %v7030_v31 = vsel %vm6789_vm14, %v22270_v22, %v7029_v40  ;;  %v22273_v40 = vld [vmem:[#allocation91_spill] sm:$0xff] }
 0x60a   :  { %v9508_v5 = vpack.c.bf16 %v9367_v34, %v9367_v34  ;;  %v9507_v57 = vpack.c.bf16 %v9363_v28, %v9363_v28  ;;  %v20004_v48 = vpack.c.bf16 %v9368_v0, %v9368_v0  ;;  %v7034_v10 = vsel %vm6789_vm14, %v22271_v41, %v7033_v59 }
 0x60b   :  { %v7046_v9 = vsel %vm6789_vm14, %v22272_v26, %v7045_v35  ;;  %v7048_v50 = vsel %vm6785_vm12, %v22268_v23, %v7047_v43  ;;  %v7176_v56 = vcombine.high %v6950_v1, %v6954_v29  ;;  %v7177_v0 = vcombine.low %v7030_v31, %v7034_v10  ;;  %v22274_v29 = vld [vmem:[#allocation50_spill] sm:$0xff]  ;;  %v22275_v43 = vld [vmem:[#allocation71_spill] sm:$0xff] }
 0x60c   :  { %11511 = vmatprep.mubr.bf16.mxu0 %v9508_v5  ;;  %11816 = vmatprep.mubr.bf16.mxu1 %v9508_v5  ;;  %v7049_v54 = vsel %vm6787_vm13, %v22269_v25, %v7048_v50  ;;  %v7178_v34 = vcombine.high %v7030_v31, %v7034_v10  ;;  %v7213_v59 = vrot.slane %v7175_v13, %v22215_v51  ;;  %v22276_v10 = vld [vmem:[#allocation54_spill] sm:$0xff]  ;;  %v22278_v25 = vld [vmem:[#allocation92_spill] sm:$0xff] }
 0x60d   :  { %11512 = vmatmul.mubr.bf16.gmra.mrb[44].mxu0 %v9507_v57  ;;  %11817 = vmatmul.mubr.bf16.gmra.mrb[44].mxu1 %v9507_v57  ;;  %v7050_v28 = vsel %vm6789_vm14, %v22273_v40, %v7049_v54  ;;  %v7220_v35 = vrot.slane %v7176_v56, %v22215_v51  ;;  %v7227_v5 = vrot.slane %v7177_v0, %v22215_v51  ;;  %v22277_v57 = vld [vmem:[#allocation73_spill] sm:$0xff]  ;;  %v22279_v54 = vld [vmem:[#allocation103_spill] sm:$0xff] }
 0x60e   :  { %11552 = vmatprep.mubr.bf16.mxu0 %v19910_v21  ;;  %11857 = vmatprep.mubr.bf16.mxu1 %v19910_v21  ;;  %v7234_v1 = vrot.slane %v7178_v34, %v22215_v51  ;;  %v7333_v31 = vcombine.high %v22275_v43, %v22274_v29  ;;  %v7335_v50 = vcombine.high %v22277_v57, %v22276_v10  ;;  %v15034_v29 = vld [vmem:[#allocation6 + $0x400] ss:$16 sps:$4 sm:$0xff]   ;;  %v15037_v43 = vld [vmem:[#allocation6 + $0x408] ss:$16 sps:$4 sm:$0xff]  }
 0x60f   :  { %v7443_v40 = vcombine.low %v22279_v54, %v22278_v25  ;;  %v7489_v13 = vcombine.low %v6966_v58, %v6970_v42  ;;  %v7490_v26 = vcombine.high %v6966_v58, %v6970_v42  ;;  %v7238_v56 = vcombine.low %v7213_v59, %v7227_v5 }
 0x610   :  { %v7239_v23 = vcombine.high %v7213_v59, %v7227_v5  ;;  %v7240_v27 = vcombine.low %v7220_v35, %v7234_v1  ;;  %v7377_v21 = vrot.slane %v7333_v31, %v22215_v51  ;;  %v7391_v0 = vrot.slane %v7335_v50, %v22215_v51  ;;  %v22280_v50 = vld [vmem:[#allocation99_spill] sm:$0xff] }
 0x611   :  { %v7491_v32 = vcombine.low %v7046_v9, %v7050_v28  ;;  %v7492_v34 = vcombine.high %v7046_v9, %v7050_v28  ;;  %v7527_v41 = vrot.slane %v7489_v13, %v22215_v51  ;;  %v7268_v10 = vrot.slane %v7238_v56, %v22215_v51  ;;  %v15042_v9 = vld [vmem:[#allocation6 + $0x424] ss:$16 sps:$4 sm:$0xff]   ;;  %v15045_v28 = vld [vmem:[#allocation6 + $0x42c] ss:$16 sps:$4 sm:$0xff]  }
 0x612   :  { %v7275_v57 = vrot.slane %v7240_v27, %v22215_v51  ;;  %v7282_v54 = vrot.slane %v7239_v23, %v22215_v51  ;;  %v7534_v58 = vrot.slane %v7490_v26, %v22215_v51  ;;  %v20037_v42 = vpack.c.bf16 %v9364_v20, %v9364_v20  ;;  %v15043_v26 = vld [vmem:[#allocation6 + $0x428] ss:$16 sps:$4 sm:$0xff]  }
 0x613   :  { %v7397_v59 = vcombine.low %v7377_v21, %v7391_v0  ;;  %v7541_v35 = vrot.slane %v7491_v32, %v22215_v51  ;;  %v7548_v5 = vrot.slane %v7492_v34, %v22215_v51  ;;  %v14163_v56 = vcombine.high %v7443_v40, %v22280_v50  ;;  %v15040_v32 = vld [vmem:[#allocation6 + $0x420] ss:$16 sps:$4 sm:$0xff]   ;;  %v15048_v40 = vld [vmem:[#allocation6 + $0x444] ss:$16 sps:$4 sm:$0xff]  }
 0x614   :  { %v14157_v1 = vcombine.low %v7268_v10, %v7282_v54  ;;  %v14159_v31 = vcombine.high %v7268_v10, %v7282_v54  ;;  %v14161_v13 = vcombine.low %v7275_v57, %v22280_v50  ;;  %v15051_v10 = vld [vmem:[#allocation6 + $0x44c] ss:$16 sps:$4 sm:$0xff]  }
 0x615   :  { %11553 = vmatmul.mubr.bf16.vlgmr.msra.gmra.mrb[36].mxu0 %v19945_v19  ;;  %11858 = vmatmul.mubr.bf16.vlgmr.msra.gmra.mrb[36].mxu1 %v19945_v19  ;;  %v7432_v23 = vrot.slane %v7397_v59, %v22215_v51  ;;  %v7552_v27 = vcombine.low %v7527_v41, %v7541_v35  ;;  %v7553_v20 = vcombine.high %v7527_v41, %v7541_v35  ;;  %v22281_v19 = vld [vmem:[#allocation72_spill] sm:$0xff] }
 0x616   :  { %11582 = vmatpush1.bf16.msra.mxu0 %v15034_v29  ;;  %11887 = vmatpush1.bf16.msra.mxu1 %v15037_v43  ;;  %v7554_v21 = vcombine.low %v7534_v58, %v7548_v5  ;;  %v8448_v0 = vrot.slane %v14157_v1, %v22215_v51  ;;  %v8462_v34 = vrot.slane %v14159_v31, %v22215_v51  ;;  %v15046_v1 = vld [vmem:[#allocation6 + $0x440] ss:$16 sps:$4 sm:$0xff]   ;;  %v15049_v31 = vld [vmem:[#allocation6 + $0x448] ss:$16 sps:$4 sm:$0xff]  }
 0x617   :  { %11562 = vmatprep.mubr.bf16.mxu0 %v19937_v39  ;;  %11867 = vmatprep.mubr.bf16.mxu1 %v19937_v39  ;;  %v7442_v57 = vcombine.low %v22281_v19, %v7432_v23  ;;  %v7582_v54 = vrot.slane %v7552_v27, %v22215_v51  ;;  %v7596_v41 = vrot.slane %v7553_v20, %v22215_v51  ;;  %v15057_v20 = vld [vmem:[#allocation6 + $0x46c] ss:$16 sps:$4 sm:$0xff]   ;;  %v15052_v19 = vld [vmem:[#allocation6 + $0x460] ss:$16 sps:$4 sm:$0xff]  }
 0x618   :  { %11583 = vmatprep.subr.bf16.mxu0 %v15042_v9  ;;  %11888 = vmatprep.subr.bf16.mxu1 %v15045_v28  ;;  %v7589_v29 = vrot.slane %v7554_v21, %v22215_v51  ;;  %v8476_v43 = vrot.slane %v14161_v13, %v22215_v51  ;;  %v8490_v58 = vrot.slane %v14163_v56, %v22215_v51  ;;  %v22282_v13 = vld [vmem:[#allocation151_spill] sm:$0xff] }
 0x619   :  { %v8493_v59 = vcombine.low %v8448_v0, %v8462_v34  ;;  %v8494_v35 = vcombine.high %v8448_v0, %v8462_v34  ;;  %v14166_v39 = vcombine.high %v22278_v25, %v7442_v57  ;;  %v14168_v5 = vcombine.low %v7582_v54, %v7596_v41  ;;  %v15054_v25 = vld [vmem:[#allocation6 + $0x464] ss:$16 sps:$4 sm:$0xff]   ;;  %v15055_v57 = vld [vmem:[#allocation6 + $0x468] ss:$16 sps:$4 sm:$0xff]  }
 0x61a   :  { %11584 = vmatpush1.bf16.msra.mxu0 %v15040_v32  ;;  %11889 = vmatpush1.bf16.msra.mxu1 %v15043_v26  ;;  %v8497_v50 = vcombine.low %v8476_v43, %v8490_v58  ;;  %v8498_v23 = vcombine.high %v8476_v43, %v8490_v58  ;;  %v14170_v27 = vcombine.high %v7582_v54, %v7596_v41  ;;  %v15063_v43 = vld [vmem:[#allocation6 + $0x48c] ss:$16 sps:$4 sm:$0xff]  }
 0x61b   :  { %11585 = vmatprep.subr.bf16.mxu0 %v15048_v40  ;;  %11890 = vmatprep.subr.bf16.mxu1 %v15051_v10  ;;  %v20058_v9 = vrot.slane %v8494_v35, %v22215_v51  ;;  %v14172_v28 = vcombine.low %v7589_v29, %v19701_v62  ;;  %v6980_v56 = vsel %vm6785_vm12, %v22156_v6, %v22282_v13  ;;  %v15061_v13 = vld [vmem:[#allocation6 + $0x488] ss:$16 sps:$4 sm:$0xff]  }
 0x61c   :  { %v20065_v32 = vrot.slane %v8498_v23, %v22215_v51  ;;  %v8650_v26 = vrot.slane %v14166_v39, %v22215_v51  ;;  %v8664_v21 = vrot.slane %v14168_v5, %v22215_v51  ;;  %v8678_v0 = vrot.slane %v14170_v27, %v22215_v51  ;;  %v22283_v23 = vld [vmem:[#allocation24_spill] sm:$0xff]  ;;  %v22294_v5 = vld [vmem:[#allocation150_spill] sm:$0xff] }
 0x61d   :  { %11563 = vmatmul.mubr.bf16.gmra.mrb[40].mxu0 %v19939_v7  ;;  %11868 = vmatmul.mubr.bf16.gmra.mrb[40].mxu1 %v19939_v7  ;;  %v8692_v34 = vrot.slane %v14172_v28, %v22215_v51  ;;  %v20074_v40 = vrot.slane %v8493_v59, %v22215_v51  ;;  %v20077_v10 = vrot.slane %v8497_v50, %v22215_v51  ;;  %v15060_v7 = vld [vmem:[#allocation6 + $0x484] ss:$16 sps:$4 sm:$0xff]   ;;  %v15058_v28 = vld [vmem:[#allocation6 + $0x480] ss:$16 sps:$4 sm:$0xff]  }
 0x61e   :  { %11586 = vmatpush1.bf16.msra.mxu0 %v15046_v1  ;;  %11891 = vmatpush1.bf16.msra.mxu1 %v15049_v31  ;;  %v8695_v54 = vcombine.low %v8650_v26, %v8664_v21  ;;  %v8696_v41 = vcombine.high %v8650_v26, %v8664_v21  ;;  %v6981_v29 = vsel %vm6787_vm13, %v22179_v47, %v6980_v56  ;;  %v22284_v26 = vld [vmem:[#allocation131_spill] sm:$0xff] }
 0x61f   :  { %11572 = vmatprep.mubr.bf16.mxu0 %v20004_v48  ;;  %11877 = vmatprep.mubr.bf16.mxu1 %v20004_v48  ;;  %v8561_v58 = vcombine.low %v20058_v9, %v20065_v32  ;;  %v8699_v59 = vcombine.low %v8678_v0, %v8692_v34  ;;  %v8700_v35 = vcombine.high %v8678_v0, %v8692_v34  ;;  %v15066_v34 = vld [vmem:[#allocation6 + $0x4a4] ss:$16 sps:$4 sm:$0xff]  }
 0x620   :  { %11587 = vmatprep.subr.bf16.mxu0 %v15054_v25  ;;  %11892 = vmatprep.subr.bf16.mxu1 %v15057_v20  ;;  %v20086_v39 = vrot.slane %v8696_v41, %v22215_v51  ;;  %v20091_v1 = vrot.slane %v8695_v54, %v22215_v51  ;;  %v6983_v50 = vsel %vm6783_vm11, %v22161_v49, %v22158_v15  ;;  %v22285_v54 = vld [vmem:[#allocation132_spill] sm:$0xff] }
 0x621   :  { %v20094_v48 = vrot.slane %v8700_v35, %v22215_v51  ;;  %v20097_v31 = vrot.slane %v8699_v59, %v22215_v51  ;;  %v6996_v27 = vsel %vm6785_vm12, %v19121_v61, %v22283_v23  ;;  %v6984_v56 = vsel %vm6785_vm12, %v22167_v45, %v6983_v50  ;;  %v15064_v50 = vld [vmem:[#allocation6 + $0x4a0] ss:$16 sps:$4 sm:$0xff]   ;;  %v15067_v23 = vld [vmem:[#allocation6 + $0x4a8] ss:$16 sps:$4 sm:$0xff]  }
 0x622   :  { %11588 = vmatpush1.bf16.msra.mxu0 %v15052_v19  ;;  %11893 = vmatpush1.bf16.msra.mxu1 %v15055_v57  ;;  %v6997_v25 = vsel %vm6787_vm13, %v22188_v4, %v6996_v27  ;;  %v6999_v20 = vsel %vm6783_vm11, %v19119_v53, %v19111_v14  ;;  %v20116_v21 = vsel %vm6789_vm14, %v22284_v26, %v6981_v29  ;;  %v15069_v19 = vld [vmem:[#allocation6 + $0x4ac] ss:$16 sps:$4 sm:$0xff]   ;;  %v22287_v27 = vld [vmem:[#allocation163_spill] sm:$0xff] }
 0x623   :  { %11589 = vmatprep.subr.bf16.mxu0 %v15060_v7  ;;  %11894 = vmatprep.subr.bf16.mxu1 %v15063_v43  ;;  %v8763_v15 = vcombine.low %v20086_v39, %v20094_v48  ;;  %v6985_v0 = vsel %vm6787_vm13, %v22182_v44, %v6984_v56  ;;  %v7000_v41 = vsel %vm6785_vm12, %v19123_v11, %v6999_v20  ;;  %v22286_v43 = vld [vmem:[#allocation162_spill] sm:$0xff] }
 0x624   :  { %v6986_v14 = vsel %vm6789_vm14, %v22285_v54, %v6985_v0  ;;  %v7059_v7 = vsel %vm6783_vm11, %v22156_v6, %v22155_v18  ;;  %v20133_v59 = vsel %vm6789_vm14, %v22286_v43, %v6997_v25  ;;  %v7001_v35 = vsel %vm6787_vm13, %v22194_v8, %v7000_v41  ;;  %v15075_v25 = vld [vmem:[#allocation6 + $0x4cc] ss:$16 sps:$4 sm:$0xff]  }
 0x625   :  { %11573 = vmatmul.mubr.bf16.gmra.mrb[44].mxu0 %v20037_v42  ;;  %11878 = vmatmul.mubr.bf16.gmra.mrb[44].mxu1 %v20037_v42  ;;  %v9492_v29 = vpack.c.bf16 %v8763_v15, %v8561_v58  ;;  %v20139_v56 = vsel %vm6789_vm14, %v22287_v27, %v7001_v35  ;;  %v7060_v18 = vsel %vm6785_vm12, %v22179_v47, %v7059_v7  ;;  %v15072_v58 = vld [vmem:[#allocation6 + $0x4c4] ss:$16 sps:$4 sm:$0xff]   ;;  %v22289_v7 = vld [vmem:[#allocation134_spill] sm:$0xff] }
 0x626   :  { %11590 = vmatpush1.bf16.msra.mxu0 %v15058_v28  ;;  %11895 = vmatpush1.bf16.msra.mxu1 %v15061_v13  ;;  %v7063_v42 = vsel %vm6783_vm11, %v22167_v45, %v22161_v49  ;;  %v7061_v28 = vsel %vm6787_vm13, %v22284_v26, %v7060_v18  ;;  %v7075_v20 = vsel %vm6783_vm11, %v19121_v61, %v19115_v16  ;;  %v22288_v15 = vld [vmem:[#allocation133_spill] sm:$0xff] }
 0x627   :  { %11613 = vmatprep.mubr.bf16.mxu0 %v9492_v29  ;;  %11918 = vmatprep.mubr.bf16.mxu1 %v9492_v29  ;;  %v7064_v13 = vsel %vm6785_vm12, %v22182_v44, %v7063_v42  ;;  %v7062_v0 = vsel %vm6789_vm14, %v22288_v15, %v7061_v28  ;;  %v7076_v41 = vsel %vm6785_vm12, %v22188_v4, %v7075_v20  ;;  %v15073_v18 = vld [vmem:[#allocation6 + $0x4c8] ss:$16 sps:$4 sm:$0xff]   ;;  %v22290_v42 = vld [vmem:[#allocation164_spill] sm:$0xff] }
 0x628   :  { %11591 = vmatprep.subr.bf16.mxu0 %v15066_v34  ;;  %11896 = vmatprep.subr.bf16.mxu1 %v15069_v19  ;;  %v7065_v49 = vsel %vm6787_vm13, %v22285_v54, %v7064_v13  ;;  %v7077_v35 = vsel %vm6787_vm13, %v22286_v43, %v7076_v41  ;;  %v7079_v16 = vsel %vm6783_vm11, %v19123_v11, %v19119_v53  ;;  %v15070_v19 = vld [vmem:[#allocation6 + $0x4c0] ss:$16 sps:$4 sm:$0xff]   ;;  %v15078_v53 = vld [vmem:[#allocation6 + $0x4e4] ss:$16 sps:$4 sm:$0xff]   ;;  %v15093_v11 = vld [vmem:[#allocation6 + $0x52c] ss:$16 sps:$4 sm:$0xff]  }
 0x629   :  { %v7066_v29 = vsel %vm6789_vm14, %v22289_v7, %v7065_v49  ;;  %v7647_v34 = vcombine.high %v19601_v46, %v19626_v63  ;;  %v20170_v28 = vsel %vm6789_vm14, %v22290_v42, %v7077_v35  ;;  %v7080_v13 = vsel %vm6785_vm12, %v22194_v8, %v7079_v16  ;;  %v15081_v49 = vld [vmem:[#allocation6 + $0x4ec] ss:$16 sps:$4 sm:$0xff]   ;;  %v22293_v35 = vld [vmem:[#allocation165_spill] sm:$0xff] }
 0x62a   :  { %11592 = vmatpush1.bf16.msra.mxu0 %v15064_v50  ;;  %11897 = vmatpush1.bf16.msra.mxu1 %v15067_v23  ;;  %v7649_v20 = vcombine.high %v19639_v52, %v19664_v3  ;;  %v7081_v46 = vsel %vm6787_vm13, %v22287_v27, %v7080_v13  ;;  %v22291_v50 = vld [vmem:[#allocation156_spill] sm:$0xff]  ;;  %v22292_v23 = vld [vmem:[#allocation142_spill] sm:$0xff]  ;;  %v7803_v3 = vcombine.low %v20116_v21, %v6986_v14  ;;  %v22296_v27 = vld [vmem:[#allocation143_spill] sm:$0xff] }
 0x62b   :  { %11593 = vmatprep.subr.bf16.mxu0 %v15072_v58  ;;  %11898 = vmatprep.subr.bf16.mxu1 %v15075_v25  ;;  %v7691_v63 = vrot.slane %v7647_v34, %v22215_v51  ;;  %v7757_v41 = vcombine.low %v22292_v23, %v22291_v50  ;;  %v20183_v57 = vsel %vm6789_vm14, %v22293_v35, %v7081_v46  ;;  %v22295_v42 = vld [vmem:[#allocation96_spill] sm:$0xff]  ;;  %v22297_v34 = vld [vmem:[#allocation129_spill] sm:$0xff] }
 0x62c   :  { %v7705_v16 = vrot.slane %v7649_v20, %v22215_v51  ;;  %v7804_v52 = vcombine.high %v20116_v21, %v6986_v14  ;;  %v7805_v58 = vcombine.low %v7062_v0, %v7066_v29  ;;  %v7806_v25 = vcombine.high %v7062_v0, %v7066_v29  ;;  %v15076_v23 = vld [vmem:[#allocation6 + $0x4e0] ss:$16 sps:$4 sm:$0xff]   ;;  %v15079_v8 = vld [vmem:[#allocation6 + $0x4e8] ss:$16 sps:$4 sm:$0xff]   ;;  %v15084_v21 = vld [vmem:[#allocation6 + $0x504] ss:$16 sps:$4 sm:$0xff]  }
 0x62d   :  { %v7961_v13 = vcombine.high %v22295_v42, %v22294_v5  ;;  %v7963_v43 = vcombine.high %v22297_v34, %v22296_v27  ;;  %v7841_v35 = vrot.slane %v7803_v3, %v22215_v51  ;;  %v15087_v14 = vld [vmem:[#allocation6 + $0x50c] ss:$16 sps:$4 sm:$0xff]   ;;  %v22299_v42 = vld [vmem:[#allocation111_spill] sm:$0xff] }
 0x62e   :  { %11594 = vmatpush1.bf16.msra.mxu0 %v15070_v19  ;;  %11899 = vmatpush1.bf16.msra.mxu1 %v15073_v18  ;;  %v7711_v46 = vcombine.low %v7691_v63, %v7705_v16  ;;  %v7848_v20 = vrot.slane %v7804_v52, %v22215_v51  ;;  %v7855_v0 = vrot.slane %v7805_v58, %v22215_v51  ;;  %v22298_v18 = vld [vmem:[#allocation149_spill] sm:$0xff]  ;;  %v15082_v58 = vld [vmem:[#allocation6 + $0x500] ss:$16 sps:$4 sm:$0xff]  }
 0x62f   :  { %11595 = vmatprep.subr.bf16.mxu0 %v15078_v53  ;;  %11900 = vmatprep.subr.bf16.mxu1 %v15081_v49  ;;  %v7862_v5 = vrot.slane %v7806_v25, %v22215_v51  ;;  %v8005_v29 = vrot.slane %v7961_v13, %v22215_v51  ;;  %v8019_v19 = vrot.slane %v7963_v43, %v22215_v51  ;;  %v15085_v25 = vld [vmem:[#allocation6 + $0x508] ss:$16 sps:$4 sm:$0xff]   ;;  %v22300_v13 = vld [vmem:[#allocation130_spill] sm:$0xff] }
 0x630   :  { %v7746_v27 = vrot.slane %v7711_v46, %v22215_v51  ;;  %v8071_v63 = vcombine.low %v22299_v42, %v22298_v18  ;;  %v8117_v16 = vcombine.low %v20133_v59, %v20139_v56  ;;  %v7866_v53 = vcombine.low %v7841_v35, %v7855_v0  ;;  %v15090_v42 = vld [vmem:[#allocation6 + $0x524] ss:$16 sps:$4 sm:$0xff]  }
 0x631   :  { %v7867_v49 = vcombine.high %v7841_v35, %v7855_v0  ;;  %v7868_v3 = vcombine.low %v7848_v20, %v7862_v5  ;;  %v8119_v52 = vcombine.low %v20170_v28, %v20183_v57  ;;  %v8025_v46 = vcombine.low %v8005_v29, %v8019_v19 }
 0x632   :  { %11596 = vmatpush1.bf16.msra.mxu0 %v15076_v23  ;;  %11901 = vmatpush1.bf16.msra.mxu1 %v15079_v8  ;;  %v7756_v34 = vcombine.low %v22300_v13, %v7746_v27  ;;  %v8155_v43 = vrot.slane %v8117_v16, %v22215_v51  ;;  %v7896_v4 = vrot.slane %v7866_v53, %v22215_v51  ;;  %v22302_v16 = vld [vmem:[#allocation128_spill] sm:$0xff]  ;;  %v22303_v13 = vld [vmem:[#allocation110_spill] sm:$0xff] }
 0x633   :  { %11597 = vmatprep.subr.bf16.mxu0 %v15084_v21  ;;  %11902 = vmatprep.subr.bf16.mxu1 %v15087_v14  ;;  %v7903_v35 = vrot.slane %v7868_v3, %v22215_v51  ;;  %v7910_v20 = vrot.slane %v7867_v49, %v22215_v51  ;;  %v8060_v23 = vrot.slane %v8025_v46, %v22215_v51  ;;  %v22301_v21 = vld [vmem:[#allocation148_spill] sm:$0xff]  ;;  %v6557_v53 = vrot.slane %v22302_v16, 1  ;;  %v15091_v49 = vld [vmem:[#allocation6 + $0x528] ss:$16 sps:$4 sm:$0xff]  }
 0x634   :  { %v8169_v8 = vrot.slane %v8119_v52, %v22215_v51  ;;  %v14175_v0 = vcombine.high %v7757_v41, %v19701_v62  ;;  %v14177_v5 = vcombine.high %v22291_v50, %v7756_v34  ;;  %v14186_v19 = vcombine.high %v8071_v63, %v22301_v21  ;;  %v15088_v3 = vld [vmem:[#allocation6 + $0x520] ss:$16 sps:$4 sm:$0xff]   ;;  %v15096_v62 = vld [vmem:[#allocation6 + $0x544] ss:$16 sps:$4 sm:$0xff]   ;;  %v15099_v50 = vld [vmem:[#allocation6 + $0x54c] ss:$16 sps:$4 sm:$0xff]  }
 0x635   :  { %v14179_v29 = vcombine.low %v7896_v4, %v7910_v20  ;;  %v14181_v27 = vcombine.high %v7896_v4, %v7910_v20  ;;  %v14184_v14 = vcombine.low %v7903_v35, %v22301_v21  ;;  %v8070_v46 = vcombine.low %v22303_v13, %v8060_v23 }
 0x636   :  { %11598 = vmatpush1.bf16.msra.mxu0 %v15082_v58  ;;  %11903 = vmatpush1.bf16.msra.mxu1 %v15085_v25  ;;  %v8180_v61 = vcombine.low %v8155_v43, %v8169_v8  ;;  %v8181_v52 = vcombine.high %v8155_v43, %v8169_v8  ;;  %v8852_v4 = vrot.slane %v14175_v0, %v22215_v51  ;;  %v15097_v8 = vld [vmem:[#allocation6 + $0x548] ss:$16 sps:$4 sm:$0xff]  }
 0x637   :  { %11599 = vmatprep.subr.bf16.mxu0 %v15090_v42  ;;  %11904 = vmatprep.subr.bf16.mxu1 %v15093_v11  ;;  %v8866_v41 = vrot.slane %v14177_v5, %v22215_v51  ;;  %v8880_v63 = vrot.slane %v14179_v29, %v22215_v51  ;;  %v8894_v25 = vrot.slane %v14181_v27, %v22215_v51  ;;  %v15105_v29 = vld [vmem:[#allocation6 + $0x56c] ss:$16 sps:$4 sm:$0xff]  }
 0x638   :  { %v20222_v34 = vrot.slane %v8180_v61, %v22215_v51  ;;  %v20225_v58 = vrot.slane %v8181_v52, %v22215_v51  ;;  %v14188_v43 = vcombine.high %v22298_v18, %v8070_v46  ;;  %v9054_v11 = vrot.slane %v14184_v14, %v22215_v51  ;;  %v15094_v61 = vld [vmem:[#allocation6 + $0x540] ss:$16 sps:$4 sm:$0xff]   ;;  %v15102_v18 = vld [vmem:[#allocation6 + $0x564] ss:$16 sps:$4 sm:$0xff]  }
 0x639   :  { %v8898_v42 = vcombine.high %v8852_v4, %v8866_v41  ;;  %v9068_v35 = vrot.slane %v14186_v19, %v22215_v51  ;;  %v8897_v20 = vcombine.low %v8852_v4, %v8866_v41  ;;  %v20232_v23 = vmax.f32 %v22302_v16, %v6557_v53  ;;  %v15100_v4 = vld [vmem:[#allocation6 + $0x560] ss:$16 sps:$4 sm:$0xff]   ;;  %v15103_v41 = vld [vmem:[#allocation6 + $0x568] ss:$16 sps:$4 sm:$0xff]  }
 0x63a   :  { %11600 = vmatpush1.bf16.msra.mxu0 %v15088_v3  ;;  %11905 = vmatpush1.bf16.msra.mxu1 %v15091_v49  ;;  %v8902_v0 = vcombine.high %v8880_v63, %v8894_v25  ;;  %v14190_v5 = vcombine.low %v20222_v34, %v20225_v58  ;;  %v22304_v27 = vcombine.low %v20074_v40, %v20077_v10 }
 0x63b   :  { %11601 = vmatprep.subr.bf16.mxu0 %v15096_v62  ;;  %11906 = vmatprep.subr.bf16.mxu1 %v15099_v50  ;;  %v22305_v21 = vcombine.low %v20091_v1, %v20097_v31  ;;  %v9100_v19 = vcombine.high %v9054_v11, %v9068_v35  ;;  %v8901_v16 = vcombine.low %v8880_v63, %v8894_v25 }
 0x63c   :  { %v20245_v53 = vrot.slane %v8898_v42, %v22215_v51  ;;  %v20248_v3 = vrot.slane %v8902_v0, %v22215_v51  ;;  %v9082_v49 = vrot.slane %v14188_v43, %v22215_v51  ;;  %v9096_v13 = vrot.slane %v14190_v5, %v22215_v51  ;;  %v15108_v42 = vld [vmem:[#allocation6 + $0x584] ss:$16 sps:$4 sm:$0xff]  }
 0x63d   :  { %v20242_v14 = vpack.c.bf16 %v22305_v21, %v22304_v27  ;;  %v20253_v46 = vrot.slane %v8897_v20, %v22215_v51  ;;  %v9099_v52 = vcombine.low %v9054_v11, %v9068_v35  ;;  %v8118_v62 = vcombine.high %v20133_v59, %v20139_v56  ;;  %v15111_v20 = vld [vmem:[#allocation6 + $0x58c] ss:$16 sps:$4 sm:$0xff]   ;;  %v15109_v27 = vld [vmem:[#allocation6 + $0x588] ss:$16 sps:$4 sm:$0xff]  }
 0x63e   :  { %v8120_v50 = vcombine.high %v20170_v28, %v20183_v57  ;;  %11602 = vmatpush1.bf16.msra.mxu0 %v15094_v61  ;;  %11907 = vmatpush1.bf16.msra.mxu1 %v15097_v8  ;;  %v9104_v63 = vcombine.high %v9082_v49, %v9096_v13  ;;  %v20260_v25 = vrot.slane %v8901_v16, %v22215_v51 }
 0x63f   :  { %v9103_v43 = vcombine.low %v9082_v49, %v9096_v13  ;;  %11603 = vmatprep.subr.bf16.mxu0 %v15102_v18  ;;  %11908 = vmatprep.subr.bf16.mxu1 %v15105_v29  ;;  %v8965_v11 = vcombine.low %v20245_v53, %v20248_v3  ;;  %v20265_v59 = vrot.slane %v9100_v19, %v22215_v51  ;;  %v15106_v29 = vld [vmem:[#allocation6 + $0x580] ss:$16 sps:$4 sm:$0xff]  }
 0x640   :  { %v8162_v57 = vrot.slane %v8118_v62, %v22215_v51  ;;  %v20269_v56 = vrot.slane %v9104_v63, %v22215_v51  ;;  %v8176_v35 = vrot.slane %v8120_v50, %v22215_v51  ;;  %v8275_v61 = vcombine.high %v19847_v30, %v19859_v2  ;;  %v15112_v50 = vld [vmem:[#allocation6 + $0x5a0] ss:$16 sps:$4 sm:$0xff]  }
 0x641   :  { %v20272_v28 = vrot.slane %v9103_v43, %v22215_v51  ;;  %v8277_v8 = vcombine.high %v19868_v37, %v19876_v12  ;;  %v8385_v0 = vcombine.low %v19908_v38, %v19916_v33  ;;  %v14192_v5 = vcombine.high %v20222_v34, %v20225_v58  ;;  %v15114_v37 = vld [vmem:[#allocation6 + $0x5a4] ss:$16 sps:$4 sm:$0xff]   ;;  %v15117_v12 = vld [vmem:[#allocation6 + $0x5ac] ss:$16 sps:$4 sm:$0xff]  }
 0x642   :  { %v8562_v18 = vcombine.high %v20058_v9, %v20065_v32  ;;  %11604 = vmatpush1.bf16.msra.mxu0 %v15100_v4  ;;  %11909 = vmatpush1.bf16.msra.mxu1 %v15103_v41  ;;  %v8961_v21 = vcombine.low %v20253_v46, %v20260_v25  ;;  %v9118_v30 = vrot.slane %v9099_v52, %v22215_v51  ;;  %v15115_v4 = vld [vmem:[#allocation6 + $0x5a8] ss:$16 sps:$4 sm:$0xff]  }
 0x643   :  { %v8182_v2 = vcombine.low %v8162_v57, %v8176_v35  ;;  %11605 = vmatprep.subr.bf16.mxu0 %v15108_v42  ;;  %11910 = vmatprep.subr.bf16.mxu1 %v15111_v20  ;;  %v8319_v38 = vrot.slane %v8275_v61, %v22215_v51  ;;  %v8333_v34 = vrot.slane %v8277_v8, %v22215_v51  ;;  %v15120_v42 = vld [vmem:[#allocation6 + $0x5c4] ss:$16 sps:$4 sm:$0xff]   ;;  %v15123_v20 = vld [vmem:[#allocation6 + $0x5cc] ss:$16 sps:$4 sm:$0xff]  }
 0x644   :  { %v14196_v9 = vcombine.high %v8385_v0, %v19913_v60  ;;  %v9167_v32 = vcombine.low %v20265_v59, %v20269_v56  ;;  %v9163_v58 = vcombine.low %v9118_v30, %v20272_v28  ;;  %v9256_v16 = vrot.slane %v14192_v5, %v22215_v51  ;;  %v22306_v61 = vld [vmem:[#allocation32_spill] sm:$0xff]  ;;  %v22307_v8 = vld [vmem:[#allocation31_spill] sm:$0xff]  ;;  %v22308_v5 = vld [vmem:[#allocation82_spill] sm:$0xff] }
 0x645   :  { %v8217_v19 = vrot.slane %v8182_v2, %v22215_v51  ;;  %v8339_v49 = vcombine.low %v8319_v38, %v8333_v34  ;;  %v8764_v52 = vcombine.high %v20086_v39, %v20094_v48  ;;  %v8558_v62 = vcombine.high %v20074_v40, %v20077_v10  ;;  %v22312_v38 = vld [vmem:[#allocation126_spill] sm:$0xff]  ;;  %v22313_v34 = vld [vmem:[#allocation123_spill] sm:$0xff] }
 0x646   :  { %v20297_v13 = vrot.slane %v14196_v9, %v22215_v51  ;;  %11606 = vmatpush1.bf16.msra.mxu0 %v15106_v29  ;;  %11911 = vmatpush1.bf16.msra.mxu1 %v15109_v27  ;;  %v8760_v63 = vcombine.high %v20091_v1, %v20097_v31  ;;  %v8966_v43 = vcombine.high %v20245_v53, %v20248_v3  ;;  %v22317_v53 = vld [vmem:[#allocation55_spill] sm:$0xff]  ;;  %v22318_v3 = vld [vmem:[#allocation57_spill] sm:$0xff] }
 0x647   :  { %v14194_v41 = vcombine.low %v8217_v19, %v19913_v60  ;;  %11607 = vmatprep.subr.bf16.mxu0 %v15114_v37  ;;  %11912 = vmatprep.subr.bf16.mxu1 %v15117_v12  ;;  %v8374_v39 = vrot.slane %v8339_v49, %v22215_v51  ;;  %v20309_v48 = vpack.c.bf16 %v8764_v52, %v8562_v18  ;;  %v22309_v18 = vld [vmem:[#allocation81_spill] sm:$0xff]  ;;  %v22314_v52 = vld [vmem:[#allocation34_spill] sm:$0xff] }
 0x648   :  { %v9168_v40 = vcombine.high %v20265_v59, %v20269_v56  ;;  %v20314_v60 = vpack.c.bf16 %v8760_v63, %v8558_v62  ;;  %v8962_v1 = vcombine.high %v20253_v46, %v20260_v25  ;;  %v9164_v31 = vcombine.high %v9118_v30, %v20272_v28  ;;  %v15118_v59 = vld [vmem:[#allocation6 + $0x5c0] ss:$16 sps:$4 sm:$0xff]   ;;  %v15121_v56 = vld [vmem:[#allocation6 + $0x5c8] ss:$16 sps:$4 sm:$0xff]   ;;  %v15126_v46 = vld [vmem:[#allocation6 + $0x5e4] ss:$16 sps:$4 sm:$0xff]  }
 0x649   :  { %v9270_v10 = vrot.slane %v14194_v41, %v22215_v51  ;;  %v8384_v57 = vcombine.low %v19905_v24, %v8374_v39  ;;  %v6576_v0 = vmax.f32 %v22307_v8, %v22306_v61  ;;  %v6594_v29 = vmax.f32 %v22309_v18, %v22308_v5  ;;  %v15129_v24 = vld [vmem:[#allocation6 + $0x5ec] ss:$16 sps:$4 sm:$0xff]   ;;  %v22311_v30 = vld [vmem:[#allocation107_spill] sm:$0xff]  ;;  %v22324_v8 = vld [vmem:[#allocation69_spill] sm:$0xff] }
 0x64a   :  { %v20320_v35 = vpack.c.bf16 %v9168_v40, %v8966_v43  ;;  %11608 = vmatpush1.bf16.msra.mxu0 %v15112_v50  ;;  %11913 = vmatpush1.bf16.msra.mxu1 %v15115_v4  ;;  %v20326_v37 = vpack.c.bf16 %v9164_v31, %v8962_v1  ;;  %v22310_v28 = vld [vmem:[#allocation108_spill] sm:$0xff]  ;;  %v6630_v9 = vmax.f32 %v22313_v34, %v22312_v38  ;;  %v22316_v4 = vld [vmem:[#allocation37_spill] sm:$0xff]  ;;  %v22319_v39 = vld [vmem:[#allocation62_spill] sm:$0xff] }
 0x64b   :  { %v9302_v27 = vcombine.high %v9256_v16, %v9270_v10  ;;  %v9301_v2 = vcombine.low %v9256_v16, %v9270_v10  ;;  %11609 = vmatprep.subr.bf16.mxu0 %v15120_v42  ;;  %11914 = vmatprep.subr.bf16.mxu1 %v15123_v20  ;;  %v14198_v25 = vcombine.high %v19916_v33, %v8384_v57  ;;  %v22315_v62 = vld [vmem:[#allocation36_spill] sm:$0xff]  ;;  %v15132_v43 = vld [vmem:[#allocation6 + $0x604] ss:$16 sps:$4 sm:$0xff]   ;;  %v22320_v10 = vld [vmem:[#allocation42_spill] sm:$0xff] }
 0x64c   :  { %v6612_v12 = vmax.f32 %v22311_v30, %v22310_v28  ;;  %v9502_v19 = vpack.c.bf16 %v9167_v32, %v8965_v11  ;;  %v20336_v49 = vpack.c.bf16 %v9163_v58, %v8961_v21  ;;  %v7107_v16 = vsel %vm6783_vm11, %v22252_v55, %v22251_v17  ;;  %v15124_v21 = vld [vmem:[#allocation6 + $0x5e0] ss:$16 sps:$4 sm:$0xff]   ;;  %v15127_v17 = vld [vmem:[#allocation6 + $0x5e8] ss:$16 sps:$4 sm:$0xff]   ;;  %v15135_v42 = vld [vmem:[#allocation6 + $0x60c] ss:$16 sps:$4 sm:$0xff]  }
 0x64d   :  { %v7111_v33 = vsel %vm6783_vm11, %v22315_v62, %v22314_v52  ;;  %v9298_v50 = vrot.slane %v14198_v25, %v22215_v51  ;;  %v7108_v41 = vsel %vm6785_vm12, %v22316_v4, %v7107_v16  ;;  %v7115_v11 = vsel %vm6783_vm11, %v22318_v3, %v22317_v53  ;;  %v22321_v1 = vld [vmem:[#allocation43_spill] sm:$0xff]  ;;  %v22323_v61 = vld [vmem:[#allocation40_spill] sm:$0xff]  ;;  %v22328_v16 = vld [vmem:[#allocation77_spill] sm:$0xff] }
 0x64e   :  { %v7112_v63 = vsel %vm6785_vm12, %v22260_v36, %v7111_v33  ;;  %11610 = vmatpush1.bf16.msra.mxu0 %v15118_v59  ;;  %11915 = vmatpush1.bf16.msra.mxu1 %v15121_v56  ;;  %v9334_v55 = vrot.slane %v9302_v27, %v22215_v51  ;;  %v9320_v32 = vrot.slane %v9301_v2, %v22215_v51  ;;  %v22325_v56 = vld [vmem:[#allocation56_spill] sm:$0xff]  ;;  %v22326_v27 = vld [vmem:[#allocation58_spill] sm:$0xff]  ;;  %v22333_v3 = vld [vmem:[#allocation83_spill] sm:$0xff] }
 0x64f   :  { %v7109_v58 = vsel %vm6787_vm13, %v22270_v22, %v7108_v41  ;;  %11611 = vmatprep.subr.bf16.mxu0 %v15126_v46  ;;  %11916 = vmatprep.subr.bf16.mxu1 %v15129_v24  ;;  %v9306_v36 = vcombine.high %v20297_v13, %v9298_v50  ;;  %v9305_v20 = vcombine.low %v20297_v13, %v9298_v50  ;;  %v22327_v24 = vld [vmem:[#allocation63_spill] sm:$0xff]  ;;  %v22329_v52 = vld [vmem:[#allocation80_spill] sm:$0xff]  ;;  %v22330_v50 = vld [vmem:[#allocation70_spill] sm:$0xff] }
 0x650   :  { %v7116_v40 = vsel %vm6785_vm12, %v22319_v39, %v7115_v11  ;;  %v22322_v31 = vmax.f32 %v22320_v10, %v22321_v1  ;;  %v7113_v22 = vsel %vm6787_vm13, %v22323_v61, %v7112_v63  ;;  %v7119_v2 = vsel %vm6783_vm11, %v22326_v27, %v22325_v56  ;;  %v15130_v33 = vld [vmem:[#allocation6 + $0x600] ss:$16 sps:$4 sm:$0xff]   ;;  %v22335_v61 = vld [vmem:[#allocation89_spill] sm:$0xff] }
 0x651   :  { %v7117_v59 = vsel %vm6787_vm13, %v22324_v8, %v7116_v40  ;;  %v9362_v13 = vrot.slane %v9306_v36, %v22215_v51  ;;  %v9348_v46 = vrot.slane %v9305_v20, %v22215_v51  ;;  %v7120_v25 = vsel %vm6785_vm12, %v22327_v24, %v7119_v2  ;;  %v22331_v41 = vld [vmem:[#allocation88_spill] sm:$0xff]  ;;  %v22332_v53 = vld [vmem:[#allocation78_spill] sm:$0xff]  ;;  %v22342_v24 = vld [vmem:[#allocation91_spill] sm:$0xff] }
 0x652   :  { %v20364_v57 = vsel %vm6789_vm14, %v22322_v31, %v7109_v58  ;;  %v7123_v62 = vsel %vm6783_vm11, %v22329_v52, %v22328_v16  ;;  %11612 = vmatpush1.bf16.msra.mxu0 %v15124_v21  ;;  %11917 = vmatpush1.bf16.msra.mxu1 %v15127_v17  ;;  %v7121_v4 = vsel %vm6787_vm13, %v22330_v50, %v7120_v25  ;;  %v15133_v58 = vld [vmem:[#allocation6 + $0x608] ss:$16 sps:$4 sm:$0xff]   ;;  %v15138_v21 = vld [vmem:[#allocation6 + $0x624] ss:$16 sps:$4 sm:$0xff]   ;;  %v15141_v17 = vld [vmem:[#allocation6 + $0x62c] ss:$16 sps:$4 sm:$0xff]  }
 0x653   :  { %v7124_v63 = vsel %vm6785_vm12, %v22331_v41, %v7123_v62  ;;  %v7127_v11 = vsel %vm6783_vm11, %v22333_v3, %v22332_v53  ;;  %11642 = vmatprep.subr.bf16.mxu0 %v15132_v43  ;;  %11947 = vmatprep.subr.bf16.mxu1 %v15135_v42  ;;  %v9369_v36 = vcombine.low %v9334_v55, %v9362_v13  ;;  %v22334_v1 = vld [vmem:[#allocation90_spill] sm:$0xff]  ;;  %v22336_v42 = vld [vmem:[#allocation65_spill] sm:$0xff]  ;;  %v22343_v18 = vld [vmem:[#allocation104_spill] sm:$0xff] }
 0x654   :  { %v9365_v20 = vcombine.low %v9320_v32, %v9348_v46  ;;  %v20387_v39 = vcombine.high %v9334_v55, %v9362_v13  ;;  %v20389_v40 = vcombine.high %v9320_v32, %v9348_v46  ;;  %v7114_v10 = vsel %vm6789_vm14, %v6576_v0, %v7113_v22  ;;  %v22337_v55 = vld [vmem:[#allocation66_spill] sm:$0xff]  ;;  %v22340_v13 = vld [vmem:[#allocation87_spill] sm:$0xff]  ;;  %v22345_v62 = vld [vmem:[#allocation105_spill] sm:$0xff] }
 0x655   :  { %v7125_v31 = vsel %vm6787_vm13, %v22334_v1, %v7124_v63  ;;  %v7128_v8 = vsel %vm6785_vm12, %v22335_v61, %v7127_v11  ;;  %11614 = vmatmul.mubr.bf16.vlgmr.msra.gmra.mrb[36].mxu0 %v20242_v14  ;;  %11919 = vmatmul.mubr.bf16.vlgmr.msra.gmra.mrb[36].mxu1 %v20242_v14  ;;  %v9512_v43 = vpack.c.bf16 %v9369_v36, %v9369_v36  ;;  %v15136_v32 = vld [vmem:[#allocation6 + $0x620] ss:$16 sps:$4 sm:$0xff]   ;;  %v15144_v16 = vld [vmem:[#allocation6 + $0x644] ss:$16 sps:$4 sm:$0xff]  }
 0x656   :  { %v22338_v56 = vmax.f32 %v22336_v42, %v22337_v55  ;;  %v7122_v0 = vsel %vm6789_vm14, %v6594_v29, %v7121_v4  ;;  %11623 = vmatprep.mubr.bf16.mxu0 %v9502_v19  ;;  %11643 = vmatpush1.bf16.msra.mxu0 %v15130_v33  ;;  %v20406_v22 = vpack.c.bf16 %v9365_v20, %v9365_v20  ;;  %v22339_v2 = vld [vmem:[#allocation86_spill] sm:$0xff]  ;;  %v22344_v29 = vld [vmem:[#allocation51_spill] sm:$0xff]  ;;  %v22346_v33 = vld [vmem:[#allocation112_spill] sm:$0xff] }
 0x657   :  { %v22341_v46 = vmax.f32 %v22339_v2, %v22340_v13  ;;  %v7129_v25 = vsel %vm6787_vm13, %v22342_v24, %v7128_v8  ;;  %11928 = vmatprep.mubr.bf16.mxu1 %v9502_v19  ;;  %11948 = vmatpush1.bf16.msra.mxu1 %v15133_v58  ;;  %v7131_v52 = vsel %vm6783_vm11, %v22344_v29, %v22343_v18  ;;  %v15147_v4 = vld [vmem:[#allocation6 + $0x64c] ss:$16 sps:$4 sm:$0xff]   ;;  %v22348_v63 = vld [vmem:[#allocation115_spill] sm:$0xff]  ;;  %v22350_v3 = vld [vmem:[#allocation117_spill] sm:$0xff] }
 0x658   :  { %v7118_v27 = vsel %vm6789_vm14, %v22338_v56, %v7117_v59  ;;  %v15139_v59 = vld [vmem:[#allocation6 + $0x628] ss:$16 sps:$4 sm:$0xff]   ;;  %v7130_v5 = vsel %vm6789_vm14, %v6612_v12, %v7129_v25  ;;  %v7135_v50 = vsel %vm6783_vm11, %v22346_v33, %v22345_v62  ;;  %11644 = vmatprep.subr.bf16.mxu0 %v15138_v21  ;;  %11949 = vmatprep.subr.bf16.mxu1 %v15141_v17  ;;  %v22347_v19 = vld [vmem:[#allocation114_spill] sm:$0xff]  ;;  %v22349_v30 = vld [vmem:[#allocation116_spill] sm:$0xff] }
 0x659   :  { %v7126_v14 = vsel %vm6789_vm14, %v22341_v46, %v7125_v31  ;;  %v7132_v41 = vsel %vm6785_vm12, %v22347_v19, %v7131_v52  ;;  %v7136_v53 = vsel %vm6785_vm12, %v22348_v63, %v7135_v50  ;;  %v7288_v28 = vcombine.low %v20364_v57, %v7114_v10  ;;  %v15142_v20 = vld [vmem:[#allocation6 + $0x640] ss:$16 sps:$4 sm:$0xff]   ;;  %v22351_v21 = vld [vmem:[#allocation113_spill] sm:$0xff]  ;;  %v15153_v2 = vld [vmem:[#allocation6 + $0x66c] ss:$16 sps:$4 sm:$0xff]  }
 0x65a   :  { %v7133_v12 = vsel %vm6787_vm13, %v22349_v30, %v7132_v41  ;;  %v7137_v11 = vsel %vm6787_vm13, %v22350_v3, %v7136_v53  ;;  %v7289_v58 = vcombine.high %v20364_v57, %v7114_v10  ;;  %v7445_v36 = vcombine.low %v7118_v27, %v7122_v0  ;;  %11645 = vmatpush1.bf16.msra.mxu0 %v15136_v32  ;;  %v22352_v17 = vld [vmem:[#allocation52_spill] sm:$0xff]  ;;  %v15145_v57 = vld [vmem:[#allocation6 + $0x648] ss:$16 sps:$4 sm:$0xff]   ;;  %v15150_v32 = vld [vmem:[#allocation6 + $0x664] ss:$16 sps:$4 sm:$0xff]  }
 0x65b   :  { %v22353_v1 = vmax.f32 %v22351_v21, %v22352_v17  ;;  %v20444_v61 = vsel %vm6789_vm14, %v6630_v9, %v7137_v11  ;;  %v7296_v8 = vrot.slane %v7288_v28, %v22215_v51  ;;  %v7446_v42 = vcombine.high %v7118_v27, %v7122_v0  ;;  %11950 = vmatpush1.bf16.msra.mxu1 %v15139_v59  ;;  %v15148_v24 = vld [vmem:[#allocation6 + $0x660] ss:$16 sps:$4 sm:$0xff]   ;;  %v15159_v52 = vld [vmem:[#allocation6 + $0x68c] ss:$16 sps:$4 sm:$0xff]   ;;  %v15157_v3 = vld [vmem:[#allocation6 + $0x688] ss:$16 sps:$4 sm:$0xff]  }
 0x65c   :  { %11646 = vmatprep.subr.bf16.mxu0 %v15144_v16  ;;  %v7303_v10 = vrot.slane %v7289_v58, %v22215_v51  ;;  %v7453_v55 = vrot.slane %v7445_v36, %v22215_v51  ;;  %v7602_v56 = vcombine.low %v7126_v14, %v7130_v5  ;;  %11951 = vmatprep.subr.bf16.mxu1 %v15147_v4  ;;  %v15154_v63 = vld [vmem:[#allocation6 + $0x680] ss:$16 sps:$4 sm:$0xff]   ;;  %v15165_v21 = vld [vmem:[#allocation6 + $0x6ac] ss:$16 sps:$4 sm:$0xff]  }
 0x65d   :  { %v20438_v31 = vsel %vm6789_vm14, %v22353_v1, %v7133_v12  ;;  %v7304_v13 = vcombine.high %v7296_v8, %v7296_v8  ;;  %v7311_v38 = vrot.slane %v7296_v8, %v22215_v51  ;;  %v7460_v34 = vrot.slane %v7446_v42, %v22215_v51  ;;  %11624 = vmatmul.mubr.bf16.gmra.mrb[40].mxu0 %v20336_v49 }
 0x65e   :  { %v7603_v9 = vcombine.high %v7126_v14, %v7130_v5  ;;  %11929 = vmatmul.mubr.bf16.gmra.mrb[40].mxu1 %v20336_v49  ;;  %v7318_v27 = vrot.slane %v7303_v10, %v22215_v51  ;;  %v7461_v0 = vcombine.high %v7453_v55, %v7453_v55  ;;  %v7468_v46 = vrot.slane %v7453_v55, %v22215_v51  ;;  %v15151_v14 = vld [vmem:[#allocation6 + $0x668] ss:$16 sps:$4 sm:$0xff]   ;;  %v15156_v5 = vld [vmem:[#allocation6 + $0x684] ss:$16 sps:$4 sm:$0xff]  }
 0x65f   :  { %11633 = vmatprep.mubr.bf16.mxu0 %v9512_v43  ;;  %11647 = vmatpush1.bf16.msra.mxu0 %v15142_v20  ;;  %v7325_v25 = vrot.slane %v7304_v13, %v22215_v51  ;;  %v7475_v59 = vrot.slane %v7460_v34, %v22215_v51  ;;  %v7610_v16 = vrot.slane %v7602_v56, %v22215_v51  ;;  %v15162_v20 = vld [vmem:[#allocation6 + $0x6a4] ss:$16 sps:$4 sm:$0xff]   ;;  %v15160_v56 = vld [vmem:[#allocation6 + $0x6a0] ss:$16 sps:$4 sm:$0xff]  }
 0x660   :  { %11938 = vmatprep.mubr.bf16.mxu1 %v9512_v43  ;;  %11952 = vmatpush1.bf16.msra.mxu1 %v15145_v57  ;;  %v7482_v49 = vrot.slane %v7461_v0, %v22215_v51  ;;  %v7483_v18 = vcombine.high %v7468_v46, %v7468_v46  ;;  %v7617_v29 = vrot.slane %v7603_v9, %v22215_v51  ;;  %v15168_v34 = vld [vmem:[#allocation6 + $0x6c4] ss:$16 sps:$4 sm:$0xff]   ;;  %v15171_v0 = vld [vmem:[#allocation6 + $0x6cc] ss:$16 sps:$4 sm:$0xff]  }
 0x661   :  { %11648 = vmatprep.subr.bf16.mxu0 %v15150_v32  ;;  %11953 = vmatprep.subr.bf16.mxu1 %v15153_v2  ;;  %v7618_v62 = vcombine.high %v7610_v16, %v7610_v16  ;;  %v7625_v33 = vrot.slane %v7610_v16, %v22215_v51  ;;  %v7759_v50 = vcombine.low %v20438_v31, %v20444_v61 }
 0x662   :  { %v7484_v4 = vcombine.high %v7482_v49, %v7482_v49  ;;  %v7632_v43 = vrot.slane %v7617_v29, %v22215_v51  ;;  %v8563_v19 = vcombine.low %v7311_v38, %v7325_v25  ;;  %v14164_v41 = vcombine.high %v7311_v38, %v7325_v25  ;;  %v15163_v38 = vld [vmem:[#allocation6 + $0x6a8] ss:$16 sps:$4 sm:$0xff]  }
 0x663   :  { %11649 = vmatpush1.bf16.msra.mxu0 %v15148_v24  ;;  %v7639_v53 = vrot.slane %v7618_v62, %v22215_v51  ;;  %v20466_v28 = vrot.slane %v7759_v50, %v22215_v51  ;;  %v8565_v30 = vcombine.low %v7318_v27, %v7468_v46  ;;  %v8566_v12 = vcombine.low %v7482_v49, %v7483_v18  ;;  %v22355_v62 = vld [vmem:[#allocation153_spill] sm:$0xff] }
 0x664   :  { %11954 = vmatpush1.bf16.msra.mxu1 %v15151_v14  ;;  %11650 = vmatprep.subr.bf16.mxu0 %v15156_v5  ;;  %v8573_v11 = vrot.slane %v8563_v19, %v22215_v51  ;;  %v8580_v58 = vrot.slane %v14164_v41, %v22215_v51  ;;  %v8765_v36 = vcombine.low %v7484_v4, %v7475_v59  ;;  %v15166_v5 = vld [vmem:[#allocation6 + $0x6c0] ss:$16 sps:$4 sm:$0xff]   ;;  %v15169_v50 = vld [vmem:[#allocation6 + $0x6c8] ss:$16 sps:$4 sm:$0xff]   ;;  %v15174_v4 = vld [vmem:[#allocation6 + $0x6e4] ss:$16 sps:$4 sm:$0xff]  }
 0x665   :  { %11955 = vmatprep.subr.bf16.mxu1 %v15159_v52  ;;  %v20472_v17 = vrot.slane %v20466_v28, %v22215_v51  ;;  %v8587_v1 = vrot.slane %v8565_v30, %v22215_v51  ;;  %v8594_v8 = vrot.slane %v8566_v12, %v22215_v51  ;;  %v8766_v42 = vcombine.low %v7625_v33, %v7639_v53  ;;  %v22354_v52 = vld [vmem:[#allocation154_spill] sm:$0xff] }
 0x666   :  { %11634 = vmatmul.mubr.bf16.gmra.mrb[44].mxu0 %v20406_v22  ;;  %11939 = vmatmul.mubr.bf16.gmra.mrb[44].mxu1 %v20406_v22  ;;  %v8595_v57 = vcombine.low %v8573_v11, %v8580_v58  ;;  %v8596_v10 = vcombine.high %v8573_v11, %v8580_v58  ;;  %v14173_v55 = vcombine.high %v7625_v33, %v7639_v53  ;;  %v22356_v12 = vld [vmem:[#allocation22_spill] sm:$0xff]  ;;  %v22358_v58 = vld [vmem:[#allocation173_spill] sm:$0xff] }
 0x667   :  { %11651 = vmatpush1.bf16.msra.mxu0 %v15154_v63  ;;  %11674 = vmatprep.mubr.bf16.mxu0 %v20309_v48  ;;  %v8597_v32 = vcombine.low %v8587_v1, %v8594_v8  ;;  %v8598_v2 = vcombine.high %v8587_v1, %v8594_v8  ;;  %v8768_v13 = vcombine.low %v7632_v43, %v20472_v17  ;;  %v15177_v63 = vld [vmem:[#allocation6 + $0x6ec] ss:$16 sps:$4 sm:$0xff]  }
 0x668   :  { %11956 = vmatpush1.bf16.msra.mxu1 %v15157_v3  ;;  %11979 = vmatprep.mubr.bf16.mxu1 %v20309_v48  ;;  %v8612_v9 = vrot.slane %v8596_v10, %v22215_v51  ;;  %v8775_v22 = vrot.slane %v8765_v36, %v22215_v51  ;;  %v8782_v27 = vrot.slane %v8766_v42, %v22215_v51  ;;  %v22357_v3 = vld [vmem:[#allocation64_spill] sm:$0xff]  ;;  %v22361_v42 = vld [vmem:[#allocation146_spill] sm:$0xff]  ;;  %v22362_v10 = vld [vmem:[#allocation145_spill] sm:$0xff] }
 0x669   :  { %11652 = vmatprep.subr.bf16.mxu0 %v15162_v20  ;;  %11957 = vmatprep.subr.bf16.mxu1 %v15165_v21  ;;  %v8626_v46 = vrot.slane %v8598_v2, %v22215_v51  ;;  %v8789_v24 = vrot.slane %v14173_v55, %v22215_v51  ;;  %v8796_v25 = vrot.slane %v8768_v13, %v22215_v51  ;;  %v22359_v36 = vld [vmem:[#allocation172_spill] sm:$0xff]  ;;  %v22363_v55 = vld [vmem:[#allocation147_spill] sm:$0xff] }
 0x66a   :  { %v8797_v59 = vcombine.low %v8775_v22, %v8782_v27  ;;  %v8798_v16 = vcombine.high %v8775_v22, %v8782_v27  ;;  %v8605_v48 = vrot.slane %v8595_v57, %v22215_v51  ;;  %v8619_v14 = vrot.slane %v8597_v32, %v22215_v51  ;;  %v22360_v8 = vld [vmem:[#allocation144_spill] sm:$0xff] }
 0x66b   :  { %11653 = vmatpush1.bf16.msra.mxu0 %v15160_v56  ;;  %v8628_v49 = vcombine.low %v8612_v9, %v8626_v46  ;;  %v8799_v18 = vcombine.low %v8789_v24, %v8796_v25  ;;  %v8800_v29 = vcombine.high %v8789_v24, %v8796_v25  ;;  %v6648_v33 = vmax.f32 %v22355_v62, %v22354_v52  ;;  %v15172_v32 = vld [vmem:[#allocation6 + $0x6e0] ss:$16 sps:$4 sm:$0xff]   ;;  %v15183_v27 = vld [vmem:[#allocation6 + $0x70c] ss:$16 sps:$4 sm:$0xff]  }
 0x66c   :  { %11958 = vmatpush1.bf16.msra.mxu1 %v15163_v38  ;;  %11654 = vmatprep.subr.bf16.mxu0 %v15168_v34  ;;  %v8814_v43 = vrot.slane %v8798_v16, %v22215_v51  ;;  %v8627_v19 = vcombine.low %v8605_v48, %v8619_v14  ;;  %v8807_v41 = vrot.slane %v8797_v59, %v22215_v51  ;;  %v22364_v9 = vld [vmem:[#allocation152_spill] sm:$0xff]  ;;  %v22370_v14 = vld [vmem:[#allocation155_spill] sm:$0xff] }
 0x66d   :  { %11959 = vmatprep.subr.bf16.mxu1 %v15171_v0  ;;  %v8828_v53 = vrot.slane %v8800_v29, %v22215_v51  ;;  %v8821_v30 = vrot.slane %v8799_v18, %v22215_v51  ;;  %v6666_v11 = vmax.f32 %v22357_v3, %v22356_v12  ;;  %v6684_v20 = vmax.f32 %v22359_v36, %v22358_v58  ;;  %v22366_v46 = vld [vmem:[#allocation136_spill] sm:$0xff]  ;;  %v22373_v29 = vld [vmem:[#allocation158_spill] sm:$0xff]  ;;  %v15181_v3 = vld [vmem:[#allocation6 + $0x708] ss:$16 sps:$4 sm:$0xff]  }
 0x66e   :  { %v7139_v21 = vsel %vm6783_vm11, %v22179_v47, %v22156_v6  ;;  %v7143_v1 = vsel %vm6783_vm11, %v22182_v44, %v22167_v45  ;;  %v7147_v57 = vsel %vm6783_vm11, %v22361_v42, %v22360_v8  ;;  %v7151_v56 = vsel %vm6783_vm11, %v22363_v55, %v22362_v10  ;;  %v15175_v45 = vld [vmem:[#allocation6 + $0x6e8] ss:$16 sps:$4 sm:$0xff]   ;;  %v15180_v47 = vld [vmem:[#allocation6 + $0x704] ss:$16 sps:$4 sm:$0xff]   ;;  %v22372_v18 = vld [vmem:[#allocation28_spill] sm:$0xff] }
 0x66f   :  { %11655 = vmatpush1.bf16.msra.mxu0 %v15166_v5  ;;  %v8830_v2 = vcombine.low %v8814_v43, %v8828_v53  ;;  %v8829_v13 = vcombine.low %v8807_v41, %v8821_v30  ;;  %v7140_v38 = vsel %vm6785_vm12, %v22284_v26, %v7139_v21  ;;  %v7144_v6 = vsel %vm6785_vm12, %v22285_v54, %v7143_v1  ;;  %v22365_v54 = vld [vmem:[#allocation135_spill] sm:$0xff]  ;;  %v22371_v5 = vld [vmem:[#allocation26_spill] sm:$0xff]  ;;  %v22380_v21 = vld [vmem:[#allocation164_spill] sm:$0xff] }
 0x670   :  { %11960 = vmatpush1.bf16.msra.mxu1 %v15169_v50  ;;  %11656 = vmatprep.subr.bf16.mxu0 %v15174_v4  ;;  %v7141_v44 = vsel %vm6787_vm13, %v22288_v15, %v7140_v38  ;;  %v7145_v34 = vsel %vm6787_vm13, %v22289_v7, %v7144_v6  ;;  %v7148_v22 = vsel %vm6785_vm12, %v22364_v9, %v7147_v57  ;;  %v22368_v15 = vld [vmem:[#allocation47_spill] sm:$0xff]  ;;  %v22369_v7 = vld [vmem:[#allocation157_spill] sm:$0xff]  ;;  %v15178_v62 = vld [vmem:[#allocation6 + $0x700] ss:$16 sps:$4 sm:$0xff]  }
 0x671   :  { %11961 = vmatprep.subr.bf16.mxu1 %v15177_v63  ;;  %v20521_v0 = vpack.c.bf16 %v8830_v2, %v8628_v49  ;;  %v20523_v26 = vpack.c.bf16 %v8829_v13, %v8627_v19  ;;  %v22367_v24 = vmax.f32 %v22365_v54, %v22366_v46  ;;  %v7146_v59 = vsel %vm6789_vm14, %v6648_v33, %v7145_v34  ;;  %v22374_v50 = vld [vmem:[#allocation25_spill] sm:$0xff]  ;;  %v22375_v4 = vld [vmem:[#allocation48_spill] sm:$0xff]  ;;  %v22378_v63 = vld [vmem:[#allocation162_spill] sm:$0xff] }
 0x672   :  { %v7149_v16 = vsel %vm6787_vm13, %v22368_v15, %v7148_v22  ;;  %v7152_v48 = vsel %vm6785_vm12, %v22369_v7, %v7151_v56  ;;  %v7155_v49 = vsel %vm6783_vm11, %v22371_v5, %v22370_v14  ;;  %v7159_v52 = vsel %vm6783_vm11, %v22373_v29, %v22372_v18  ;;  %v22377_v19 = vld [vmem:[#allocation53_spill] sm:$0xff]  ;;  %v22379_v30 = vld [vmem:[#allocation163_spill] sm:$0xff]  ;;  %v15189_v57 = vld [vmem:[#allocation6 + $0x72c] ss:$16 sps:$4 sm:$0xff]  }
 0x673   :  { %v7142_v25 = vsel %vm6789_vm14, %v22367_v24, %v7141_v44  ;;  %11657 = vmatpush1.bf16.msra.mxu0 %v15172_v32  ;;  %v22376_v43 = vmax.f32 %v22374_v50, %v22375_v4  ;;  %v7153_v41 = vsel %vm6787_vm13, %v22377_v19, %v7152_v48  ;;  %v7156_v53 = vsel %vm6785_vm12, %v22378_v63, %v7155_v49  ;;  %v15186_v58 = vld [vmem:[#allocation6 + $0x724] ss:$16 sps:$4 sm:$0xff]   ;;  %v22383_v55 = vld [vmem:[#allocation160_spill] sm:$0xff] }
 0x674   :  { %v7160_v12 = vsel %vm6785_vm12, %v22379_v30, %v7159_v52  ;;  %11962 = vmatpush1.bf16.msra.mxu1 %v15175_v45  ;;  %11658 = vmatprep.subr.bf16.mxu0 %v15180_v47  ;;  %v7154_v36 = vsel %vm6789_vm14, %v6666_v11, %v7153_v41  ;;  %v7157_v1 = vsel %vm6787_vm13, %v22380_v21, %v7156_v53  ;;  %v22381_v8 = vld [vmem:[#allocation165_spill] sm:$0xff]  ;;  %v22382_v10 = vld [vmem:[#allocation159_spill] sm:$0xff]  ;;  %v15184_v44 = vld [vmem:[#allocation6 + $0x720] ss:$16 sps:$4 sm:$0xff]  }
 0x675   :  { %v7150_v33 = vsel %vm6789_vm14, %v22376_v43, %v7149_v16  ;;  %v7161_v42 = vsel %vm6787_vm13, %v22381_v8, %v7160_v12  ;;  %11963 = vmatprep.subr.bf16.mxu1 %v15183_v27  ;;  %v22384_v56 = vmax.f32 %v22382_v10, %v22383_v55  ;;  %v7760_v11 = vcombine.high %v20438_v31, %v20444_v61  ;;  %v15187_v31 = vld [vmem:[#allocation6 + $0x728] ss:$16 sps:$4 sm:$0xff]   ;;  %v15192_v61 = vld [vmem:[#allocation6 + $0x744] ss:$16 sps:$4 sm:$0xff]   ;;  %v15195_v54 = vld [vmem:[#allocation6 + $0x74c] ss:$16 sps:$4 sm:$0xff]  }
 0x676   :  { %v20562_v2 = vsel %vm6789_vm14, %v6684_v20, %v7161_v42  ;;  %v7775_v13 = vcombine.high %v20466_v28, %v20466_v28  ;;  %v7797_v38 = vcombine.high %v20472_v17, %v20472_v17  ;;  %v7916_v6 = vcombine.low %v7142_v25, %v7146_v59  ;;  %v15190_v14 = vld [vmem:[#allocation6 + $0x740] ss:$16 sps:$4 sm:$0xff]   ;;  %v15193_v52 = vld [vmem:[#allocation6 + $0x748] ss:$16 sps:$4 sm:$0xff]   ;;  %v15204_v10 = vld [vmem:[#allocation6 + $0x784] ss:$16 sps:$4 sm:$0xff]  }
 0x677   :  { %v20559_v32 = vsel %vm6789_vm14, %v22384_v56, %v7157_v1  ;;  %v7917_v45 = vcombine.high %v7142_v25, %v7146_v59  ;;  %v8073_v47 = vcombine.low %v7150_v33, %v7154_v36  ;;  %11659 = vmatpush1.bf16.msra.mxu0 %v15178_v62  ;;  %v7774_v34 = vrot.slane %v7760_v11, %v22215_v51  ;;  %v15198_v62 = vld [vmem:[#allocation6 + $0x764] ss:$16 sps:$4 sm:$0xff]  }
 0x678   :  { %v7796_v9 = vrot.slane %v7775_v13, %v22215_v51  ;;  %v8074_v20 = vcombine.high %v7150_v33, %v7154_v36  ;;  %v8230_v22 = vcombine.low %v20559_v32, %v20562_v2  ;;  %11964 = vmatpush1.bf16.msra.mxu1 %v15181_v3  ;;  %11660 = vmatprep.subr.bf16.mxu0 %v15186_v58  ;;  %v15201_v33 = vld [vmem:[#allocation6 + $0x76c] ss:$16 sps:$4 sm:$0xff]   ;;  %v15196_v36 = vld [vmem:[#allocation6 + $0x760] ss:$16 sps:$4 sm:$0xff]  }
 0x679   :  { %v7924_v28 = vrot.slane %v7916_v6, %v22215_v51  ;;  %v7931_v17 = vrot.slane %v7917_v45, %v22215_v51  ;;  %v8081_v27 = vrot.slane %v8073_v47, %v22215_v51  ;;  %11965 = vmatprep.subr.bf16.mxu1 %v15189_v57  ;;  %v7789_v46 = vrot.slane %v7774_v34, %v22215_v51  ;;  %v15199_v57 = vld [vmem:[#allocation6 + $0x768] ss:$16 sps:$4 sm:$0xff]   ;;  %v15207_v13 = vld [vmem:[#allocation6 + $0x78c] ss:$16 sps:$4 sm:$0xff]  }
 0x67a   :  { %v7798_v24 = vcombine.high %v7796_v9, %v7796_v9  ;;  %v8088_v25 = vrot.slane %v8074_v20, %v22215_v51  ;;  %v8238_v59 = vrot.slane %v8230_v22, %v22215_v51  ;;  %v8967_v43 = vcombine.low %v7796_v9, %v7797_v38  ;;  %v22385_v20 = vld [vmem:[#allocation124_spill] sm:$0xff]  ;;  %v22386_v22 = vld [vmem:[#allocation122_spill] sm:$0xff] }
 0x67b   :  { %v7932_v15 = vcombine.high %v7924_v28, %v7924_v28  ;;  %v7939_v16 = vrot.slane %v7924_v28, %v22215_v51  ;;  %v7946_v7 = vrot.slane %v7931_v17, %v22215_v51  ;;  %v8089_v48 = vcombine.high %v8081_v27, %v8081_v27  ;;  %11661 = vmatpush1.bf16.msra.mxu0 %v15184_v44 }
 0x67c   :  { %v8096_v5 = vrot.slane %v8081_v27, %v22215_v51  ;;  %v8103_v49 = vrot.slane %v8088_v25, %v22215_v51  ;;  %v8246_v18 = vcombine.high %v8238_v59, %v8238_v59  ;;  %v20585_v29 = vrot.slane %v8238_v59, %v22215_v51  ;;  %11966 = vmatpush1.bf16.msra.mxu1 %v15187_v31 }
 0x67d   :  { %11662 = vmatprep.subr.bf16.mxu0 %v15192_v61  ;;  %v7953_v50 = vrot.slane %v7932_v15, %v22215_v51  ;;  %v8110_v4 = vrot.slane %v8089_v48, %v22215_v51  ;;  %11967 = vmatprep.subr.bf16.mxu1 %v15195_v54  ;;  %v8968_v63 = vcombine.low %v7798_v24, %v7789_v46  ;;  %v15202_v61 = vld [vmem:[#allocation6 + $0x780] ss:$16 sps:$4 sm:$0xff]   ;;  %v15205_v46 = vld [vmem:[#allocation6 + $0x788] ss:$16 sps:$4 sm:$0xff]   ;;  %v15210_v24 = vld [vmem:[#allocation6 + $0x7a4] ss:$16 sps:$4 sm:$0xff]  }
 0x67e   :  { %v8111_v19 = vcombine.high %v8096_v5, %v8096_v5  ;;  %v20590_v41 = vrot.slane %v8246_v18, %v22215_v51  ;;  %v9169_v53 = vcombine.low %v7946_v7, %v8096_v5  ;;  %v8977_v58 = vrot.slane %v8967_v43, %v22215_v51  ;;  %v22387_v5 = vld [vmem:[#allocation125_spill] sm:$0xff] }
 0x67f   :  { %v8112_v30 = vcombine.high %v8110_v4, %v8110_v4  ;;  %v8969_v12 = vcombine.low %v7939_v16, %v7953_v50  ;;  %v14182_v3 = vcombine.high %v7939_v16, %v7953_v50  ;;  %11663 = vmatpush1.bf16.msra.mxu0 %v15190_v14  ;;  %v8984_v21 = vrot.slane %v8968_v63, %v22215_v51  ;;  %v15213_v16 = vld [vmem:[#allocation6 + $0x7ac] ss:$16 sps:$4 sm:$0xff]   ;;  %v22388_v50 = vld [vmem:[#allocation121_spill] sm:$0xff]  ;;  %v22390_v63 = vld [vmem:[#allocation139_spill] sm:$0xff] }
 0x680   :  { %v9170_v1 = vcombine.low %v8110_v4, %v8111_v19  ;;  %v9172_v8 = vcombine.low %v20585_v29, %v20590_v41  ;;  %v9179_v42 = vrot.slane %v9169_v53, %v22215_v51  ;;  %11968 = vmatpush1.bf16.msra.mxu1 %v15193_v52  ;;  %11664 = vmatprep.subr.bf16.mxu0 %v15198_v62  ;;  %v22389_v4 = vld [vmem:[#allocation137_spill] sm:$0xff] }
 0x681   :  { %v8991_v55 = vrot.slane %v8969_v12, %v22215_v51  ;;  %v8998_v56 = vrot.slane %v14182_v3, %v22215_v51  ;;  %v9171_v11 = vcombine.low %v8112_v30, %v8103_v49  ;;  %11969 = vmatprep.subr.bf16.mxu1 %v15201_v33  ;;  %v9000_v38 = vcombine.high %v8977_v58, %v8984_v21  ;;  %v15208_v33 = vld [vmem:[#allocation6 + $0x7a0] ss:$16 sps:$4 sm:$0xff]  }
 0x682   :  { %v9186_v6 = vrot.slane %v9170_v1, %v22215_v51  ;;  %v9200_v45 = vrot.slane %v9172_v8, %v22215_v51  ;;  %v8999_v47 = vcombine.low %v8977_v58, %v8984_v21  ;;  %v6701_v31 = vmax.f32 %v22386_v22, %v22385_v20  ;;  %v22391_v30 = vld [vmem:[#allocation140_spill] sm:$0xff]  ;;  %v22392_v12 = vld [vmem:[#allocation138_spill] sm:$0xff]  ;;  %v15211_v58 = vld [vmem:[#allocation6 + $0x7a8] ss:$16 sps:$4 sm:$0xff]  }
 0x683   :  { %v9002_v44 = vcombine.high %v8991_v55, %v8998_v56  ;;  %v9193_v34 = vrot.slane %v9171_v11, %v22215_v51  ;;  %v9001_v9 = vcombine.low %v8991_v55, %v8998_v56  ;;  %11665 = vmatpush1.bf16.msra.mxu0 %v15196_v36  ;;  %v9016_v28 = vrot.slane %v9000_v38, %v22215_v51  ;;  %v15216_v36 = vld [vmem:[#allocation6 + $0x7c4] ss:$16 sps:$4 sm:$0xff]   ;;  %v22393_v1 = vld [vmem:[#allocation120_spill] sm:$0xff] }
 0x684   :  { %v9202_v17 = vcombine.high %v9179_v42, %v9186_v6  ;;  %v9009_v27 = vrot.slane %v8999_v47, %v22215_v51  ;;  %v9201_v54 = vcombine.low %v9179_v42, %v9186_v6  ;;  %11970 = vmatpush1.bf16.msra.mxu1 %v15199_v57  ;;  %11666 = vmatprep.subr.bf16.mxu0 %v15204_v10  ;;  %v22394_v42 = vld [vmem:[#allocation127_spill] sm:$0xff]  ;;  %v15219_v10 = vld [vmem:[#allocation6 + $0x7cc] ss:$16 sps:$4 sm:$0xff]   ;;  %v22395_v56 = vld [vmem:[#allocation85_spill] sm:$0xff] }
 0x685   :  { %v9030_v25 = vrot.slane %v9002_v44, %v22215_v51  ;;  %v9204_v59 = vcombine.high %v9193_v34, %v9200_v45  ;;  %v9023_v15 = vrot.slane %v9001_v9, %v22215_v51  ;;  %11971 = vmatprep.subr.bf16.mxu1 %v15207_v13  ;;  %v9203_v48 = vcombine.low %v9193_v34, %v9200_v45  ;;  %v15214_v38 = vld [vmem:[#allocation6 + $0x7c0] ss:$16 sps:$4 sm:$0xff]   ;;  %v15217_v34 = vld [vmem:[#allocation6 + $0x7c8] ss:$16 sps:$4 sm:$0xff]   ;;  %v15222_v9 = vld [vmem:[#allocation6 + $0x7e4] ss:$16 sps:$4 sm:$0xff]  }
 0x686   :  { %v9218_v7 = vrot.slane %v9202_v17, %v22215_v51  ;;  %v9211_v14 = vrot.slane %v9201_v54, %v22215_v51  ;;  %v6702_v49 = vmax.f32 %v22387_v5, %v20232_v23  ;;  %v7163_v43 = vsel %vm6783_vm11, %v22389_v4, %v22388_v50  ;;  %v15225_v20 = vld [vmem:[#allocation6 + $0x7ec] ss:$16 sps:$4 sm:$0xff]   ;;  %v15226_v5 = vld [vmem:[#allocation6 + $0x800] ss:$16 sps:$4 sm:$0xff]  }
 0x687   :  { %v9032_v18 = vcombine.low %v9016_v28, %v9030_v25  ;;  %v9232_v52 = vrot.slane %v9204_v59, %v22215_v51  ;;  %v9031_v62 = vcombine.low %v9009_v27, %v9023_v15  ;;  %11667 = vmatpush1.bf16.msra.mxu0 %v15202_v61  ;;  %v9225_v19 = vrot.slane %v9203_v48, %v22215_v51  ;;  %v15220_v61 = vld [vmem:[#allocation6 + $0x7e0] ss:$16 sps:$4 sm:$0xff]   ;;  %v15231_v25 = vld [vmem:[#allocation6 + $0x80c] ss:$16 sps:$4 sm:$0xff]  }
 0x688   :  { %v7164_v53 = vsel %vm6785_vm12, %v22390_v63, %v7163_v43  ;;  %v7167_v3 = vsel %vm6783_vm11, %v22392_v12, %v22391_v30  ;;  %v8231_v23 = vcombine.high %v20559_v32, %v20562_v2  ;;  %11972 = vmatpush1.bf16.msra.mxu1 %v15205_v46  ;;  %11668 = vmatprep.subr.bf16.mxu0 %v15210_v24  ;;  %v15223_v46 = vld [vmem:[#allocation6 + $0x7e8] ss:$16 sps:$4 sm:$0xff]   ;;  %v15228_v24 = vld [vmem:[#allocation6 + $0x804] ss:$16 sps:$4 sm:$0xff]   ;;  %v15237_v4 = vld [vmem:[#allocation6 + $0x82c] ss:$16 sps:$4 sm:$0xff]  }
 0x689   :  { %v9234_v21 = vcombine.low %v9218_v7, %v9232_v52  ;;  %v7165_v8 = vsel %vm6787_vm13, %v22393_v1, %v7164_v53  ;;  %v7168_v57 = vsel %vm6785_vm12, %v22394_v42, %v7167_v3  ;;  %11973 = vmatprep.subr.bf16.mxu1 %v15213_v16  ;;  %v9233_v55 = vcombine.low %v9211_v14, %v9225_v19  ;;  %v15232_v19 = vld [vmem:[#allocation6 + $0x820] ss:$16 sps:$4 sm:$0xff]   ;;  %v15235_v63 = vld [vmem:[#allocation6 + $0x828] ss:$16 sps:$4 sm:$0xff]   ;;  %v15240_v53 = vld [vmem:[#allocation6 + $0x844] ss:$16 sps:$4 sm:$0xff]  }
 0x68a   :  { %v7169_v11 = vsel %vm6787_vm13, %v22395_v56, %v7168_v57  ;;  %v7166_v32 = vsel %vm6789_vm14, %v6701_v31, %v7165_v8  ;;  %v8245_v45 = vrot.slane %v8231_v23, %v22215_v51  ;;  %v14199_v31 = vcombine.high %v20585_v29, %v20590_v41  ;;  %v15243_v3 = vld [vmem:[#allocation6 + $0x84c] ss:$16 sps:$4 sm:$0xff]   ;;  %v15246_v8 = vld [vmem:[#allocation6 + $0x864] ss:$16 sps:$4 sm:$0xff]   ;;  %v15247_v56 = vld [vmem:[#allocation6 + $0x868] ss:$16 sps:$4 sm:$0xff]  }
 0x68b   :  { %v20630_v13 = vpack.c.bf16 %v9234_v21, %v9032_v18  ;;  %v7170_v2 = vsel %vm6789_vm14, %v6702_v49, %v7169_v11  ;;  %11669 = vmatpush1.bf16.msra.mxu0 %v15208_v33  ;;  %v20634_v6 = vpack.c.bf16 %v9233_v55, %v9031_v62  ;;  %v15229_v49 = vld [vmem:[#allocation6 + $0x808] ss:$16 sps:$4 sm:$0xff]   ;;  %v15234_v18 = vld [vmem:[#allocation6 + $0x824] ss:$16 sps:$4 sm:$0xff]   ;;  %v15238_v21 = vld [vmem:[#allocation6 + $0x840] ss:$16 sps:$4 sm:$0xff]   ;;  %v9514_v1 = vpack.c.bf16 %v20387_v39, %v20387_v39 }
 0x68c   :  { %v8387_v47 = vcombine.low %v7166_v32, %v7170_v2  ;;  %v8388_v44 = vcombine.high %v7166_v32, %v7170_v2  ;;  %11974 = vmatpush1.bf16.msra.mxu1 %v15211_v58  ;;  %11670 = vmatprep.subr.bf16.mxu0 %v15216_v36  ;;  %v8260_v28 = vrot.slane %v8245_v45, %v22215_v51  ;;  %v15244_v55 = vld [vmem:[#allocation6 + $0x860] ss:$16 sps:$4 sm:$0xff]   ;;  %v15252_v11 = vld [vmem:[#allocation6 + $0x884] ss:$16 sps:$4 sm:$0xff]   ;;  %v15255_v39 = vld [vmem:[#allocation6 + $0x88c] ss:$16 sps:$4 sm:$0xff]  }
 0x68d   :  { %11975 = vmatprep.subr.bf16.mxu1 %v15219_v10  ;;  %v9381_v29 = vrot.slane %v14199_v31, %v22215_v51  ;;  %v15249_v10 = vld [vmem:[#allocation6 + $0x86c] ss:$16 sps:$4 sm:$0xff]   ;;  %v9513_v32 = vpack.c.bf16 %v20389_v40, %v20389_v40  ;;  %v15250_v2 = vld [vmem:[#allocation6 + $0x880] ss:$16 sps:$4 sm:$0xff]   ;;  %v15258_v45 = vld [vmem:[#allocation6 + $0x8a4] ss:$16 sps:$4 sm:$0xff]  }
 0x68e   :  { %v8395_v22 = vrot.slane %v8387_v47, %v22215_v51  ;;  %v8402_v17 = vrot.slane %v8388_v44, %v22215_v51  ;;  %v15256_v47 = vld [vmem:[#allocation6 + $0x8a0] ss:$16 sps:$4 sm:$0xff]   ;;  %v15259_v44 = vld [vmem:[#allocation6 + $0x8a8] ss:$16 sps:$4 sm:$0xff]   ;;  %v15267_v40 = vld [vmem:[#allocation6 + $0x8cc] ss:$16 sps:$4 sm:$0xff]  }
 0x68f   :  { %11671 = vmatpush1.bf16.msra.mxu0 %v15214_v38  ;;  %v15253_v38 = vld [vmem:[#allocation6 + $0x888] ss:$16 sps:$4 sm:$0xff]   ;;  %v15273_v31 = vld [vmem:[#allocation6 + $0x8ec] ss:$16 sps:$4 sm:$0xff]  }
 0x690   :  { %v8403_v27 = vcombine.high %v8395_v22, %v8395_v22  ;;  %v8410_v54 = vrot.slane %v8395_v22, %v22215_v51  ;;  %11976 = vmatpush1.bf16.msra.mxu1 %v15217_v34  ;;  %11672 = vmatprep.subr.bf16.mxu0 %v15222_v9  ;;  %v8417_v41 = vrot.slane %v8402_v17, %v22215_v51  ;;  %v15264_v34 = vld [vmem:[#allocation6 + $0x8c4] ss:$16 sps:$4 sm:$0xff]   ;;  %v15262_v9 = vld [vmem:[#allocation6 + $0x8c0] ss:$16 sps:$4 sm:$0xff]   ;;  %v15279_v17 = vld [vmem:[#allocation6 + $0x90c] ss:$16 sps:$4 sm:$0xff]  }
 0x691   :  { %11977 = vmatprep.subr.bf16.mxu1 %v15225_v20  ;;  %v15265_v20 = vld [vmem:[#allocation6 + $0x8c8] ss:$16 sps:$4 sm:$0xff]   ;;  %v15270_v22 = vld [vmem:[#allocation6 + $0x8e4] ss:$16 sps:$4 sm:$0xff]  }
 0x692   :  { %v8424_v59 = vrot.slane %v8403_v27, %v22215_v51  ;;  %v8425_v15 = vcombine.high %v8410_v54, %v8410_v54  ;;  %v9372_v16 = vcombine.low %v8260_v28, %v8410_v54  ;;  %v15276_v28 = vld [vmem:[#allocation6 + $0x904] ss:$16 sps:$4 sm:$0xff]   ;;  %v15274_v27 = vld [vmem:[#allocation6 + $0x900] ss:$16 sps:$4 sm:$0xff]   ;;  %v15277_v54 = vld [vmem:[#allocation6 + $0x908] ss:$16 sps:$4 sm:$0xff]  }
 0x693   :  { %11673 = vmatpush1.bf16.msra.mxu0 %v15220_v61  ;;  %v15268_v61 = vld [vmem:[#allocation6 + $0x8e0] ss:$16 sps:$4 sm:$0xff]  }
 0x694   :  { %v8426_v7 = vcombine.high %v8424_v59, %v8424_v59  ;;  %v9373_v48 = vcombine.low %v8424_v59, %v8425_v15  ;;  %v9388_v14 = vrot.slane %v9372_v16, %v22215_v51  ;;  %11978 = vmatpush1.bf16.msra.mxu1 %v15223_v46  ;;  %11703 = vmatprep.subr.bf16.mxu0 %v15228_v24  ;;  %v15282_v46 = vld [vmem:[#allocation6 + $0x924] ss:$16 sps:$4 sm:$0xff]   ;;  %v15285_v24 = vld [vmem:[#allocation6 + $0x92c] ss:$16 sps:$4 sm:$0xff]   ;;  %v15283_v59 = vld [vmem:[#allocation6 + $0x928] ss:$16 sps:$4 sm:$0xff]  }
 0x695   :  { %12008 = vmatprep.subr.bf16.mxu1 %v15231_v25  ;;  %v15280_v25 = vld [vmem:[#allocation6 + $0x920] ss:$16 sps:$4 sm:$0xff]   ;;  %v15288_v15 = vld [vmem:[#allocation6 + $0x944] ss:$16 sps:$4 sm:$0xff]   ;;  %v15291_v16 = vld [vmem:[#allocation6 + $0x94c] ss:$16 sps:$4 sm:$0xff]  }
 0x696   :  { %v9374_v52 = vcombine.low %v8426_v7, %v8417_v41  ;;  %v9404_v62 = vcombine.high %v9381_v29, %v9388_v14  ;;  %v9403_v50 = vcombine.low %v9381_v29, %v9388_v14  ;;  %11675 = vmatmul.mubr.bf16.vlgmr.msra.gmra.mrb[36].mxu0 %v20314_v60  ;;  %v9395_v43 = vrot.slane %v9373_v48, %v22215_v51  ;;  %v15286_v29 = vld [vmem:[#allocation6 + $0x940] ss:$16 sps:$4 sm:$0xff]   ;;  %v15289_v41 = vld [vmem:[#allocation6 + $0x948] ss:$16 sps:$4 sm:$0xff]   ;;  %v15294_v7 = vld [vmem:[#allocation6 + $0x964] ss:$16 sps:$4 sm:$0xff]  }
 0x697   :  { %11980 = vmatmul.mubr.bf16.vlgmr.msra.gmra.mrb[36].mxu1 %v20314_v60  ;;  %11684 = vmatprep.mubr.bf16.mxu0 %v20320_v35  ;;  %v15297_v48 = vld [vmem:[#allocation6 + $0x96c] ss:$16 sps:$4 sm:$0xff]   ;;  %v15292_v14 = vld [vmem:[#allocation6 + $0x960] ss:$16 sps:$4 sm:$0xff]  }
 0x698   :  { %v9402_v33 = vrot.slane %v9374_v52, %v22215_v51  ;;  %11704 = vmatpush1.bf16.msra.mxu0 %v15226_v5  ;;  %11989 = vmatprep.mubr.bf16.mxu1 %v20320_v35  ;;  %v9420_v60 = vrot.slane %v9404_v62, %v22215_v51  ;;  %v9413_v58 = vrot.slane %v9403_v50, %v22215_v51  ;;  %v15241_v35 = vld [vmem:[#allocation6 + $0x848] ss:$16 sps:$4 sm:$0xff]   ;;  %v15298_v52 = vld [vmem:[#allocation6 + $0x980] ss:$16 sps:$4 sm:$0xff]   ;;  %v15306_v50 = vld [vmem:[#allocation6 + $0x9a4] ss:$16 sps:$4 sm:$0xff]  }
 0x699   :  { %12009 = vmatpush1.bf16.msra.mxu1 %v15229_v49  ;;  %11705 = vmatprep.subr.bf16.mxu0 %v15234_v18  ;;  %v15295_v5 = vld [vmem:[#allocation6 + $0x968] ss:$16 sps:$4 sm:$0xff]   ;;  %v15300_v49 = vld [vmem:[#allocation6 + $0x984] ss:$16 sps:$4 sm:$0xff]   ;;  %v15303_v18 = vld [vmem:[#allocation6 + $0x98c] ss:$16 sps:$4 sm:$0xff]  }
 0x69a   :  { %v9406_v30 = vcombine.high %v9395_v43, %v9402_v33  ;;  %v9405_v12 = vcombine.low %v9395_v43, %v9402_v33  ;;  %12010 = vmatprep.subr.bf16.mxu1 %v15237_v4  ;;  %v15301_v62 = vld [vmem:[#allocation6 + $0x988] ss:$16 sps:$4 sm:$0xff]   ;;  %v15309_v4 = vld [vmem:[#allocation6 + $0x9ac] ss:$16 sps:$4 sm:$0xff]   ;;  %v15304_v43 = vld [vmem:[#allocation6 + $0x9a0] ss:$16 sps:$4 sm:$0xff]  }
 0x69b   :  { %v15307_v33 = vld [vmem:[#allocation6 + $0x9a8] ss:$16 sps:$4 sm:$0xff]  }
 0x69c   :  { %v9434_v23 = vrot.slane %v9406_v30, %v22215_v51  ;;  %v9427_v36 = vrot.slane %v9405_v12, %v22215_v51  ;;  %11706 = vmatpush1.bf16.msra.mxu0 %v15232_v19  ;;  %v15312_v19 = vld [vmem:[#allocation6 + $0x9c4] ss:$16 sps:$4 sm:$0xff]   ;;  %v15313_v30 = vld [vmem:[#allocation6 + $0x9c8] ss:$16 sps:$4 sm:$0xff]  }
 0x69d   :  { %12011 = vmatpush1.bf16.msra.mxu1 %v15235_v63  ;;  %11707 = vmatprep.subr.bf16.mxu0 %v15240_v53  ;;  %v15315_v63 = vld [vmem:[#allocation6 + $0x9cc] ss:$16 sps:$4 sm:$0xff]   ;;  %v15310_v53 = vld [vmem:[#allocation6 + $0x9c0] ss:$16 sps:$4 sm:$0xff]   ;;  %v15318_v12 = vld [vmem:[#allocation6 + $0x9e4] ss:$16 sps:$4 sm:$0xff]  }
 0x69e   :  { %v20659_v42 = vcombine.low %v9420_v60, %v9434_v23  ;;  %v20661_v57 = vcombine.low %v9413_v58, %v9427_v36  ;;  %11685 = vmatmul.mubr.bf16.gmra.mrb[40].mxu0 %v20326_v37  ;;  %12012 = vmatprep.subr.bf16.mxu1 %v15243_v3  ;;  %v15321_v3 = vld [vmem:[#allocation6 + $0x9ec] ss:$16 sps:$4 sm:$0xff]   ;;  %v15316_v60 = vld [vmem:[#allocation6 + $0x9e0] ss:$16 sps:$4 sm:$0xff]   ;;  %v15319_v23 = vld [vmem:[#allocation6 + $0x9e8] ss:$16 sps:$4 sm:$0xff]  }
 0x69f   :  { %11990 = vmatmul.mubr.bf16.gmra.mrb[40].mxu1 %v20326_v37  ;;  %11694 = vmatprep.mubr.bf16.mxu0 %v9514_v1  ;;  %v15261_v37 = vld [vmem:[#allocation6 + $0x8ac] ss:$16 sps:$4 sm:$0xff]  }
 0x6a0   :  { %11708 = vmatpush1.bf16.msra.mxu0 %v15238_v21  ;;  %11999 = vmatprep.mubr.bf16.mxu1 %v9514_v1  ;;  %v9516_v58 = vpack.c.bf16 %v20659_v42, %v20659_v42  ;;  %v9515_v36 = vpack.c.bf16 %v20661_v57, %v20661_v57  ;;  %v9837_v21 = vld [vmem:[#allocation7] sm:$0xf] }
 0x6a1   :  { %12013 = vmatpush1.bf16.msra.mxu1 %v15241_v35  ;;  %11709 = vmatprep.subr.bf16.mxu0 %v15246_v8 }
 0x6a2   :  { %12014 = vmatprep.subr.bf16.mxu1 %v15249_v10 }
 0x6a4   :  { %11710 = vmatpush1.bf16.msra.mxu0 %v15244_v55 }
 0x6a5   :  { %12015 = vmatpush1.bf16.msra.mxu1 %v15247_v56  ;;  %11711 = vmatprep.subr.bf16.mxu0 %v15252_v11 }
 0x6a6   :  { %11695 = vmatmul.mubr.bf16.gmra.mrb[44].mxu0 %v9513_v32  ;;  %12016 = vmatprep.subr.bf16.mxu1 %v15255_v39 }
 0x6a7   :  { %12000 = vmatmul.mubr.bf16.gmra.mrb[44].mxu1 %v9513_v32  ;;  %11735 = vmatprep.mubr.bf16.mxu0 %v20521_v0 }
 0x6a8   :  { %11712 = vmatpush1.bf16.msra.mxu0 %v15250_v2  ;;  %12040 = vmatprep.mubr.bf16.mxu1 %v20521_v0  ;;  %v15271_v0 = vld [vmem:[#allocation6 + $0x8e8] ss:$16 sps:$4 sm:$0xff]  }
 0x6a9   :  { %12017 = vmatpush1.bf16.msra.mxu1 %v15253_v38  ;;  %11713 = vmatprep.subr.bf16.mxu0 %v15258_v45 }
 0x6aa   :  { %12018 = vmatprep.subr.bf16.mxu1 %v15261_v37 }
 0x6ac   :  { %11714 = vmatpush1.bf16.msra.mxu0 %v15256_v47 }
 0x6ad   :  { %12019 = vmatpush1.bf16.msra.mxu1 %v15259_v44  ;;  %11715 = vmatprep.subr.bf16.mxu0 %v15264_v34 }
 0x6ae   :  { %12020 = vmatprep.subr.bf16.mxu1 %v15267_v40 }
 0x6b0   :  { %11716 = vmatpush1.bf16.msra.mxu0 %v15262_v9 }
 0x6b1   :  { %12021 = vmatpush1.bf16.msra.mxu1 %v15265_v20  ;;  %11717 = vmatprep.subr.bf16.mxu0 %v15270_v22 }
 0x6b2   :  { %12022 = vmatprep.subr.bf16.mxu1 %v15273_v31 }
 0x6b4   :  { %11718 = vmatpush1.bf16.msra.mxu0 %v15268_v61 }
 0x6b5   :  { %12023 = vmatpush1.bf16.msra.mxu1 %v15271_v0  ;;  %11719 = vmatprep.subr.bf16.mxu0 %v15276_v28 }
 0x6b6   :  { %12024 = vmatprep.subr.bf16.mxu1 %v15279_v17 }
 0x6b8   :  { %11720 = vmatpush1.bf16.msra.mxu0 %v15274_v27 }
 0x6b9   :  { %12025 = vmatpush1.bf16.msra.mxu1 %v15277_v54  ;;  %11721 = vmatprep.subr.bf16.mxu0 %v15282_v46 }
 0x6ba   :  { %12026 = vmatprep.subr.bf16.mxu1 %v15285_v24 }
 0x6bc   :  { %11722 = vmatpush1.bf16.msra.mxu0 %v15280_v25 }
 0x6bd   :  { %12027 = vmatpush1.bf16.msra.mxu1 %v15283_v59  ;;  %11723 = vmatprep.subr.bf16.mxu0 %v15288_v15 }
 0x6be   :  { %12028 = vmatprep.subr.bf16.mxu1 %v15291_v16 }
 0x6c0   :  { %11724 = vmatpush1.bf16.msra.mxu0 %v15286_v29 }
 0x6c1   :  { %12029 = vmatpush1.bf16.msra.mxu1 %v15289_v41  ;;  %11725 = vmatprep.subr.bf16.mxu0 %v15294_v7 }
 0x6c2   :  { %12030 = vmatprep.subr.bf16.mxu1 %v15297_v48 }
 0x6c4   :  { %11726 = vmatpush1.bf16.msra.mxu0 %v15292_v14 }
 0x6c5   :  { %12031 = vmatpush1.bf16.msra.mxu1 %v15295_v5  ;;  %11727 = vmatprep.subr.bf16.mxu0 %v15300_v49 }
 0x6c6   :  { %12032 = vmatprep.subr.bf16.mxu1 %v15303_v18 }
 0x6c8   :  { %11728 = vmatpush1.bf16.msra.mxu0 %v15298_v52 }
 0x6c9   :  { %12033 = vmatpush1.bf16.msra.mxu1 %v15301_v62  ;;  %11729 = vmatprep.subr.bf16.mxu0 %v15306_v50 }
 0x6ca   :  { %12034 = vmatprep.subr.bf16.mxu1 %v15309_v4 }
 0x6cc   :  { %11730 = vmatpush1.bf16.msra.mxu0 %v15304_v43 }
 0x6cd   :  { %12035 = vmatpush1.bf16.msra.mxu1 %v15307_v33  ;;  %11731 = vmatprep.subr.bf16.mxu0 %v15312_v19 }
 0x6ce   :  { %12036 = vmatprep.subr.bf16.mxu1 %v15315_v63 }
 0x6d0   :  { %11732 = vmatpush1.bf16.msra.mxu0 %v15310_v53 }
 0x6d1   :  { %12037 = vmatpush1.bf16.msra.mxu1 %v15313_v30  ;;  %11733 = vmatprep.subr.bf16.mxu0 %v15318_v12 }
 0x6d2   :  { %12038 = vmatprep.subr.bf16.mxu1 %v15321_v3 }
 0x6d4   :  { %11734 = vmatpush1.bf16.msra.mxu0 %v15316_v60 }
 0x6d5   :  { %12039 = vmatpush1.bf16.msra.mxu1 %v15319_v23 }
 0x6d7   :  { %11736 = vmatmul.mubr.bf16.vlgmr.msra.gmra.mrb[36].mxu0 %v20523_v26 }
 0x6d8   :  { %12041 = vmatmul.mubr.bf16.vlgmr.msra.gmra.mrb[36].mxu1 %v20523_v26  ;;  %11745 = vmatprep.mubr.bf16.mxu0 %v20630_v13  ;;  %v22396_v26 = vld [vmem:[#allocation21_spill] sm:$0xff] }
 0x6d9   :  { %12050 = vmatprep.mubr.bf16.mxu1 %v20630_v13  ;;  %v22397_v35 = vsub.s32 0, %v22396_v26  ;;  %v22398_v13 = vsub.s32 2, %v22396_v26  ;;  %v22399_v42 = vsub.s32 1, %v22396_v26 }
 0x6db   :  { %v20681_v1 = vrot.slane %v9837_v21, %v22397_v35  ;;  %v20685_v8 = vrot.slane %v9837_v21, %v22398_v13  ;;  %v20689_v10 = vrot.slane %v9837_v21, %v22399_v42 }
 0x6df   :  { %11746 = vmatmul.mubr.bf16.gmra.mrb[40].mxu0 %v20634_v6 }
 0x6e0   :  { %12051 = vmatmul.mubr.bf16.gmra.mrb[40].mxu1 %v20634_v6  ;;  %11755 = vmatprep.mubr.bf16.mxu0 %v9516_v58  ;;  %v22400_v6 = vsub.s32 3, %v22396_v26 }
 0x6e1   :  { %12060 = vmatprep.mubr.bf16.mxu1 %v9516_v58 }
 0x6e2   :  { %v20693_v55 = vrot.slane %v9837_v21, %v22400_v6 }
 0x6e7   :  { %11756 = vmatmul.mubr.bf16.gmra.mrb[44].mxu0 %v9515_v36 }
 0x6e8   :  { %12061 = vmatmul.mubr.bf16.gmra.mrb[44].mxu1 %v9515_v36 }
 0x7aa   :  { %v11737_v57 = vpop.f32.mrb[36].mxu0 }
 0x7ab   :  { %v14650_v56 = vadd.f32 %v11737_v57, %v20681_v1  ;;  %v12042_v11 = vpop.f32.mrb[36].mxu1  ;;  %v11739_v39 = vpop.f32.mrb[37].mxu0 }
 0x7ac   :  { %v14660_v32 = vadd.f32 %v12042_v11, %v20685_v8  ;;  %v14651_v2 = vadd.f32 %v11739_v39, %v20689_v10  ;;  %v12044_v38 = vpop.f32.mrb[37].mxu1  ;;  %v11741_v45 = vpop.f32.mrb[38].mxu0 }
 0x7ad   :  { %v12069_v37 = vmax.f32 %v14650_v56, 0.0  ;;  %v14661_v47 = vadd.f32 %v12044_v38, %v20693_v55  ;;  %v14652_v44 = vadd.f32 %v11741_v45, %v20681_v1  ;;  %v12046_v34 = vpop.f32.mrb[38].mxu1  ;;  %v11743_v40 = vpop.f32.mrb[39].mxu0 }
 0x7ae   :  { %v12071_v9 = vmax.f32 %v14660_v32, 0.0  ;;  %v12070_v20 = vmax.f32 %v14651_v2, 0.0  ;;  %v14662_v22 = vadd.f32 %v12046_v34, %v20685_v8  ;;  %v14653_v31 = vadd.f32 %v11743_v40, %v20689_v10  ;;  %v12048_v61 = vpop.f32.mrb[39].mxu1 }
 0x7af   :  { %v12072_v0 = vmax.f32 %v14661_v47, 0.0  ;;  %v12073_v28 = vmax.f32 %v14652_v44, 0.0  ;;  %v14663_v17 = vadd.f32 %v12048_v61, %v20693_v55 }
 0x7b0   :  { %v12109_v27 = vcombine.low %v12069_v37, %v12070_v20  ;;  %v12110_v54 = vcombine.high %v12069_v37, %v12070_v20  ;;  %v12075_v46 = vmax.f32 %v14662_v22, 0.0  ;;  %v12074_v24 = vmax.f32 %v14653_v31, 0.0 }
 0x7b1   :  { %v12111_v25 = vcombine.low %v12071_v9, %v12072_v0  ;;  %v12112_v59 = vcombine.high %v12071_v9, %v12072_v0  ;;  %v12076_v15 = vmax.f32 %v14663_v17, 0.0 }
 0x7b2   :  { %v12119_v16 = vrot.slane %v12109_v27, %v22215_v51  ;;  %v12126_v29 = vrot.slane %v12110_v54, %v22215_v51  ;;  %v12177_v41 = vcombine.low %v12073_v28, %v12074_v24  ;;  %v12178_v7 = vcombine.high %v12073_v28, %v12074_v24  ;;  %v11747_v48 = vpop.f32.mrb[40].mxu0 }
 0x7b3   :  { %v12133_v14 = vrot.slane %v12111_v25, %v22215_v51  ;;  %v12140_v5 = vrot.slane %v12112_v59, %v22215_v51  ;;  %v12179_v49 = vcombine.low %v12075_v46, %v12076_v15  ;;  %v12180_v18 = vcombine.high %v12075_v46, %v12076_v15  ;;  %v12052_v52 = vpop.f32.mrb[40].mxu1  ;;  %v11749_v62 = vpop.f32.mrb[41].mxu0 }
 0x7b4   :  { %v12187_v50 = vrot.slane %v12177_v41, %v22215_v51  ;;  %v12194_v4 = vrot.slane %v12178_v7, %v22215_v51  ;;  %v20710_v43 = vadd.f32 %v11747_v48, %v20681_v1  ;;  %v20712_v33 = vpop.f32.mrb[41].mxu1  ;;  %v20714_v19 = vpop.f32.mrb[42].mxu0  ;;  %v20724_v21 = vadd.f32 %v12052_v52, %v20685_v8  ;;  %v15323_v52 = vld [vmem:[%s21477_s5 + $0xc0] sm:$0xff]  }
 0x7b5   :  { %v12141_v63 = vcombine.low %v12119_v16, %v12133_v14  ;;  %v12142_v53 = vcombine.high %v12119_v16, %v12133_v14  ;;  %v12143_v30 = vcombine.low %v12126_v29, %v12140_v5  ;;  %v12144_v12 = vcombine.high %v12126_v29, %v12140_v5  ;;  %v20716_v3 = vpop.f32.mrb[42].mxu1  ;;  %v20718_v60 = vpop.f32.mrb[43].mxu0  ;;  %14592 = vmatprep.subr.bf16.mxu1 %v15323_v52 }
 0x7b6   :  { %v12201_v23 = vrot.slane %v12179_v49, %v22215_v51  ;;  %v12208_v58 = vrot.slane %v12180_v18, %v22215_v51  ;;  %v20726_v26 = vpop.f32.mrb[43].mxu1  ;;  %v20749_v54 = vadd.f32 %v11749_v62, %v20689_v10  ;;  %v15322_v18 = vld [vmem:[%s21477_s5 + $0x40] sm:$0xff]  }
 0x7b7   :  { %v12151_v35 = vrot.slane %v12141_v63, %v22215_v51  ;;  %v12158_v13 = vrot.slane %v12143_v30, %v22215_v51  ;;  %v12165_v42 = vrot.slane %v12142_v53, %v22215_v51  ;;  %v12172_v6 = vrot.slane %v12144_v12, %v22215_v51  ;;  %v15324_v62 = vld [vmem:[%s21477_s5] sm:$0xff]   ;;  %v15326_v12 = vld [vmem:[%s21477_s5 + $0x48] sm:$0xff]   ;;  %14570 = vmatprep.subr.bf16.mxu0 %v15322_v18 }
 0x7b8   :  { %v12209_v57 = vcombine.low %v12187_v50, %v12201_v23  ;;  %v12210_v56 = vcombine.high %v12187_v50, %v12201_v23  ;;  %v12211_v11 = vcombine.low %v12194_v4, %v12208_v58  ;;  %v12212_v39 = vcombine.high %v12194_v4, %v12208_v58  ;;  %v15325_v30 = vld [vmem:[%s21477_s5 + $0x80] sm:$0xff]   ;;  %v15327_v23 = vld [vmem:[%s21477_s5 + $0xc8] sm:$0xff]   ;;  %14571 = vmatpush3.bf16.msra.mxu0 %v15324_v62 }
 0x7b9   :  { %v12174_v32 = vcombine.high %v12158_v13, %v12158_v13  ;;  %v12176_v2 = vcombine.high %v12172_v6, %v12172_v6  ;;  %v12445_v38 = vcombine.low %v12151_v35, %v12165_v42  ;;  %v14520_v45 = vcombine.high %v12151_v35, %v12165_v42  ;;  %14593 = vmatpush3.bf16.msra.mxu1 %v15325_v30 }
 0x7ba   :  { %v12219_v37 = vrot.slane %v12209_v57, %v22215_v51  ;;  %v12226_v47 = vrot.slane %v12211_v11, %v22215_v51  ;;  %v12233_v44 = vrot.slane %v12210_v56, %v22215_v51  ;;  %v20736_v34 = vrot.slane %v12212_v39, %v22215_v51  ;;  %v20738_v40 = vpop.f32.mrb[44].mxu0  ;;  %v15328_v39 = vld [vmem:[%s21477_s5 + $0x8] sm:$0xff]   ;;  %14572 = vmatprep.subr.bf16.mxu0 %v15326_v12 }
 0x7bb   :  { %v12452_v9 = vrot.slane %v12445_v38, %v22215_v51  ;;  %v12477_v20 = vrot.slane %v14520_v45, %v22215_v51  ;;  %v12495_v22 = vcombine.low %v12172_v6, %v12174_v32  ;;  %v20743_v61 = vpop.f32.mrb[44].mxu1  ;;  %v20745_v0 = vpop.f32.mrb[45].mxu0  ;;  %v15329_v32 = vld [vmem:[%s21477_s5 + $0x88] sm:$0xff]   ;;  %14594 = vmatprep.subr.bf16.mxu1 %v15327_v23 }
 0x7bc   :  { %v12520_v28 = vcombine.low %v12176_v2, %v12219_v37  ;;  %v14521_v17 = vcombine.high %v12219_v37, %v12233_v44  ;;  %v12570_v27 = vcombine.low %v12226_v47, %v20736_v34  ;;  %v20751_v46 = vpop.f32.mrb[45].mxu1  ;;  %v11761_v24 = vpop.f32.mrb[46].mxu0  ;;  %v15330_v47 = vld [vmem:[%s21477_s5 + $0x50] sm:$0xff]   ;;  %14573 = vmatpush3.bf16.msra.mxu0 %v15328_v39 }
 0x7bd   :  { %v12453_v25 = vcombine.high %v12452_v9, %v12452_v9  ;;  %v12460_v59 = vrot.slane %v12452_v9, %v22215_v51  ;;  %v12478_v15 = vcombine.high %v12477_v20, %v12477_v20  ;;  %v12485_v16 = vrot.slane %v12477_v20, %v22215_v51  ;;  %v12066_v29 = vpop.f32.mrb[46].mxu1  ;;  %v11762_v41 = vpop.f32.mrb[47].mxu0  ;;  %v15331_v44 = vld [vmem:[%s21477_s5 + $0xd0] sm:$0xff]   ;;  %14595 = vmatpush3.bf16.msra.mxu1 %v15329_v32  ;;  %v15336_v32 = vld [vmem:[%s21477_s5 + $0x18] sm:$0xff]  }
 0x7be   :  { %v12502_v7 = vrot.slane %v12495_v22, %v22215_v51  ;;  %v20759_v14 = vrot.slane %v12520_v28, %v22215_v51  ;;  %v20762_v5 = vrot.slane %v14521_v17, %v22215_v51  ;;  %v12067_v49 = vpop.f32.mrb[47].mxu1  ;;  %v20776_v53 = vrot.slane %v12570_v27, %v22215_v51  ;;  %v15332_v41 = vld [vmem:[%s21477_s5 + $0x10] sm:$0xff]   ;;  %14574 = vmatprep.subr.bf16.mxu0 %v15330_v47 }
 0x7bf   :  { %v12467_v50 = vrot.slane %v12453_v25, %v22215_v51  ;;  %v12468_v4 = vcombine.high %v12460_v59, %v12460_v59  ;;  %v12492_v63 = vrot.slane %v12478_v15, %v22215_v51  ;;  %v12909_v13 = vsel %vm211_vm0, %v12460_v59, -inf  ;;  %14596 = vmatprep.subr.bf16.mxu1 %v15331_v44 }
 0x7c0   :  { %v12503_v58 = vcombine.high %v12502_v7, %v12502_v7  ;;  %v20788_v35 = vrot.slane %v12502_v7, %v22215_v51  ;;  %v12937_v42 = vsel %vm211_vm0, %v12485_v16, -inf  ;;  %v12493_v57 = vcombine.high %v12485_v16, %v12485_v16  ;;  %v15333_v7 = vld [vmem:[%s21477_s5 + $0x90] sm:$0xff]   ;;  %14575 = vmatpush3.bf16.msra.mxu0 %v15332_v41 }
 0x7c1   :  { %v12469_v6 = vcombine.high %v12467_v50, %v12467_v50  ;;  %v12910_v56 = vrot.slane %v12909_v13, 4  ;;  %v12916_v11 = vsel %vm211_vm0, %v12467_v50, -inf  ;;  %v12494_v2 = vcombine.high %v12492_v63, %v12492_v63  ;;  %v15334_v50 = vld [vmem:[%s21477_s5 + $0x58] sm:$0xff]   ;;  %14597 = vmatpush3.bf16.msra.mxu1 %v15333_v7 }
 0x7c2   :  { %v20800_v38 = vrot.slane %v12503_v58, %v22215_v51  ;;  %v12917_v45 = vrot.slane %v12916_v11, 4  ;;  %v12923_v37 = vsel %vm211_vm0, %v12468_v4, -inf  ;;  %v12938_v28 = vrot.slane %v12937_v42, 4  ;;  %v15335_v4 = vld [vmem:[%s21477_s5 + $0xd8] sm:$0xff]   ;;  %14576 = vmatprep.subr.bf16.mxu0 %v15334_v50 }
 0x7c3   :  { %v12911_v9 = vmax.f32 %v12909_v13, %v12910_v56  ;;  %v12924_v20 = vrot.slane %v12923_v37, 4  ;;  %v12930_v22 = vsel %vm211_vm0, %v12469_v6, -inf  ;;  %v12518_v17 = vcombine.high %v20788_v35, %v20788_v35  ;;  %14598 = vmatprep.subr.bf16.mxu1 %v15335_v4 }
 0x7c4   :  { %v12918_v27 = vmax.f32 %v12916_v11, %v12917_v45  ;;  %v12931_v24 = vrot.slane %v12930_v22, 4  ;;  %v12944_v25 = vsel %vm211_vm0, %v12492_v63, -inf  ;;  %v12939_v16 = vmax.f32 %v12937_v42, %v12938_v28  ;;  %14577 = vmatpush3.bf16.msra.mxu0 %v15336_v32 }
 0x7c5   :  { %v12912_v59 = vrot.slane %v12911_v9, 2  ;;  %v12925_v15 = vmax.f32 %v12923_v37, %v12924_v20  ;;  %v12945_v29 = vrot.slane %v12944_v25, 4  ;;  %v12951_v52 = vsel %vm211_vm0, %v12493_v57, -inf  ;;  %v15339_v20 = vld [vmem:[%s21477_s5 + $0xe0] sm:$0xff]  }
 0x7c6   :  { %v12919_v49 = vrot.slane %v12918_v27, 2  ;;  %v12932_v18 = vmax.f32 %v12930_v22, %v12931_v24  ;;  %v12958_v62 = vsel %vm211_vm0, %v12494_v2, -inf  ;;  %v12940_v12 = vrot.slane %v12939_v16, 2  ;;  %v15337_v2 = vld [vmem:[%s21477_s5 + $0x98] sm:$0xff]  }
 0x7c7   :  { %v12913_v63 = vmax.f32 %v12911_v9, %v12912_v59  ;;  %v12926_v30 = vrot.slane %v12925_v15, 2  ;;  %v12946_v23 = vmax.f32 %v12944_v25, %v12945_v29  ;;  %v12952_v42 = vrot.slane %v12951_v52, 4  ;;  %v15338_v9 = vld [vmem:[%s21477_s5 + $0x60] sm:$0xff]   ;;  %14599 = vmatpush3.bf16.msra.mxu1 %v15337_v2 }
 0x7c8   :  { %v12920_v58 = vmax.f32 %v12918_v27, %v12919_v49  ;;  %v12933_v13 = vrot.slane %v12932_v18, 2  ;;  %v12959_v6 = vrot.slane %v12958_v62, 4  ;;  %v12941_v11 = vmax.f32 %v12939_v16, %v12940_v12  ;;  %14578 = vmatprep.subr.bf16.mxu0 %v15338_v9  ;;  %14600 = vmatprep.subr.bf16.mxu1 %v15339_v20  ;;  %v15343_v12 = vld [vmem:[%s21477_s5 + $0xe8] sm:$0xff]   ;;  %v15346_v20 = vld [vmem:[%s21477_s5 + $0x70] sm:$0xff]  }
 0x7c9   :  { %v12914_v57 = vrot.slane %v12913_v63, 1  ;;  %v12927_v56 = vmax.f32 %v12925_v15, %v12926_v30  ;;  %v12947_v39 = vrot.slane %v12946_v23, 2  ;;  %v12953_v47 = vmax.f32 %v12951_v52, %v12952_v42  ;;  %v15341_v52 = vld [vmem:[%s21477_s5 + $0xa0] sm:$0xff]   ;;  %v15342_v30 = vld [vmem:[%s21477_s5 + $0x68] sm:$0xff]  }
 0x7ca   :  { %v12921_v45 = vrot.slane %v12920_v58, 1  ;;  %v20833_v37 = vmax.f32 %v12932_v18, %v12933_v13  ;;  %v12960_v44 = vmax.f32 %v12958_v62, %v12959_v6  ;;  %v12519_v22 = vcombine.high %v20800_v38, %v20800_v38  ;;  %v15340_v18 = vld [vmem:[%s21477_s5 + $0x20] sm:$0xff]  }
 0x7cb   :  { %v12928_v28 = vrot.slane %v12927_v56, 1  ;;  %v12942_v27 = vrot.slane %v12941_v11, 1  ;;  %v12948_v24 = vmax.f32 %v12946_v23, %v12947_v39  ;;  %v20843_v25 = vmax.f32 %v12913_v63, %v12914_v57  ;;  %14579 = vmatpush3.bf16.msra.mxu0 %v15340_v18  ;;  %14601 = vmatpush3.bf16.msra.mxu1 %v15341_v52 }
 0x7cc   :  { %v20845_v59 = vmax.f32 %v12920_v58, %v12921_v45  ;;  %v12954_v15 = vrot.slane %v12953_v47, 2  ;;  %v12961_v16 = vrot.slane %v12960_v44, 2  ;;  %v12965_v49 = vsel %vm211_vm0, %v20788_v35, -inf  ;;  %v15344_v35 = vld [vmem:[%s21477_s5 + $0x28] sm:$0xff]   ;;  %14580 = vmatprep.subr.bf16.mxu0 %v15342_v30  ;;  %14602 = vmatprep.subr.bf16.mxu1 %v15343_v12  ;;  %v15349_v30 = vld [vmem:[%s21477_s5 + $0xb0] sm:$0xff]  }
 0x7cd   :  { %v20847_v29 = vmax.f32 %v12927_v56, %v12928_v28  ;;  %v12949_v7 = vrot.slane %v12948_v24, 1  ;;  %v12966_v4 = vrot.slane %v12965_v49, 4  ;;  %v12972_v63 = vsel %vm211_vm0, %v20800_v38, -inf }
 0x7ce   :  { %v12955_v62 = vmax.f32 %v12953_v47, %v12954_v15  ;;  %v20858_v50 = vmax.f32 %v12960_v44, %v12961_v16  ;;  %v20868_v23 = vmax.f32 %v12941_v11, %v12942_v27  ;;  %v12973_v58 = vrot.slane %v12972_v63, 4 }
 0x7cf   :  { %v12979_v13 = vsel %vm211_vm0, %v12518_v17, -inf  ;;  %v12986_v38 = vsel %vm211_vm0, %v12519_v22, -inf  ;;  %v20875_v42 = vmax.f32 %v12948_v24, %v12949_v7  ;;  %v12967_v57 = vmax.f32 %v12965_v49, %v12966_v4  ;;  %v15345_v17 = vld [vmem:[%s21477_s5 + $0xa8] sm:$0xff]   ;;  %v15347_v22 = vld [vmem:[%s21477_s5 + $0xf0] sm:$0xff]   ;;  %14581 = vmatpush3.bf16.msra.mxu0 %v15344_v35 }
 0x7d0   :  { %22401 = vst [vmem:[#allocation118_spill] sm:$0xff] %v20868_v23  ;;  %v12956_v6 = vrot.slane %v12955_v62, 1  ;;  %v12980_v56 = vrot.slane %v12979_v13, 4  ;;  %v12974_v32 = vmax.f32 %v12972_v63, %v12973_v58  ;;  %v12987_v2 = vrot.slane %v12986_v38, 4  ;;  %14603 = vmatpush3.bf16.msra.mxu1 %v15345_v17  ;;  %v15348_v63 = vld [vmem:[%s21477_s5 + $0x30] sm:$0xff]   ;;  %14582 = vmatprep.subr.bf16.mxu0 %v15346_v20 }
 0x7d1   :  { %v12528_v11 = vcombine.high %v20759_v14, %v20759_v14  ;;  %v12968_v47 = vrot.slane %v12967_v57, 2  ;;  %v12535_v9 = vrot.slane %v20759_v14, %v22215_v51  ;;  %v12553_v15 = vcombine.high %v20762_v5, %v20762_v5  ;;  %14604 = vmatprep.subr.bf16.mxu1 %v15347_v22 }
 0x7d2   :  { %v20886_v45 = vmax.f32 %v12955_v62, %v12956_v6  ;;  %v12981_v44 = vmax.f32 %v12979_v13, %v12980_v56  ;;  %v12975_v28 = vrot.slane %v12974_v32, 2  ;;  %v12988_v27 = vmax.f32 %v12986_v38, %v12987_v2  ;;  %v15351_v6 = vld [vmem:[%s21477_s5 + $0xf8] sm:$0xff]  }
 0x7d3   :  { %v12542_v24 = vrot.slane %v12528_v11, %v22215_v51  ;;  %v12969_v16 = vmax.f32 %v12967_v57, %v12968_v47  ;;  %v12543_v62 = vcombine.high %v12535_v9, %v12535_v9  ;;  %v12560_v4 = vrot.slane %v20762_v5, %v22215_v51  ;;  %v15350_v5 = vld [vmem:[%s21477_s5 + $0x78] sm:$0xff]   ;;  %14583 = vmatpush3.bf16.msra.mxu0 %v15348_v63 }
 0x7d4   :  { %22402 = vst [vmem:[#allocation79_spill] sm:$0xff] %v20886_v45  ;;  %v12982_v7 = vrot.slane %v12981_v44, 2  ;;  %v12976_v18 = vmax.f32 %v12974_v32, %v12975_v28  ;;  %v12989_v52 = vrot.slane %v12988_v27, 2  ;;  %v12567_v13 = vrot.slane %v12553_v15, %v22215_v51  ;;  %14605 = vmatpush3.bf16.msra.mxu1 %v15349_v30  ;;  %14584 = vmatprep.subr.bf16.mxu0 %v15350_v5 }
 0x7d5   :  { %v12970_v12 = vrot.slane %v12969_v16, 1  ;;  %v12578_v38 = vcombine.high %v20776_v53, %v20776_v53  ;;  %v12544_v32 = vcombine.high %v12542_v24, %v12542_v24  ;;  %v20924_v2 = vrot.slane %v20776_v53, %v22215_v51  ;;  %v15352_v53 = vld [vmem:[%s21477_s5 + $0x38] sm:$0xff]   ;;  %14606 = vmatprep.subr.bf16.mxu1 %v15351_v6 }
 0x7d6   :  { %v12983_v58 = vmax.f32 %v12981_v44, %v12982_v7  ;;  %v12977_v57 = vrot.slane %v12976_v18, 1  ;;  %v20920_v56 = vmax.f32 %v12988_v27, %v12989_v52  ;;  %v12568_v17 = vcombine.high %v12560_v4, %v12560_v4  ;;  %v15353_v27 = vld [vmem:[%s21477_s5 + $0xb8] sm:$0xff]  }
 0x7d7   :  { %v20926_v11 = vmax.f32 %v12969_v16, %v12970_v12  ;;  %v20929_v47 = vrot.slane %v12578_v38, %v22215_v51  ;;  %v12569_v22 = vcombine.high %v12567_v13, %v12567_v13  ;;  %v12993_v28 = vsel %vm211_vm0, %v12535_v9, -inf  ;;  %14585 = vmatpush3.bf16.msra.mxu0 %v15352_v53 }
 0x7d8   :  { %v12984_v35 = vrot.slane %v12983_v58, 1  ;;  %v20931_v44 = vmax.f32 %v12976_v18, %v12977_v57  ;;  %v12593_v16 = vcombine.high %v20924_v2, %v20924_v2  ;;  %v12994_v7 = vrot.slane %v12993_v28, 4  ;;  %14607 = vmatpush3.bf16.msra.mxu1 %v15353_v27 }
 0x7d9   :  { %v13000_v18 = vsel %vm211_vm0, %v12542_v24, -inf  ;;  %v13007_v52 = vsel %vm211_vm0, %v12543_v62, -inf  ;;  %v13014_v63 = vsel %vm211_vm0, %v12544_v32, -inf  ;;  %v13021_v30 = vsel %vm211_vm0, %v12560_v4, -inf }
 0x7da   :  { %v20941_v15 = vmax.f32 %v12983_v58, %v12984_v35  ;;  %v13001_v9 = vrot.slane %v13000_v18, 4  ;;  %v12594_v12 = vcombine.high %v20929_v47, %v20929_v47  ;;  %v12995_v58 = vmax.f32 %v12993_v28, %v12994_v7 }
 0x7db   :  { %v13008_v38 = vrot.slane %v13007_v52, 4  ;;  %v13015_v57 = vrot.slane %v13014_v63, 4  ;;  %v13022_v49 = vrot.slane %v13021_v30, 4  ;;  %v13028_v14 = vsel %vm211_vm0, %v12567_v13, -inf }
 0x7dc   :  { %v13002_v35 = vmax.f32 %v13000_v18, %v13001_v9  ;;  %v13035_v24 = vsel %vm211_vm0, %v12568_v17, -inf  ;;  %v12996_v5 = vrot.slane %v12995_v58, 2  ;;  %v13029_v32 = vrot.slane %v13028_v14, 4 }
 0x7dd   :  { %v13009_v62 = vmax.f32 %v13007_v52, %v13008_v38  ;;  %v13016_v6 = vmax.f32 %v13014_v63, %v13015_v57  ;;  %v13023_v4 = vmax.f32 %v13021_v30, %v13022_v49  ;;  %v13036_v20 = vrot.slane %v13035_v24, 4 }
 0x7de   :  { %v13003_v39 = vrot.slane %v13002_v35, 2  ;;  %v13042_v41 = vsel %vm211_vm0, %v12569_v22, -inf  ;;  %v12997_v28 = vmax.f32 %v12995_v58, %v12996_v5  ;;  %v13030_v18 = vmax.f32 %v13028_v14, %v13029_v32 }
 0x7df   :  { %v13010_v7 = vrot.slane %v13009_v62, 2  ;;  %v13017_v48 = vrot.slane %v13016_v6, 2  ;;  %v13024_v31 = vrot.slane %v13023_v4, 2  ;;  %v13037_v13 = vmax.f32 %v13035_v24, %v13036_v20 }
 0x7e0   :  { %v13004_v9 = vmax.f32 %v13002_v35, %v13003_v39  ;;  %v13043_v36 = vrot.slane %v13042_v41, 4  ;;  %v12998_v17 = vrot.slane %v12997_v28, 1  ;;  %v13031_v52 = vrot.slane %v13030_v18, 2 }
 0x7e1   :  { %v13011_v53 = vmax.f32 %v13009_v62, %v13010_v7  ;;  %v20954_v27 = vmax.f32 %v13016_v6, %v13017_v48  ;;  %v13025_v38 = vmax.f32 %v13023_v4, %v13024_v31  ;;  %v13038_v57 = vrot.slane %v13037_v13, 2 }
 0x7e2   :  { %v13005_v63 = vrot.slane %v13004_v9, 1  ;;  %v20956_v49 = vmax.f32 %v13042_v41, %v13043_v36  ;;  %v20960_v30 = vmax.f32 %v12997_v28, %v12998_v17  ;;  %v20965_v35 = vmax.f32 %v13030_v18, %v13031_v52 }
 0x7e3   :  { %v13012_v14 = vrot.slane %v13011_v53, 1  ;;  %v13026_v58 = vrot.slane %v13025_v38, 1  ;;  %v13039_v48 = vmax.f32 %v13037_v13, %v13038_v57  ;;  %v13049_v36 = vsel %vm211_vm0, %v20924_v2, -inf }
 0x7e4   :  { %22403 = vst [vmem:[#allocation23_spill] sm:$0xff] %v20960_v30  ;;  %v20963_v20 = vmax.f32 %v13004_v9, %v13005_v63  ;;  %v13056_v31 = vsel %vm211_vm0, %v20929_v47, -inf  ;;  %v13063_v41 = vsel %vm211_vm0, %v12593_v16, -inf  ;;  %v13050_v6 = vrot.slane %v13049_v36, 4 }
 0x7e5   :  { %v20973_v5 = vmax.f32 %v13011_v53, %v13012_v14  ;;  %v13040_v62 = vrot.slane %v13039_v48, 1  ;;  %v13057_v32 = vrot.slane %v13056_v31, 4  ;;  %v20975_v4 = vmax.f32 %v13025_v38, %v13026_v58 }
 0x7e6   :  { %v13064_v28 = vrot.slane %v13063_v41, 4  ;;  %v13070_v7 = vsel %vm211_vm0, %v12594_v12, -inf  ;;  %v12078_v18 = vmax.f32 %v20749_v54, 0.0  ;;  %v13051_v2 = vmax.f32 %v13049_v36, %v13050_v6 }
 0x7e7   :  { %22404 = vst [vmem:[#allocation45_spill] sm:$0xff] %v20973_v5  ;;  %22405 = vst [vmem:[#allocation44_spill] sm:$0xff] %v20975_v4  ;;  %v20979_v9 = vmax.f32 %v13039_v48, %v13040_v62  ;;  %v13058_v13 = vmax.f32 %v13056_v31, %v13057_v32  ;;  %v13071_v17 = vrot.slane %v13070_v7, 4  ;;  %v22407_v16 = vmax.f32 %v20710_v43, 0.0 }
 0x7e8   :  { %v13065_v47 = vmax.f32 %v13063_v41, %v13064_v28  ;;  %v14665_v38 = vadd.f32 %v20712_v33, %v20693_v55  ;;  %v13052_v57 = vrot.slane %v13051_v2, 2  ;;  %v14656_v33 = vadd.f32 %v20714_v19, %v20681_v1 }
 0x7e9   :  { %22406 = vst [vmem:[#allocation67_spill] sm:$0xff] %v20979_v9  ;;  %v12244_v53 = vcombine.low %v22407_v16, %v12078_v18  ;;  %v22408_v52 = vmov %v22407_v16  ;;  %v13059_v14 = vrot.slane %v13058_v13, 2  ;;  %v20987_v12 = vmax.f32 %v13070_v7, %v13071_v17 }
 0x7ea   :  { %v12245_v63 = vcombine.high %v22408_v52, %v12078_v18  ;;  %v13066_v58 = vrot.slane %v13065_v47, 2  ;;  %v12080_v31 = vmax.f32 %v14665_v38, 0.0  ;;  %v13053_v41 = vmax.f32 %v13051_v2, %v13052_v57 }
 0x7eb   :  { %v12254_v36 = vrot.slane %v12244_v53, %v22215_v51  ;;  %v20994_v43 = vmax.f32 %v13058_v13, %v13059_v14  ;;  %v22409_v32 = vmax.f32 %v20724_v21, 0.0  ;;  %v14666_v17 = vadd.f32 %v20716_v3, %v20685_v8 }
 0x7ec   :  { %v12261_v62 = vrot.slane %v12245_v63, %v22215_v51  ;;  %v13067_v6 = vmax.f32 %v13065_v47, %v13066_v58  ;;  %v13054_v16 = vrot.slane %v13053_v41, 1  ;;  %v12081_v53 = vmax.f32 %v14656_v33, 0.0 }
 0x7ed   :  { %v12246_v28 = vcombine.low %v22409_v32, %v12080_v31  ;;  %v22410_v7 = vmov %v22409_v32  ;;  %v14657_v2 = vadd.f32 %v20718_v60, %v20689_v10  ;;  %v14667_v13 = vadd.f32 %v20726_v26, %v20693_v55 }
 0x7ee   :  { %v12247_v18 = vcombine.high %v22410_v7, %v12080_v31  ;;  %v13068_v52 = vrot.slane %v13067_v6, 1  ;;  %v12083_v63 = vmax.f32 %v14666_v17, 0.0  ;;  %v21011_v38 = vmax.f32 %v13053_v41, %v13054_v16 }
 0x7ef   :  { %v12268_v19 = vrot.slane %v12246_v28, %v22215_v51  ;;  %v12082_v21 = vmax.f32 %v14657_v2, 0.0  ;;  %v12084_v57 = vmax.f32 %v14667_v13, 0.0  ;;  %v21015_v3 = vadd.f32 %v20738_v40, %v20681_v1 }
 0x7f0   :  { %v12275_v47 = vrot.slane %v12247_v18, %v22215_v51  ;;  %22411 = vst [vmem:[#allocation46_spill] sm:$0xff] %v21011_v38  ;;  %v21017_v14 = vmax.f32 %v13067_v6, %v13068_v52 }
 0x7f1   :  { %v12276_v60 = vcombine.low %v12254_v36, %v12268_v19  ;;  %v12277_v58 = vcombine.high %v12254_v36, %v12268_v19  ;;  %v12311_v33 = vcombine.low %v12081_v53, %v12082_v21  ;;  %v12312_v32 = vcombine.high %v12081_v53, %v12082_v21 }
 0x7f2   :  { %22412 = vst [vmem:[#allocation68_spill] sm:$0xff] %v21017_v14  ;;  %v12278_v31 = vcombine.low %v12261_v62, %v12275_v47  ;;  %v12279_v26 = vcombine.high %v12261_v62, %v12275_v47  ;;  %v12313_v28 = vcombine.low %v12083_v63, %v12084_v57  ;;  %v12314_v62 = vcombine.high %v12083_v63, %v12084_v57 }
 0x7f3   :  { %v12286_v18 = vrot.slane %v12276_v60, %v22215_v51  ;;  %v21026_v40 = vrot.slane %v12311_v33, %v22215_v51  ;;  %v21029_v36 = vrot.slane %v12312_v32, %v22215_v51  ;;  %v12300_v6 = vrot.slane %v12277_v58, %v22215_v51 }
 0x7f4   :  { %v12293_v17 = vrot.slane %v12278_v31, %v22215_v51  ;;  %v12307_v1 = vrot.slane %v12279_v26, %v22215_v51  ;;  %v22413_v53 = vcombine.high %v20736_v34, %v20736_v34  ;;  %v21036_v13 = vrot.slane %v12313_v28, %v22215_v51 }
 0x7f5   :  { %v12308_v16 = vcombine.high %v12286_v18, %v12286_v18  ;;  %v21039_v47 = vrot.slane %v12314_v62, %v22215_v51 }
 0x7f6   :  { %v12595_v2 = vcombine.low %v22413_v53, %v12286_v18  ;;  %v12645_v52 = vcombine.low %v12293_v17, %v12307_v1  ;;  %v14522_v19 = vcombine.high %v12293_v17, %v12307_v1  ;;  %v12343_v57 = vcombine.low %v21026_v40, %v21036_v13 }
 0x7f7   :  { %v12620_v63 = vcombine.low %v12300_v6, %v12308_v16  ;;  %v21057_v17 = vadd.f32 %v20743_v61, %v20685_v8 }
 0x7f8   :  { %v12602_v60 = vrot.slane %v12595_v2, %v22215_v51  ;;  %v12652_v58 = vrot.slane %v12645_v52, %v22215_v51  ;;  %v12677_v31 = vrot.slane %v14522_v19, %v22215_v51  ;;  %v21070_v8 = vrot.slane %v12343_v57, %v22215_v51 }
 0x7f9   :  { %v12627_v18 = vrot.slane %v12620_v63, %v22215_v51 }
 0x7fa   :  { %v12603_v32 = vcombine.high %v12602_v60, %v12602_v60  ;;  %v12610_v28 = vrot.slane %v12602_v60, %v22215_v51  ;;  %v12653_v1 = vcombine.high %v12652_v58, %v12652_v58  ;;  %v12660_v62 = vrot.slane %v12652_v58, %v22215_v51 }
 0x7fb   :  { %v12678_v6 = vcombine.high %v12677_v31, %v12677_v31  ;;  %v21061_v16 = vrot.slane %v12677_v31, %v22215_v51  ;;  %v12628_v52 = vcombine.high %v12627_v18, %v12627_v18  ;;  %v12635_v19 = vrot.slane %v12627_v18, %v22215_v51 }
 0x7fc   :  { %v12617_v53 = vrot.slane %v12603_v32, %v22215_v51  ;;  %v12618_v2 = vcombine.high %v12610_v28, %v12610_v28  ;;  %v12667_v60 = vrot.slane %v12653_v1, %v22215_v51  ;;  %v12668_v63 = vcombine.high %v12660_v62, %v12660_v62 }
 0x7fd   :  { %v21067_v41 = vrot.slane %v12678_v6, %v22215_v51  ;;  %v12642_v58 = vrot.slane %v12628_v52, %v22215_v51  ;;  %v12643_v31 = vcombine.high %v12635_v19, %v12635_v19  ;;  %v13077_v54 = vsel %vm211_vm0, %v12610_v28, -inf }
 0x7fe   :  { %v12619_v61 = vcombine.high %v12617_v53, %v12617_v53  ;;  %v12669_v32 = vcombine.high %v12667_v60, %v12667_v60  ;;  %v12693_v48 = vcombine.high %v21061_v16, %v21061_v16  ;;  %v13078_v18 = vrot.slane %v13077_v54, 4 }
 0x7ff   :  { %v13084_v1 = vsel %vm211_vm0, %v12617_v53, -inf  ;;  %v12644_v22 = vcombine.high %v12642_v58, %v12642_v58  ;;  %v13091_v6 = vsel %vm211_vm0, %v12618_v2, -inf  ;;  %v13105_v52 = vsel %vm211_vm0, %v12635_v19, -inf }
 0x800   :  { %v13085_v39 = vrot.slane %v13084_v1, 4  ;;  %v13098_v57 = vsel %vm211_vm0, %v12619_v61, -inf  ;;  %v13079_v7 = vmax.f32 %v13077_v54, %v13078_v18  ;;  %v13092_v24 = vrot.slane %v13091_v6, 4 }
 0x801   :  { %v13099_v21 = vrot.slane %v13098_v57, 4  ;;  %v12694_v28 = vcombine.high %v21067_v41, %v21067_v41  ;;  %v13106_v33 = vrot.slane %v13105_v52, 4  ;;  %v13112_v34 = vsel %vm211_vm0, %v12642_v58, -inf }
 0x802   :  { %v13119_v26 = vsel %vm211_vm0, %v12643_v31, -inf  ;;  %v13080_v53 = vrot.slane %v13079_v7, 2  ;;  %v21084_v14 = vmax.f32 %v13084_v1, %v13085_v39  ;;  %v13093_v38 = vmax.f32 %v13091_v6, %v13092_v24 }
 0x803   :  { %v13113_v2 = vrot.slane %v13112_v34, 4  ;;  %v21086_v5 = vmax.f32 %v13098_v57, %v13099_v21  ;;  %v13107_v54 = vmax.f32 %v13105_v52, %v13106_v33  ;;  %v13120_v61 = vrot.slane %v13119_v26, 4 }
 0x804   :  { %v13126_v18 = vsel %vm211_vm0, %v12644_v22, -inf  ;;  %v13081_v19 = vmax.f32 %v13079_v7, %v13080_v53  ;;  %v13094_v30 = vrot.slane %v13093_v38, 2  ;;  %v13133_v31 = vsel %vm211_vm0, %v12660_v62, -inf }
 0x805   :  { %v21089_v45 = vmax.f32 %v13112_v34, %v13113_v2  ;;  %v13127_v23 = vrot.slane %v13126_v18, 4  ;;  %v13108_v9 = vrot.slane %v13107_v54, 2  ;;  %v13121_v58 = vmax.f32 %v13119_v26, %v13120_v61 }
 0x806   :  { %v13140_v39 = vsel %vm211_vm0, %v12667_v60, -inf  ;;  %v13082_v1 = vrot.slane %v13081_v19, 1  ;;  %v13095_v21 = vmax.f32 %v13093_v38, %v13094_v30  ;;  %v13134_v22 = vrot.slane %v13133_v31, 4 }
 0x807   :  { %v13109_v6 = vmax.f32 %v13107_v54, %v13108_v9  ;;  %v13122_v57 = vrot.slane %v13121_v58, 2  ;;  %v13141_v7 = vrot.slane %v13140_v39, 4  ;;  %v21095_v34 = vmax.f32 %v13126_v18, %v13127_v23 }
 0x808   :  { %v13096_v52 = vrot.slane %v13095_v21, 1  ;;  %v13147_v53 = vsel %vm211_vm0, %v12668_v63, -inf  ;;  %v21099_v26 = vsel %vm211_vm0, %v12669_v32, -inf  ;;  %v21101_v62 = vmax.f32 %v13081_v19, %v13082_v1 }
 0x809   :  { %v13110_v60 = vrot.slane %v13109_v6, 1  ;;  %v13123_v2 = vmax.f32 %v13121_v58, %v13122_v57  ;;  %v13135_v61 = vmax.f32 %v13133_v31, %v13134_v22  ;;  %v21105_v38 = vmax.f32 %v13140_v39, %v13141_v7 }
 0x80a   :  { %22414 = vst [vmem:[#allocation98_spill] sm:$0xff] %v21101_v62  ;;  %v21103_v30 = vmax.f32 %v13095_v21, %v13096_v52  ;;  %v13148_v9 = vrot.slane %v13147_v53, 4  ;;  %v13161_v54 = vsel %vm211_vm0, %v21061_v16, -inf  ;;  %v13168_v19 = vsel %vm211_vm0, %v21067_v41, -inf }
 0x80b   :  { %v13124_v23 = vrot.slane %v13123_v2, 1  ;;  %v13136_v18 = vrot.slane %v13135_v61, 2  ;;  %v13162_v33 = vrot.slane %v13161_v54, 4  ;;  %v13175_v58 = vsel %vm211_vm0, %v12693_v48, -inf }
 0x80c   :  { %22415 = vst [vmem:[#allocation93_spill] sm:$0xff] %v21103_v30  ;;  %v13149_v32 = vmax.f32 %v13147_v53, %v13148_v9  ;;  %v21114_v31 = vsel %vm211_vm0, %v12694_v28, -inf  ;;  %v13169_v57 = vrot.slane %v13168_v19, 4  ;;  %v21118_v16 = vmax.f32 %v13109_v6, %v13110_v60 }
 0x80d   :  { %v21116_v39 = vmax.f32 %v13123_v2, %v13124_v23  ;;  %v13137_v1 = vmax.f32 %v13135_v61, %v13136_v18  ;;  %v13163_v21 = vmax.f32 %v13161_v54, %v13162_v33  ;;  %v13176_v7 = vrot.slane %v13175_v58, 4 }
 0x80e   :  { %22417 = vst [vmem:[#allocation101_spill] sm:$0xff] %v21118_v16  ;;  %v13150_v22 = vrot.slane %v13149_v32, 2  ;;  %v21121_v63 = vmax.f32 %v13168_v19, %v13169_v57  ;;  %v22418_v33 = vcombine.low %v21029_v36, %v21039_v47  ;;  %v22419_v6 = vcombine.high %v21026_v40, %v21036_v13 }
 0x80f   :  { %22416 = vst [vmem:[#allocation141_spill] sm:$0xff] %v21116_v39  ;;  %v13138_v53 = vrot.slane %v13137_v1, 1  ;;  %v13164_v9 = vrot.slane %v13163_v21, 2  ;;  %v13177_v28 = vmax.f32 %v13175_v58, %v13176_v7  ;;  %v22420_v23 = vcombine.high %v21029_v36, %v21039_v47 }
 0x810   :  { %v13151_v41 = vmax.f32 %v13149_v32, %v13150_v22  ;;  %v12360_v2 = vrot.slane %v22418_v33, %v22215_v51  ;;  %v12367_v60 = vrot.slane %v22419_v6, %v22215_v51  ;;  %v12375_v32 = vcombine.high %v21070_v8, %v21070_v8 }
 0x811   :  { %v13165_v61 = vmax.f32 %v13163_v21, %v13164_v9  ;;  %v12374_v18 = vrot.slane %v22420_v23, %v22215_v51  ;;  %v21141_v19 = vmax.f32 %v13137_v1, %v13138_v53  ;;  %v13178_v57 = vrot.slane %v13177_v28, 2 }
 0x812   :  { %v13152_v58 = vrot.slane %v13151_v41, 1  ;;  %v12377_v22 = vcombine.high %v12367_v60, %v12367_v60  ;;  %v12695_v40 = vcombine.low %v12367_v60, %v12375_v32  ;;  %v14659_v21 = vadd.f32 %v20745_v0, %v20689_v10 }
 0x813   :  { %v13166_v7 = vrot.slane %v13165_v61, 1  ;;  %v14523_v13 = vcombine.high %v12360_v2, %v12374_v18  ;;  %v13179_v9 = vmax.f32 %v13177_v28, %v13178_v57  ;;  %v21148_v36 = vadd.f32 %v20751_v46, %v20693_v55 }
 0x814   :  { %v12720_v33 = vcombine.low %v12377_v22, %v12360_v2  ;;  %v21150_v47 = vmax.f32 %v13151_v41, %v13152_v58  ;;  %v12702_v8 = vrot.slane %v12695_v40, %v22215_v51  ;;  %v12086_v53 = vmax.f32 %v14659_v21, 0.0 }
 0x815   :  { %v12752_v1 = vrot.slane %v14523_v13, %v22215_v51  ;;  %v21154_v60 = vmax.f32 %v13165_v61, %v13166_v7  ;;  %v13180_v23 = vrot.slane %v13179_v9, 1  ;;  %v12088_v0 = vmax.f32 %v21148_v36, 0.0 }
 0x816   :  { %v12727_v10 = vrot.slane %v12720_v33, %v22215_v51  ;;  %v12703_v28 = vcombine.high %v12702_v8, %v12702_v8  ;;  %v12710_v2 = vrot.slane %v12702_v8, %v22215_v51  ;;  %v22422_v32 = vmax.f32 %v21015_v3, 0.0 }
 0x817   :  { %22421 = vst [vmem:[#allocation161_spill] sm:$0xff] %v21154_v60  ;;  %v12753_v18 = vcombine.high %v12752_v1, %v12752_v1  ;;  %v12760_v55 = vrot.slane %v12752_v1, %v22215_v51  ;;  %v22423_v61 = vrot.slane %v20833_v37, 1  ;;  %v21168_v22 = vmax.f32 %v13179_v9, %v13180_v23 }
 0x818   :  { %v12728_v46 = vcombine.high %v12727_v10, %v12727_v10  ;;  %v12735_v41 = vrot.slane %v12727_v10, %v22215_v51  ;;  %v12379_v58 = vcombine.low %v22422_v32, %v12086_v53  ;;  %v21171_v7 = vrot.slane %v12703_v28, %v22215_v51 }
 0x819   :  { %v21166_v57 = vmax.f32 %v20833_v37, %v22423_v61  ;;  %22424 = vst [vmem:[#allocation167_spill] sm:$0xff] %v21168_v22  ;;  %v12718_v40 = vcombine.high %v12710_v2, %v12710_v2  ;;  %v21174_v13 = vrot.slane %v12753_v18, %v22215_v51  ;;  %v13189_v36 = vsel %vm211_vm0, %v12710_v2, -inf }
 0x81a   :  { %v21177_v21 = vrot.slane %v12728_v46, %v22215_v51  ;;  %v12743_v33 = vcombine.high %v12735_v41, %v12735_v41  ;;  %v13217_v8 = vsel %vm211_vm0, %v12735_v41, -inf  ;;  %v12768_v9 = vcombine.high %v12760_v55, %v12760_v55 }
 0x81b   :  { %v13190_v1 = vrot.slane %v13189_v36, 4  ;;  %v21185_v23 = vsel %vm211_vm0, %v21171_v7, -inf  ;;  %v13203_v18 = vsel %vm211_vm0, %v12718_v40, -inf  ;;  %v13218_v2 = vrot.slane %v13217_v8, 4 }
 0x81c   :  { %v13204_v32 = vrot.slane %v13203_v18, 4  ;;  %v13231_v61 = vsel %vm211_vm0, %v12743_v33, -inf  ;;  %v21196_v48 = vsel %vm211_vm0, %v21177_v21, -inf  ;;  %v13245_v10 = vsel %vm211_vm0, %v12760_v55, -inf }
 0x81d   :  { %v13191_v46 = vmax.f32 %v13189_v36, %v13190_v1  ;;  %v13219_v54 = vmax.f32 %v13217_v8, %v13218_v2  ;;  %v13232_v52 = vrot.slane %v13231_v61, 4  ;;  %v13246_v28 = vrot.slane %v13245_v10, 4 }
 0x81e   :  { %v13205_v24 = vmax.f32 %v13203_v18, %v13204_v32  ;;  %v13259_v40 = vsel %vm211_vm0, %v12768_v9, -inf  ;;  %v22425_v41 = vmax.f32 %v21015_v3, 0.0  ;;  %v12389_v16 = vrot.slane %v12379_v58, %v22215_v51 }
 0x81f   :  { %v13192_v37 = vrot.slane %v13191_v46, 2  ;;  %v13220_v6 = vrot.slane %v13219_v54, 2  ;;  %v13233_v36 = vmax.f32 %v13231_v61, %v13232_v52  ;;  %v13260_v1 = vrot.slane %v13259_v40, 4 }
 0x820   :  { %v12380_v39 = vcombine.high %v22425_v41, %v12086_v53  ;;  %v13206_v8 = vrot.slane %v13205_v24, 2  ;;  %v13247_v2 = vmax.f32 %v13245_v10, %v13246_v28  ;;  %v22426_v52 = vmax.f32 %v21057_v17, 0.0 }
 0x821   :  { %v13193_v33 = vmax.f32 %v13191_v46, %v13192_v37  ;;  %v13221_v60 = vmax.f32 %v13219_v54, %v13220_v6  ;;  %v13234_v22 = vrot.slane %v13233_v36, 2  ;;  %v13261_v30 = vmax.f32 %v13259_v40, %v13260_v1 }
 0x822   :  { %v12396_v55 = vrot.slane %v12380_v39, %v22215_v51  ;;  %v21204_v32 = vmax.f32 %v13205_v24, %v13206_v8  ;;  %v13248_v9 = vrot.slane %v13247_v2, 2  ;;  %v12381_v61 = vcombine.low %v22426_v52, %v12088_v0 }
 0x823   :  { %v13194_v18 = vrot.slane %v13193_v33, 1  ;;  %v13222_v62 = vrot.slane %v13221_v60, 1  ;;  %v21208_v3 = vmax.f32 %v13233_v36, %v13234_v22  ;;  %v13262_v53 = vrot.slane %v13261_v30, 2 }
 0x824   :  { %v22428_v37 = vmov %v22426_v52  ;;  %v21215_v6 = vmax.f32 %v13247_v2, %v13248_v9  ;;  %v12403_v24 = vrot.slane %v12381_v61, %v22215_v51  ;;  %v22430_v8 = vrot.slane %v20956_v49, 2 }
 0x825   :  { %22427 = vst [vmem:[#allocation94_spill] sm:$0xff] %v21208_v3  ;;  %v12382_v10 = vcombine.high %v22428_v37, %v12088_v0  ;;  %v21212_v58 = vmax.f32 %v13193_v33, %v13194_v18  ;;  %v21219_v28 = vmax.f32 %v13221_v60, %v13222_v62  ;;  %v21224_v17 = vmax.f32 %v13261_v30, %v13262_v53 }
 0x826   :  { %v12411_v0 = vcombine.low %v12389_v16, %v12403_v24  ;;  %v12412_v40 = vcombine.high %v12389_v16, %v12403_v24  ;;  %v13033_v33 = vrot.slane %v20965_v35, 1  ;;  %v13046_v2 = vmax.f32 %v20956_v49, %v22430_v8 }
 0x827   :  { %22429 = vst [vmem:[#allocation97_spill] sm:$0xff] %v21219_v28  ;;  %v12410_v22 = vrot.slane %v12382_v10, %v22215_v51  ;;  %v22431_v18 = vrot.slane %v21084_v14, 2  ;;  %v13101_v30 = vrot.slane %v21086_v5, 2  ;;  %v22432_v52 = vrot.slane %v20920_v56, 1 }
 0x828   :  { %v12421_v62 = vrot.slane %v12411_v0, %v22215_v51  ;;  %v12435_v60 = vrot.slane %v12412_v40, %v22215_v51  ;;  %v13047_v49 = vrot.slane %v13046_v2, 1  ;;  %v13143_v0 = vrot.slane %v21105_v38, 2 }
 0x829   :  { %v12413_v36 = vcombine.low %v12396_v55, %v12410_v22  ;;  %v12414_v1 = vcombine.high %v12396_v55, %v12410_v22  ;;  %v13088_v9 = vmax.f32 %v21084_v14, %v22431_v18  ;;  %v21241_v61 = vmax.f32 %v20920_v56, %v22432_v52 }
 0x82a   :  { %v12444_v53 = vcombine.high %v12435_v60, %v12435_v60  ;;  %v12770_v37 = vcombine.low %v12421_v62, %v12435_v60  ;;  %v13102_v24 = vmax.f32 %v21086_v5, %v13101_v30  ;;  %v21245_v14 = vmax.f32 %v20965_v35, %v13033_v33 }
 0x82b   :  { %v12428_v16 = vrot.slane %v12413_v36, %v22215_v51  ;;  %v12442_v55 = vrot.slane %v12414_v1, %v22215_v51  ;;  %v13089_v10 = vrot.slane %v13088_v9, 1  ;;  %v22433_v40 = vrot.slane %v21099_v26, 4 }
 0x82c   :  { %v12777_v1 = vrot.slane %v12770_v37, %v22215_v51  ;;  %v21252_v8 = vmax.f32 %v13046_v2, %v13047_v49  ;;  %v13103_v18 = vrot.slane %v13102_v24, 1  ;;  %v13144_v60 = vmax.f32 %v21105_v38, %v13143_v0 }
 0x82d   :  { %v12443_v22 = vcombine.high %v12428_v16, %v12428_v16  ;;  %v13156_v36 = vmax.f32 %v21099_v26, %v22433_v40  ;;  %v12795_v56 = vcombine.low %v12444_v53, %v12428_v16  ;;  %v22434_v30 = vrot.slane %v21185_v23, 4 }
 0x82e   :  { %v12778_v33 = vcombine.high %v12777_v1, %v12777_v1  ;;  %v12785_v52 = vrot.slane %v12777_v1, %v22215_v51  ;;  %v21260_v26 = vmax.f32 %v13088_v9, %v13089_v10  ;;  %v21263_v2 = vmax.f32 %v13102_v24, %v13103_v18 }
 0x82f   :  { %v12820_v62 = vcombine.low %v12442_v55, %v12443_v22  ;;  %v13157_v5 = vrot.slane %v13156_v36, 2  ;;  %v13198_v35 = vmax.f32 %v21185_v23, %v22434_v30  ;;  %v12802_v46 = vrot.slane %v12795_v56, %v22215_v51 }
 0x830   :  { %v13145_v49 = vrot.slane %v13144_v60, 1  ;;  %v21266_v38 = vrot.slane %v12778_v33, %v22215_v51  ;;  %v12793_v53 = vcombine.high %v12785_v52, %v12785_v52  ;;  %v13273_v40 = vsel %vm211_vm0, %v12785_v52, -inf }
 0x831   :  { %v12827_v16 = vrot.slane %v12820_v62, %v22215_v51  ;;  %v13158_v55 = vmax.f32 %v13156_v36, %v13157_v5  ;;  %v12803_v37 = vcombine.high %v12802_v46, %v12802_v46  ;;  %v12810_v23 = vrot.slane %v12802_v46, %v22215_v51 }
 0x832   :  { %v13199_v9 = vrot.slane %v13198_v35, 2  ;;  %v13274_v1 = vrot.slane %v13273_v40, 4  ;;  %v21273_v56 = vmax.f32 %v13144_v60, %v13145_v49  ;;  %v13287_v62 = vsel %vm211_vm0, %v12793_v53, -inf }
 0x833   :  { %v12828_v22 = vcombine.high %v12827_v16, %v12827_v16  ;;  %v12835_v0 = vrot.slane %v12827_v16, %v22215_v51  ;;  %v12818_v24 = vcombine.high %v12810_v23, %v12810_v23  ;;  %v12817_v36 = vrot.slane %v12803_v37, %v22215_v51 }
 0x834   :  { %v13301_v46 = vsel %vm211_vm0, %v12810_v23, -inf  ;;  %v13275_v5 = vmax.f32 %v13273_v40, %v13274_v1  ;;  %v13288_v30 = vrot.slane %v13287_v62, 4  ;;  %v13159_v40 = vrot.slane %v13158_v55, 1 }
 0x835   :  { %v12843_v18 = vcombine.high %v12835_v0, %v12835_v0  ;;  %v13302_v33 = vrot.slane %v13301_v46, 4  ;;  %v13315_v52 = vsel %vm211_vm0, %v12818_v24, -inf  ;;  %v21280_v16 = vrot.slane %v12828_v22, %v22215_v51 }
 0x836   :  { %v13316_v41 = vrot.slane %v13315_v52, 4  ;;  %v13329_v39 = vsel %vm211_vm0, %v12835_v0, -inf  ;;  %v13276_v49 = vrot.slane %v13275_v5, 2  ;;  %v13289_v37 = vmax.f32 %v13287_v62, %v13288_v30 }
 0x837   :  { %v13343_v60 = vsel %vm211_vm0, %v12843_v18, -inf  ;;  %v13303_v10 = vmax.f32 %v13301_v46, %v13302_v33  ;;  %v13330_v54 = vrot.slane %v13329_v39, 4  ;;  %v13200_v1 = vmax.f32 %v13198_v35, %v13199_v9 }
 0x838   :  { %v21284_v53 = vmax.f32 %v13315_v52, %v13316_v41  ;;  %v13344_v23 = vrot.slane %v13343_v60, 4  ;;  %v21286_v28 = vmax.f32 %v13275_v5, %v13276_v49  ;;  %v13290_v24 = vrot.slane %v13289_v37, 2 }
 0x839   :  { %v13304_v3 = vrot.slane %v13303_v10, 2  ;;  %v13331_v51 = vmax.f32 %v13329_v39, %v13330_v54  ;;  %v12819_v0 = vcombine.high %v12817_v36, %v12817_v36  ;;  %v13201_v18 = vrot.slane %v13200_v1, 1 }
 0x83a   :  { %v13318_v22 = vrot.slane %v21284_v53, 2  ;;  %v21289_v4 = vmax.f32 %v13343_v60, %v13344_v23  ;;  %v21292_v46 = vmax.f32 %v13289_v37, %v13290_v24  ;;  %v13160_v30 = vmax.f32 %v13158_v55, %v13159_v40 }
 0x83b   :  { %v13332_v41 = vrot.slane %v13331_v51, 2  ;;  %v21294_v33 = vmax.f32 %v13303_v10, %v13304_v3  ;;  %v22435_v9 = vcombine.high %v21171_v7, %v21171_v7  ;;  %v13252_v39 = vsel %vm211_vm0, %v21174_v13, -inf }
 0x83c   :  { %v13202_v5 = vmax.f32 %v13200_v1, %v13201_v18  ;;  %v13253_v60 = vrot.slane %v13252_v39, 4  ;;  %v22436_v49 = vcombine.high %v21174_v13, %v21174_v13  ;;  %v13308_v37 = vsel %vm211_vm0, %v12817_v36, -inf }
 0x83d   :  { %v13210_v54 = vsel %vm211_vm0, %v22435_v9, -inf  ;;  %v21307_v3 = vmax.f32 %v13331_v51, %v13332_v41  ;;  %v13322_v7 = vsel %vm211_vm0, %v12819_v0, -inf  ;;  %v13309_v24 = vrot.slane %v13308_v37, 4 }
 0x83e   :  { %v13211_v52 = vrot.slane %v13210_v54, 4  ;;  %v13266_v55 = vsel %vm211_vm0, %v22436_v49, -inf  ;;  %v13254_v40 = vmax.f32 %v13252_v39, %v13253_v60  ;;  %v13323_v9 = vrot.slane %v13322_v7, 4 }
 0x83f   :  { %v13267_v10 = vrot.slane %v13266_v55, 4  ;;  %v13358_v1 = vmax.f32 %v20845_v59, %v21166_v57  ;;  %v13362_v13 = vmax.f32 %v20931_v44, %v21241_v61  ;;  %v13366_v51 = vmax.f32 %v21245_v14, %v21252_v8 }
 0x840   :  { %v13212_v23 = vmax.f32 %v13210_v54, %v13211_v52  ;;  %v13255_v41 = vrot.slane %v13254_v40, 2  ;;  %v13310_v49 = vmax.f32 %v13308_v37, %v13309_v24  ;;  %v13324_v36 = vmax.f32 %v13322_v7, %v13323_v9 }
 0x841   :  { %v13268_v35 = vmax.f32 %v13266_v55, %v13267_v10  ;;  %v13370_v0 = vmax.f32 %v21260_v26, %v21263_v2  ;;  %v13374_v54 = vmax.f32 %v21273_v56, %v13160_v30  ;;  %v13415_v44 = vsel %vm6783_vm11, %v13362_v13, %v13358_v1 }
 0x842   :  { %v13213_v18 = vrot.slane %v13212_v23, 2  ;;  %v13256_v52 = vmax.f32 %v13254_v40, %v13255_v41  ;;  %v13311_v59 = vrot.slane %v13310_v49, 2  ;;  %v13325_v57 = vrot.slane %v13324_v36, 2 }
 0x843   :  { %v13269_v62 = vrot.slane %v13268_v35, 2  ;;  %v13416_v37 = vsel %vm6785_vm12, %v13366_v51, %v13415_v44  ;;  %v12844_v26 = vcombine.high %v21280_v16, %v21280_v16  ;;  %v22437_v2 = vrot.slane %v20858_v50, 1 }
 0x844   :  { %v13214_v39 = vmax.f32 %v13212_v23, %v13213_v18  ;;  %v13257_v14 = vrot.slane %v13256_v52, 1  ;;  %v13312_v8 = vmax.f32 %v13310_v49, %v13311_v59  ;;  %v13326_v55 = vmax.f32 %v13324_v36, %v13325_v57 }
 0x845   :  { %v13270_v60 = vmax.f32 %v13268_v35, %v13269_v62  ;;  %v21327_v56 = vmax.f32 %v20858_v50, %v22437_v2  ;;  %v13417_v40 = vsel %vm6787_vm13, %v13370_v0, %v13416_v37  ;;  %v13061_v24 = vrot.slane %v20994_v43, 1 }
 0x846   :  { %v13215_v61 = vrot.slane %v13214_v39, 1  ;;  %v13258_v30 = vmax.f32 %v13256_v52, %v13257_v14  ;;  %v13313_v35 = vrot.slane %v13312_v8, 1  ;;  %v13327_v7 = vrot.slane %v13326_v55, 1 }
 0x847   :  { %v13271_v10 = vrot.slane %v13270_v60, 1  ;;  %v22438_v9 = vrot.slane %v20987_v12, 2  ;;  %v13418_v41 = vsel %vm6789_vm14, %v13374_v54, %v13417_v40  ;;  %v22439_v49 = vrot.slane %v20954_v27, 1 }
 0x848   :  { %v13216_v62 = vmax.f32 %v13214_v39, %v13215_v61  ;;  %v13314_v13 = vmax.f32 %v13312_v8, %v13313_v35  ;;  %v13328_v51 = vmax.f32 %v13326_v55, %v13327_v7  ;;  %v22440_v52 = vrot.slane %v21089_v45, 2 }
 0x849   :  { %v13272_v23 = vmax.f32 %v13270_v60, %v13271_v10  ;;  %v13074_v1 = vmax.f32 %v20987_v12, %v22438_v9  ;;  %v13020_v36 = vmax.f32 %v20954_v27, %v22439_v49  ;;  %v13129_v12 = vrot.slane %v21095_v34, 2 }
 0x84a   :  { %v13378_v18 = vmax.f32 %v13202_v5, %v13216_v62  ;;  %v13116_v0 = vmax.f32 %v21089_v45, %v22440_v52  ;;  %v13386_v59 = vmax.f32 %v13314_v13, %v13328_v51  ;;  %v13171_v60 = vrot.slane %v21121_v63, 2 }
 0x84b   :  { %v13382_v50 = vmax.f32 %v13258_v30, %v13272_v23  ;;  %v13075_v39 = vrot.slane %v13074_v1, 1  ;;  %v13062_v54 = vmax.f32 %v20994_v43, %v13061_v24  ;;  %v22441_v61 = vrot.slane %v21114_v31, 4 }
 0x84c   :  { %v13419_v57 = vsel %vm13409_vm15, %v13378_v18, %v13418_v41  ;;  %v13117_v44 = vrot.slane %v13116_v0, 1  ;;  %v13130_v45 = vmax.f32 %v21095_v34, %v13129_v12  ;;  %v13172_v8 = vmax.f32 %v21121_v63, %v13171_v60 }
 0x84d   :  { %v13420_v5 = vsel %vm13411_vm1, %v13382_v50, %v13419_v57  ;;  %v13184_v27 = vmax.f32 %v21114_v31, %v22441_v61  ;;  %v22442_v55 = vrot.slane %v21196_v48, 4  ;;  %v13076_v2 = vmax.f32 %v13074_v1, %v13075_v39 }
 0x84e   :  { %v13421_v14 = vsel %vm13413_vm2, %v13386_v59, %v13420_v5  ;;  %v22443_v43 = vcombine.high %v21177_v21, %v21177_v21  ;;  %v13131_v35 = vrot.slane %v13130_v45, 1  ;;  %v13173_v31 = vrot.slane %v13172_v8, 1 }
 0x84f   :  { %v13226_v10 = vmax.f32 %v21196_v48, %v22442_v55  ;;  %v13457_v37 = vpack.c.bf16 %v13421_v14, %v13421_v14  ;;  %v13185_v62 = vrot.slane %v13184_v27, 2  ;;  %v13280_v63 = vsel %vm211_vm0, %v21266_v38, -inf }
 0x850   :  { %v13238_v30 = vsel %vm211_vm0, %v22443_v43, -inf  ;;  %v22444_v48 = vcombine.high %v21266_v38, %v21266_v38  ;;  %v13336_v24 = vsel %vm211_vm0, %v21280_v16, -inf  ;;  %v13118_v21 = vmax.f32 %v13116_v0, %v13117_v44 }
 0x851   :  { %v13227_v7 = vrot.slane %v13226_v10, 2  ;;  %v13239_v23 = vrot.slane %v13238_v30, 4  ;;  %13755 = vmatprep.mubr.bf16.mxu0 %v13457_v37  ;;  %v13186_v34 = vmax.f32 %v13184_v27, %v13185_v62  ;;  %v13132_v9 = vmax.f32 %v13130_v45, %v13131_v35 }
 0x852   :  { %v13294_v40 = vsel %vm211_vm0, %v22444_v48, -inf  ;;  %v13281_v18 = vrot.slane %v13280_v63, 4  ;;  %v13337_v50 = vrot.slane %v13336_v24, 4  ;;  %v13174_v49 = vmax.f32 %v13172_v8, %v13173_v31 }
 0x853   :  { %v13228_v1 = vmax.f32 %v13226_v10, %v13227_v7  ;;  %v13240_v13 = vmax.f32 %v13238_v30, %v13239_v23  ;;  %v13187_v51 = vrot.slane %v13186_v34, 1  ;;  %v13295_v41 = vrot.slane %v13294_v40, 4 }
 0x854   :  { %v13350_v59 = vsel %vm211_vm0, %v12844_v26, -inf  ;;  %v13282_v57 = vmax.f32 %v13280_v63, %v13281_v18  ;;  %v13338_v12 = vmax.f32 %v13336_v24, %v13337_v50  ;;  %v13360_v60 = vmax.f32 %v20875_v42, %v21327_v56 }
 0x855   :  { %v13229_v39 = vrot.slane %v13228_v1, 1  ;;  %v13241_v52 = vrot.slane %v13240_v13, 2  ;;  %v13296_v38 = vmax.f32 %v13294_v40, %v13295_v41  ;;  %v13188_v16 = vmax.f32 %v13186_v34, %v13187_v51 }
 0x856   :  { %v13351_v5 = vrot.slane %v13350_v59, 4  ;;  %v13364_v44 = vmax.f32 %v20963_v20, %v13020_v36  ;;  %v13283_v61 = vrot.slane %v13282_v57, 2  ;;  %v13339_v14 = vrot.slane %v13338_v12, 2 }
 0x857   :  { %v13242_v0 = vmax.f32 %v13240_v13, %v13241_v52  ;;  %v13297_v27 = vrot.slane %v13296_v38, 2  ;;  %v13368_v45 = vmax.f32 %v13062_v54, %v13076_v2  ;;  %v13230_v8 = vmax.f32 %v13228_v1, %v13229_v39 }
 0x858   :  { %v13352_v10 = vmax.f32 %v13350_v59, %v13351_v5  ;;  %v13372_v37 = vmax.f32 %v13118_v21, %v13132_v9  ;;  %v13284_v26 = vmax.f32 %v13282_v57, %v13283_v61  ;;  %v13340_v43 = vmax.f32 %v13338_v12, %v13339_v14  ;;  %v22452_v5 = vld [vmem:[#allocation98_spill] sm:$0xff] }
 0x859   :  { %v13243_v55 = vrot.slane %v13242_v0, 1  ;;  %v13298_v62 = vmax.f32 %v13296_v38, %v13297_v27  ;;  %v13447_v30 = vsel %vm6783_vm11, %v13364_v44, %v13360_v60  ;;  %v13376_v56 = vmax.f32 %v13174_v49, %v13188_v16  ;;  %v22449_v60 = vld [vmem:[#allocation44_spill] sm:$0xff]  ;;  %v22450_v16 = vld [vmem:[#allocation67_spill] sm:$0xff]  ;;  %v22453_v44 = vld [vmem:[#allocation93_spill] sm:$0xff] }
 0x85a   :  { %v13353_v42 = vrot.slane %v13352_v10, 2  ;;  %v13448_v31 = vsel %vm6785_vm12, %v13368_v45, %v13447_v30  ;;  %v13285_v7 = vrot.slane %v13284_v26, 1  ;;  %v13341_v36 = vrot.slane %v13340_v43, 1 }
 0x85b   :  { %v13244_v35 = vmax.f32 %v13242_v0, %v13243_v55  ;;  %v13299_v20 = vrot.slane %v13298_v62, 1  ;;  %v13449_v23 = vsel %vm6787_vm13, %v13372_v37, %v13448_v31  ;;  %v22445_v63 = vrot.slane %v21204_v32, 1 }
 0x85c   :  { %v13354_v54 = vmax.f32 %v13352_v10, %v13353_v42  ;;  %v13450_v34 = vsel %vm6789_vm14, %v13376_v56, %v13449_v23  ;;  %v13286_v40 = vmax.f32 %v13284_v26, %v13285_v7  ;;  %v22446_v21 = vrot.slane %v21215_v6, 1  ;;  %v22459_v42 = vld [vmem:[#allocation167_spill] sm:$0xff] }
 0x85d   :  { %v13380_v2 = vmax.f32 %v13230_v8, %v13244_v35  ;;  %v13209_v48 = vmax.f32 %v21204_v32, %v22445_v63  ;;  %v13300_v24 = vmax.f32 %v13298_v62, %v13299_v20  ;;  %v13264_v1 = vrot.slane %v21224_v17, 1  ;;  %v22461_v20 = vld [vmem:[#allocation97_spill] sm:$0xff]  ;;  %v22463_v23 = vld [vmem:[#allocation79_spill] sm:$0xff] }
 0x85e   :  { %v13251_v9 = vmax.f32 %v21215_v6, %v22446_v21  ;;  %v13355_v13 = vrot.slane %v13354_v54, 1  ;;  %v13306_v18 = vrot.slane %v21294_v33, 1  ;;  %v13319_v41 = vmax.f32 %v21284_v53, %v13318_v22  ;;  %v22468_v21 = vld [vmem:[#allocation46_spill] sm:$0xff] }
 0x85f   :  { %v13451_v51 = vsel %vm13409_vm15, %v13380_v2, %v13450_v34  ;;  %v13342_v50 = vmax.f32 %v13340_v43, %v13341_v36  ;;  %v13384_v49 = vmax.f32 %v13286_v40, %v13300_v24  ;;  %v13265_v32 = vmax.f32 %v21224_v17, %v13264_v1  ;;  %v22462_v36 = vld [vmem:[#allocation118_spill] sm:$0xff]  ;;  %v22465_v2 = vld [vmem:[#allocation23_spill] sm:$0xff]  ;;  %v22466_v34 = vld [vmem:[#allocation45_spill] sm:$0xff] }
 0x860   :  { %v13373_v39 = vmax.f32 %v21141_v19, %v21150_v47  ;;  %v13356_v52 = vmax.f32 %v13354_v54, %v13355_v13  ;;  %v13320_v6 = vrot.slane %v13319_v41, 1  ;;  %v13377_v59 = vmax.f32 %v21212_v58, %v13209_v48 }
 0x861   :  { %v22447_v57 = vmax.f32 %v20843_v25, %v20847_v29  ;;  %v22448_v38 = vmax.f32 %v20926_v11, %v20941_v15  ;;  %v13452_v53 = vsel %vm13411_vm1, %v13384_v49, %v13451_v51  ;;  %v13307_v22 = vmax.f32 %v21294_v33, %v13306_v18  ;;  %v22455_v11 = vld [vmem:[#allocation94_spill] sm:$0xff] }
 0x862   :  { %v13381_v17 = vmax.f32 %v13251_v9, %v13265_v32  ;;  %v22451_v19 = vmax.f32 %v22449_v60, %v22450_v16  ;;  %v13388_v0 = vmax.f32 %v13342_v50, %v13356_v52  ;;  %v13321_v58 = vmax.f32 %v13319_v41, %v13320_v6  ;;  %v22469_v9 = vld [vmem:[#allocation68_spill] sm:$0xff]  ;;  %v22471_v41 = vld [vmem:[#allocation101_spill] sm:$0xff] }
 0x863   :  { %v13405_v12 = vsel %vm6783_vm11, %v22448_v38, %v22447_v57  ;;  %v22454_v25 = vmax.f32 %v22452_v5, %v22453_v44  ;;  %v22456_v15 = vrot.slane %v22455_v11, 1  ;;  %v22457_v33 = vrot.slane %v21286_v28, 1  ;;  %v22472_v50 = vld [vmem:[#allocation141_spill] sm:$0xff] }
 0x864   :  { %v13406_v47 = vsel %vm6785_vm12, %v22451_v19, %v13405_v12  ;;  %v13292_v45 = vrot.slane %v21292_v46, 1  ;;  %v22458_v8 = vrot.slane %v21289_v4, 2  ;;  %v13453_v10 = vsel %vm13413_vm2, %v13388_v0, %v13452_v53  ;;  %v15355_v12 = vld [vmem:[%s21479_s7 + $0x8] sm:$0xff]   ;;  %v15356_v53 = vld [vmem:[%s21479_s7 + $0x10] sm:$0xff]  }
 0x865   :  { %v13407_v29 = vsel %vm6787_vm13, %v22454_v25, %v13406_v47  ;;  %v13237_v61 = vmax.f32 %v22455_v11, %v22456_v15  ;;  %v13279_v14 = vmax.f32 %v21286_v28, %v22457_v33  ;;  %v13385_v37 = vmax.f32 %v13307_v22, %v13321_v58  ;;  %v22460_v28 = vld [vmem:[#allocation161_spill] sm:$0xff]  ;;  %v15358_v22 = vld [vmem:[%s21481_s9] sm:$0xff]   ;;  %v14524_v0 = vld [vmem:[#allocation9] ss:$0 sm:$0xff] }
 0x866   :  { %v13408_v27 = vsel %vm6789_vm14, %v13373_v39, %v13407_v29  ;;  %v13347_v55 = vmax.f32 %v21289_v4, %v22458_v8  ;;  %v13334_v62 = vrot.slane %v21307_v3, 1  ;;  %v13459_v43 = vpack.c.bf16 %v13453_v10, %v13453_v10 }
 0x867   :  { %v13410_v26 = vsel %vm13409_vm15, %v13377_v59, %v13408_v27  ;;  %v13293_v35 = vmax.f32 %v21292_v46, %v13292_v45  ;;  %v13375_v56 = vmax.f32 %v22460_v28, %v22459_v42  ;;  %v13379_v4 = vmax.f32 %v22461_v20, %v13237_v61  ;;  %v15354_v46 = vld [vmem:[%s21479_s7] sm:$0xff]   ;;  %v14557_v45 = vld [vmem:[#allocation10] ss:$0 sm:$0xff] }
 0x868   :  { %v13412_v30 = vsel %vm13411_vm1, %v13381_v17, %v13410_v26  ;;  %v13348_v7 = vrot.slane %v13347_v55, 1  ;;  %v22464_v54 = vmax.f32 %v22462_v36, %v22463_v23  ;;  %v22467_v63 = vmax.f32 %v22465_v2, %v22466_v34  ;;  %13795 = vmatprep.mubr.bf16.mxu1 %v13459_v43  ;;  %v15357_v17 = vld [vmem:[%s21479_s7 + $0x18] sm:$0xff]   ;;  %v15360_v43 = vld [vmem:[#allocation13] sm:$0xff]   ;;  %v14567_v36 = vld [vmem:[#allocation15] ss:$0 sm:$0xff] }
 0x869   :  { %v13414_v31 = vsel %vm13413_vm2, %v13385_v37, %v13412_v30  ;;  %v13383_v24 = vmax.f32 %v13279_v14, %v13293_v35  ;;  %v22470_v1 = vmax.f32 %v22468_v21, %v22469_v9  ;;  %v13335_v51 = vmax.f32 %v21307_v3, %v13334_v62  ;;  %v15359_v14 = vld [vmem:[%s21481_s9 + $0x8] sm:$0xff]  }
 0x86a   :  { %v13440_v48 = vsel %vm6783_vm11, %v22467_v63, %v22464_v54  ;;  %v13456_v40 = vpack.c.bf16 %v13414_v31, %v13414_v31  ;;  %v13349_v18 = vmax.f32 %v13347_v55, %v13348_v7  ;;  %v22473_v49 = vmax.f32 %v22471_v41, %v22472_v50  ;;  %v14563_v35 = vld [vmem:[#allocation12] ss:$0 sm:$0xff] }
 0x86b   :  { %v13441_v13 = vsel %vm6785_vm12, %v22470_v1, %v13440_v48  ;;  %v15589_v39 = vmov 0.0   ;;  %vm15590_vm0 = vmmov 0  }
 0x86c   :  { %v13442_v32 = vsel %vm6787_vm13, %v22473_v49, %v13441_v13  ;;  %14624 = vmatprep.subr.bf16.mxu0 %v15589_v39  ;;  %14636 = vmatprep.subr.bf16.mxu1 %v15589_v39  ;;  %v13387_v6 = vmax.f32 %v13335_v51, %v13349_v18 }
 0x86d   :  { %13756 = vmatmul.mubr.bf16.vlgmr.msra.gmra.mrb[48].mxu0 %v13456_v40  ;;  %v13443_v52 = vsel %vm6789_vm14, %v13375_v56, %v13442_v32 }
 0x86e   :  { %v13444_v59 = vsel %vm13409_vm15, %v13379_v4, %v13443_v52  ;;  %14625 = vmatpush3.bf16.msra.mxu0 %v15354_v46  ;;  %14632 = vmatprep.mubr.msk.bf16.mxu0 %vm15590_vm0, %v15589_v39 }
 0x86f   :  { %v13445_v57 = vsel %vm13411_vm1, %v13383_v24, %v13444_v59  ;;  %14626 = vmatprep.subr.bf16.mxu0 %v15589_v39 }
 0x870   :  { %v13446_v3 = vsel %vm13413_vm2, %v13387_v6, %v13445_v57 }
 0x871   :  { %v13458_v38 = vpack.c.bf16 %v13446_v3, %v13446_v3 }
 0x872   :  { %14627 = vmatpush3.bf16.msra.mxu0 %v15355_v12 }
 0x873   :  { %13796 = vmatmul.mubr.bf16.vlgmr.msra.gmra.mrb[48].mxu1 %v13458_v38  ;;  %14628 = vmatprep.subr.bf16.mxu0 %v15589_v39 }
 0x874   :  { %14640 = vmatprep.mubr.msk.bf16.mxu1 %vm15590_vm0, %v15589_v39  ;;  %14637 = vmatpush3.bf16.msra.mxu1 %v15358_v22 }
 0x875   :  { %14638 = vmatprep.subr.bf16.mxu1 %v15589_v39 }
 0x876   :  { %14629 = vmatpush3.bf16.msra.mxu0 %v15356_v53 }
 0x877   :  { %14630 = vmatprep.subr.bf16.mxu0 %v15589_v39 }
 0x878   :  { %14639 = vmatpush3.bf16.msra.mxu1 %v15359_v14 }
 0x879   :  { %14644 = vmatprep.subr.bf16.mxu1 %v15589_v39 }
 0x87a   :  { %14631 = vmatpush3.bf16.msra.mxu0 %v15357_v17 }
 0x940   :  { %v14586_v60 = vpop.f32.mrb[48].mxu0 }
 0x941   :  { %v14587_v16 = vpop.f32.mrb[49].mxu0 }
 0x942   :  { %v14588_v19 = vadd.f32 %v14587_v16, %v14586_v60  ;;  %v14589_v47 = vpop.f32.mrb[50].mxu0 }
 0x943   :  { %v14590_v58 = vpop.f32.mrb[51].mxu0 }
 0x944   :  { %v13758_v44 = vadd.f32 %v14588_v19, %v14524_v0 }
 0x946   :  { %v14608_v5 = vpop.f32.mrb[48].mxu1 }
 0x947   :  { %v14609_v25 = vpop.f32.mrb[49].mxu1 }
 0x948   :  { %v14610_v29 = vadd.f32 %v14609_v25, %v14608_v5  ;;  %v14611_v11 = vpop.f32.mrb[50].mxu1 }
 0x949   :  { %v14612_v15 = vpop.f32.mrb[51].mxu1 }
 0x94a   :  { %v13798_v61 = vadd.f32 %v14610_v29, %v13758_v44 }
 0x94c   :  { %v13803_v27 = vmax.f32 %v13798_v61, 0.0 }
 0x94e   :  { %v13804_v33 = vpack.c.bf16 %v13803_v27, %v13803_v27 }
 0x950   :  { %14633 = vmatmul.mubr.msk.bf16.vlgmr.msra.gmra.mrb[52].mxu0 %vm13844_vm3, %v13804_v33 }
 0xa23   :  { %v13882_v8 = vpop.f32.mrb[52].mxu0 }
 0xa24   :  { %v13883_v55 = vadd.f32 %v14557_v45, %v13882_v8  ;;  %v14634_v10 = vpop.f32.mrb[53].mxu0 }
 0xa25   :  { %v13885_v37 = vpop.f32.mrb[54].mxu0 }
 0xa26   :  { %v13888_v26 = vmax.f32 %v13883_v55, 0.0  ;;  %v14635_v62 = vpop.f32.mrb[55].mxu0 }
 0xa28   :  { %v13889_v30 = vpack.c.bf16 %v13888_v26, %v13888_v26 }
 0xa2a   :  { %14641 = vmatmul.mubr.msk.bf16.vlgmr.msra.gmra.mrb[52].mxu1 %vm13913_vm4, %v13889_v30 }
 0xa2b   :  { %14645 = vmatpush3.bf16.msra.mxu1 %v15360_v43  ;;  %14646 = vmatprep.mubr.msk.bf16.mxu1 %vm15590_vm0, %v15589_v39 }
 0xafd   :  { %v13951_v42 = vpop.f32.mrb[52].mxu1 }
 0xafe   :  { %v13952_v28 = vadd.f32 %v14563_v35, %v13951_v42  ;;  %v14642_v56 = vpop.f32.mrb[53].mxu1 }
 0xaff   :  { %v13954_v31 = vpop.f32.mrb[54].mxu1 }
 0xb00   :  { %v13957_v7 = vmax.f32 %v13952_v28, 0.0  ;;  %v14643_v20 = vpop.f32.mrb[55].mxu1 }
 0xb02   :  { %v13958_v4 = vpack.c.bf16 %v13957_v7, %v13957_v7 }
 0xb04   :  { %14647 = vmatmul.mubr.msk.bf16.vlgmr.msra.gmra.mrb[56].mxu1 %vm13974_vm5, %v13958_v4 }
 0xbd7   :  { %v14012_v23 = vpop.f32.mrb[56].mxu1 }
 0xbd8   :  { %v14013_v54 = vadd.f32 %v14567_v36, %v14012_v23  ;;  %v14648_v2 = vpop.f32.mrb[57].mxu1 }
 0xbd9   :  { %v14015_v34 = vpop.f32.mrb[58].mxu1 }
 0xbda   :  { %14018 = vst [vmem:[%s21485_s13] sm:$0xff] %v14013_v54  ;;  %v14649_v63 = vpop.f32.mrb[59].mxu1 }
 0xbdb   :  { %14023 = vsyncpa [#allocation3], 1 }
 0xbdc   :  { %14024 = vsyncpa [#allocation5], 1 }
 0xbdd   :  { %14025 = vsyncpa [#allocation8], 1 }
 0xbde   :  { %14026 = vsyncpa [#allocation11], 1 }
 0xbdf   :  { %14027 = vsyncpa [#allocation14], 1 }

</bundles_post_ra>
